<compile_context>
chip_gen: v7x
topology: tpu7x:2x2x1
jax: 0.10.0
libtpu: 0.0.40
codegen_flags: <defaults>
</compile_context>

<pallas_src>
import functools

import jax
import jax.numpy as jnp
from jax.experimental import pallas as pl
from jax.experimental.pallas import tpu as pltpu


# ---------------------------------------------------------------------------
# Helpers
# ---------------------------------------------------------------------------

def _pick_tile(M, cap):
    """Largest lane-tile (multiple of 128) dividing M, bounded by cap; else full."""
    if M <= cap:
        return M
    t = cap
    while t >= 128:
        if M % t == 0:
            return t
        t //= 2
    return M


# ---------------------------------------------------------------------------
# Pallas kernels
# ---------------------------------------------------------------------------

def _matmul_affine_kernel(w_ref, p_ref, b_ref, o_ref, *, relu):
    """out = optional_relu(W_scaled @ patches^T + shift), (Cout,K)@(K,tm)."""
    acc = jnp.dot(w_ref[...], p_ref[...], preferred_element_type=jnp.float32)
    acc = acc + b_ref[...]                      # shift broadcast along lanes
    if relu:
        acc = jnp.maximum(acc, 0.0)
    o_ref[...] = acc.astype(o_ref.dtype)


def _maxpool_kernel(xq_ref, base_ref, out_ref, ind_ref, *, C, W):
    """2x2/stride-2 max pool + argmax flat index (PyTorch H*W flat index).

    xq_ref packs the four window taps along sublanes: rows [q*C:(q+1)*C] are
    tap q = dh*2+dw.  base_ref holds the flat index of the (0,0) tap per lane.
    """
    xq = xq_ref[...]
    a = xq[0 * C:1 * C, :]
    b = xq[1 * C:2 * C, :]
    c = xq[2 * C:3 * C, :]
    d = xq[3 * C:4 * C, :]
    m = jnp.maximum(jnp.maximum(a, b), jnp.maximum(c, d))
    base = base_ref[...]
    idx = jnp.where(a == m, base,
          jnp.where(b == m, base + 1,
          jnp.where(c == m, base + W, base + W + 1)))
    out_ref[...] = m
    ind_ref[...] = idx.astype(jnp.int32)


def _unpool_kernel(x_ref, i_ref, base_ref, out_ref, *, W):
    """MaxUnpool2d(2,2): write the value into the quadrant its index selects.

    Output packs the four quadrants along sublanes (rows [q*C:(q+1)*C]); the
    wrapper reassembles them into the (C, N, H, W) layout.
    """
    v = x_ref[...]
    idx = i_ref[...]
    base = base_ref[...]
    quads = []
    for dh in range(2):
        for dw in range(2):
            tgt = base + (dh * W + dw)
            quads.append(jnp.where(idx == tgt, v, 0.0))
    out_ref[...] = jnp.concatenate(quads, axis=0)


# ---------------------------------------------------------------------------
# Pallas wrappers
# ---------------------------------------------------------------------------

def _matmul_affine(w_t, p_t, shift, relu):
    """(Cout, K) @ (K, M) + shift[:,None], tiled over the lane (M) axis."""
    Cout, K = w_t.shape
    M = p_t.shape[1]
    tm = _pick_tile(M, 1024)
    grid = (M // tm,)
    return pl.pallas_call(
        functools.partial(_matmul_affine_kernel, relu=relu),
        out_shape=jax.ShapeDtypeStruct((Cout, M), jnp.float32),
        grid=grid,
        in_specs=[
            pl.BlockSpec((Cout, K), lambda i: (0, 0)),
            pl.BlockSpec((K, tm), lambda i: (0, i)),
            pl.BlockSpec((Cout, 1), lambda i: (0, 0)),
        ],
        out_specs=pl.BlockSpec((Cout, tm), lambda i: (0, i)),
        compiler_params=pltpu.CompilerParams(dimension_semantics=("parallel",)),
    )(w_t, p_t, shift)


def conv_bn_relu(x, w, b, gamma, beta, rmean, rvar, eps=1e-5):
    """3x3 conv (padding=1) + eval-mode BN + ReLU fused into one matmul.

    x: (Cin, N, H, W); w: PyTorch layout (Cout, Cin, kh, kw).
    """
    Cin, N, H, W = x.shape
    Cout = w.shape[0]
    M = N * H * W
    xp = jnp.pad(x, ((0, 0), (0, 0), (1, 1), (1, 1)))
    taps = [xp[:, :, kh:kh + H, kw:kw + W] for kh in range(3) for kw in range(3)]
    patches_t = jnp.concatenate(taps, axis=0).reshape(9 * Cin, M)

    # (Cout, Cin, kh, kw) -> (Cout, kh, kw, Cin) -> (Cout, 9*Cin); fold BN scale.
    w_t = jnp.transpose(w, (0, 2, 3, 1)).reshape(Cout, 9 * Cin)
    scale = gamma * jax.lax.rsqrt(rvar + eps)
    shift = beta + (b - rmean) * scale
    w_scaled = (w_t * scale[:, None]).astype(jnp.bfloat16)

    out = _matmul_affine(w_scaled, patches_t.astype(jnp.bfloat16),
                         shift[:, None].astype(jnp.float32), relu=True)
    return out.reshape(Cout, N, H, W)


def conv1x1(x, w, b):
    """1x1 conv classification head (no BN / no ReLU)."""
    Cin, N, H, W = x.shape
    Cout = w.shape[0]
    M = N * H * W
    p_t = x.reshape(Cin, M).astype(jnp.bfloat16)
    w_t = w.reshape(Cout, Cin).astype(jnp.bfloat16)
    out = _matmul_affine(w_t, p_t, b[:, None].astype(jnp.float32), relu=False)
    return out.reshape(Cout, N, H, W)


def maxpool2x2(x):
    C, N, H, W = x.shape
    Ho, Wo = H // 2, W // 2
    M = N * Ho * Wo
    # Pack the 4 window taps along the sublane axis: (4*C, M).
    xr = x.reshape(C, N, Ho, 2, Wo, 2)
    packed = jnp.transpose(xr, (3, 5, 0, 1, 2, 4)).reshape(4 * C, M)
    oh = jnp.arange(Ho, dtype=jnp.int32)
    ow = jnp.arange(Wo, dtype=jnp.int32)
    base2d = (2 * oh)[:, None] * W + 2 * ow[None, :]
    base = jnp.broadcast_to(base2d[None], (N, Ho, Wo)).reshape(1, M)

    tm = _pick_tile(M, 256)
    grid = (M // tm,)
    out, ind = pl.pallas_call(
        functools.partial(_maxpool_kernel, C=C, W=W),
        out_shape=(jax.ShapeDtypeStruct((C, M), jnp.float32),
                   jax.ShapeDtypeStruct((C, M), jnp.int32)),
        grid=grid,
        in_specs=[pl.BlockSpec((4 * C, tm), lambda i: (0, i)),
                  pl.BlockSpec((1, tm), lambda i: (0, i))],
        out_specs=(pl.BlockSpec((C, tm), lambda i: (0, i)),
                   pl.BlockSpec((C, tm), lambda i: (0, i))),
        compiler_params=pltpu.CompilerParams(dimension_semantics=("parallel",)),
    )(packed, base)
    return out.reshape(C, N, Ho, Wo), ind.reshape(C, N, Ho, Wo)


def maxunpool2x2(x, ind):
    C, N, Ho, Wo = x.shape
    H, W = 2 * Ho, 2 * Wo
    M = N * Ho * Wo
    xv = x.reshape(C, M)
    iv = ind.reshape(C, M)
    oh = jnp.arange(Ho, dtype=jnp.int32)
    ow = jnp.arange(Wo, dtype=jnp.int32)
    base2d = (2 * oh)[:, None] * W + 2 * ow[None, :]
    base = jnp.broadcast_to(base2d[None], (N, Ho, Wo)).reshape(1, M)

    tm = _pick_tile(M, 256)
    grid = (M // tm,)
    out4 = pl.pallas_call(
        functools.partial(_unpool_kernel, W=W),
        out_shape=jax.ShapeDtypeStruct((4 * C, M), jnp.float32),
        grid=grid,
        in_specs=[pl.BlockSpec((C, tm), lambda i: (0, i)),
                  pl.BlockSpec((C, tm), lambda i: (0, i)),
                  pl.BlockSpec((1, tm), lambda i: (0, i))],
        out_specs=pl.BlockSpec((4 * C, tm), lambda i: (0, i)),
        compiler_params=pltpu.CompilerParams(dimension_semantics=("parallel",)),
    )(xv, iv, base)
    out = out4.reshape(2, 2, C, N, Ho, Wo)
    out = jnp.transpose(out, (2, 3, 4, 0, 5, 1)).reshape(C, N, H, W)
    return out


# ---------------------------------------------------------------------------
# Parameter construction (deterministic, synthetic).  NOTE: dicts hold only
# arrays (no strings) so the whole tree can be passed through jax.jit.
# ---------------------------------------------------------------------------

def _conv_relu_params(key, in_c, out_c, ksize=3):
    kw, kb, kg, kbeta, km, kv = jax.random.split(key, 6)
    fan_in = in_c * ksize * ksize
    w = jax.random.normal(kw, (out_c, in_c, ksize, ksize), jnp.float32) / jnp.sqrt(fan_in)
    b = 0.01 * jax.random.normal(kb, (out_c,), jnp.float32)
    gamma = 1.0 + 0.1 * jax.random.normal(kg, (out_c,), jnp.float32)
    beta = 0.1 * jax.random.normal(kbeta, (out_c,), jnp.float32)
    rmean = 0.1 * jax.random.normal(km, (out_c,), jnp.float32)
    rvar = 1.0 + 0.1 * jax.random.uniform(kv, (out_c,), jnp.float32)
    return dict(w=w, b=b, gamma=gamma, beta=beta, rmean=rmean, rvar=rvar)


def _conv1x1_params(key, in_c, out_c):
    kw, kb = jax.random.split(key, 2)
    w = jax.random.normal(kw, (out_c, in_c, 1, 1), jnp.float32) / jnp.sqrt(in_c)
    b = 0.01 * jax.random.normal(kb, (out_c,), jnp.float32)
    return dict(w=w, b=b)


def make_segnet_params(key, in_channels=3, num_classes=5, base_f=8):
    enc_cfg = [(in_channels, base_f, 2),
               (base_f, base_f * 2, 2),
               (base_f * 2, base_f * 4, 3),
               (base_f * 4, base_f * 8, 3),
               (base_f * 8, base_f * 8, 3)]
    dec_cfg = [(base_f * 8, base_f * 8, 3, False),
               (base_f * 8, base_f * 4, 3, False),
               (base_f * 4, base_f * 2, 3, False),
               (base_f * 2, base_f, 2, False),
               (base_f, num_classes, 1, True)]

    params = {"enc": [], "dec": []}
    for (in_c, out_c, convs) in enc_cfg:
        block = []
        for i in range(convs):
            key, sub = jax.random.split(key)
            block.append(_conv_relu_params(sub, in_c if i == 0 else out_c, out_c))
        params["enc"].append(block)
    for (in_c, out_c, convs, classification) in dec_cfg:
        block = []
        for i in range(convs):
            key, sub = jax.random.split(key)
            if i == convs - 1 and classification:
                block.append(_conv1x1_params(sub, in_c, out_c))
            elif i == convs - 1:
                block.append(_conv_relu_params(sub, in_c, out_c))
            else:
                block.append(_conv_relu_params(sub, in_c, in_c))
        params["dec"].append(block)
    return params


# ---------------------------------------------------------------------------
# SegNet forward
# ---------------------------------------------------------------------------

def _apply_layer(x, layer):
    if "gamma" in layer:          # ConvReLU (conv + BN + ReLU)
        return conv_bn_relu(x, layer["w"], layer["b"], layer["gamma"],
                            layer["beta"], layer["rmean"], layer["rvar"])
    return conv1x1(x, layer["w"], layer["b"])   # classification head


def segnet_forward(x_nchw, params):
    # NCHW -> (C, N, H, W): channels on sublanes, spatial on lanes.
    x = jnp.transpose(x_nchw, (1, 0, 2, 3)).astype(jnp.float32)
    indices = []
    for block in params["enc"]:
        for layer in block:
            x = _apply_layer(x, layer)
        x, ind = maxpool2x2(x)
        indices.append(ind)
    for block, ind in zip(params["dec"], reversed(indices)):
        x = maxunpool2x2(x, ind)
        for layer in block:
            x = _apply_layer(x, layer)
    return jnp.transpose(x, (1, 0, 2, 3))        # (C, N, H, W) -> NCHW


# ---------------------------------------------------------------------------
# Main
# ---------------------------------------------------------------------------

if __name__ == "__main__":
    key = jax.random.PRNGKey(0)
    k_params, k_x = jax.random.split(key)

    IN_CHANNELS, NUM_CLASSES, BASE_F = 3, 5, 8
    N, H, W = 2, 32, 32                         # 5 pooling levels: 32 -> 1

    params = make_segnet_params(k_params, IN_CHANNELS, NUM_CLASSES, BASE_F)
    x = jax.random.normal(k_x, (N, IN_CHANNELS, H, W), jnp.float32)

    fwd = jax.jit(segnet_forward)
    out = fwd(x, params)
    out = jax.block_until_ready(out)

    assert out.shape == (N, NUM_CLASSES, H, W), out.shape
    assert bool(jnp.all(jnp.isfinite(out)))
    print("KERNEL_OK")
</pallas_src>

<mosaic_0001>
module attributes {stable_mosaic.version = 11 : i64} {
  func.func @_matmul_affine_kernel(%arg0: i32, %arg1: memref<8x27xbf16, #tpu.memory_space<vmem>>, %arg2: memref<27x1024xbf16, #tpu.memory_space<vmem>>, %arg3: memref<8x1xf32, #tpu.memory_space<vmem>>, %arg4: memref<8x1024xf32, #tpu.memory_space<vmem>>) attributes {dimension_semantics = [#tpu.dimension_semantics<parallel>], iteration_bounds = array<i64: 2>, scalar_prefetch = 0 : i64, scratch_operands = 0 : i64, tpu.core_type = #tpu.core_type<tc>, window_params = [{pipeline_mode = #tpu.pipeline_mode<synchronous>, transform_indices = @transform_0, window_bounds = array<i64: 8, 27>}, {transform_indices = @transform_1, window_bounds = array<i64: 27, 1024>}, {pipeline_mode = #tpu.pipeline_mode<synchronous>, transform_indices = @transform_2, window_bounds = array<i64: 8, 1>}, {transform_indices = @transform_3, window_bounds = array<i64: 8, 1024>}]} {
    %c0 = arith.constant 0 : index
    %c0_0 = arith.constant 0 : index
    %0 = vector.load %arg1[%c0, %c0_0] : memref<8x27xbf16, #tpu.memory_space<vmem>>, vector<8x27xbf16>
    %c0_1 = arith.constant 0 : index
    %c0_2 = arith.constant 0 : index
    %1 = vector.load %arg2[%c0_1, %c0_2] : memref<27x1024xbf16, #tpu.memory_space<vmem>>, vector<27x1024xbf16>
    %cst = arith.constant dense<0.000000e+00> : vector<8x1024xf32>
    %2 = tpu.matmul %0, %1, %cst {dimension_numbers = #tpu.dot_dimension_numbers<[1], [0], [0], [1], [0, 0, 1, 1], [], []>} : vector<8x27xbf16>, vector<27x1024xbf16>, vector<8x1024xf32> -> vector<8x1024xf32>
    %c0_3 = arith.constant 0 : index
    %c0_4 = arith.constant 0 : index
    %3 = vector.load %arg3[%c0_3, %c0_4] : memref<8x1xf32, #tpu.memory_space<vmem>>, vector<8x1xf32>
    %4 = vector.broadcast %3 : vector<8x1xf32> to vector<8x1024xf32>
    %5 = arith.addf %2, %4 : vector<8x1024xf32>
    %cst_5 = arith.constant 0.000000e+00 : f32
    %6 = vector.broadcast %cst_5 : f32 to vector<8x1024xf32>
    %7 = arith.maximumf %5, %6 : vector<8x1024xf32>
    %c0_6 = arith.constant 0 : index
    %c0_7 = arith.constant 0 : index
    %8 = vector.load %arg4[%c0_6, %c0_7] : memref<8x1024xf32, #tpu.memory_space<vmem>>, vector<8x1024xf32>
    tpu.vector_store %arg4[%c0_6, %c0_7], %7 {strides = array<i32>} : memref<8x1024xf32, #tpu.memory_space<vmem>>, vector<8x1024xf32>,
    return
  }
  func.func @transform_0(%arg0: i32) -> (i32, i32) {
    %c0_i32 = arith.constant 0 : i32
    %c0_i32_0 = arith.constant 0 : i32
    %c0_i32_1 = arith.constant 0 : i32
    return %c0_i32, %c0_i32_0 : i32, i32
  }
  func.func @transform_1(%arg0: i32) -> (i32, i32) {
    %c0_i32 = arith.constant 0 : i32
    %c0_i32_0 = arith.constant 0 : i32
    return %c0_i32, %arg0 : i32, i32
  }
  func.func @transform_2(%arg0: i32) -> (i32, i32) {
    %c0_i32 = arith.constant 0 : i32
    %c0_i32_0 = arith.constant 0 : i32
    %c0_i32_1 = arith.constant 0 : i32
    return %c0_i32, %c0_i32_0 : i32, i32
  }
  func.func @transform_3(%arg0: i32) -> (i32, i32) {
    %c0_i32 = arith.constant 0 : i32
    %c0_i32_0 = arith.constant 0 : i32
    return %c0_i32, %arg0 : i32, i32
  }
}

module attributes {stable_mosaic.version = 11 : i64} {
  func.func @_matmul_affine_kernel(%arg0: i32, %arg1: memref<8x72xbf16, #tpu.memory_space<vmem>>, %arg2: memref<72x1024xbf16, #tpu.memory_space<vmem>>, %arg3: memref<8x1xf32, #tpu.memory_space<vmem>>, %arg4: memref<8x1024xf32, #tpu.memory_space<vmem>>) attributes {dimension_semantics = [#tpu.dimension_semantics<parallel>], iteration_bounds = array<i64: 2>, scalar_prefetch = 0 : i64, scratch_operands = 0 : i64, tpu.core_type = #tpu.core_type<tc>, window_params = [{pipeline_mode = #tpu.pipeline_mode<synchronous>, transform_indices = @transform_0, window_bounds = array<i64: 8, 72>}, {transform_indices = @transform_1, window_bounds = array<i64: 72, 1024>}, {pipeline_mode = #tpu.pipeline_mode<synchronous>, transform_indices = @transform_2, window_bounds = array<i64: 8, 1>}, {transform_indices = @transform_3, window_bounds = array<i64: 8, 1024>}]} {
    %c0 = arith.constant 0 : index
    %c0_0 = arith.constant 0 : index
    %0 = vector.load %arg1[%c0, %c0_0] : memref<8x72xbf16, #tpu.memory_space<vmem>>, vector<8x72xbf16>
    %c0_1 = arith.constant 0 : index
    %c0_2 = arith.constant 0 : index
    %1 = vector.load %arg2[%c0_1, %c0_2] : memref<72x1024xbf16, #tpu.memory_space<vmem>>, vector<72x1024xbf16>
    %cst = arith.constant dense<0.000000e+00> : vector<8x1024xf32>
    %2 = tpu.matmul %0, %1, %cst {dimension_numbers = #tpu.dot_dimension_numbers<[1], [0], [0], [1], [0, 0, 1, 1], [], []>} : vector<8x72xbf16>, vector<72x1024xbf16>, vector<8x1024xf32> -> vector<8x1024xf32>
    %c0_3 = arith.constant 0 : index
    %c0_4 = arith.constant 0 : index
    %3 = vector.load %arg3[%c0_3, %c0_4] : memref<8x1xf32, #tpu.memory_space<vmem>>, vector<8x1xf32>
    %4 = vector.broadcast %3 : vector<8x1xf32> to vector<8x1024xf32>
    %5 = arith.addf %2, %4 : vector<8x1024xf32>
    %cst_5 = arith.constant 0.000000e+00 : f32
    %6 = vector.broadcast %cst_5 : f32 to vector<8x1024xf32>
    %7 = arith.maximumf %5, %6 : vector<8x1024xf32>
    %c0_6 = arith.constant 0 : index
    %c0_7 = arith.constant 0 : index
    %8 = vector.load %arg4[%c0_6, %c0_7] : memref<8x1024xf32, #tpu.memory_space<vmem>>, vector<8x1024xf32>
    tpu.vector_store %arg4[%c0_6, %c0_7], %7 {strides = array<i32>} : memref<8x1024xf32, #tpu.memory_space<vmem>>, vector<8x1024xf32>,
    return
  }
  func.func @transform_0(%arg0: i32) -> (i32, i32) {
    %c0_i32 = arith.constant 0 : i32
    %c0_i32_0 = arith.constant 0 : i32
    %c0_i32_1 = arith.constant 0 : i32
    return %c0_i32, %c0_i32_0 : i32, i32
  }
  func.func @transform_1(%arg0: i32) -> (i32, i32) {
    %c0_i32 = arith.constant 0 : i32
    %c0_i32_0 = arith.constant 0 : i32
    return %c0_i32, %arg0 : i32, i32
  }
  func.func @transform_2(%arg0: i32) -> (i32, i32) {
    %c0_i32 = arith.constant 0 : i32
    %c0_i32_0 = arith.constant 0 : i32
    %c0_i32_1 = arith.constant 0 : i32
    return %c0_i32, %c0_i32_0 : i32, i32
  }
  func.func @transform_3(%arg0: i32) -> (i32, i32) {
    %c0_i32 = arith.constant 0 : i32
    %c0_i32_0 = arith.constant 0 : i32
    return %c0_i32, %arg0 : i32, i32
  }
}

module attributes {stable_mosaic.version = 11 : i64} {
  func.func @_maxpool_kernel(%arg0: i32, %arg1: memref<32x256xf32, #tpu.memory_space<vmem>>, %arg2: memref<1x256xi32, #tpu.memory_space<vmem>>, %arg3: memref<8x256xf32, #tpu.memory_space<vmem>>, %arg4: memref<8x256xi32, #tpu.memory_space<vmem>>) attributes {dimension_semantics = [#tpu.dimension_semantics<parallel>], iteration_bounds = array<i64: 2>, scalar_prefetch = 0 : i64, scratch_operands = 0 : i64, tpu.core_type = #tpu.core_type<tc>, window_params = [{transform_indices = @transform_0, window_bounds = array<i64: 32, 256>}, {transform_indices = @transform_1, window_bounds = array<i64: 1, 256>}, {transform_indices = @transform_2, window_bounds = array<i64: 8, 256>}, {transform_indices = @transform_3, window_bounds = array<i64: 8, 256>}]} {
    %c0 = arith.constant 0 : index
    %c0_0 = arith.constant 0 : index
    %0 = vector.load %arg1[%c0, %c0_0] : memref<32x256xf32, #tpu.memory_space<vmem>>, vector<32x256xf32>
    %1 = vector.extract_strided_slice %0 {offsets = [0, 0], sizes = [8, 256], strides = [1, 1]} : vector<32x256xf32> to vector<8x256xf32>
    %2 = vector.extract_strided_slice %0 {offsets = [8, 0], sizes = [8, 256], strides = [1, 1]} : vector<32x256xf32> to vector<8x256xf32>
    %3 = vector.extract_strided_slice %0 {offsets = [16, 0], sizes = [8, 256], strides = [1, 1]} : vector<32x256xf32> to vector<8x256xf32>
    %4 = vector.extract_strided_slice %0 {offsets = [24, 0], sizes = [8, 256], strides = [1, 1]} : vector<32x256xf32> to vector<8x256xf32>
    %5 = arith.maximumf %1, %2 : vector<8x256xf32>
    %6 = arith.maximumf %3, %4 : vector<8x256xf32>
    %7 = arith.maximumf %5, %6 : vector<8x256xf32>
    %c0_1 = arith.constant 0 : index
    %c0_2 = arith.constant 0 : index
    %8 = vector.load %arg2[%c0_1, %c0_2] : memref<1x256xi32, #tpu.memory_space<vmem>>, vector<1x256xi32>
    %9 = arith.cmpf oeq, %1, %7 : vector<8x256xf32>
    %10 = arith.cmpf oeq, %2, %7 : vector<8x256xf32>
    %c1_i32 = arith.constant 1 : i32
    %11 = vector.broadcast %c1_i32 : i32 to vector<1x256xi32>
    %12 = arith.addi %8, %11 : vector<1x256xi32>
    %13 = arith.cmpf oeq, %3, %7 : vector<8x256xf32>
    %c32_i32 = arith.constant 32 : i32
    %14 = vector.broadcast %c32_i32 : i32 to vector<1x256xi32>
    %15 = arith.addi %8, %14 : vector<1x256xi32>
    %c32_i32_3 = arith.constant 32 : i32
    %16 = vector.broadcast %c32_i32_3 : i32 to vector<1x256xi32>
    %17 = arith.addi %8, %16 : vector<1x256xi32>
    %c1_i32_4 = arith.constant 1 : i32
    %18 = vector.broadcast %c1_i32_4 : i32 to vector<1x256xi32>
    %19 = arith.addi %17, %18 : vector<1x256xi32>
    %20 = vector.shape_cast %15 : vector<1x256xi32> to vector<1x256xi32>
    %21 = vector.broadcast %20 : vector<1x256xi32> to vector<8x256xi32>
    %22 = vector.shape_cast %19 : vector<1x256xi32> to vector<1x256xi32>
    %23 = vector.broadcast %22 : vector<1x256xi32> to vector<8x256xi32>
    %24 = arith.select %13, %21, %23 : vector<8x256xi1>, vector<8x256xi32>
    %25 = vector.shape_cast %12 : vector<1x256xi32> to vector<1x256xi32>
    %26 = vector.broadcast %25 : vector<1x256xi32> to vector<8x256xi32>
    %27 = arith.select %10, %26, %24 : vector<8x256xi1>, vector<8x256xi32>
    %28 = vector.shape_cast %8 : vector<1x256xi32> to vector<1x256xi32>
    %29 = vector.broadcast %28 : vector<1x256xi32> to vector<8x256xi32>
    %30 = arith.select %9, %29, %27 : vector<8x256xi1>, vector<8x256xi32>
    %c0_5 = arith.constant 0 : index
    %c0_6 = arith.constant 0 : index
    %31 = vector.load %arg3[%c0_5, %c0_6] : memref<8x256xf32, #tpu.memory_space<vmem>>, vector<8x256xf32>
    tpu.vector_store %arg3[%c0_5, %c0_6], %7 {strides = array<i32>} : memref<8x256xf32, #tpu.memory_space<vmem>>, vector<8x256xf32>,
    %c0_7 = arith.constant 0 : index
    %c0_8 = arith.constant 0 : index
    %32 = vector.load %arg4[%c0_7, %c0_8] : memref<8x256xi32, #tpu.memory_space<vmem>>, vector<8x256xi32>
    tpu.vector_store %arg4[%c0_7, %c0_8], %30 {strides = array<i32>} : memref<8x256xi32, #tpu.memory_space<vmem>>, vector<8x256xi32>,
    return
  }
  func.func @transform_0(%arg0: i32) -> (i32, i32) {
    %c0_i32 = arith.constant 0 : i32
    %c0_i32_0 = arith.constant 0 : i32
    return %c0_i32, %arg0 : i32, i32
  }
  func.func @transform_1(%arg0: i32) -> (i32, i32) {
    %c0_i32 = arith.constant 0 : i32
    %c0_i32_0 = arith.constant 0 : i32
    return %c0_i32, %arg0 : i32, i32
  }
  func.func @transform_2(%arg0: i32) -> (i32, i32) {
    %c0_i32 = arith.constant 0 : i32
    %c0_i32_0 = arith.constant 0 : i32
    return %c0_i32, %arg0 : i32, i32
  }
  func.func @transform_3(%arg0: i32) -> (i32, i32) {
    %c0_i32 = arith.constant 0 : i32
    %c0_i32_0 = arith.constant 0 : i32
    return %c0_i32, %arg0 : i32, i32
  }
}

module attributes {stable_mosaic.version = 11 : i64} {
  func.func @_matmul_affine_kernel(%arg0: i32, %arg1: memref<16x72xbf16, #tpu.memory_space<vmem>>, %arg2: memref<72x512xbf16, #tpu.memory_space<vmem>>, %arg3: memref<16x1xf32, #tpu.memory_space<vmem>>, %arg4: memref<16x512xf32, #tpu.memory_space<vmem>>) attributes {dimension_semantics = [#tpu.dimension_semantics<parallel>], iteration_bounds = array<i64: 1>, scalar_prefetch = 0 : i64, scratch_operands = 0 : i64, tpu.core_type = #tpu.core_type<tc>, window_params = [{pipeline_mode = #tpu.pipeline_mode<synchronous>, transform_indices = @transform_0, window_bounds = array<i64: 16, 72>}, {transform_indices = @transform_1, window_bounds = array<i64: 72, 512>}, {pipeline_mode = #tpu.pipeline_mode<synchronous>, transform_indices = @transform_2, window_bounds = array<i64: 16, 1>}, {transform_indices = @transform_3, window_bounds = array<i64: 16, 512>}]} {
    %c0 = arith.constant 0 : index
    %c0_0 = arith.constant 0 : index
    %0 = vector.load %arg1[%c0, %c0_0] : memref<16x72xbf16, #tpu.memory_space<vmem>>, vector<16x72xbf16>
    %c0_1 = arith.constant 0 : index
    %c0_2 = arith.constant 0 : index
    %1 = vector.load %arg2[%c0_1, %c0_2] : memref<72x512xbf16, #tpu.memory_space<vmem>>, vector<72x512xbf16>
    %cst = arith.constant dense<0.000000e+00> : vector<16x512xf32>
    %2 = tpu.matmul %0, %1, %cst {dimension_numbers = #tpu.dot_dimension_numbers<[1], [0], [0], [1], [0, 0, 1, 1], [], []>} : vector<16x72xbf16>, vector<72x512xbf16>, vector<16x512xf32> -> vector<16x512xf32>
    %c0_3 = arith.constant 0 : index
    %c0_4 = arith.constant 0 : index
    %3 = vector.load %arg3[%c0_3, %c0_4] : memref<16x1xf32, #tpu.memory_space<vmem>>, vector<16x1xf32>
    %4 = vector.broadcast %3 : vector<16x1xf32> to vector<16x512xf32>
    %5 = arith.addf %2, %4 : vector<16x512xf32>
    %cst_5 = arith.constant 0.000000e+00 : f32
    %6 = vector.broadcast %cst_5 : f32 to vector<16x512xf32>
    %7 = arith.maximumf %5, %6 : vector<16x512xf32>
    %c0_6 = arith.constant 0 : index
    %c0_7 = arith.constant 0 : index
    %8 = vector.load %arg4[%c0_6, %c0_7] : memref<16x512xf32, #tpu.memory_space<vmem>>, vector<16x512xf32>
    tpu.vector_store %arg4[%c0_6, %c0_7], %7 {strides = array<i32>} : memref<16x512xf32, #tpu.memory_space<vmem>>, vector<16x512xf32>,
    return
  }
  func.func @transform_0(%arg0: i32) -> (i32, i32) {
    %c0_i32 = arith.constant 0 : i32
    %c0_i32_0 = arith.constant 0 : i32
    %c0_i32_1 = arith.constant 0 : i32
    return %c0_i32, %c0_i32_0 : i32, i32
  }
  func.func @transform_1(%arg0: i32) -> (i32, i32) {
    %c0_i32 = arith.constant 0 : i32
    %c0_i32_0 = arith.constant 0 : i32
    return %c0_i32, %arg0 : i32, i32
  }
  func.func @transform_2(%arg0: i32) -> (i32, i32) {
    %c0_i32 = arith.constant 0 : i32
    %c0_i32_0 = arith.constant 0 : i32
    %c0_i32_1 = arith.constant 0 : i32
    return %c0_i32, %c0_i32_0 : i32, i32
  }
  func.func @transform_3(%arg0: i32) -> (i32, i32) {
    %c0_i32 = arith.constant 0 : i32
    %c0_i32_0 = arith.constant 0 : i32
    return %c0_i32, %arg0 : i32, i32
  }
}

module attributes {stable_mosaic.version = 11 : i64} {
  func.func @_matmul_affine_kernel(%arg0: i32, %arg1: memref<16x144xbf16, #tpu.memory_space<vmem>>, %arg2: memref<144x512xbf16, #tpu.memory_space<vmem>>, %arg3: memref<16x1xf32, #tpu.memory_space<vmem>>, %arg4: memref<16x512xf32, #tpu.memory_space<vmem>>) attributes {dimension_semantics = [#tpu.dimension_semantics<parallel>], iteration_bounds = array<i64: 1>, scalar_prefetch = 0 : i64, scratch_operands = 0 : i64, tpu.core_type = #tpu.core_type<tc>, window_params = [{pipeline_mode = #tpu.pipeline_mode<synchronous>, transform_indices = @transform_0, window_bounds = array<i64: 16, 144>}, {transform_indices = @transform_1, window_bounds = array<i64: 144, 512>}, {pipeline_mode = #tpu.pipeline_mode<synchronous>, transform_indices = @transform_2, window_bounds = array<i64: 16, 1>}, {transform_indices = @transform_3, window_bounds = array<i64: 16, 512>}]} {
    %c0 = arith.constant 0 : index
    %c0_0 = arith.constant 0 : index
    %0 = vector.load %arg1[%c0, %c0_0] : memref<16x144xbf16, #tpu.memory_space<vmem>>, vector<16x144xbf16>
    %c0_1 = arith.constant 0 : index
    %c0_2 = arith.constant 0 : index
    %1 = vector.load %arg2[%c0_1, %c0_2] : memref<144x512xbf16, #tpu.memory_space<vmem>>, vector<144x512xbf16>
    %cst = arith.constant dense<0.000000e+00> : vector<16x512xf32>
    %2 = tpu.matmul %0, %1, %cst {dimension_numbers = #tpu.dot_dimension_numbers<[1], [0], [0], [1], [0, 0, 1, 1], [], []>} : vector<16x144xbf16>, vector<144x512xbf16>, vector<16x512xf32> -> vector<16x512xf32>
    %c0_3 = arith.constant 0 : index
    %c0_4 = arith.constant 0 : index
    %3 = vector.load %arg3[%c0_3, %c0_4] : memref<16x1xf32, #tpu.memory_space<vmem>>, vector<16x1xf32>
    %4 = vector.broadcast %3 : vector<16x1xf32> to vector<16x512xf32>
    %5 = arith.addf %2, %4 : vector<16x512xf32>
    %cst_5 = arith.constant 0.000000e+00 : f32
    %6 = vector.broadcast %cst_5 : f32 to vector<16x512xf32>
    %7 = arith.maximumf %5, %6 : vector<16x512xf32>
    %c0_6 = arith.constant 0 : index
    %c0_7 = arith.constant 0 : index
    %8 = vector.load %arg4[%c0_6, %c0_7] : memref<16x512xf32, #tpu.memory_space<vmem>>, vector<16x512xf32>
    tpu.vector_store %arg4[%c0_6, %c0_7], %7 {strides = array<i32>} : memref<16x512xf32, #tpu.memory_space<vmem>>, vector<16x512xf32>,
    return
  }
  func.func @transform_0(%arg0: i32) -> (i32, i32) {
    %c0_i32 = arith.constant 0 : i32
    %c0_i32_0 = arith.constant 0 : i32
    %c0_i32_1 = arith.constant 0 : i32
    return %c0_i32, %c0_i32_0 : i32, i32
  }
  func.func @transform_1(%arg0: i32) -> (i32, i32) {
    %c0_i32 = arith.constant 0 : i32
    %c0_i32_0 = arith.constant 0 : i32
    return %c0_i32, %arg0 : i32, i32
  }
  func.func @transform_2(%arg0: i32) -> (i32, i32) {
    %c0_i32 = arith.constant 0 : i32
    %c0_i32_0 = arith.constant 0 : i32
    %c0_i32_1 = arith.constant 0 : i32
    return %c0_i32, %c0_i32_0 : i32, i32
  }
  func.func @transform_3(%arg0: i32) -> (i32, i32) {
    %c0_i32 = arith.constant 0 : i32
    %c0_i32_0 = arith.constant 0 : i32
    return %c0_i32, %arg0 : i32, i32
  }
}

module attributes {stable_mosaic.version = 11 : i64} {
  func.func @_maxpool_kernel(%arg0: i32, %arg1: memref<64x128xf32, #tpu.memory_space<vmem>>, %arg2: memref<1x128xi32, #tpu.memory_space<vmem>>, %arg3: memref<16x128xf32, #tpu.memory_space<vmem>>, %arg4: memref<16x128xi32, #tpu.memory_space<vmem>>) attributes {dimension_semantics = [#tpu.dimension_semantics<parallel>], iteration_bounds = array<i64: 1>, scalar_prefetch = 0 : i64, scratch_operands = 0 : i64, tpu.core_type = #tpu.core_type<tc>, window_params = [{transform_indices = @transform_0, window_bounds = array<i64: 64, 128>}, {transform_indices = @transform_1, window_bounds = array<i64: 1, 128>}, {transform_indices = @transform_2, window_bounds = array<i64: 16, 128>}, {transform_indices = @transform_3, window_bounds = array<i64: 16, 128>}]} {
    %c0 = arith.constant 0 : index
    %c0_0 = arith.constant 0 : index
    %0 = vector.load %arg1[%c0, %c0_0] : memref<64x128xf32, #tpu.memory_space<vmem>>, vector<64x128xf32>
    %1 = vector.extract_strided_slice %0 {offsets = [0, 0], sizes = [16, 128], strides = [1, 1]} : vector<64x128xf32> to vector<16x128xf32>
    %2 = vector.extract_strided_slice %0 {offsets = [16, 0], sizes = [16, 128], strides = [1, 1]} : vector<64x128xf32> to vector<16x128xf32>
    %3 = vector.extract_strided_slice %0 {offsets = [32, 0], sizes = [16, 128], strides = [1, 1]} : vector<64x128xf32> to vector<16x128xf32>
    %4 = vector.extract_strided_slice %0 {offsets = [48, 0], sizes = [16, 128], strides = [1, 1]} : vector<64x128xf32> to vector<16x128xf32>
    %5 = arith.maximumf %1, %2 : vector<16x128xf32>
    %6 = arith.maximumf %3, %4 : vector<16x128xf32>
    %7 = arith.maximumf %5, %6 : vector<16x128xf32>
    %c0_1 = arith.constant 0 : index
    %c0_2 = arith.constant 0 : index
    %8 = vector.load %arg2[%c0_1, %c0_2] : memref<1x128xi32, #tpu.memory_space<vmem>>, vector<1x128xi32>
    %9 = arith.cmpf oeq, %1, %7 : vector<16x128xf32>
    %10 = arith.cmpf oeq, %2, %7 : vector<16x128xf32>
    %c1_i32 = arith.constant 1 : i32
    %11 = vector.broadcast %c1_i32 : i32 to vector<1x128xi32>
    %12 = arith.addi %8, %11 : vector<1x128xi32>
    %13 = arith.cmpf oeq, %3, %7 : vector<16x128xf32>
    %c16_i32 = arith.constant 16 : i32
    %14 = vector.broadcast %c16_i32 : i32 to vector<1x128xi32>
    %15 = arith.addi %8, %14 : vector<1x128xi32>
    %c16_i32_3 = arith.constant 16 : i32
    %16 = vector.broadcast %c16_i32_3 : i32 to vector<1x128xi32>
    %17 = arith.addi %8, %16 : vector<1x128xi32>
    %c1_i32_4 = arith.constant 1 : i32
    %18 = vector.broadcast %c1_i32_4 : i32 to vector<1x128xi32>
    %19 = arith.addi %17, %18 : vector<1x128xi32>
    %20 = vector.shape_cast %15 : vector<1x128xi32> to vector<1x128xi32>
    %21 = vector.broadcast %20 : vector<1x128xi32> to vector<16x128xi32>
    %22 = vector.shape_cast %19 : vector<1x128xi32> to vector<1x128xi32>
    %23 = vector.broadcast %22 : vector<1x128xi32> to vector<16x128xi32>
    %24 = arith.select %13, %21, %23 : vector<16x128xi1>, vector<16x128xi32>
    %25 = vector.shape_cast %12 : vector<1x128xi32> to vector<1x128xi32>
    %26 = vector.broadcast %25 : vector<1x128xi32> to vector<16x128xi32>
    %27 = arith.select %10, %26, %24 : vector<16x128xi1>, vector<16x128xi32>
    %28 = vector.shape_cast %8 : vector<1x128xi32> to vector<1x128xi32>
    %29 = vector.broadcast %28 : vector<1x128xi32> to vector<16x128xi32>
    %30 = arith.select %9, %29, %27 : vector<16x128xi1>, vector<16x128xi32>
    %c0_5 = arith.constant 0 : index
    %c0_6 = arith.constant 0 : index
    %31 = vector.load %arg3[%c0_5, %c0_6] : memref<16x128xf32, #tpu.memory_space<vmem>>, vector<16x128xf32>
    tpu.vector_store %arg3[%c0_5, %c0_6], %7 {strides = array<i32>} : memref<16x128xf32, #tpu.memory_space<vmem>>, vector<16x128xf32>,
    %c0_7 = arith.constant 0 : index
    %c0_8 = arith.constant 0 : index
    %32 = vector.load %arg4[%c0_7, %c0_8] : memref<16x128xi32, #tpu.memory_space<vmem>>, vector<16x128xi32>
    tpu.vector_store %arg4[%c0_7, %c0_8], %30 {strides = array<i32>} : memref<16x128xi32, #tpu.memory_space<vmem>>, vector<16x128xi32>,
    return
  }
  func.func @transform_0(%arg0: i32) -> (i32, i32) {
    %c0_i32 = arith.constant 0 : i32
    %c0_i32_0 = arith.constant 0 : i32
    return %c0_i32, %arg0 : i32, i32
  }
  func.func @transform_1(%arg0: i32) -> (i32, i32) {
    %c0_i32 = arith.constant 0 : i32
    %c0_i32_0 = arith.constant 0 : i32
    return %c0_i32, %arg0 : i32, i32
  }
  func.func @transform_2(%arg0: i32) -> (i32, i32) {
    %c0_i32 = arith.constant 0 : i32
    %c0_i32_0 = arith.constant 0 : i32
    return %c0_i32, %arg0 : i32, i32
  }
  func.func @transform_3(%arg0: i32) -> (i32, i32) {
    %c0_i32 = arith.constant 0 : i32
    %c0_i32_0 = arith.constant 0 : i32
    return %c0_i32, %arg0 : i32, i32
  }
}

module attributes {stable_mosaic.version = 11 : i64} {
  func.func @_matmul_affine_kernel(%arg0: i32, %arg1: memref<32x144xbf16, #tpu.memory_space<vmem>>, %arg2: memref<144x128xbf16, #tpu.memory_space<vmem>>, %arg3: memref<32x1xf32, #tpu.memory_space<vmem>>, %arg4: memref<32x128xf32, #tpu.memory_space<vmem>>) attributes {dimension_semantics = [#tpu.dimension_semantics<parallel>], iteration_bounds = array<i64: 1>, scalar_prefetch = 0 : i64, scratch_operands = 0 : i64, tpu.core_type = #tpu.core_type<tc>, window_params = [{pipeline_mode = #tpu.pipeline_mode<synchronous>, transform_indices = @transform_0, window_bounds = array<i64: 32, 144>}, {transform_indices = @transform_1, window_bounds = array<i64: 144, 128>}, {pipeline_mode = #tpu.pipeline_mode<synchronous>, transform_indices = @transform_2, window_bounds = array<i64: 32, 1>}, {transform_indices = @transform_3, window_bounds = array<i64: 32, 128>}]} {
    %c0 = arith.constant 0 : index
    %c0_0 = arith.constant 0 : index
    %0 = vector.load %arg1[%c0, %c0_0] : memref<32x144xbf16, #tpu.memory_space<vmem>>, vector<32x144xbf16>
    %c0_1 = arith.constant 0 : index
    %c0_2 = arith.constant 0 : index
    %1 = vector.load %arg2[%c0_1, %c0_2] : memref<144x128xbf16, #tpu.memory_space<vmem>>, vector<144x128xbf16>
    %cst = arith.constant dense<0.000000e+00> : vector<32x128xf32>
    %2 = tpu.matmul %0, %1, %cst {dimension_numbers = #tpu.dot_dimension_numbers<[1], [0], [0], [1], [0, 0, 1, 1], [], []>} : vector<32x144xbf16>, vector<144x128xbf16>, vector<32x128xf32> -> vector<32x128xf32>
    %c0_3 = arith.constant 0 : index
    %c0_4 = arith.constant 0 : index
    %3 = vector.load %arg3[%c0_3, %c0_4] : memref<32x1xf32, #tpu.memory_space<vmem>>, vector<32x1xf32>
    %4 = vector.broadcast %3 : vector<32x1xf32> to vector<32x128xf32>
    %5 = arith.addf %2, %4 : vector<32x128xf32>
    %cst_5 = arith.constant 0.000000e+00 : f32
    %6 = vector.broadcast %cst_5 : f32 to vector<32x128xf32>
    %7 = arith.maximumf %5, %6 : vector<32x128xf32>
    %c0_6 = arith.constant 0 : index
    %c0_7 = arith.constant 0 : index
    %8 = vector.load %arg4[%c0_6, %c0_7] : memref<32x128xf32, #tpu.memory_space<vmem>>, vector<32x128xf32>
    tpu.vector_store %arg4[%c0_6, %c0_7], %7 {strides = array<i32>} : memref<32x128xf32, #tpu.memory_space<vmem>>, vector<32x128xf32>,
    return
  }
  func.func @transform_0(%arg0: i32) -> (i32, i32) {
    %c0_i32 = arith.constant 0 : i32
    %c0_i32_0 = arith.constant 0 : i32
    %c0_i32_1 = arith.constant 0 : i32
    return %c0_i32, %c0_i32_0 : i32, i32
  }
  func.func @transform_1(%arg0: i32) -> (i32, i32) {
    %c0_i32 = arith.constant 0 : i32
    %c0_i32_0 = arith.constant 0 : i32
    return %c0_i32, %arg0 : i32, i32
  }
  func.func @transform_2(%arg0: i32) -> (i32, i32) {
    %c0_i32 = arith.constant 0 : i32
    %c0_i32_0 = arith.constant 0 : i32
    %c0_i32_1 = arith.constant 0 : i32
    return %c0_i32, %c0_i32_0 : i32, i32
  }
  func.func @transform_3(%arg0: i32) -> (i32, i32) {
    %c0_i32 = arith.constant 0 : i32
    %c0_i32_0 = arith.constant 0 : i32
    return %c0_i32, %arg0 : i32, i32
  }
}

module attributes {stable_mosaic.version = 11 : i64} {
  func.func @_matmul_affine_kernel(%arg0: i32, %arg1: memref<32x288xbf16, #tpu.memory_space<vmem>>, %arg2: memref<288x128xbf16, #tpu.memory_space<vmem>>, %arg3: memref<32x1xf32, #tpu.memory_space<vmem>>, %arg4: memref<32x128xf32, #tpu.memory_space<vmem>>) attributes {dimension_semantics = [#tpu.dimension_semantics<parallel>], iteration_bounds = array<i64: 1>, scalar_prefetch = 0 : i64, scratch_operands = 0 : i64, tpu.core_type = #tpu.core_type<tc>, window_params = [{pipeline_mode = #tpu.pipeline_mode<synchronous>, transform_indices = @transform_0, window_bounds = array<i64: 32, 288>}, {transform_indices = @transform_1, window_bounds = array<i64: 288, 128>}, {pipeline_mode = #tpu.pipeline_mode<synchronous>, transform_indices = @transform_2, window_bounds = array<i64: 32, 1>}, {transform_indices = @transform_3, window_bounds = array<i64: 32, 128>}]} {
    %c0 = arith.constant 0 : index
    %c0_0 = arith.constant 0 : index
    %0 = vector.load %arg1[%c0, %c0_0] : memref<32x288xbf16, #tpu.memory_space<vmem>>, vector<32x288xbf16>
    %c0_1 = arith.constant 0 : index
    %c0_2 = arith.constant 0 : index
    %1 = vector.load %arg2[%c0_1, %c0_2] : memref<288x128xbf16, #tpu.memory_space<vmem>>, vector<288x128xbf16>
    %cst = arith.constant dense<0.000000e+00> : vector<32x128xf32>
    %2 = tpu.matmul %0, %1, %cst {dimension_numbers = #tpu.dot_dimension_numbers<[1], [0], [0], [1], [0, 0, 1, 1], [], []>} : vector<32x288xbf16>, vector<288x128xbf16>, vector<32x128xf32> -> vector<32x128xf32>
    %c0_3 = arith.constant 0 : index
    %c0_4 = arith.constant 0 : index
    %3 = vector.load %arg3[%c0_3, %c0_4] : memref<32x1xf32, #tpu.memory_space<vmem>>, vector<32x1xf32>
    %4 = vector.broadcast %3 : vector<32x1xf32> to vector<32x128xf32>
    %5 = arith.addf %2, %4 : vector<32x128xf32>
    %cst_5 = arith.constant 0.000000e+00 : f32
    %6 = vector.broadcast %cst_5 : f32 to vector<32x128xf32>
    %7 = arith.maximumf %5, %6 : vector<32x128xf32>
    %c0_6 = arith.constant 0 : index
    %c0_7 = arith.constant 0 : index
    %8 = vector.load %arg4[%c0_6, %c0_7] : memref<32x128xf32, #tpu.memory_space<vmem>>, vector<32x128xf32>
    tpu.vector_store %arg4[%c0_6, %c0_7], %7 {strides = array<i32>} : memref<32x128xf32, #tpu.memory_space<vmem>>, vector<32x128xf32>,
    return
  }
  func.func @transform_0(%arg0: i32) -> (i32, i32) {
    %c0_i32 = arith.constant 0 : i32
    %c0_i32_0 = arith.constant 0 : i32
    %c0_i32_1 = arith.constant 0 : i32
    return %c0_i32, %c0_i32_0 : i32, i32
  }
  func.func @transform_1(%arg0: i32) -> (i32, i32) {
    %c0_i32 = arith.constant 0 : i32
    %c0_i32_0 = arith.constant 0 : i32
    return %c0_i32, %arg0 : i32, i32
  }
  func.func @transform_2(%arg0: i32) -> (i32, i32) {
    %c0_i32 = arith.constant 0 : i32
    %c0_i32_0 = arith.constant 0 : i32
    %c0_i32_1 = arith.constant 0 : i32
    return %c0_i32, %c0_i32_0 : i32, i32
  }
  func.func @transform_3(%arg0: i32) -> (i32, i32) {
    %c0_i32 = arith.constant 0 : i32
    %c0_i32_0 = arith.constant 0 : i32
    return %c0_i32, %arg0 : i32, i32
  }
}

module attributes {stable_mosaic.version = 11 : i64} {
  func.func @_maxpool_kernel(%arg0: i32, %arg1: memref<128x32xf32, #tpu.memory_space<vmem>>, %arg2: memref<1x32xi32, #tpu.memory_space<vmem>>, %arg3: memref<32x32xf32, #tpu.memory_space<vmem>>, %arg4: memref<32x32xi32, #tpu.memory_space<vmem>>) attributes {dimension_semantics = [#tpu.dimension_semantics<parallel>], iteration_bounds = array<i64: 1>, scalar_prefetch = 0 : i64, scratch_operands = 0 : i64, tpu.core_type = #tpu.core_type<tc>, window_params = [{transform_indices = @transform_0, window_bounds = array<i64: 128, 32>}, {transform_indices = @transform_1, window_bounds = array<i64: 1, 32>}, {transform_indices = @transform_2, window_bounds = array<i64: 32, 32>}, {transform_indices = @transform_3, window_bounds = array<i64: 32, 32>}]} {
    %c0 = arith.constant 0 : index
    %c0_0 = arith.constant 0 : index
    %0 = vector.load %arg1[%c0, %c0_0] : memref<128x32xf32, #tpu.memory_space<vmem>>, vector<128x32xf32>
    %1 = vector.extract_strided_slice %0 {offsets = [0, 0], sizes = [32, 32], strides = [1, 1]} : vector<128x32xf32> to vector<32x32xf32>
    %2 = vector.extract_strided_slice %0 {offsets = [32, 0], sizes = [32, 32], strides = [1, 1]} : vector<128x32xf32> to vector<32x32xf32>
    %3 = vector.extract_strided_slice %0 {offsets = [64, 0], sizes = [32, 32], strides = [1, 1]} : vector<128x32xf32> to vector<32x32xf32>
    %4 = vector.extract_strided_slice %0 {offsets = [96, 0], sizes = [32, 32], strides = [1, 1]} : vector<128x32xf32> to vector<32x32xf32>
    %5 = arith.maximumf %1, %2 : vector<32x32xf32>
    %6 = arith.maximumf %3, %4 : vector<32x32xf32>
    %7 = arith.maximumf %5, %6 : vector<32x32xf32>
    %c0_1 = arith.constant 0 : index
    %c0_2 = arith.constant 0 : index
    %8 = vector.load %arg2[%c0_1, %c0_2] : memref<1x32xi32, #tpu.memory_space<vmem>>, vector<1x32xi32>
    %9 = arith.cmpf oeq, %1, %7 : vector<32x32xf32>
    %10 = arith.cmpf oeq, %2, %7 : vector<32x32xf32>
    %c1_i32 = arith.constant 1 : i32
    %11 = vector.broadcast %c1_i32 : i32 to vector<1x32xi32>
    %12 = arith.addi %8, %11 : vector<1x32xi32>
    %13 = arith.cmpf oeq, %3, %7 : vector<32x32xf32>
    %c8_i32 = arith.constant 8 : i32
    %14 = vector.broadcast %c8_i32 : i32 to vector<1x32xi32>
    %15 = arith.addi %8, %14 : vector<1x32xi32>
    %c8_i32_3 = arith.constant 8 : i32
    %16 = vector.broadcast %c8_i32_3 : i32 to vector<1x32xi32>
    %17 = arith.addi %8, %16 : vector<1x32xi32>
    %c1_i32_4 = arith.constant 1 : i32
    %18 = vector.broadcast %c1_i32_4 : i32 to vector<1x32xi32>
    %19 = arith.addi %17, %18 : vector<1x32xi32>
    %20 = vector.shape_cast %15 : vector<1x32xi32> to vector<1x32xi32>
    %21 = vector.broadcast %20 : vector<1x32xi32> to vector<32x32xi32>
    %22 = vector.shape_cast %19 : vector<1x32xi32> to vector<1x32xi32>
    %23 = vector.broadcast %22 : vector<1x32xi32> to vector<32x32xi32>
    %24 = arith.select %13, %21, %23 : vector<32x32xi1>, vector<32x32xi32>
    %25 = vector.shape_cast %12 : vector<1x32xi32> to vector<1x32xi32>
    %26 = vector.broadcast %25 : vector<1x32xi32> to vector<32x32xi32>
    %27 = arith.select %10, %26, %24 : vector<32x32xi1>, vector<32x32xi32>
    %28 = vector.shape_cast %8 : vector<1x32xi32> to vector<1x32xi32>
    %29 = vector.broadcast %28 : vector<1x32xi32> to vector<32x32xi32>
    %30 = arith.select %9, %29, %27 : vector<32x32xi1>, vector<32x32xi32>
    %c0_5 = arith.constant 0 : index
    %c0_6 = arith.constant 0 : index
    %31 = vector.load %arg3[%c0_5, %c0_6] : memref<32x32xf32, #tpu.memory_space<vmem>>, vector<32x32xf32>
    tpu.vector_store %arg3[%c0_5, %c0_6], %7 {strides = array<i32>} : memref<32x32xf32, #tpu.memory_space<vmem>>, vector<32x32xf32>,
    %c0_7 = arith.constant 0 : index
    %c0_8 = arith.constant 0 : index
    %32 = vector.load %arg4[%c0_7, %c0_8] : memref<32x32xi32, #tpu.memory_space<vmem>>, vector<32x32xi32>
    tpu.vector_store %arg4[%c0_7, %c0_8], %30 {strides = array<i32>} : memref<32x32xi32, #tpu.memory_space<vmem>>, vector<32x32xi32>,
    return
  }
  func.func @transform_0(%arg0: i32) -> (i32, i32) {
    %c0_i32 = arith.constant 0 : i32
    %c0_i32_0 = arith.constant 0 : i32
    return %c0_i32, %arg0 : i32, i32
  }
  func.func @transform_1(%arg0: i32) -> (i32, i32) {
    %c0_i32 = arith.constant 0 : i32
    %c0_i32_0 = arith.constant 0 : i32
    return %c0_i32, %arg0 : i32, i32
  }
  func.func @transform_2(%arg0: i32) -> (i32, i32) {
    %c0_i32 = arith.constant 0 : i32
    %c0_i32_0 = arith.constant 0 : i32
    return %c0_i32, %arg0 : i32, i32
  }
  func.func @transform_3(%arg0: i32) -> (i32, i32) {
    %c0_i32 = arith.constant 0 : i32
    %c0_i32_0 = arith.constant 0 : i32
    return %c0_i32, %arg0 : i32, i32
  }
}

module attributes {stable_mosaic.version = 11 : i64} {
  func.func @_matmul_affine_kernel(%arg0: i32, %arg1: memref<64x288xbf16, #tpu.memory_space<vmem>>, %arg2: memref<288x32xbf16, #tpu.memory_space<vmem>>, %arg3: memref<64x1xf32, #tpu.memory_space<vmem>>, %arg4: memref<64x32xf32, #tpu.memory_space<vmem>>) attributes {dimension_semantics = [#tpu.dimension_semantics<parallel>], iteration_bounds = array<i64: 1>, scalar_prefetch = 0 : i64, scratch_operands = 0 : i64, tpu.core_type = #tpu.core_type<tc>, window_params = [{pipeline_mode = #tpu.pipeline_mode<synchronous>, transform_indices = @transform_0, window_bounds = array<i64: 64, 288>}, {transform_indices = @transform_1, window_bounds = array<i64: 288, 32>}, {pipeline_mode = #tpu.pipeline_mode<synchronous>, transform_indices = @transform_2, window_bounds = array<i64: 64, 1>}, {transform_indices = @transform_3, window_bounds = array<i64: 64, 32>}]} {
    %c0 = arith.constant 0 : index
    %c0_0 = arith.constant 0 : index
    %0 = vector.load %arg1[%c0, %c0_0] : memref<64x288xbf16, #tpu.memory_space<vmem>>, vector<64x288xbf16>
    %c0_1 = arith.constant 0 : index
    %c0_2 = arith.constant 0 : index
    %1 = vector.load %arg2[%c0_1, %c0_2] : memref<288x32xbf16, #tpu.memory_space<vmem>>, vector<288x32xbf16>
    %cst = arith.constant dense<0.000000e+00> : vector<64x32xf32>
    %2 = tpu.matmul %0, %1, %cst {dimension_numbers = #tpu.dot_dimension_numbers<[1], [0], [0], [1], [0, 0, 1, 1], [], []>} : vector<64x288xbf16>, vector<288x32xbf16>, vector<64x32xf32> -> vector<64x32xf32>
    %c0_3 = arith.constant 0 : index
    %c0_4 = arith.constant 0 : index
    %3 = vector.load %arg3[%c0_3, %c0_4] : memref<64x1xf32, #tpu.memory_space<vmem>>, vector<64x1xf32>
    %4 = vector.broadcast %3 : vector<64x1xf32> to vector<64x32xf32>
    %5 = arith.addf %2, %4 : vector<64x32xf32>
    %cst_5 = arith.constant 0.000000e+00 : f32
    %6 = vector.broadcast %cst_5 : f32 to vector<64x32xf32>
    %7 = arith.maximumf %5, %6 : vector<64x32xf32>
    %c0_6 = arith.constant 0 : index
    %c0_7 = arith.constant 0 : index
    %8 = vector.load %arg4[%c0_6, %c0_7] : memref<64x32xf32, #tpu.memory_space<vmem>>, vector<64x32xf32>
    tpu.vector_store %arg4[%c0_6, %c0_7], %7 {strides = array<i32>} : memref<64x32xf32, #tpu.memory_space<vmem>>, vector<64x32xf32>,
    return
  }
  func.func @transform_0(%arg0: i32) -> (i32, i32) {
    %c0_i32 = arith.constant 0 : i32
    %c0_i32_0 = arith.constant 0 : i32
    %c0_i32_1 = arith.constant 0 : i32
    return %c0_i32, %c0_i32_0 : i32, i32
  }
  func.func @transform_1(%arg0: i32) -> (i32, i32) {
    %c0_i32 = arith.constant 0 : i32
    %c0_i32_0 = arith.constant 0 : i32
    return %c0_i32, %arg0 : i32, i32
  }
  func.func @transform_2(%arg0: i32) -> (i32, i32) {
    %c0_i32 = arith.constant 0 : i32
    %c0_i32_0 = arith.constant 0 : i32
    %c0_i32_1 = arith.constant 0 : i32
    return %c0_i32, %c0_i32_0 : i32, i32
  }
  func.func @transform_3(%arg0: i32) -> (i32, i32) {
    %c0_i32 = arith.constant 0 : i32
    %c0_i32_0 = arith.constant 0 : i32
    return %c0_i32, %arg0 : i32, i32
  }
}

module attributes {stable_mosaic.version = 11 : i64} {
  func.func @_matmul_affine_kernel(%arg0: i32, %arg1: memref<64x576xbf16, #tpu.memory_space<vmem>>, %arg2: memref<576x32xbf16, #tpu.memory_space<vmem>>, %arg3: memref<64x1xf32, #tpu.memory_space<vmem>>, %arg4: memref<64x32xf32, #tpu.memory_space<vmem>>) attributes {dimension_semantics = [#tpu.dimension_semantics<parallel>], iteration_bounds = array<i64: 1>, scalar_prefetch = 0 : i64, scratch_operands = 0 : i64, tpu.core_type = #tpu.core_type<tc>, window_params = [{pipeline_mode = #tpu.pipeline_mode<synchronous>, transform_indices = @transform_0, window_bounds = array<i64: 64, 576>}, {transform_indices = @transform_1, window_bounds = array<i64: 576, 32>}, {pipeline_mode = #tpu.pipeline_mode<synchronous>, transform_indices = @transform_2, window_bounds = array<i64: 64, 1>}, {transform_indices = @transform_3, window_bounds = array<i64: 64, 32>}]} {
    %c0 = arith.constant 0 : index
    %c0_0 = arith.constant 0 : index
    %0 = vector.load %arg1[%c0, %c0_0] : memref<64x576xbf16, #tpu.memory_space<vmem>>, vector<64x576xbf16>
    %c0_1 = arith.constant 0 : index
    %c0_2 = arith.constant 0 : index
    %1 = vector.load %arg2[%c0_1, %c0_2] : memref<576x32xbf16, #tpu.memory_space<vmem>>, vector<576x32xbf16>
    %cst = arith.constant dense<0.000000e+00> : vector<64x32xf32>
    %2 = tpu.matmul %0, %1, %cst {dimension_numbers = #tpu.dot_dimension_numbers<[1], [0], [0], [1], [0, 0, 1, 1], [], []>} : vector<64x576xbf16>, vector<576x32xbf16>, vector<64x32xf32> -> vector<64x32xf32>
    %c0_3 = arith.constant 0 : index
    %c0_4 = arith.constant 0 : index
    %3 = vector.load %arg3[%c0_3, %c0_4] : memref<64x1xf32, #tpu.memory_space<vmem>>, vector<64x1xf32>
    %4 = vector.broadcast %3 : vector<64x1xf32> to vector<64x32xf32>
    %5 = arith.addf %2, %4 : vector<64x32xf32>
    %cst_5 = arith.constant 0.000000e+00 : f32
    %6 = vector.broadcast %cst_5 : f32 to vector<64x32xf32>
    %7 = arith.maximumf %5, %6 : vector<64x32xf32>
    %c0_6 = arith.constant 0 : index
    %c0_7 = arith.constant 0 : index
    %8 = vector.load %arg4[%c0_6, %c0_7] : memref<64x32xf32, #tpu.memory_space<vmem>>, vector<64x32xf32>
    tpu.vector_store %arg4[%c0_6, %c0_7], %7 {strides = array<i32>} : memref<64x32xf32, #tpu.memory_space<vmem>>, vector<64x32xf32>,
    return
  }
  func.func @transform_0(%arg0: i32) -> (i32, i32) {
    %c0_i32 = arith.constant 0 : i32
    %c0_i32_0 = arith.constant 0 : i32
    %c0_i32_1 = arith.constant 0 : i32
    return %c0_i32, %c0_i32_0 : i32, i32
  }
  func.func @transform_1(%arg0: i32) -> (i32, i32) {
    %c0_i32 = arith.constant 0 : i32
    %c0_i32_0 = arith.constant 0 : i32
    return %c0_i32, %arg0 : i32, i32
  }
  func.func @transform_2(%arg0: i32) -> (i32, i32) {
    %c0_i32 = arith.constant 0 : i32
    %c0_i32_0 = arith.constant 0 : i32
    %c0_i32_1 = arith.constant 0 : i32
    return %c0_i32, %c0_i32_0 : i32, i32
  }
  func.func @transform_3(%arg0: i32) -> (i32, i32) {
    %c0_i32 = arith.constant 0 : i32
    %c0_i32_0 = arith.constant 0 : i32
    return %c0_i32, %arg0 : i32, i32
  }
}

module attributes {stable_mosaic.version = 11 : i64} {
  func.func @_maxpool_kernel(%arg0: i32, %arg1: memref<256x8xf32, #tpu.memory_space<vmem>>, %arg2: memref<1x8xi32, #tpu.memory_space<vmem>>, %arg3: memref<64x8xf32, #tpu.memory_space<vmem>>, %arg4: memref<64x8xi32, #tpu.memory_space<vmem>>) attributes {dimension_semantics = [#tpu.dimension_semantics<parallel>], iteration_bounds = array<i64: 1>, scalar_prefetch = 0 : i64, scratch_operands = 0 : i64, tpu.core_type = #tpu.core_type<tc>, window_params = [{transform_indices = @transform_0, window_bounds = array<i64: 256, 8>}, {transform_indices = @transform_1, window_bounds = array<i64: 1, 8>}, {transform_indices = @transform_2, window_bounds = array<i64: 64, 8>}, {transform_indices = @transform_3, window_bounds = array<i64: 64, 8>}]} {
    %c0 = arith.constant 0 : index
    %c0_0 = arith.constant 0 : index
    %0 = vector.load %arg1[%c0, %c0_0] : memref<256x8xf32, #tpu.memory_space<vmem>>, vector<256x8xf32>
    %1 = vector.extract_strided_slice %0 {offsets = [0, 0], sizes = [64, 8], strides = [1, 1]} : vector<256x8xf32> to vector<64x8xf32>
    %2 = vector.extract_strided_slice %0 {offsets = [64, 0], sizes = [64, 8], strides = [1, 1]} : vector<256x8xf32> to vector<64x8xf32>
    %3 = vector.extract_strided_slice %0 {offsets = [128, 0], sizes = [64, 8], strides = [1, 1]} : vector<256x8xf32> to vector<64x8xf32>
    %4 = vector.extract_strided_slice %0 {offsets = [192, 0], sizes = [64, 8], strides = [1, 1]} : vector<256x8xf32> to vector<64x8xf32>
    %5 = arith.maximumf %1, %2 : vector<64x8xf32>
    %6 = arith.maximumf %3, %4 : vector<64x8xf32>
    %7 = arith.maximumf %5, %6 : vector<64x8xf32>
    %c0_1 = arith.constant 0 : index
    %c0_2 = arith.constant 0 : index
    %8 = vector.load %arg2[%c0_1, %c0_2] : memref<1x8xi32, #tpu.memory_space<vmem>>, vector<1x8xi32>
    %9 = arith.cmpf oeq, %1, %7 : vector<64x8xf32>
    %10 = arith.cmpf oeq, %2, %7 : vector<64x8xf32>
    %c1_i32 = arith.constant 1 : i32
    %11 = vector.broadcast %c1_i32 : i32 to vector<1x8xi32>
    %12 = arith.addi %8, %11 : vector<1x8xi32>
    %13 = arith.cmpf oeq, %3, %7 : vector<64x8xf32>
    %c4_i32 = arith.constant 4 : i32
    %14 = vector.broadcast %c4_i32 : i32 to vector<1x8xi32>
    %15 = arith.addi %8, %14 : vector<1x8xi32>
    %c4_i32_3 = arith.constant 4 : i32
    %16 = vector.broadcast %c4_i32_3 : i32 to vector<1x8xi32>
    %17 = arith.addi %8, %16 : vector<1x8xi32>
    %c1_i32_4 = arith.constant 1 : i32
    %18 = vector.broadcast %c1_i32_4 : i32 to vector<1x8xi32>
    %19 = arith.addi %17, %18 : vector<1x8xi32>
    %20 = vector.shape_cast %15 : vector<1x8xi32> to vector<1x8xi32>
    %21 = vector.broadcast %20 : vector<1x8xi32> to vector<64x8xi32>
    %22 = vector.shape_cast %19 : vector<1x8xi32> to vector<1x8xi32>
    %23 = vector.broadcast %22 : vector<1x8xi32> to vector<64x8xi32>
    %24 = arith.select %13, %21, %23 : vector<64x8xi1>, vector<64x8xi32>
    %25 = vector.shape_cast %12 : vector<1x8xi32> to vector<1x8xi32>
    %26 = vector.broadcast %25 : vector<1x8xi32> to vector<64x8xi32>
    %27 = arith.select %10, %26, %24 : vector<64x8xi1>, vector<64x8xi32>
    %28 = vector.shape_cast %8 : vector<1x8xi32> to vector<1x8xi32>
    %29 = vector.broadcast %28 : vector<1x8xi32> to vector<64x8xi32>
    %30 = arith.select %9, %29, %27 : vector<64x8xi1>, vector<64x8xi32>
    %c0_5 = arith.constant 0 : index
    %c0_6 = arith.constant 0 : index
    %31 = vector.load %arg3[%c0_5, %c0_6] : memref<64x8xf32, #tpu.memory_space<vmem>>, vector<64x8xf32>
    tpu.vector_store %arg3[%c0_5, %c0_6], %7 {strides = array<i32>} : memref<64x8xf32, #tpu.memory_space<vmem>>, vector<64x8xf32>,
    %c0_7 = arith.constant 0 : index
    %c0_8 = arith.constant 0 : index
    %32 = vector.load %arg4[%c0_7, %c0_8] : memref<64x8xi32, #tpu.memory_space<vmem>>, vector<64x8xi32>
    tpu.vector_store %arg4[%c0_7, %c0_8], %30 {strides = array<i32>} : memref<64x8xi32, #tpu.memory_space<vmem>>, vector<64x8xi32>,
    return
  }
  func.func @transform_0(%arg0: i32) -> (i32, i32) {
    %c0_i32 = arith.constant 0 : i32
    %c0_i32_0 = arith.constant 0 : i32
    return %c0_i32, %arg0 : i32, i32
  }
  func.func @transform_1(%arg0: i32) -> (i32, i32) {
    %c0_i32 = arith.constant 0 : i32
    %c0_i32_0 = arith.constant 0 : i32
    return %c0_i32, %arg0 : i32, i32
  }
  func.func @transform_2(%arg0: i32) -> (i32, i32) {
    %c0_i32 = arith.constant 0 : i32
    %c0_i32_0 = arith.constant 0 : i32
    return %c0_i32, %arg0 : i32, i32
  }
  func.func @transform_3(%arg0: i32) -> (i32, i32) {
    %c0_i32 = arith.constant 0 : i32
    %c0_i32_0 = arith.constant 0 : i32
    return %c0_i32, %arg0 : i32, i32
  }
}

module attributes {stable_mosaic.version = 11 : i64} {
  func.func @_matmul_affine_kernel(%arg0: i32, %arg1: memref<64x576xbf16, #tpu.memory_space<vmem>>, %arg2: memref<576x8xbf16, #tpu.memory_space<vmem>>, %arg3: memref<64x1xf32, #tpu.memory_space<vmem>>, %arg4: memref<64x8xf32, #tpu.memory_space<vmem>>) attributes {dimension_semantics = [#tpu.dimension_semantics<parallel>], iteration_bounds = array<i64: 1>, scalar_prefetch = 0 : i64, scratch_operands = 0 : i64, tpu.core_type = #tpu.core_type<tc>, window_params = [{pipeline_mode = #tpu.pipeline_mode<synchronous>, transform_indices = @transform_0, window_bounds = array<i64: 64, 576>}, {transform_indices = @transform_1, window_bounds = array<i64: 576, 8>}, {pipeline_mode = #tpu.pipeline_mode<synchronous>, transform_indices = @transform_2, window_bounds = array<i64: 64, 1>}, {transform_indices = @transform_3, window_bounds = array<i64: 64, 8>}]} {
    %c0 = arith.constant 0 : index
    %c0_0 = arith.constant 0 : index
    %0 = vector.load %arg1[%c0, %c0_0] : memref<64x576xbf16, #tpu.memory_space<vmem>>, vector<64x576xbf16>
    %c0_1 = arith.constant 0 : index
    %c0_2 = arith.constant 0 : index
    %1 = vector.load %arg2[%c0_1, %c0_2] : memref<576x8xbf16, #tpu.memory_space<vmem>>, vector<576x8xbf16>
    %cst = arith.constant dense<0.000000e+00> : vector<64x8xf32>
    %2 = tpu.matmul %0, %1, %cst {dimension_numbers = #tpu.dot_dimension_numbers<[1], [0], [0], [1], [0, 0, 1, 1], [], []>} : vector<64x576xbf16>, vector<576x8xbf16>, vector<64x8xf32> -> vector<64x8xf32>
    %c0_3 = arith.constant 0 : index
    %c0_4 = arith.constant 0 : index
    %3 = vector.load %arg3[%c0_3, %c0_4] : memref<64x1xf32, #tpu.memory_space<vmem>>, vector<64x1xf32>
    %4 = vector.broadcast %3 : vector<64x1xf32> to vector<64x8xf32>
    %5 = arith.addf %2, %4 : vector<64x8xf32>
    %cst_5 = arith.constant 0.000000e+00 : f32
    %6 = vector.broadcast %cst_5 : f32 to vector<64x8xf32>
    %7 = arith.maximumf %5, %6 : vector<64x8xf32>
    %c0_6 = arith.constant 0 : index
    %c0_7 = arith.constant 0 : index
    %8 = vector.load %arg4[%c0_6, %c0_7] : memref<64x8xf32, #tpu.memory_space<vmem>>, vector<64x8xf32>
    tpu.vector_store %arg4[%c0_6, %c0_7], %7 {strides = array<i32>} : memref<64x8xf32, #tpu.memory_space<vmem>>, vector<64x8xf32>,
    return
  }
  func.func @transform_0(%arg0: i32) -> (i32, i32) {
    %c0_i32 = arith.constant 0 : i32
    %c0_i32_0 = arith.constant 0 : i32
    %c0_i32_1 = arith.constant 0 : i32
    return %c0_i32, %c0_i32_0 : i32, i32
  }
  func.func @transform_1(%arg0: i32) -> (i32, i32) {
    %c0_i32 = arith.constant 0 : i32
    %c0_i32_0 = arith.constant 0 : i32
    return %c0_i32, %arg0 : i32, i32
  }
  func.func @transform_2(%arg0: i32) -> (i32, i32) {
    %c0_i32 = arith.constant 0 : i32
    %c0_i32_0 = arith.constant 0 : i32
    %c0_i32_1 = arith.constant 0 : i32
    return %c0_i32, %c0_i32_0 : i32, i32
  }
  func.func @transform_3(%arg0: i32) -> (i32, i32) {
    %c0_i32 = arith.constant 0 : i32
    %c0_i32_0 = arith.constant 0 : i32
    return %c0_i32, %arg0 : i32, i32
  }
}

module attributes {stable_mosaic.version = 11 : i64} {
  func.func @_unpool_kernel(%arg0: i32, %arg1: memref<64x2xf32, #tpu.memory_space<vmem>>, %arg2: memref<64x2xi32, #tpu.memory_space<vmem>>, %arg3: memref<1x2xi32, #tpu.memory_space<vmem>>, %arg4: memref<256x2xf32, #tpu.memory_space<vmem>>) attributes {dimension_semantics = [#tpu.dimension_semantics<parallel>], iteration_bounds = array<i64: 1>, scalar_prefetch = 0 : i64, scratch_operands = 0 : i64, tpu.core_type = #tpu.core_type<tc>, window_params = [{transform_indices = @transform_0, window_bounds = array<i64: 64, 2>}, {transform_indices = @transform_1, window_bounds = array<i64: 64, 2>}, {transform_indices = @transform_2, window_bounds = array<i64: 1, 2>}, {transform_indices = @transform_3, window_bounds = array<i64: 256, 2>}]} {
    %c0 = arith.constant 0 : index
    %c0_0 = arith.constant 0 : index
    %0 = vector.load %arg1[%c0, %c0_0] : memref<64x2xf32, #tpu.memory_space<vmem>>, vector<64x2xf32>
    %c0_1 = arith.constant 0 : index
    %c0_2 = arith.constant 0 : index
    %1 = vector.load %arg2[%c0_1, %c0_2] : memref<64x2xi32, #tpu.memory_space<vmem>>, vector<64x2xi32>
    %c0_3 = arith.constant 0 : index
    %c0_4 = arith.constant 0 : index
    %2 = vector.load %arg3[%c0_3, %c0_4] : memref<1x2xi32, #tpu.memory_space<vmem>>, vector<1x2xi32>
    %c0_i32 = arith.constant 0 : i32
    %3 = vector.broadcast %c0_i32 : i32 to vector<1x2xi32>
    %4 = arith.addi %2, %3 : vector<1x2xi32>
    %5 = vector.broadcast %4 : vector<1x2xi32> to vector<64x2xi32>
    %6 = arith.cmpi eq, %1, %5 : vector<64x2xi32>
    %cst = arith.constant 0.000000e+00 : f32
    %7 = vector.broadcast %cst : f32 to vector<64x2xf32>
    %8 = arith.select %6, %0, %7 : vector<64x2xi1>, vector<64x2xf32>
    %c1_i32 = arith.constant 1 : i32
    %9 = vector.broadcast %c1_i32 : i32 to vector<1x2xi32>
    %10 = arith.addi %2, %9 : vector<1x2xi32>
    %11 = vector.broadcast %10 : vector<1x2xi32> to vector<64x2xi32>
    %12 = arith.cmpi eq, %1, %11 : vector<64x2xi32>
    %cst_5 = arith.constant 0.000000e+00 : f32
    %13 = vector.broadcast %cst_5 : f32 to vector<64x2xf32>
    %14 = arith.select %12, %0, %13 : vector<64x2xi1>, vector<64x2xf32>
    %c2_i32 = arith.constant 2 : i32
    %15 = vector.broadcast %c2_i32 : i32 to vector<1x2xi32>
    %16 = arith.addi %2, %15 : vector<1x2xi32>
    %17 = vector.broadcast %16 : vector<1x2xi32> to vector<64x2xi32>
    %18 = arith.cmpi eq, %1, %17 : vector<64x2xi32>
    %cst_6 = arith.constant 0.000000e+00 : f32
    %19 = vector.broadcast %cst_6 : f32 to vector<64x2xf32>
    %20 = arith.select %18, %0, %19 : vector<64x2xi1>, vector<64x2xf32>
    %c3_i32 = arith.constant 3 : i32
    %21 = vector.broadcast %c3_i32 : i32 to vector<1x2xi32>
    %22 = arith.addi %2, %21 : vector<1x2xi32>
    %23 = vector.broadcast %22 : vector<1x2xi32> to vector<64x2xi32>
    %24 = arith.cmpi eq, %1, %23 : vector<64x2xi32>
    %cst_7 = arith.constant 0.000000e+00 : f32
    %25 = vector.broadcast %cst_7 : f32 to vector<64x2xf32>
    %26 = arith.select %24, %0, %25 : vector<64x2xi1>, vector<64x2xf32>
    %27 = tpu.concatenate %8, %14, %20, %26 in 0 : vector<64x2xf32>, vector<64x2xf32>, vector<64x2xf32>, vector<64x2xf32> -> vector<256x2xf32>
    %c0_8 = arith.constant 0 : index
    %c0_9 = arith.constant 0 : index
    %28 = vector.load %arg4[%c0_8, %c0_9] : memref<256x2xf32, #tpu.memory_space<vmem>>, vector<256x2xf32>
    tpu.vector_store %arg4[%c0_8, %c0_9], %27 {strides = array<i32>} : memref<256x2xf32, #tpu.memory_space<vmem>>, vector<256x2xf32>,
    return
  }
  func.func @transform_0(%arg0: i32) -> (i32, i32) {
    %c0_i32 = arith.constant 0 : i32
    %c0_i32_0 = arith.constant 0 : i32
    return %c0_i32, %arg0 : i32, i32
  }
  func.func @transform_1(%arg0: i32) -> (i32, i32) {
    %c0_i32 = arith.constant 0 : i32
    %c0_i32_0 = arith.constant 0 : i32
    return %c0_i32, %arg0 : i32, i32
  }
  func.func @transform_2(%arg0: i32) -> (i32, i32) {
    %c0_i32 = arith.constant 0 : i32
    %c0_i32_0 = arith.constant 0 : i32
    return %c0_i32, %arg0 : i32, i32
  }
  func.func @transform_3(%arg0: i32) -> (i32, i32) {
    %c0_i32 = arith.constant 0 : i32
    %c0_i32_0 = arith.constant 0 : i32
    return %c0_i32, %arg0 : i32, i32
  }
}

module attributes {stable_mosaic.version = 11 : i64} {
  func.func @_maxpool_kernel(%arg0: i32, %arg1: memref<256x2xf32, #tpu.memory_space<vmem>>, %arg2: memref<1x2xi32, #tpu.memory_space<vmem>>, %arg3: memref<64x2xf32, #tpu.memory_space<vmem>>, %arg4: memref<64x2xi32, #tpu.memory_space<vmem>>) attributes {dimension_semantics = [#tpu.dimension_semantics<parallel>], iteration_bounds = array<i64: 1>, scalar_prefetch = 0 : i64, scratch_operands = 0 : i64, tpu.core_type = #tpu.core_type<tc>, window_params = [{transform_indices = @transform_0, window_bounds = array<i64: 256, 2>}, {transform_indices = @transform_1, window_bounds = array<i64: 1, 2>}, {transform_indices = @transform_2, window_bounds = array<i64: 64, 2>}, {transform_indices = @transform_3, window_bounds = array<i64: 64, 2>}]} {
    %c0 = arith.constant 0 : index
    %c0_0 = arith.constant 0 : index
    %0 = vector.load %arg1[%c0, %c0_0] : memref<256x2xf32, #tpu.memory_space<vmem>>, vector<256x2xf32>
    %1 = vector.extract_strided_slice %0 {offsets = [0, 0], sizes = [64, 2], strides = [1, 1]} : vector<256x2xf32> to vector<64x2xf32>
    %2 = vector.extract_strided_slice %0 {offsets = [64, 0], sizes = [64, 2], strides = [1, 1]} : vector<256x2xf32> to vector<64x2xf32>
    %3 = vector.extract_strided_slice %0 {offsets = [128, 0], sizes = [64, 2], strides = [1, 1]} : vector<256x2xf32> to vector<64x2xf32>
    %4 = vector.extract_strided_slice %0 {offsets = [192, 0], sizes = [64, 2], strides = [1, 1]} : vector<256x2xf32> to vector<64x2xf32>
    %5 = arith.maximumf %1, %2 : vector<64x2xf32>
    %6 = arith.maximumf %3, %4 : vector<64x2xf32>
    %7 = arith.maximumf %5, %6 : vector<64x2xf32>
    %c0_1 = arith.constant 0 : index
    %c0_2 = arith.constant 0 : index
    %8 = vector.load %arg2[%c0_1, %c0_2] : memref<1x2xi32, #tpu.memory_space<vmem>>, vector<1x2xi32>
    %9 = arith.cmpf oeq, %1, %7 : vector<64x2xf32>
    %10 = arith.cmpf oeq, %2, %7 : vector<64x2xf32>
    %c1_i32 = arith.constant 1 : i32
    %11 = vector.broadcast %c1_i32 : i32 to vector<1x2xi32>
    %12 = arith.addi %8, %11 : vector<1x2xi32>
    %13 = arith.cmpf oeq, %3, %7 : vector<64x2xf32>
    %c2_i32 = arith.constant 2 : i32
    %14 = vector.broadcast %c2_i32 : i32 to vector<1x2xi32>
    %15 = arith.addi %8, %14 : vector<1x2xi32>
    %c2_i32_3 = arith.constant 2 : i32
    %16 = vector.broadcast %c2_i32_3 : i32 to vector<1x2xi32>
    %17 = arith.addi %8, %16 : vector<1x2xi32>
    %c1_i32_4 = arith.constant 1 : i32
    %18 = vector.broadcast %c1_i32_4 : i32 to vector<1x2xi32>
    %19 = arith.addi %17, %18 : vector<1x2xi32>
    %20 = vector.shape_cast %15 : vector<1x2xi32> to vector<1x2xi32>
    %21 = vector.broadcast %20 : vector<1x2xi32> to vector<64x2xi32>
    %22 = vector.shape_cast %19 : vector<1x2xi32> to vector<1x2xi32>
    %23 = vector.broadcast %22 : vector<1x2xi32> to vector<64x2xi32>
    %24 = arith.select %13, %21, %23 : vector<64x2xi1>, vector<64x2xi32>
    %25 = vector.shape_cast %12 : vector<1x2xi32> to vector<1x2xi32>
    %26 = vector.broadcast %25 : vector<1x2xi32> to vector<64x2xi32>
    %27 = arith.select %10, %26, %24 : vector<64x2xi1>, vector<64x2xi32>
    %28 = vector.shape_cast %8 : vector<1x2xi32> to vector<1x2xi32>
    %29 = vector.broadcast %28 : vector<1x2xi32> to vector<64x2xi32>
    %30 = arith.select %9, %29, %27 : vector<64x2xi1>, vector<64x2xi32>
    %c0_5 = arith.constant 0 : index
    %c0_6 = arith.constant 0 : index
    %31 = vector.load %arg3[%c0_5, %c0_6] : memref<64x2xf32, #tpu.memory_space<vmem>>, vector<64x2xf32>
    tpu.vector_store %arg3[%c0_5, %c0_6], %7 {strides = array<i32>} : memref<64x2xf32, #tpu.memory_space<vmem>>, vector<64x2xf32>,
    %c0_7 = arith.constant 0 : index
    %c0_8 = arith.constant 0 : index
    %32 = vector.load %arg4[%c0_7, %c0_8] : memref<64x2xi32, #tpu.memory_space<vmem>>, vector<64x2xi32>
    tpu.vector_store %arg4[%c0_7, %c0_8], %30 {strides = array<i32>} : memref<64x2xi32, #tpu.memory_space<vmem>>, vector<64x2xi32>,
    return
  }
  func.func @transform_0(%arg0: i32) -> (i32, i32) {
    %c0_i32 = arith.constant 0 : i32
    %c0_i32_0 = arith.constant 0 : i32
    return %c0_i32, %arg0 : i32, i32
  }
  func.func @transform_1(%arg0: i32) -> (i32, i32) {
    %c0_i32 = arith.constant 0 : i32
    %c0_i32_0 = arith.constant 0 : i32
    return %c0_i32, %arg0 : i32, i32
  }
  func.func @transform_2(%arg0: i32) -> (i32, i32) {
    %c0_i32 = arith.constant 0 : i32
    %c0_i32_0 = arith.constant 0 : i32
    return %c0_i32, %arg0 : i32, i32
  }
  func.func @transform_3(%arg0: i32) -> (i32, i32) {
    %c0_i32 = arith.constant 0 : i32
    %c0_i32_0 = arith.constant 0 : i32
    return %c0_i32, %arg0 : i32, i32
  }
}

module attributes {stable_mosaic.version = 11 : i64} {
  func.func @_unpool_kernel(%arg0: i32, %arg1: memref<64x8xf32, #tpu.memory_space<vmem>>, %arg2: memref<64x8xi32, #tpu.memory_space<vmem>>, %arg3: memref<1x8xi32, #tpu.memory_space<vmem>>, %arg4: memref<256x8xf32, #tpu.memory_space<vmem>>) attributes {dimension_semantics = [#tpu.dimension_semantics<parallel>], iteration_bounds = array<i64: 1>, scalar_prefetch = 0 : i64, scratch_operands = 0 : i64, tpu.core_type = #tpu.core_type<tc>, window_params = [{transform_indices = @transform_0, window_bounds = array<i64: 64, 8>}, {transform_indices = @transform_1, window_bounds = array<i64: 64, 8>}, {transform_indices = @transform_2, window_bounds = array<i64: 1, 8>}, {transform_indices = @transform_3, window_bounds = array<i64: 256, 8>}]} {
    %c0 = arith.constant 0 : index
    %c0_0 = arith.constant 0 : index
    %0 = vector.load %arg1[%c0, %c0_0] : memref<64x8xf32, #tpu.memory_space<vmem>>, vector<64x8xf32>
    %c0_1 = arith.constant 0 : index
    %c0_2 = arith.constant 0 : index
    %1 = vector.load %arg2[%c0_1, %c0_2] : memref<64x8xi32, #tpu.memory_space<vmem>>, vector<64x8xi32>
    %c0_3 = arith.constant 0 : index
    %c0_4 = arith.constant 0 : index
    %2 = vector.load %arg3[%c0_3, %c0_4] : memref<1x8xi32, #tpu.memory_space<vmem>>, vector<1x8xi32>
    %c0_i32 = arith.constant 0 : i32
    %3 = vector.broadcast %c0_i32 : i32 to vector<1x8xi32>
    %4 = arith.addi %2, %3 : vector<1x8xi32>
    %5 = vector.broadcast %4 : vector<1x8xi32> to vector<64x8xi32>
    %6 = arith.cmpi eq, %1, %5 : vector<64x8xi32>
    %cst = arith.constant 0.000000e+00 : f32
    %7 = vector.broadcast %cst : f32 to vector<64x8xf32>
    %8 = arith.select %6, %0, %7 : vector<64x8xi1>, vector<64x8xf32>
    %c1_i32 = arith.constant 1 : i32
    %9 = vector.broadcast %c1_i32 : i32 to vector<1x8xi32>
    %10 = arith.addi %2, %9 : vector<1x8xi32>
    %11 = vector.broadcast %10 : vector<1x8xi32> to vector<64x8xi32>
    %12 = arith.cmpi eq, %1, %11 : vector<64x8xi32>
    %cst_5 = arith.constant 0.000000e+00 : f32
    %13 = vector.broadcast %cst_5 : f32 to vector<64x8xf32>
    %14 = arith.select %12, %0, %13 : vector<64x8xi1>, vector<64x8xf32>
    %c4_i32 = arith.constant 4 : i32
    %15 = vector.broadcast %c4_i32 : i32 to vector<1x8xi32>
    %16 = arith.addi %2, %15 : vector<1x8xi32>
    %17 = vector.broadcast %16 : vector<1x8xi32> to vector<64x8xi32>
    %18 = arith.cmpi eq, %1, %17 : vector<64x8xi32>
    %cst_6 = arith.constant 0.000000e+00 : f32
    %19 = vector.broadcast %cst_6 : f32 to vector<64x8xf32>
    %20 = arith.select %18, %0, %19 : vector<64x8xi1>, vector<64x8xf32>
    %c5_i32 = arith.constant 5 : i32
    %21 = vector.broadcast %c5_i32 : i32 to vector<1x8xi32>
    %22 = arith.addi %2, %21 : vector<1x8xi32>
    %23 = vector.broadcast %22 : vector<1x8xi32> to vector<64x8xi32>
    %24 = arith.cmpi eq, %1, %23 : vector<64x8xi32>
    %cst_7 = arith.constant 0.000000e+00 : f32
    %25 = vector.broadcast %cst_7 : f32 to vector<64x8xf32>
    %26 = arith.select %24, %0, %25 : vector<64x8xi1>, vector<64x8xf32>
    %27 = tpu.concatenate %8, %14, %20, %26 in 0 : vector<64x8xf32>, vector<64x8xf32>, vector<64x8xf32>, vector<64x8xf32> -> vector<256x8xf32>
    %c0_8 = arith.constant 0 : index
    %c0_9 = arith.constant 0 : index
    %28 = vector.load %arg4[%c0_8, %c0_9] : memref<256x8xf32, #tpu.memory_space<vmem>>, vector<256x8xf32>
    tpu.vector_store %arg4[%c0_8, %c0_9], %27 {strides = array<i32>} : memref<256x8xf32, #tpu.memory_space<vmem>>, vector<256x8xf32>,
    return
  }
  func.func @transform_0(%arg0: i32) -> (i32, i32) {
    %c0_i32 = arith.constant 0 : i32
    %c0_i32_0 = arith.constant 0 : i32
    return %c0_i32, %arg0 : i32, i32
  }
  func.func @transform_1(%arg0: i32) -> (i32, i32) {
    %c0_i32 = arith.constant 0 : i32
    %c0_i32_0 = arith.constant 0 : i32
    return %c0_i32, %arg0 : i32, i32
  }
  func.func @transform_2(%arg0: i32) -> (i32, i32) {
    %c0_i32 = arith.constant 0 : i32
    %c0_i32_0 = arith.constant 0 : i32
    return %c0_i32, %arg0 : i32, i32
  }
  func.func @transform_3(%arg0: i32) -> (i32, i32) {
    %c0_i32 = arith.constant 0 : i32
    %c0_i32_0 = arith.constant 0 : i32
    return %c0_i32, %arg0 : i32, i32
  }
}

module attributes {stable_mosaic.version = 11 : i64} {
  func.func @_matmul_affine_kernel(%arg0: i32, %arg1: memref<32x576xbf16, #tpu.memory_space<vmem>>, %arg2: memref<576x32xbf16, #tpu.memory_space<vmem>>, %arg3: memref<32x1xf32, #tpu.memory_space<vmem>>, %arg4: memref<32x32xf32, #tpu.memory_space<vmem>>) attributes {dimension_semantics = [#tpu.dimension_semantics<parallel>], iteration_bounds = array<i64: 1>, scalar_prefetch = 0 : i64, scratch_operands = 0 : i64, tpu.core_type = #tpu.core_type<tc>, window_params = [{pipeline_mode = #tpu.pipeline_mode<synchronous>, transform_indices = @transform_0, window_bounds = array<i64: 32, 576>}, {transform_indices = @transform_1, window_bounds = array<i64: 576, 32>}, {pipeline_mode = #tpu.pipeline_mode<synchronous>, transform_indices = @transform_2, window_bounds = array<i64: 32, 1>}, {transform_indices = @transform_3, window_bounds = array<i64: 32, 32>}]} {
    %c0 = arith.constant 0 : index
    %c0_0 = arith.constant 0 : index
    %0 = vector.load %arg1[%c0, %c0_0] : memref<32x576xbf16, #tpu.memory_space<vmem>>, vector<32x576xbf16>
    %c0_1 = arith.constant 0 : index
    %c0_2 = arith.constant 0 : index
    %1 = vector.load %arg2[%c0_1, %c0_2] : memref<576x32xbf16, #tpu.memory_space<vmem>>, vector<576x32xbf16>
    %cst = arith.constant dense<0.000000e+00> : vector<32x32xf32>
    %2 = tpu.matmul %0, %1, %cst {dimension_numbers = #tpu.dot_dimension_numbers<[1], [0], [0], [1], [0, 0, 1, 1], [], []>} : vector<32x576xbf16>, vector<576x32xbf16>, vector<32x32xf32> -> vector<32x32xf32>
    %c0_3 = arith.constant 0 : index
    %c0_4 = arith.constant 0 : index
    %3 = vector.load %arg3[%c0_3, %c0_4] : memref<32x1xf32, #tpu.memory_space<vmem>>, vector<32x1xf32>
    %4 = vector.broadcast %3 : vector<32x1xf32> to vector<32x32xf32>
    %5 = arith.addf %2, %4 : vector<32x32xf32>
    %cst_5 = arith.constant 0.000000e+00 : f32
    %6 = vector.broadcast %cst_5 : f32 to vector<32x32xf32>
    %7 = arith.maximumf %5, %6 : vector<32x32xf32>
    %c0_6 = arith.constant 0 : index
    %c0_7 = arith.constant 0 : index
    %8 = vector.load %arg4[%c0_6, %c0_7] : memref<32x32xf32, #tpu.memory_space<vmem>>, vector<32x32xf32>
    tpu.vector_store %arg4[%c0_6, %c0_7], %7 {strides = array<i32>} : memref<32x32xf32, #tpu.memory_space<vmem>>, vector<32x32xf32>,
    return
  }
  func.func @transform_0(%arg0: i32) -> (i32, i32) {
    %c0_i32 = arith.constant 0 : i32
    %c0_i32_0 = arith.constant 0 : i32
    %c0_i32_1 = arith.constant 0 : i32
    return %c0_i32, %c0_i32_0 : i32, i32
  }
  func.func @transform_1(%arg0: i32) -> (i32, i32) {
    %c0_i32 = arith.constant 0 : i32
    %c0_i32_0 = arith.constant 0 : i32
    return %c0_i32, %arg0 : i32, i32
  }
  func.func @transform_2(%arg0: i32) -> (i32, i32) {
    %c0_i32 = arith.constant 0 : i32
    %c0_i32_0 = arith.constant 0 : i32
    %c0_i32_1 = arith.constant 0 : i32
    return %c0_i32, %c0_i32_0 : i32, i32
  }
  func.func @transform_3(%arg0: i32) -> (i32, i32) {
    %c0_i32 = arith.constant 0 : i32
    %c0_i32_0 = arith.constant 0 : i32
    return %c0_i32, %arg0 : i32, i32
  }
}

module attributes {stable_mosaic.version = 11 : i64} {
  func.func @_unpool_kernel(%arg0: i32, %arg1: memref<32x32xf32, #tpu.memory_space<vmem>>, %arg2: memref<32x32xi32, #tpu.memory_space<vmem>>, %arg3: memref<1x32xi32, #tpu.memory_space<vmem>>, %arg4: memref<128x32xf32, #tpu.memory_space<vmem>>) attributes {dimension_semantics = [#tpu.dimension_semantics<parallel>], iteration_bounds = array<i64: 1>, scalar_prefetch = 0 : i64, scratch_operands = 0 : i64, tpu.core_type = #tpu.core_type<tc>, window_params = [{transform_indices = @transform_0, window_bounds = array<i64: 32, 32>}, {transform_indices = @transform_1, window_bounds = array<i64: 32, 32>}, {transform_indices = @transform_2, window_bounds = array<i64: 1, 32>}, {transform_indices = @transform_3, window_bounds = array<i64: 128, 32>}]} {
    %c0 = arith.constant 0 : index
    %c0_0 = arith.constant 0 : index
    %0 = vector.load %arg1[%c0, %c0_0] : memref<32x32xf32, #tpu.memory_space<vmem>>, vector<32x32xf32>
    %c0_1 = arith.constant 0 : index
    %c0_2 = arith.constant 0 : index
    %1 = vector.load %arg2[%c0_1, %c0_2] : memref<32x32xi32, #tpu.memory_space<vmem>>, vector<32x32xi32>
    %c0_3 = arith.constant 0 : index
    %c0_4 = arith.constant 0 : index
    %2 = vector.load %arg3[%c0_3, %c0_4] : memref<1x32xi32, #tpu.memory_space<vmem>>, vector<1x32xi32>
    %c0_i32 = arith.constant 0 : i32
    %3 = vector.broadcast %c0_i32 : i32 to vector<1x32xi32>
    %4 = arith.addi %2, %3 : vector<1x32xi32>
    %5 = vector.broadcast %4 : vector<1x32xi32> to vector<32x32xi32>
    %6 = arith.cmpi eq, %1, %5 : vector<32x32xi32>
    %cst = arith.constant 0.000000e+00 : f32
    %7 = vector.broadcast %cst : f32 to vector<32x32xf32>
    %8 = arith.select %6, %0, %7 : vector<32x32xi1>, vector<32x32xf32>
    %c1_i32 = arith.constant 1 : i32
    %9 = vector.broadcast %c1_i32 : i32 to vector<1x32xi32>
    %10 = arith.addi %2, %9 : vector<1x32xi32>
    %11 = vector.broadcast %10 : vector<1x32xi32> to vector<32x32xi32>
    %12 = arith.cmpi eq, %1, %11 : vector<32x32xi32>
    %cst_5 = arith.constant 0.000000e+00 : f32
    %13 = vector.broadcast %cst_5 : f32 to vector<32x32xf32>
    %14 = arith.select %12, %0, %13 : vector<32x32xi1>, vector<32x32xf32>
    %c8_i32 = arith.constant 8 : i32
    %15 = vector.broadcast %c8_i32 : i32 to vector<1x32xi32>
    %16 = arith.addi %2, %15 : vector<1x32xi32>
    %17 = vector.broadcast %16 : vector<1x32xi32> to vector<32x32xi32>
    %18 = arith.cmpi eq, %1, %17 : vector<32x32xi32>
    %cst_6 = arith.constant 0.000000e+00 : f32
    %19 = vector.broadcast %cst_6 : f32 to vector<32x32xf32>
    %20 = arith.select %18, %0, %19 : vector<32x32xi1>, vector<32x32xf32>
    %c9_i32 = arith.constant 9 : i32
    %21 = vector.broadcast %c9_i32 : i32 to vector<1x32xi32>
    %22 = arith.addi %2, %21 : vector<1x32xi32>
    %23 = vector.broadcast %22 : vector<1x32xi32> to vector<32x32xi32>
    %24 = arith.cmpi eq, %1, %23 : vector<32x32xi32>
    %cst_7 = arith.constant 0.000000e+00 : f32
    %25 = vector.broadcast %cst_7 : f32 to vector<32x32xf32>
    %26 = arith.select %24, %0, %25 : vector<32x32xi1>, vector<32x32xf32>
    %27 = tpu.concatenate %8, %14, %20, %26 in 0 : vector<32x32xf32>, vector<32x32xf32>, vector<32x32xf32>, vector<32x32xf32> -> vector<128x32xf32>
    %c0_8 = arith.constant 0 : index
    %c0_9 = arith.constant 0 : index
    %28 = vector.load %arg4[%c0_8, %c0_9] : memref<128x32xf32, #tpu.memory_space<vmem>>, vector<128x32xf32>
    tpu.vector_store %arg4[%c0_8, %c0_9], %27 {strides = array<i32>} : memref<128x32xf32, #tpu.memory_space<vmem>>, vector<128x32xf32>,
    return
  }
  func.func @transform_0(%arg0: i32) -> (i32, i32) {
    %c0_i32 = arith.constant 0 : i32
    %c0_i32_0 = arith.constant 0 : i32
    return %c0_i32, %arg0 : i32, i32
  }
  func.func @transform_1(%arg0: i32) -> (i32, i32) {
    %c0_i32 = arith.constant 0 : i32
    %c0_i32_0 = arith.constant 0 : i32
    return %c0_i32, %arg0 : i32, i32
  }
  func.func @transform_2(%arg0: i32) -> (i32, i32) {
    %c0_i32 = arith.constant 0 : i32
    %c0_i32_0 = arith.constant 0 : i32
    return %c0_i32, %arg0 : i32, i32
  }
  func.func @transform_3(%arg0: i32) -> (i32, i32) {
    %c0_i32 = arith.constant 0 : i32
    %c0_i32_0 = arith.constant 0 : i32
    return %c0_i32, %arg0 : i32, i32
  }
}

module attributes {stable_mosaic.version = 11 : i64} {
  func.func @_unpool_kernel(%arg0: i32, %arg1: memref<16x128xf32, #tpu.memory_space<vmem>>, %arg2: memref<16x128xi32, #tpu.memory_space<vmem>>, %arg3: memref<1x128xi32, #tpu.memory_space<vmem>>, %arg4: memref<64x128xf32, #tpu.memory_space<vmem>>) attributes {dimension_semantics = [#tpu.dimension_semantics<parallel>], iteration_bounds = array<i64: 1>, scalar_prefetch = 0 : i64, scratch_operands = 0 : i64, tpu.core_type = #tpu.core_type<tc>, window_params = [{transform_indices = @transform_0, window_bounds = array<i64: 16, 128>}, {transform_indices = @transform_1, window_bounds = array<i64: 16, 128>}, {transform_indices = @transform_2, window_bounds = array<i64: 1, 128>}, {transform_indices = @transform_3, window_bounds = array<i64: 64, 128>}]} {
    %c0 = arith.constant 0 : index
    %c0_0 = arith.constant 0 : index
    %0 = vector.load %arg1[%c0, %c0_0] : memref<16x128xf32, #tpu.memory_space<vmem>>, vector<16x128xf32>
    %c0_1 = arith.constant 0 : index
    %c0_2 = arith.constant 0 : index
    %1 = vector.load %arg2[%c0_1, %c0_2] : memref<16x128xi32, #tpu.memory_space<vmem>>, vector<16x128xi32>
    %c0_3 = arith.constant 0 : index
    %c0_4 = arith.constant 0 : index
    %2 = vector.load %arg3[%c0_3, %c0_4] : memref<1x128xi32, #tpu.memory_space<vmem>>, vector<1x128xi32>
    %c0_i32 = arith.constant 0 : i32
    %3 = vector.broadcast %c0_i32 : i32 to vector<1x128xi32>
    %4 = arith.addi %2, %3 : vector<1x128xi32>
    %5 = vector.broadcast %4 : vector<1x128xi32> to vector<16x128xi32>
    %6 = arith.cmpi eq, %1, %5 : vector<16x128xi32>
    %cst = arith.constant 0.000000e+00 : f32
    %7 = vector.broadcast %cst : f32 to vector<16x128xf32>
    %8 = arith.select %6, %0, %7 : vector<16x128xi1>, vector<16x128xf32>
    %c1_i32 = arith.constant 1 : i32
    %9 = vector.broadcast %c1_i32 : i32 to vector<1x128xi32>
    %10 = arith.addi %2, %9 : vector<1x128xi32>
    %11 = vector.broadcast %10 : vector<1x128xi32> to vector<16x128xi32>
    %12 = arith.cmpi eq, %1, %11 : vector<16x128xi32>
    %cst_5 = arith.constant 0.000000e+00 : f32
    %13 = vector.broadcast %cst_5 : f32 to vector<16x128xf32>
    %14 = arith.select %12, %0, %13 : vector<16x128xi1>, vector<16x128xf32>
    %c16_i32 = arith.constant 16 : i32
    %15 = vector.broadcast %c16_i32 : i32 to vector<1x128xi32>
    %16 = arith.addi %2, %15 : vector<1x128xi32>
    %17 = vector.broadcast %16 : vector<1x128xi32> to vector<16x128xi32>
    %18 = arith.cmpi eq, %1, %17 : vector<16x128xi32>
    %cst_6 = arith.constant 0.000000e+00 : f32
    %19 = vector.broadcast %cst_6 : f32 to vector<16x128xf32>
    %20 = arith.select %18, %0, %19 : vector<16x128xi1>, vector<16x128xf32>
    %c17_i32 = arith.constant 17 : i32
    %21 = vector.broadcast %c17_i32 : i32 to vector<1x128xi32>
    %22 = arith.addi %2, %21 : vector<1x128xi32>
    %23 = vector.broadcast %22 : vector<1x128xi32> to vector<16x128xi32>
    %24 = arith.cmpi eq, %1, %23 : vector<16x128xi32>
    %cst_7 = arith.constant 0.000000e+00 : f32
    %25 = vector.broadcast %cst_7 : f32 to vector<16x128xf32>
    %26 = arith.select %24, %0, %25 : vector<16x128xi1>, vector<16x128xf32>
    %27 = tpu.concatenate %8, %14, %20, %26 in 0 : vector<16x128xf32>, vector<16x128xf32>, vector<16x128xf32>, vector<16x128xf32> -> vector<64x128xf32>
    %c0_8 = arith.constant 0 : index
    %c0_9 = arith.constant 0 : index
    %28 = vector.load %arg4[%c0_8, %c0_9] : memref<64x128xf32, #tpu.memory_space<vmem>>, vector<64x128xf32>
    tpu.vector_store %arg4[%c0_8, %c0_9], %27 {strides = array<i32>} : memref<64x128xf32, #tpu.memory_space<vmem>>, vector<64x128xf32>,
    return
  }
  func.func @transform_0(%arg0: i32) -> (i32, i32) {
    %c0_i32 = arith.constant 0 : i32
    %c0_i32_0 = arith.constant 0 : i32
    return %c0_i32, %arg0 : i32, i32
  }
  func.func @transform_1(%arg0: i32) -> (i32, i32) {
    %c0_i32 = arith.constant 0 : i32
    %c0_i32_0 = arith.constant 0 : i32
    return %c0_i32, %arg0 : i32, i32
  }
  func.func @transform_2(%arg0: i32) -> (i32, i32) {
    %c0_i32 = arith.constant 0 : i32
    %c0_i32_0 = arith.constant 0 : i32
    return %c0_i32, %arg0 : i32, i32
  }
  func.func @transform_3(%arg0: i32) -> (i32, i32) {
    %c0_i32 = arith.constant 0 : i32
    %c0_i32_0 = arith.constant 0 : i32
    return %c0_i32, %arg0 : i32, i32
  }
}

module attributes {stable_mosaic.version = 11 : i64} {
  func.func @_matmul_affine_kernel(%arg0: i32, %arg1: memref<16x288xbf16, #tpu.memory_space<vmem>>, %arg2: memref<288x128xbf16, #tpu.memory_space<vmem>>, %arg3: memref<16x1xf32, #tpu.memory_space<vmem>>, %arg4: memref<16x128xf32, #tpu.memory_space<vmem>>) attributes {dimension_semantics = [#tpu.dimension_semantics<parallel>], iteration_bounds = array<i64: 1>, scalar_prefetch = 0 : i64, scratch_operands = 0 : i64, tpu.core_type = #tpu.core_type<tc>, window_params = [{pipeline_mode = #tpu.pipeline_mode<synchronous>, transform_indices = @transform_0, window_bounds = array<i64: 16, 288>}, {transform_indices = @transform_1, window_bounds = array<i64: 288, 128>}, {pipeline_mode = #tpu.pipeline_mode<synchronous>, transform_indices = @transform_2, window_bounds = array<i64: 16, 1>}, {transform_indices = @transform_3, window_bounds = array<i64: 16, 128>}]} {
    %c0 = arith.constant 0 : index
    %c0_0 = arith.constant 0 : index
    %0 = vector.load %arg1[%c0, %c0_0] : memref<16x288xbf16, #tpu.memory_space<vmem>>, vector<16x288xbf16>
    %c0_1 = arith.constant 0 : index
    %c0_2 = arith.constant 0 : index
    %1 = vector.load %arg2[%c0_1, %c0_2] : memref<288x128xbf16, #tpu.memory_space<vmem>>, vector<288x128xbf16>
    %cst = arith.constant dense<0.000000e+00> : vector<16x128xf32>
    %2 = tpu.matmul %0, %1, %cst {dimension_numbers = #tpu.dot_dimension_numbers<[1], [0], [0], [1], [0, 0, 1, 1], [], []>} : vector<16x288xbf16>, vector<288x128xbf16>, vector<16x128xf32> -> vector<16x128xf32>
    %c0_3 = arith.constant 0 : index
    %c0_4 = arith.constant 0 : index
    %3 = vector.load %arg3[%c0_3, %c0_4] : memref<16x1xf32, #tpu.memory_space<vmem>>, vector<16x1xf32>
    %4 = vector.broadcast %3 : vector<16x1xf32> to vector<16x128xf32>
    %5 = arith.addf %2, %4 : vector<16x128xf32>
    %cst_5 = arith.constant 0.000000e+00 : f32
    %6 = vector.broadcast %cst_5 : f32 to vector<16x128xf32>
    %7 = arith.maximumf %5, %6 : vector<16x128xf32>
    %c0_6 = arith.constant 0 : index
    %c0_7 = arith.constant 0 : index
    %8 = vector.load %arg4[%c0_6, %c0_7] : memref<16x128xf32, #tpu.memory_space<vmem>>, vector<16x128xf32>
    tpu.vector_store %arg4[%c0_6, %c0_7], %7 {strides = array<i32>} : memref<16x128xf32, #tpu.memory_space<vmem>>, vector<16x128xf32>,
    return
  }
  func.func @transform_0(%arg0: i32) -> (i32, i32) {
    %c0_i32 = arith.constant 0 : i32
    %c0_i32_0 = arith.constant 0 : i32
    %c0_i32_1 = arith.constant 0 : i32
    return %c0_i32, %c0_i32_0 : i32, i32
  }
  func.func @transform_1(%arg0: i32) -> (i32, i32) {
    %c0_i32 = arith.constant 0 : i32
    %c0_i32_0 = arith.constant 0 : i32
    return %c0_i32, %arg0 : i32, i32
  }
  func.func @transform_2(%arg0: i32) -> (i32, i32) {
    %c0_i32 = arith.constant 0 : i32
    %c0_i32_0 = arith.constant 0 : i32
    %c0_i32_1 = arith.constant 0 : i32
    return %c0_i32, %c0_i32_0 : i32, i32
  }
  func.func @transform_3(%arg0: i32) -> (i32, i32) {
    %c0_i32 = arith.constant 0 : i32
    %c0_i32_0 = arith.constant 0 : i32
    return %c0_i32, %arg0 : i32, i32
  }
}

module attributes {stable_mosaic.version = 11 : i64} {
  func.func @_unpool_kernel(%arg0: i32, %arg1: memref<8x256xf32, #tpu.memory_space<vmem>>, %arg2: memref<8x256xi32, #tpu.memory_space<vmem>>, %arg3: memref<1x256xi32, #tpu.memory_space<vmem>>, %arg4: memref<32x256xf32, #tpu.memory_space<vmem>>) attributes {dimension_semantics = [#tpu.dimension_semantics<parallel>], iteration_bounds = array<i64: 2>, scalar_prefetch = 0 : i64, scratch_operands = 0 : i64, tpu.core_type = #tpu.core_type<tc>, window_params = [{transform_indices = @transform_0, window_bounds = array<i64: 8, 256>}, {transform_indices = @transform_1, window_bounds = array<i64: 8, 256>}, {transform_indices = @transform_2, window_bounds = array<i64: 1, 256>}, {transform_indices = @transform_3, window_bounds = array<i64: 32, 256>}]} {
    %c0 = arith.constant 0 : index
    %c0_0 = arith.constant 0 : index
    %0 = vector.load %arg1[%c0, %c0_0] : memref<8x256xf32, #tpu.memory_space<vmem>>, vector<8x256xf32>
    %c0_1 = arith.constant 0 : index
    %c0_2 = arith.constant 0 : index
    %1 = vector.load %arg2[%c0_1, %c0_2] : memref<8x256xi32, #tpu.memory_space<vmem>>, vector<8x256xi32>
    %c0_3 = arith.constant 0 : index
    %c0_4 = arith.constant 0 : index
    %2 = vector.load %arg3[%c0_3, %c0_4] : memref<1x256xi32, #tpu.memory_space<vmem>>, vector<1x256xi32>
    %c0_i32 = arith.constant 0 : i32
    %3 = vector.broadcast %c0_i32 : i32 to vector<1x256xi32>
    %4 = arith.addi %2, %3 : vector<1x256xi32>
    %5 = vector.broadcast %4 : vector<1x256xi32> to vector<8x256xi32>
    %6 = arith.cmpi eq, %1, %5 : vector<8x256xi32>
    %cst = arith.constant 0.000000e+00 : f32
    %7 = vector.broadcast %cst : f32 to vector<8x256xf32>
    %8 = arith.select %6, %0, %7 : vector<8x256xi1>, vector<8x256xf32>
    %c1_i32 = arith.constant 1 : i32
    %9 = vector.broadcast %c1_i32 : i32 to vector<1x256xi32>
    %10 = arith.addi %2, %9 : vector<1x256xi32>
    %11 = vector.broadcast %10 : vector<1x256xi32> to vector<8x256xi32>
    %12 = arith.cmpi eq, %1, %11 : vector<8x256xi32>
    %cst_5 = arith.constant 0.000000e+00 : f32
    %13 = vector.broadcast %cst_5 : f32 to vector<8x256xf32>
    %14 = arith.select %12, %0, %13 : vector<8x256xi1>, vector<8x256xf32>
    %c32_i32 = arith.constant 32 : i32
    %15 = vector.broadcast %c32_i32 : i32 to vector<1x256xi32>
    %16 = arith.addi %2, %15 : vector<1x256xi32>
    %17 = vector.broadcast %16 : vector<1x256xi32> to vector<8x256xi32>
    %18 = arith.cmpi eq, %1, %17 : vector<8x256xi32>
    %cst_6 = arith.constant 0.000000e+00 : f32
    %19 = vector.broadcast %cst_6 : f32 to vector<8x256xf32>
    %20 = arith.select %18, %0, %19 : vector<8x256xi1>, vector<8x256xf32>
    %c33_i32 = arith.constant 33 : i32
    %21 = vector.broadcast %c33_i32 : i32 to vector<1x256xi32>
    %22 = arith.addi %2, %21 : vector<1x256xi32>
    %23 = vector.broadcast %22 : vector<1x256xi32> to vector<8x256xi32>
    %24 = arith.cmpi eq, %1, %23 : vector<8x256xi32>
    %cst_7 = arith.constant 0.000000e+00 : f32
    %25 = vector.broadcast %cst_7 : f32 to vector<8x256xf32>
    %26 = arith.select %24, %0, %25 : vector<8x256xi1>, vector<8x256xf32>
    %27 = tpu.concatenate %8, %14, %20, %26 in 0 : vector<8x256xf32>, vector<8x256xf32>, vector<8x256xf32>, vector<8x256xf32> -> vector<32x256xf32>
    %c0_8 = arith.constant 0 : index
    %c0_9 = arith.constant 0 : index
    %28 = vector.load %arg4[%c0_8, %c0_9] : memref<32x256xf32, #tpu.memory_space<vmem>>, vector<32x256xf32>
    tpu.vector_store %arg4[%c0_8, %c0_9], %27 {strides = array<i32>} : memref<32x256xf32, #tpu.memory_space<vmem>>, vector<32x256xf32>,
    return
  }
  func.func @transform_0(%arg0: i32) -> (i32, i32) {
    %c0_i32 = arith.constant 0 : i32
    %c0_i32_0 = arith.constant 0 : i32
    return %c0_i32, %arg0 : i32, i32
  }
  func.func @transform_1(%arg0: i32) -> (i32, i32) {
    %c0_i32 = arith.constant 0 : i32
    %c0_i32_0 = arith.constant 0 : i32
    return %c0_i32, %arg0 : i32, i32
  }
  func.func @transform_2(%arg0: i32) -> (i32, i32) {
    %c0_i32 = arith.constant 0 : i32
    %c0_i32_0 = arith.constant 0 : i32
    return %c0_i32, %arg0 : i32, i32
  }
  func.func @transform_3(%arg0: i32) -> (i32, i32) {
    %c0_i32 = arith.constant 0 : i32
    %c0_i32_0 = arith.constant 0 : i32
    return %c0_i32, %arg0 : i32, i32
  }
}

module attributes {stable_mosaic.version = 11 : i64} {
  func.func @_matmul_affine_kernel(%arg0: i32, %arg1: memref<8x144xbf16, #tpu.memory_space<vmem>>, %arg2: memref<144x512xbf16, #tpu.memory_space<vmem>>, %arg3: memref<8x1xf32, #tpu.memory_space<vmem>>, %arg4: memref<8x512xf32, #tpu.memory_space<vmem>>) attributes {dimension_semantics = [#tpu.dimension_semantics<parallel>], iteration_bounds = array<i64: 1>, scalar_prefetch = 0 : i64, scratch_operands = 0 : i64, tpu.core_type = #tpu.core_type<tc>, window_params = [{pipeline_mode = #tpu.pipeline_mode<synchronous>, transform_indices = @transform_0, window_bounds = array<i64: 8, 144>}, {transform_indices = @transform_1, window_bounds = array<i64: 144, 512>}, {pipeline_mode = #tpu.pipeline_mode<synchronous>, transform_indices = @transform_2, window_bounds = array<i64: 8, 1>}, {transform_indices = @transform_3, window_bounds = array<i64: 8, 512>}]} {
    %c0 = arith.constant 0 : index
    %c0_0 = arith.constant 0 : index
    %0 = vector.load %arg1[%c0, %c0_0] : memref<8x144xbf16, #tpu.memory_space<vmem>>, vector<8x144xbf16>
    %c0_1 = arith.constant 0 : index
    %c0_2 = arith.constant 0 : index
    %1 = vector.load %arg2[%c0_1, %c0_2] : memref<144x512xbf16, #tpu.memory_space<vmem>>, vector<144x512xbf16>
    %cst = arith.constant dense<0.000000e+00> : vector<8x512xf32>
    %2 = tpu.matmul %0, %1, %cst {dimension_numbers = #tpu.dot_dimension_numbers<[1], [0], [0], [1], [0, 0, 1, 1], [], []>} : vector<8x144xbf16>, vector<144x512xbf16>, vector<8x512xf32> -> vector<8x512xf32>
    %c0_3 = arith.constant 0 : index
    %c0_4 = arith.constant 0 : index
    %3 = vector.load %arg3[%c0_3, %c0_4] : memref<8x1xf32, #tpu.memory_space<vmem>>, vector<8x1xf32>
    %4 = vector.broadcast %3 : vector<8x1xf32> to vector<8x512xf32>
    %5 = arith.addf %2, %4 : vector<8x512xf32>
    %cst_5 = arith.constant 0.000000e+00 : f32
    %6 = vector.broadcast %cst_5 : f32 to vector<8x512xf32>
    %7 = arith.maximumf %5, %6 : vector<8x512xf32>
    %c0_6 = arith.constant 0 : index
    %c0_7 = arith.constant 0 : index
    %8 = vector.load %arg4[%c0_6, %c0_7] : memref<8x512xf32, #tpu.memory_space<vmem>>, vector<8x512xf32>
    tpu.vector_store %arg4[%c0_6, %c0_7], %7 {strides = array<i32>} : memref<8x512xf32, #tpu.memory_space<vmem>>, vector<8x512xf32>,
    return
  }
  func.func @transform_0(%arg0: i32) -> (i32, i32) {
    %c0_i32 = arith.constant 0 : i32
    %c0_i32_0 = arith.constant 0 : i32
    %c0_i32_1 = arith.constant 0 : i32
    return %c0_i32, %c0_i32_0 : i32, i32
  }
  func.func @transform_1(%arg0: i32) -> (i32, i32) {
    %c0_i32 = arith.constant 0 : i32
    %c0_i32_0 = arith.constant 0 : i32
    return %c0_i32, %arg0 : i32, i32
  }
  func.func @transform_2(%arg0: i32) -> (i32, i32) {
    %c0_i32 = arith.constant 0 : i32
    %c0_i32_0 = arith.constant 0 : i32
    %c0_i32_1 = arith.constant 0 : i32
    return %c0_i32, %c0_i32_0 : i32, i32
  }
  func.func @transform_3(%arg0: i32) -> (i32, i32) {
    %c0_i32 = arith.constant 0 : i32
    %c0_i32_0 = arith.constant 0 : i32
    return %c0_i32, %arg0 : i32, i32
  }
}

module attributes {stable_mosaic.version = 11 : i64} {
  func.func @_matmul_affine_kernel(%arg0: i32, %arg1: memref<5x8xbf16, #tpu.memory_space<vmem>>, %arg2: memref<8x1024xbf16, #tpu.memory_space<vmem>>, %arg3: memref<5x1xf32, #tpu.memory_space<vmem>>, %arg4: memref<5x1024xf32, #tpu.memory_space<vmem>>) attributes {dimension_semantics = [#tpu.dimension_semantics<parallel>], iteration_bounds = array<i64: 2>, scalar_prefetch = 0 : i64, scratch_operands = 0 : i64, tpu.core_type = #tpu.core_type<tc>, window_params = [{pipeline_mode = #tpu.pipeline_mode<synchronous>, transform_indices = @transform_0, window_bounds = array<i64: 5, 8>}, {transform_indices = @transform_1, window_bounds = array<i64: 8, 1024>}, {pipeline_mode = #tpu.pipeline_mode<synchronous>, transform_indices = @transform_2, window_bounds = array<i64: 5, 1>}, {transform_indices = @transform_3, window_bounds = array<i64: 5, 1024>}]} {
    %c0 = arith.constant 0 : index
    %c0_0 = arith.constant 0 : index
    %0 = vector.load %arg1[%c0, %c0_0] : memref<5x8xbf16, #tpu.memory_space<vmem>>, vector<5x8xbf16>
    %c0_1 = arith.constant 0 : index
    %c0_2 = arith.constant 0 : index
    %1 = vector.load %arg2[%c0_1, %c0_2] : memref<8x1024xbf16, #tpu.memory_space<vmem>>, vector<8x1024xbf16>
    %cst = arith.constant dense<0.000000e+00> : vector<5x1024xf32>
    %2 = tpu.matmul %0, %1, %cst {dimension_numbers = #tpu.dot_dimension_numbers<[1], [0], [0], [1], [0, 0, 1, 1], [], []>} : vector<5x8xbf16>, vector<8x1024xbf16>, vector<5x1024xf32> -> vector<5x1024xf32>
    %c0_3 = arith.constant 0 : index
    %c0_4 = arith.constant 0 : index
    %3 = vector.load %arg3[%c0_3, %c0_4] : memref<5x1xf32, #tpu.memory_space<vmem>>, vector<5x1xf32>
    %4 = vector.broadcast %3 : vector<5x1xf32> to vector<5x1024xf32>
    %5 = arith.addf %2, %4 : vector<5x1024xf32>
    %c0_5 = arith.constant 0 : index
    %c0_6 = arith.constant 0 : index
    %6 = vector.load %arg4[%c0_5, %c0_6] : memref<5x1024xf32, #tpu.memory_space<vmem>>, vector<5x1024xf32>
    tpu.vector_store %arg4[%c0_5, %c0_6], %5 {strides = array<i32>} : memref<5x1024xf32, #tpu.memory_space<vmem>>, vector<5x1024xf32>,
    return
  }
  func.func @transform_0(%arg0: i32) -> (i32, i32) {
    %c0_i32 = arith.constant 0 : i32
    %c0_i32_0 = arith.constant 0 : i32
    %c0_i32_1 = arith.constant 0 : i32
    return %c0_i32, %c0_i32_0 : i32, i32
  }
  func.func @transform_1(%arg0: i32) -> (i32, i32) {
    %c0_i32 = arith.constant 0 : i32
    %c0_i32_0 = arith.constant 0 : i32
    return %c0_i32, %arg0 : i32, i32
  }
  func.func @transform_2(%arg0: i32) -> (i32, i32) {
    %c0_i32 = arith.constant 0 : i32
    %c0_i32_0 = arith.constant 0 : i32
    %c0_i32_1 = arith.constant 0 : i32
    return %c0_i32, %c0_i32_0 : i32, i32
  }
  func.func @transform_3(%arg0: i32) -> (i32, i32) {
    %c0_i32 = arith.constant 0 : i32
    %c0_i32_0 = arith.constant 0 : i32
    return %c0_i32, %arg0 : i32, i32
  }
}

</mosaic_0001>

<bundles_post_ra>
// kernel: segnet_forward.35
= control target key start
LH: loop header
LB: loop body
LE: loop exit
PB: predicated region body
PF: predicated region fallthrough
CT: control target
= control target key end

     0   :  { %s700_s12 = smov 0   ;;  %s702_s13 = smov 0   ;;  %s814_s0 = inlined_call_operand.vmem [shape: bf16[8,27], index: 0, kind: input, shape index: {}]   ;;  %s815_s1 = inlined_call_operand.vmem [shape: bf16[27,2048], index: 1, kind: input, shape index: {}]   ;;  %s816_s2 = inlined_call_operand.vmem [shape: f32[8,1], index: 2, kind: input, shape index: {}]   ;;  %s817_s3 = inlined_call_operand.vmem [shape: f32[8,2048], index: 3, kind: output, shape index: {}]  }
   0x1   :  { %s704_s14 = smov 0  }
   0x2 LB: > { %s593_s15 = sadd.s32 4294967295, %s676_s14   ;;  %s717_s16 = sadd.s32 1, %s676_s14   ;;  %s676_s14 = sphi %s704_s14, %s820_s14   ;;  %s672_s13 = sphi %s702_s13, %s819_s13   ;;  %s668_s12 = sphi %s700_s12, %s818_s12  }
   0x3   : > { %s38_s17 = ssub.s32 %s676_s14, %s717_s16  ;;  %s41_s18 = sadd.s32 1, %s672_s13 }
   0x4   : > { %p39_p0 = scmp.eq.s32.totalorder %s38_s17, 0  ;;  %p48_p1 = scmp.ne.s32.totalorder %s672_s13, %s668_s12 }
   0x5   : > { %p49_p2 = scmp.eq.s32.totalorder %s676_s14, 0  ;;  %p596_p4 = scmp.ge.s32.totalorder %s676_s14, 2 }
   0x6   : > { %s726_s19 = scalar_select %p39_p0, %s672_s13, %s41_s18  }
   0x7   : > { %p50_p3 = por %p49_p2, %p48_p1  ;;  %127 = sbr.rel (%p596_p4) target bundleno = 26 (0x1a), region = 24 }
   0xe   : > { %130 = sbr.rel (!%p50_p3) target bundleno = 26 (0x1a), region = 28  ;;  %s132_s20 = sand.u32 (%p50_p3), 1, %s672_s13  }
   0xf   : > { %s626_s21 = sshll.u32 (%p50_p3), %s676_s14, 5  ;;  %s597_s22 = sshll.u32 (%p50_p3), %s132_s20, 7 }
  0x10   : > { %s734_s25 = scalar_lea.vmem (%p50_p3), %s815_s1, %s626_s21  ;;  %s134_s26 = scalar_lea.vmem (%p50_p3), [#allocation2], %s597_s22 }
  0x11   : > { %v150_v0 = vld [vmem:[%s734_s25] sm:$0xff] (%p50_p3)  ;;  %v152_v1 = vld [vmem:[%s734_s25 + $0x8] sm:$0xff] (%p50_p3)  ;;  %v154_v2 = vld [vmem:[%s734_s25 + $0x10] sm:$0xff] (%p50_p3) }
  0x12   : > { %151 = vst [vmem:[%s134_s26] sm:$0xff] (%p50_p3), %v150_v0  ;;  %153 = vst [vmem:[%s134_s26 + $0x8] sm:$0xff] (%p50_p3), %v152_v1  ;;  %v156_v3 = vld [vmem:[%s734_s25 + $0x18] sm:$0xff] (%p50_p3)  ;;  %v158_v4 = vld [vmem:[%s734_s25 + $0x40] sm:$0xff] (%p50_p3) }
  0x13   : > { %155 = vst [vmem:[%s134_s26 + $0x10] sm:$0xff] (%p50_p3), %v154_v2  ;;  %v160_v5 = vld [vmem:[%s734_s25 + $0x48] sm:$0xff] (%p50_p3)  ;;  %157 = vst [vmem:[%s134_s26 + $0x18] sm:$0xff] (%p50_p3), %v156_v3  ;;  %v162_v6 = vld [vmem:[%s734_s25 + $0x50] sm:$0xff] (%p50_p3) }
  0x14   : > { %159 = vst [vmem:[%s134_s26 + $0x20] sm:$0xff] (%p50_p3), %v158_v4  ;;  %161 = vst [vmem:[%s134_s26 + $0x28] sm:$0xff] (%p50_p3), %v160_v5  ;;  %v164_v7 = vld [vmem:[%s734_s25 + $0x58] sm:$0xff] (%p50_p3)  ;;  %v166_v8 = vld [vmem:[%s734_s25 + $0x80] sm:$0xff] (%p50_p3) }
  0x15   : > { %163 = vst [vmem:[%s134_s26 + $0x30] sm:$0xff] %v162_v6  ;;  %165 = vst [vmem:[%s134_s26 + $0x38] sm:$0xff] %v164_v7  ;;  %v168_v9 = vld [vmem:[%s734_s25 + $0x88] sm:$0xff]  ;;  %v170_v10 = vld [vmem:[%s734_s25 + $0x90] sm:$0xff] }
  0x16   : > { %167 = vst [vmem:[%s134_s26 + $0x40] sm:$0xff] %v166_v8  ;;  %v172_v11 = vld [vmem:[%s734_s25 + $0x98] sm:$0xff]  ;;  %169 = vst [vmem:[%s134_s26 + $0x48] sm:$0xff] %v168_v9  ;;  %v174_v12 = vld [vmem:[%s734_s25 + $0xc0] sm:$0xff] }
  0x17   : > { %171 = vst [vmem:[%s134_s26 + $0x50] sm:$0xff] %v170_v10  ;;  %173 = vst [vmem:[%s134_s26 + $0x58] sm:$0xff] %v172_v11  ;;  %v176_v13 = vld [vmem:[%s734_s25 + $0xc8] sm:$0xff]  ;;  %v178_v14 = vld [vmem:[%s734_s25 + $0xd0] sm:$0xff] }
  0x18   : > { %175 = vst [vmem:[%s134_s26 + $0x60] sm:$0xff] %v174_v12  ;;  %177 = vst [vmem:[%s134_s26 + $0x68] sm:$0xff] %v176_v13  ;;  %v180_v15 = vld [vmem:[%s734_s25 + $0xd8] sm:$0xff] }
  0x19   : > { %179 = vst [vmem:[%s134_s26 + $0x70] sm:$0xff] %v178_v14  ;;  %181 = vst [vmem:[%s134_s26 + $0x78] sm:$0xff] %v180_v15 }
  0x1a PF: > { %p600_p5 = scmp.ge.s32.totalorder %s676_s14, 1  ;;  %p186_p6 = scmp.lt.s32.totalorder %s676_s14, 3 }
  0x1c   : > { %p187_p7 = pnand %p600_p5, %p186_p6 }
  0x1d   : > { %s193_s27 = sand.u32 (!%p187_p7), 1, %s668_s12   ;;  %vm323_vm0 = vcmask (!%p187_p7), 1044480   ;;  %v241_v16 = vld [vmem:[%s816_s2] sm:$0xff] (!%p187_p7)  ;;  %vm324_vm1 = vcmask (!%p187_p7), 1045504   ;;  %v678_v17 = vmov (!%p187_p7), 65535   ;;  %v679_v19 = vmov (!%p187_p7), 0  }
  0x1e   : > { %190 = sbr.rel (%p187_p7) target bundleno = 271 (0x10f), region = 51  ;;  %s601_s30 = sshll.u32 (!%p187_p7), %s193_s27, 7  ;;  %v325_v18 = vsel (!%p187_p7), %vm323_vm0, 4294967295, %v678_v17  ;;  %383 = vmatprep.mubr.bf16.mxu0 (!%p187_p7), %v679_v19  ;;  %424 = vmatprep.mubr.bf16.mxu1 (!%p187_p7), %v679_v19  ;;  %v224_v53 = vld [vmem:[%s814_s0] sm:$0xf] (!%p187_p7)  ;;  %vm319_vm2 = vcmask (!%p187_p7), 220160  }
  0x1f   : > { %653 = vset.pattern.permute.xlu0 (!%p187_p7), %v679_v19  ;;  %s761_s4 = scalar_lea.vmem (!%p187_p7), [#allocation2], %s601_s30  ;;  %v326_v28 = vsel (!%p187_p7), %vm324_vm1, %v325_v18, 0  ;;  %s602_s7 = sshll.u32 (!%p187_p7), %s593_s15, 3 }
  0x20   : > { %v225_v20 = vld [vmem:[%s761_s4] sm:$0xff] (!%p187_p7)  ;;  %v226_v22 = vld [vmem:[%s761_s4 + $0x8] sm:$0xff] (!%p187_p7)  ;;  %244 = vperm.xlu0 (!%p187_p7), %653, %v241_v16   ;;  %v227_v35 = vld [vmem:[%s761_s4 + $0x10] sm:$0xff] (!%p187_p7)  ;;  %p218_p8 = scmp.lt.s32.totalorder (!%p187_p7), %s602_s7, 15 }
  0x21   : > { %v229_v21 = vld [vmem:[%s761_s4 + $0x20] sm:$0xff] (!%p187_p7)  ;;  %v230_v24 = vld [vmem:[%s761_s4 + $0x28] sm:$0xff] (!%p187_p7)  ;;  %v231_v38 = vld [vmem:[%s761_s4 + $0x30] sm:$0xff] (!%p187_p7) }
  0x22   : > { %v605_v23 = vcombine.high (!%p187_p7), %v225_v20, %v229_v21  ;;  %v604_v25 = vcombine.low (!%p187_p7), %v225_v20, %v229_v21  ;;  %v233_v26 = vld [vmem:[%s761_s4 + $0x40] sm:$0xff] (!%p187_p7)  ;;  %v607_v29 = vcombine.high (!%p187_p7), %v226_v22, %v230_v24  ;;  %v606_v30 = vcombine.low (!%p187_p7), %v226_v22, %v230_v24  ;;  %v234_v32 = vld [vmem:[%s761_s4 + $0x48] sm:$0xff] (!%p187_p7)  ;;  %v228_v39 = vld [vmem:[%s761_s4 + $0x18] sm:$0xff] (!%p187_p7) }
  0x23   : > { %v237_v27 = vld [vmem:[%s761_s4 + $0x60] sm:$0x33] (!%p187_p7)  ;;  %v238_v33 = vld [vmem:[%s761_s4 + $0x68] sm:$0x33] (!%p187_p7)  ;;  %v232_v40 = vld [vmem:[%s761_s4 + $0x38] sm:$0xff] (!%p187_p7)  ;;  %v609_v48 = vcombine.high (!%p187_p7), %v227_v35, %v231_v38  ;;  %v608_v54 = vcombine.low (!%p187_p7), %v227_v35, %v231_v38 }
  0x24   : > { %v613_v31 = vcombine.high (!%p187_p7), %v233_v26, %v237_v27  ;;  %v612_v34 = vcombine.low (!%p187_p7), %v233_v26, %v237_v27  ;;  %351 = vmatprep.subr.bf16.mxu0 (!%p187_p7), %v605_v23  ;;  %v615_v36 = vcombine.high (!%p187_p7), %v234_v32, %v238_v33  ;;  %v614_v37 = vcombine.low (!%p187_p7), %v234_v32, %v238_v33  ;;  %v235_v43 = vld [vmem:[%s761_s4 + $0x50] sm:$0xff] (!%p187_p7)  ;;  %v236_v45 = vld [vmem:[%s761_s4 + $0x58] sm:$0xff] (!%p187_p7) }
  0x25   : > { %392 = vmatprep.subr.bf16.mxu1 %v607_v29  ;;  %352 = vmatpush1.bf16.msra.mxu0 %v604_v25  ;;  %v239_v44 = vld [vmem:[%s761_s4 + $0x70] sm:$0x33]  ;;  %v240_v49 = vld [vmem:[%s761_s4 + $0x78] sm:$0x33]  ;;  %v611_v50 = vcombine.high %v228_v39, %v232_v40  ;;  %v610_v56 = vcombine.low %v228_v39, %v232_v40  ;;  %s822_s7 = smov (!%p218_p8, %s602_s7), 15 }
  0x26   : > { %v331_v41 = vand.u32 %v613_v31, %v326_v28  ;;  %v328_v42 = vand.u32 %v612_v34, %v326_v28  ;;  %393 = vmatpush1.bf16.msra.mxu1 %v606_v30  ;;  %v337_v46 = vand.u32 %v615_v36, %v326_v28  ;;  %v334_v47 = vand.u32 %v614_v37, %v326_v28  ;;  %s603_s8 = sshll.u32 %s822_s7, 3 }
  0x27   : > { %v617_v51 = vcombine.high %v235_v43, %v239_v44  ;;  %v619_v52 = vcombine.high %v236_v45, %v240_v49  ;;  %v616_v55 = vcombine.low %v235_v43, %v239_v44  ;;  %v618_v58 = vcombine.low %v236_v45, %v240_v49  ;;  %s794_s11 = scalar_lea.vmem %s817_s3, %s603_s8 }
  0x28   : > { %353 = vmatprep.subr.bf16.mxu0 %v331_v41  ;;  %394 = vmatprep.subr.bf16.mxu1 %v337_v46 }
  0x29   : > { %354 = vmatpush1.bf16.msra.mxu0 %v328_v42  ;;  %v343_v57 = vand.u32 %v617_v51, %v326_v28  ;;  %v349_v59 = vand.u32 %v619_v52, %v326_v28  ;;  %v340_v60 = vand.u32 %v616_v55, %v326_v28  ;;  %v346_v61 = vand.u32 %v618_v58, %v326_v28 }
  0x2a   : > { %395 = vmatpush1.bf16.msra.mxu1 %v334_v47  ;;  %433 = vmatprep.subr.bf16.mxu0 %v609_v48 }
  0x2b   : > { %474 = vmatprep.subr.bf16.mxu1 %v611_v50 }
  0x2c   : > { %620 = vmatmul.mubr.msk.bf16.vlgmr.msra.gmra.mrb[0].mxu0 %vm319_vm2, %v224_v53 }
  0x2d   : > { %621 = vmatmul.mubr.msk.bf16.vlgmr.msra.gmra.mrb[0].mxu1 %vm319_vm2, %v224_v53  ;;  %434 = vmatpush1.bf16.msra.mxu0 %v608_v54 }
  0x2e   : > { %475 = vmatpush1.bf16.msra.mxu1 %v610_v56  ;;  %435 = vmatprep.subr.bf16.mxu0 %v343_v57 }
  0x2f   : > { %476 = vmatprep.subr.bf16.mxu1 %v349_v59  ;;  %465 = vmatprep.mubr.bf16.mxu0 %v679_v19 }
  0x30   : > { %506 = vmatprep.mubr.bf16.mxu1 %v679_v19 }
  0x31   : > { %436 = vmatpush1.bf16.msra.mxu0 %v340_v60 }
  0x32   : > { %477 = vmatpush1.bf16.msra.mxu1 %v346_v61 }
  0x34   : > { %622 = vmatmul.mubr.msk.bf16.vlgmr.msra.gmra.mrb[4].mxu0 %vm319_vm2, %v224_v53 }
  0x35   : > { %623 = vmatmul.mubr.msk.bf16.vlgmr.msra.gmra.mrb[4].mxu1 %vm319_vm2, %v224_v53 }
  0x9f   : > { %v245_v62 = vpop.permute.xlu0 %244 }
  0xff   : > { %v385_v63 = vpop.f32.mrb[0].mxu0 }
 0x100   : > { %v426_v0 = vpop.f32.mrb[0].mxu1  ;;  %v386_v1 = vadd.f32 %v385_v63, %v245_v62  ;;  %v387_v2 = vpop.f32.mrb[1].mxu0 }
 0x101   : > { %v427_v3 = vadd.f32 %v426_v0, %v245_v62  ;;  %v388_v4 = vadd.f32 %v387_v2, %v245_v62  ;;  %v428_v5 = vpop.f32.mrb[1].mxu1  ;;  %v389_v6 = vpop.f32.mrb[2].mxu0 }
 0x102   : > { %v515_v7 = vmax.f32 %v386_v1, 0.0  ;;  %v429_v8 = vadd.f32 %v428_v5, %v245_v62  ;;  %v430_v9 = vpop.f32.mrb[2].mxu1  ;;  %v390_v10 = vpop.f32.mrb[3].mxu0 }
 0x103   : > { %v517_v11 = vmax.f32 %v427_v3, 0.0  ;;  %v516_v12 = vmax.f32 %v388_v4, 0.0  ;;  %v431_v13 = vpop.f32.mrb[3].mxu1 }
 0x104   : > { %523 = vst [vmem:[%s794_s11] sm:$0xff] %v515_v7  ;;  %v518_v14 = vmax.f32 %v429_v8, 0.0 }
 0x105   : > { %525 = vst [vmem:[%s794_s11 + $0x10] sm:$0xff] %v517_v11  ;;  %524 = vst [vmem:[%s794_s11 + $0x8] sm:$0xff] %v516_v12 }
 0x106   : > { %526 = vst [vmem:[%s794_s11 + $0x18] sm:$0xff] %v518_v14 }
 0x107   : > { %v467_v15 = vpop.f32.mrb[4].mxu0 }
 0x108   : > { %v468_v16 = vadd.f32 %v467_v15, %v245_v62  ;;  %v508_v17 = vpop.f32.mrb[4].mxu1  ;;  %v469_v18 = vpop.f32.mrb[5].mxu0 }
 0x109   : > { %v509_v19 = vadd.f32 %v508_v17, %v245_v62  ;;  %v470_v20 = vadd.f32 %v469_v18, %v245_v62  ;;  %v510_v21 = vpop.f32.mrb[5].mxu1  ;;  %v471_v22 = vpop.f32.mrb[6].mxu0 }
 0x10a   : > { %v519_v23 = vmax.f32 %v468_v16, 0.0  ;;  %v511_v24 = vadd.f32 %v510_v21, %v245_v62  ;;  %v512_v25 = vpop.f32.mrb[6].mxu1  ;;  %v472_v26 = vpop.f32.mrb[7].mxu0 }
 0x10b   : > { %v521_v27 = vmax.f32 %v509_v19, 0.0  ;;  %v520_v28 = vmax.f32 %v470_v20, 0.0  ;;  %v513_v29 = vpop.f32.mrb[7].mxu1 }
 0x10c   : > { %527 = vst [vmem:[%s794_s11 + $0x20] sm:$0xff] %v519_v23  ;;  %v522_v30 = vmax.f32 %v511_v24, 0.0 }
 0x10d   : > { %529 = vst [vmem:[%s794_s11 + $0x30] sm:$0xff] %v521_v27  ;;  %528 = vst [vmem:[%s794_s11 + $0x28] sm:$0xff] %v520_v28 }
 0x10e   : > { %530 = vst [vmem:[%s794_s11 + $0x38] sm:$0xff] %v522_v30 }
 0x10f PF: > { %p10_p9 = scmp.ge.s32.totalorder %s717_s16, 4   ;;  %s818_s12 = smov %s672_s13 }
 0x110   : > { %s819_s13 = smov %s726_s19  ;;  %s820_s14 = smov %s717_s16 }
 0x111   :  { %12 = sbr.rel (!%p10_p9) target bundleno = 2 (0x2), region = 90 }

// kernel: segnet_forward.36
= control target key start
LH: loop header
LB: loop body
LE: loop exit
PB: predicated region body
PF: predicated region fallthrough
CT: control target
= control target key end

     0   :  { %s899_s12 = smov 0   ;;  %s901_s13 = smov 0   ;;  %s1098_s0 = inlined_call_operand.vmem [shape: bf16[8,72], index: 0, kind: input, shape index: {}]   ;;  %s1099_s1 = inlined_call_operand.vmem [shape: bf16[72,2048], index: 1, kind: input, shape index: {}]   ;;  %s1100_s2 = inlined_call_operand.vmem [shape: f32[8,1], index: 2, kind: input, shape index: {}]   ;;  %s1101_s3 = inlined_call_operand.vmem [shape: f32[8,2048], index: 3, kind: output, shape index: {}]  }
   0x1   :  { %s903_s14 = smov 0  }
   0x2 LB: > { %s758_s15 = sadd.s32 4294967295, %s876_s14   ;;  %s916_s16 = sadd.s32 1, %s876_s14   ;;  %s876_s14 = sphi %s903_s14, %s1104_s14   ;;  %s872_s13 = sphi %s901_s13, %s1103_s13   ;;  %s868_s12 = sphi %s899_s12, %s1102_s12  }
   0x3   : > { %s38_s17 = ssub.s32 %s876_s14, %s916_s16  ;;  %s41_s18 = sadd.s32 1, %s872_s13 }
   0x4   : > { %p39_p0 = scmp.eq.s32.totalorder %s38_s17, 0  ;;  %p48_p1 = scmp.ne.s32.totalorder %s872_s13, %s868_s12 }
   0x5   : > { %p49_p2 = scmp.eq.s32.totalorder %s876_s14, 0  ;;  %p761_p4 = scmp.ge.s32.totalorder %s876_s14, 2 }
   0x6   : > { %s925_s19 = scalar_select %p39_p0, %s872_s13, %s41_s18  }
   0x7   : > { %p50_p3 = por %p49_p2, %p48_p1  ;;  %127 = sbr.rel (%p761_p4) target bundleno = 37 (0x25), region = 24 }
   0xe   : > { %130 = sbr.rel (!%p50_p3) target bundleno = 37 (0x25), region = 28  ;;  %s132_s20 = sand.u32 (%p50_p3), 1, %s872_s13  }
   0xf   : > { %s817_s21 = sshll.u32 (%p50_p3), %s876_s14, 5  ;;  %s818_s22 = smul.u32 (%p50_p3), 288, %s132_s20 }
  0x10   : > { %s933_s25 = scalar_lea.vmem (%p50_p3), %s1099_s1, %s817_s21 }
  0x11   : > { %v150_v0 = vld [vmem:[%s933_s25] sm:$0xff] (%p50_p3)  ;;  %v152_v1 = vld [vmem:[%s933_s25 + $0x8] sm:$0xff] (%p50_p3)  ;;  %v154_v2 = vld [vmem:[%s933_s25 + $0x10] sm:$0xff] (%p50_p3)  ;;  %s941_s26 = scalar_lea.vmem (%p50_p3), [#allocation2], %s818_s22 }
  0x12   : > { %v156_v3 = vld [vmem:[%s933_s25 + $0x18] sm:$0xff] (%p50_p3)  ;;  %v158_v4 = vld [vmem:[%s933_s25 + $0x40] sm:$0xff] (%p50_p3)  ;;  %v160_v5 = vld [vmem:[%s933_s25 + $0x48] sm:$0xff] (%p50_p3)  ;;  %151 = vst [vmem:[%s941_s26] sm:$0xff] (%p50_p3), %v150_v0 }
  0x13   : > { %153 = vst [vmem:[%s941_s26 + $0x8] sm:$0xff] (%p50_p3), %v152_v1  ;;  %155 = vst [vmem:[%s941_s26 + $0x10] sm:$0xff] (%p50_p3), %v154_v2  ;;  %v162_v6 = vld [vmem:[%s933_s25 + $0x50] sm:$0xff] (%p50_p3)  ;;  %v164_v7 = vld [vmem:[%s933_s25 + $0x58] sm:$0xff] (%p50_p3) }
  0x14   : > { %157 = vst [vmem:[%s941_s26 + $0x18] sm:$0xff] (%p50_p3), %v156_v3  ;;  %159 = vst [vmem:[%s941_s26 + $0x20] sm:$0xff] (%p50_p3), %v158_v4  ;;  %v166_v8 = vld [vmem:[%s933_s25 + $0x80] sm:$0xff] (%p50_p3)  ;;  %v168_v9 = vld [vmem:[%s933_s25 + $0x88] sm:$0xff] (%p50_p3) }
  0x15   : > { %161 = vst [vmem:[%s941_s26 + $0x28] sm:$0xff] %v160_v5  ;;  %163 = vst [vmem:[%s941_s26 + $0x30] sm:$0xff] %v162_v6  ;;  %v170_v10 = vld [vmem:[%s933_s25 + $0x90] sm:$0xff]  ;;  %v172_v11 = vld [vmem:[%s933_s25 + $0x98] sm:$0xff] }
  0x16   : > { %165 = vst [vmem:[%s941_s26 + $0x38] sm:$0xff] %v164_v7  ;;  %167 = vst [vmem:[%s941_s26 + $0x40] sm:$0xff] %v166_v8  ;;  %v174_v12 = vld [vmem:[%s933_s25 + $0xc0] sm:$0xff]  ;;  %v176_v13 = vld [vmem:[%s933_s25 + $0xc8] sm:$0xff] }
  0x17   : > { %169 = vst [vmem:[%s941_s26 + $0x48] sm:$0xff] %v168_v9  ;;  %171 = vst [vmem:[%s941_s26 + $0x50] sm:$0xff] %v170_v10  ;;  %v178_v14 = vld [vmem:[%s933_s25 + $0xd0] sm:$0xff]  ;;  %v180_v15 = vld [vmem:[%s933_s25 + $0xd8] sm:$0xff] }
  0x18   : > { %173 = vst [vmem:[%s941_s26 + $0x58] sm:$0xff] %v172_v11  ;;  %175 = vst [vmem:[%s941_s26 + $0x60] sm:$0xff] %v174_v12  ;;  %v182_v16 = vld [vmem:[%s933_s25 + $0x100] sm:$0xff]  ;;  %v184_v17 = vld [vmem:[%s933_s25 + $0x108] sm:$0xff] }
  0x19   : > { %177 = vst [vmem:[%s941_s26 + $0x68] sm:$0xff] %v176_v13  ;;  %179 = vst [vmem:[%s941_s26 + $0x70] sm:$0xff] %v178_v14  ;;  %v186_v18 = vld [vmem:[%s933_s25 + $0x110] sm:$0xff]  ;;  %v188_v19 = vld [vmem:[%s933_s25 + $0x118] sm:$0xff] }
  0x1a   : > { %181 = vst [vmem:[%s941_s26 + $0x78] sm:$0xff] %v180_v15  ;;  %183 = vst [vmem:[%s941_s26 + $0x80] sm:$0xff] %v182_v16  ;;  %v190_v20 = vld [vmem:[%s933_s25 + $0x140] sm:$0xff]  ;;  %v192_v21 = vld [vmem:[%s933_s25 + $0x148] sm:$0xff] }
  0x1b   : > { %185 = vst [vmem:[%s941_s26 + $0x88] sm:$0xff] %v184_v17  ;;  %187 = vst [vmem:[%s941_s26 + $0x90] sm:$0xff] %v186_v18  ;;  %v194_v22 = vld [vmem:[%s933_s25 + $0x150] sm:$0xff]  ;;  %v196_v23 = vld [vmem:[%s933_s25 + $0x158] sm:$0xff] }
  0x1c   : > { %189 = vst [vmem:[%s941_s26 + $0x98] sm:$0xff] %v188_v19  ;;  %191 = vst [vmem:[%s941_s26 + $0xa0] sm:$0xff] %v190_v20  ;;  %v198_v24 = vld [vmem:[%s933_s25 + $0x180] sm:$0xff]  ;;  %v200_v25 = vld [vmem:[%s933_s25 + $0x188] sm:$0xff] }
  0x1d   : > { %193 = vst [vmem:[%s941_s26 + $0xa8] sm:$0xff] %v192_v21  ;;  %195 = vst [vmem:[%s941_s26 + $0xb0] sm:$0xff] %v194_v22  ;;  %v202_v26 = vld [vmem:[%s933_s25 + $0x190] sm:$0xff]  ;;  %v204_v27 = vld [vmem:[%s933_s25 + $0x198] sm:$0xff] }
  0x1e   : > { %197 = vst [vmem:[%s941_s26 + $0xb8] sm:$0xff] %v196_v23  ;;  %199 = vst [vmem:[%s941_s26 + $0xc0] sm:$0xff] %v198_v24  ;;  %v206_v28 = vld [vmem:[%s933_s25 + $0x1c0] sm:$0xff]  ;;  %v208_v29 = vld [vmem:[%s933_s25 + $0x1c8] sm:$0xff] }
  0x1f   : > { %201 = vst [vmem:[%s941_s26 + $0xc8] sm:$0xff] %v200_v25  ;;  %203 = vst [vmem:[%s941_s26 + $0xd0] sm:$0xff] %v202_v26  ;;  %v210_v30 = vld [vmem:[%s933_s25 + $0x1d0] sm:$0xff]  ;;  %v212_v31 = vld [vmem:[%s933_s25 + $0x1d8] sm:$0xff] }
  0x20   : > { %205 = vst [vmem:[%s941_s26 + $0xd8] sm:$0xff] %v204_v27  ;;  %207 = vst [vmem:[%s941_s26 + $0xe0] sm:$0xff] %v206_v28  ;;  %v214_v32 = vld [vmem:[%s933_s25 + $0x200] sm:$0xff]  ;;  %v216_v33 = vld [vmem:[%s933_s25 + $0x208] sm:$0xff] }
  0x21   : > { %209 = vst [vmem:[%s941_s26 + $0xe8] sm:$0xff] %v208_v29  ;;  %211 = vst [vmem:[%s941_s26 + $0xf0] sm:$0xff] %v210_v30  ;;  %v218_v34 = vld [vmem:[%s933_s25 + $0x210] sm:$0xff]  ;;  %v220_v35 = vld [vmem:[%s933_s25 + $0x218] sm:$0xff] }
  0x22   : > { %213 = vst [vmem:[%s941_s26 + $0xf8] sm:$0xff] %v212_v31  ;;  %215 = vst [vmem:[%s941_s26 + $0x100] sm:$0xff] %v214_v32 }
  0x23   : > { %217 = vst [vmem:[%s941_s26 + $0x108] sm:$0xff] %v216_v33  ;;  %219 = vst [vmem:[%s941_s26 + $0x110] sm:$0xff] %v218_v34 }
  0x24   : > { %221 = vst [vmem:[%s941_s26 + $0x118] sm:$0xff] %v220_v35 }
  0x25 PF: > { %p764_p5 = scmp.ge.s32.totalorder %s876_s14, 1  ;;  %p226_p6 = scmp.lt.s32.totalorder %s876_s14, 3 }
  0x27   : > { %p227_p7 = pnand %p764_p5, %p226_p6 }
  0x28   : > { %s233_s27 = sand.u32 (!%p227_p7), 1, %s868_s12   ;;  %v878_v36 = vmov (!%p227_p7), 0   ;;  %v301_v37 = vld [vmem:[%s1100_s2] sm:$0xff] (!%p227_p7)  ;;  %vm491_vm0 = vcmask (!%p227_p7), 1043456   ;;  %vm487_vm1 = vcmask (!%p227_p7), 588800   ;;  %s765_s7 = sshll.u32 (!%p227_p7), %s758_s15, 3 }
  0x29   : > { %230 = sbr.rel (%p227_p7) target bundleno = 307 (0x133), region = 51  ;;  %548 = vmatprep.mubr.bf16.mxu0 (!%p227_p7), %v878_v36  ;;  %589 = vmatprep.mubr.bf16.mxu1 (!%p227_p7), %v878_v36  ;;  %v264_v24 = vld [vmem:[%s1098_s0] sm:$0xf] (!%p227_p7)  ;;  %p258_p8 = scmp.lt.s32.totalorder (!%p227_p7), %s765_s7, 15 }
  0x2a   : > { %s819_s28 = smul.u32 (!%p227_p7), 288, %s233_s27  ;;  %845 = vset.pattern.permute.xlu0 (!%p227_p7), %v878_v36 }
  0x2b   : > { %304 = vperm.xlu0 (!%p227_p7), %845, %v301_v37  }
  0x2c   : > { %s1018_s4 = scalar_lea.vmem (!%p227_p7), [#allocation2], %s819_s28 }
  0x2d   : > { %v265_v38 = vld [vmem:[%s1018_s4] sm:$0xff] (!%p227_p7)  ;;  %v266_v40 = vld [vmem:[%s1018_s4 + $0x8] sm:$0xff] (!%p227_p7)  ;;  %v267_v12 = vld [vmem:[%s1018_s4 + $0x10] sm:$0xff] (!%p227_p7) }
  0x2e   : > { %v269_v39 = vld [vmem:[%s1018_s4 + $0x20] sm:$0xff] (!%p227_p7)  ;;  %v270_v42 = vld [vmem:[%s1018_s4 + $0x28] sm:$0xff] (!%p227_p7)  ;;  %v271_v13 = vld [vmem:[%s1018_s4 + $0x30] sm:$0xff] (!%p227_p7) }
  0x2f   : > { %v768_v41 = vcombine.high (!%p227_p7), %v265_v38, %v269_v39  ;;  %v767_v43 = vcombine.low (!%p227_p7), %v265_v38, %v269_v39  ;;  %v273_v44 = vld [vmem:[%s1018_s4 + $0x40] sm:$0xff] (!%p227_p7)  ;;  %v770_v46 = vcombine.high (!%p227_p7), %v266_v40, %v270_v42  ;;  %v769_v47 = vcombine.low (!%p227_p7), %v266_v40, %v270_v42  ;;  %v274_v49 = vld [vmem:[%s1018_s4 + $0x48] sm:$0xff] (!%p227_p7)  ;;  %v268_v14 = vld [vmem:[%s1018_s4 + $0x18] sm:$0xff] (!%p227_p7) }
  0x30   : > { %v277_v45 = vld [vmem:[%s1018_s4 + $0x60] sm:$0xff]  ;;  %v278_v50 = vld [vmem:[%s1018_s4 + $0x68] sm:$0xff]  ;;  %v272_v15 = vld [vmem:[%s1018_s4 + $0x38] sm:$0xff]  ;;  %v772_v17 = vcombine.high %v267_v12, %v271_v13  ;;  %v771_v25 = vcombine.low %v267_v12, %v271_v13  ;;  %s1106_s7 = smov (!%p258_p8, %s765_s7), 15 }
  0x31   : > { %v776_v48 = vcombine.high %v273_v44, %v277_v45  ;;  %v281_v51 = vld [vmem:[%s1018_s4 + $0x80] sm:$0xff]  ;;  %516 = vmatprep.subr.bf16.mxu0 %v768_v41  ;;  %v778_v52 = vcombine.high %v274_v49, %v278_v50  ;;  %v282_v54 = vld [vmem:[%s1018_s4 + $0x88] sm:$0xff]  ;;  %557 = vmatprep.subr.bf16.mxu1 %v770_v46  ;;  %v775_v56 = vcombine.low %v273_v44, %v277_v45  ;;  %v275_v20 = vld [vmem:[%s1018_s4 + $0x50] sm:$0xff]  ;;  %s766_s8 = sshll.u32 %s1106_s7, 3 }
  0x32   : > { %v285_v53 = vld [vmem:[%s1018_s4 + $0xa0] sm:$0xff]  ;;  %v286_v55 = vld [vmem:[%s1018_s4 + $0xa8] sm:$0xff]  ;;  %517 = vmatpush1.bf16.msra.mxu0 %v767_v43  ;;  %558 = vmatpush1.bf16.msra.mxu1 %v769_v47  ;;  %v777_v57 = vcombine.low %v274_v49, %v278_v50  ;;  %v774_v19 = vcombine.high %v268_v14, %v272_v15  ;;  %v279_v21 = vld [vmem:[%s1018_s4 + $0x70] sm:$0xff]  ;;  %v773_v26 = vcombine.low %v268_v14, %v272_v15  ;;  %s1078_s11 = scalar_lea.vmem %s1101_s3, %s766_s8 }
  0x33   : > { %518 = vmatprep.subr.bf16.mxu0 %v776_v48  ;;  %v784_v58 = vcombine.high %v281_v51, %v285_v53  ;;  %559 = vmatprep.subr.bf16.mxu1 %v778_v52  ;;  %v786_v59 = vcombine.high %v282_v54, %v286_v55  ;;  %v289_v60 = vld [vmem:[%s1018_s4 + $0xc0] sm:$0xff]  ;;  %v290_v62 = vld [vmem:[%s1018_s4 + $0xc8] sm:$0xff]  ;;  %v783_v0 = vcombine.low %v281_v51, %v285_v53  ;;  %v276_v22 = vld [vmem:[%s1018_s4 + $0x58] sm:$0xff] }
  0x34   : > { %v293_v61 = vld [vmem:[%s1018_s4 + $0xe0] sm:$0xff]  ;;  %v294_v63 = vld [vmem:[%s1018_s4 + $0xe8] sm:$0xff]  ;;  %v785_v1 = vcombine.low %v282_v54, %v286_v55  ;;  %v280_v23 = vld [vmem:[%s1018_s4 + $0x78] sm:$0xff]  ;;  %v780_v27 = vcombine.high %v275_v20, %v279_v21  ;;  %v779_v33 = vcombine.low %v275_v20, %v279_v21 }
  0x35   : > { %v792_v2 = vcombine.high %v289_v60, %v293_v61  ;;  %v794_v3 = vcombine.high %v290_v62, %v294_v63  ;;  %v297_v4 = vld [vmem:[%s1018_s4 + $0x100] sm:$0xff]  ;;  %v298_v5 = vld [vmem:[%s1018_s4 + $0x108] sm:$0xff]  ;;  %v791_v6 = vcombine.low %v289_v60, %v293_v61  ;;  %v793_v7 = vcombine.low %v290_v62, %v294_v63  ;;  %v283_v29 = vld [vmem:[%s1018_s4 + $0x90] sm:$0xff] }
  0x36   : > { %519 = vmatpush1.bf16.msra.mxu0 %v775_v56  ;;  %560 = vmatpush1.bf16.msra.mxu1 %v777_v57  ;;  %v800_v8 = vcombine.high %v297_v4, %v297_v4  ;;  %v799_v9 = vcombine.low %v297_v4, %v297_v4  ;;  %v802_v10 = vcombine.high %v298_v5, %v298_v5  ;;  %v287_v30 = vld [vmem:[%s1018_s4 + $0xb0] sm:$0xff]  ;;  %v284_v31 = vld [vmem:[%s1018_s4 + $0x98] sm:$0xff] }
  0x37   : > { %520 = vmatprep.subr.bf16.mxu0 %v784_v58  ;;  %561 = vmatprep.subr.bf16.mxu1 %v786_v59  ;;  %v801_v11 = vcombine.low %v298_v5, %v298_v5  ;;  %v782_v28 = vcombine.high %v276_v22, %v280_v23  ;;  %v288_v32 = vld [vmem:[%s1018_s4 + $0xb8] sm:$0xff]  ;;  %v781_v34 = vcombine.low %v276_v22, %v280_v23  ;;  %v291_v38 = vld [vmem:[%s1018_s4 + $0xd0] sm:$0xff] }
  0x38   : > { %v493_v16 = vsel %vm491_vm0, %v799_v9, 0  ;;  %v788_v35 = vcombine.high %v283_v29, %v287_v30  ;;  %v790_v37 = vcombine.high %v284_v31, %v288_v32  ;;  %v295_v39 = vld [vmem:[%s1018_s4 + $0xf0] sm:$0xff]  ;;  %v292_v40 = vld [vmem:[%s1018_s4 + $0xd8] sm:$0xff]  ;;  %v787_v42 = vcombine.low %v283_v29, %v287_v30 }
  0x39   : > { %v499_v18 = vsel %vm491_vm0, %v801_v11, 0  ;;  %v296_v41 = vld [vmem:[%s1018_s4 + $0xf8] sm:$0xff]  ;;  %v789_v43 = vcombine.low %v284_v31, %v288_v32  ;;  %v796_v44 = vcombine.high %v291_v38, %v295_v39  ;;  %v299_v46 = vld [vmem:[%s1018_s4 + $0x110] sm:$0xff]  ;;  %v795_v48 = vcombine.low %v291_v38, %v295_v39 }
  0x3a   : > { %521 = vmatpush1.bf16.msra.mxu0 %v783_v0  ;;  %562 = vmatpush1.bf16.msra.mxu1 %v785_v1  ;;  %v798_v45 = vcombine.high %v292_v40, %v296_v41  ;;  %v300_v47 = vld [vmem:[%s1018_s4 + $0x118] sm:$0xff]  ;;  %v797_v49 = vcombine.low %v292_v40, %v296_v41  ;;  %v804_v50 = vcombine.high %v299_v46, %v299_v46 }
  0x3b   : > { %522 = vmatprep.subr.bf16.mxu0 %v792_v2  ;;  %563 = vmatprep.subr.bf16.mxu1 %v794_v3  ;;  %v803_v51 = vcombine.low %v299_v46, %v299_v46  ;;  %v805_v52 = vcombine.low %v300_v47, %v300_v47 }
  0x3d   : > { %v505_v53 = vsel %vm491_vm0, %v803_v51, 0  ;;  %v511_v54 = vsel %vm491_vm0, %v805_v52, 0 }
  0x3e   : > { %523 = vmatpush1.bf16.msra.mxu0 %v791_v6  ;;  %564 = vmatpush1.bf16.msra.mxu1 %v793_v7 }
  0x3f   : > { %807 = vmatprep.subr.msk.bf16.mxu0 %vm491_vm0, %v800_v8  ;;  %809 = vmatprep.subr.msk.bf16.mxu1 %vm491_vm0, %v802_v10 }
  0x42   : > { %525 = vmatpush1.bf16.msra.mxu0 %v493_v16  ;;  %566 = vmatpush1.bf16.msra.mxu1 %v499_v18 }
  0x43   : > { %598 = vmatprep.subr.bf16.mxu0 %v772_v17  ;;  %639 = vmatprep.subr.bf16.mxu1 %v774_v19 }
  0x45   : > { %808 = vmatmul.mubr.msk.bf16.vlgmr.msra.gmra.mrb[0].mxu0 %vm487_vm1, %v264_v24  ;;  %810 = vmatmul.mubr.msk.bf16.vlgmr.msra.gmra.mrb[0].mxu1 %vm487_vm1, %v264_v24 }
  0x46   : > { %599 = vmatpush1.bf16.msra.mxu0 %v771_v25  ;;  %640 = vmatpush1.bf16.msra.mxu1 %v773_v26 }
  0x47   : > { %600 = vmatprep.subr.bf16.mxu0 %v780_v27  ;;  %641 = vmatprep.subr.bf16.mxu1 %v782_v28 }
  0x48   : > { %630 = vmatprep.mubr.bf16.mxu0 %v878_v36  ;;  %671 = vmatprep.mubr.bf16.mxu1 %v878_v36  ;;  %v806_v36 = vcombine.high %v300_v47, %v300_v47 }
  0x4a   : > { %601 = vmatpush1.bf16.msra.mxu0 %v779_v33  ;;  %642 = vmatpush1.bf16.msra.mxu1 %v781_v34 }
  0x4b   : > { %602 = vmatprep.subr.bf16.mxu0 %v788_v35  ;;  %643 = vmatprep.subr.bf16.mxu1 %v790_v37 }
  0x4e   : > { %603 = vmatpush1.bf16.msra.mxu0 %v787_v42  ;;  %644 = vmatpush1.bf16.msra.mxu1 %v789_v43 }
  0x4f   : > { %604 = vmatprep.subr.bf16.mxu0 %v796_v44  ;;  %645 = vmatprep.subr.bf16.mxu1 %v798_v45 }
  0x52   : > { %605 = vmatpush1.bf16.msra.mxu0 %v795_v48  ;;  %646 = vmatpush1.bf16.msra.mxu1 %v797_v49 }
  0x53   : > { %811 = vmatprep.subr.msk.bf16.mxu0 %vm491_vm0, %v804_v50  ;;  %813 = vmatprep.subr.msk.bf16.mxu1 %vm491_vm0, %v806_v36 }
  0x56   : > { %607 = vmatpush1.bf16.msra.mxu0 %v505_v53  ;;  %648 = vmatpush1.bf16.msra.mxu1 %v511_v54 }
  0x59   : > { %812 = vmatmul.mubr.msk.bf16.vlgmr.msra.gmra.mrb[4].mxu0 %vm487_vm1, %v264_v24  ;;  %814 = vmatmul.mubr.msk.bf16.vlgmr.msra.gmra.mrb[4].mxu1 %vm487_vm1, %v264_v24 }
  0xaa   : > { %v305_v55 = vpop.permute.xlu0 %304 }
 0x118   : > { %v550_v56 = vpop.f32.mrb[0].mxu0  ;;  %v591_v57 = vpop.f32.mrb[0].mxu1 }
 0x119   : > { %v551_v58 = vadd.f32 %v550_v56, %v305_v55  ;;  %v552_v59 = vpop.f32.mrb[1].mxu0  ;;  %v592_v60 = vadd.f32 %v591_v57, %v305_v55  ;;  %v593_v62 = vpop.f32.mrb[1].mxu1 }
 0x11a   : > { %v553_v61 = vadd.f32 %v552_v59, %v305_v55  ;;  %v554_v63 = vpop.f32.mrb[2].mxu0  ;;  %v594_v1 = vadd.f32 %v593_v62, %v305_v55  ;;  %v595_v2 = vpop.f32.mrb[2].mxu1 }
 0x11b   : > { %v680_v0 = vmax.f32 %v551_v58, 0.0  ;;  %v555_v3 = vpop.f32.mrb[3].mxu0  ;;  %v682_v4 = vmax.f32 %v592_v60, 0.0  ;;  %v596_v6 = vpop.f32.mrb[3].mxu1 }
 0x11c   : > { %v681_v5 = vmax.f32 %v553_v61, 0.0  ;;  %v683_v7 = vmax.f32 %v594_v1, 0.0 }
 0x11d   : > { %688 = vst [vmem:[%s1078_s11] sm:$0xff] %v680_v0  ;;  %690 = vst [vmem:[%s1078_s11 + $0x10] sm:$0xff] %v682_v4 }
 0x11e   : > { %689 = vst [vmem:[%s1078_s11 + $0x8] sm:$0xff] %v681_v5  ;;  %691 = vst [vmem:[%s1078_s11 + $0x18] sm:$0xff] %v683_v7 }
 0x12c   : > { %v632_v8 = vpop.f32.mrb[4].mxu0  ;;  %v673_v10 = vpop.f32.mrb[4].mxu1 }
 0x12d   : > { %v633_v9 = vadd.f32 %v632_v8, %v305_v55  ;;  %v634_v11 = vpop.f32.mrb[5].mxu0  ;;  %v674_v12 = vadd.f32 %v673_v10, %v305_v55  ;;  %v675_v14 = vpop.f32.mrb[5].mxu1 }
 0x12e   : > { %v635_v13 = vadd.f32 %v634_v11, %v305_v55  ;;  %v636_v15 = vpop.f32.mrb[6].mxu0  ;;  %v676_v17 = vadd.f32 %v675_v14, %v305_v55  ;;  %v677_v18 = vpop.f32.mrb[6].mxu1 }
 0x12f   : > { %v684_v16 = vmax.f32 %v633_v9, 0.0  ;;  %v637_v19 = vpop.f32.mrb[7].mxu0  ;;  %v686_v20 = vmax.f32 %v674_v12, 0.0  ;;  %v678_v22 = vpop.f32.mrb[7].mxu1 }
 0x130   : > { %v685_v21 = vmax.f32 %v635_v13, 0.0  ;;  %v687_v23 = vmax.f32 %v676_v17, 0.0 }
 0x131   : > { %692 = vst [vmem:[%s1078_s11 + $0x20] sm:$0xff] %v684_v16  ;;  %694 = vst [vmem:[%s1078_s11 + $0x30] sm:$0xff] %v686_v20 }
 0x132   : > { %693 = vst [vmem:[%s1078_s11 + $0x28] sm:$0xff] %v685_v21  ;;  %695 = vst [vmem:[%s1078_s11 + $0x38] sm:$0xff] %v687_v23 }
 0x133 PF: > { %p10_p9 = scmp.ge.s32.totalorder %s916_s16, 4   ;;  %s1102_s12 = smov %s872_s13 }
 0x134   : > { %s1103_s13 = smov %s925_s19  ;;  %s1104_s14 = smov %s916_s16 }
 0x135   :  { %12 = sbr.rel (!%p10_p9) target bundleno = 2 (0x2), region = 90 }

// kernel: segnet_forward.37
= control target key start
LH: loop header
LB: loop body
LE: loop exit
PB: predicated region body
PF: predicated region fallthrough
CT: control target
= control target key end

     0   :  { %s496_s12 = smov 0   ;;  %s498_s13 = smov 0   ;;  %s563_s0 = inlined_call_operand.vmem [shape: f32[32,512], index: 0, kind: input, shape index: {}]   ;;  %s564_s1 = inlined_call_operand.vmem [shape: s32[1,512], index: 1, kind: input, shape index: {}]   ;;  %s565_s2 = inlined_call_operand.vmem [shape: f32[8,512], index: 2, kind: output, shape index: {0}]   ;;  %s566_s3 = inlined_call_operand.vmem [shape: s32[8,512], index: 3, kind: output, shape index: {1}]  }
   0x1   :  { %s500_s14 = smov 0  }
   0x2 LB: > { %s411_s15 = sadd.s32 4294967295, %s474_s14   ;;  %s513_s16 = sadd.s32 1, %s474_s14   ;;  %s474_s14 = sphi %s500_s14, %s569_s14   ;;  %s470_s13 = sphi %s498_s13, %s568_s13   ;;  %s466_s12 = sphi %s496_s12, %s567_s12  }
   0x3   : > { %s18_s17 = ssub.s32 %s474_s14, %s513_s16  ;;  %s21_s18 = sadd.s32 1, %s470_s13 }
   0x4   : > { %p19_p0 = scmp.eq.s32.totalorder %s18_s17, 0  ;;  %p28_p1 = scmp.ne.s32.totalorder %s470_s13, %s466_s12 }
   0x5   : > { %p29_p2 = scmp.eq.s32.totalorder %s474_s14, 0  ;;  %p414_p4 = scmp.ge.s32.totalorder %s474_s14, 2 }
   0x6   : > { %s522_s19 = scalar_select %p19_p0, %s470_s13, %s21_s18  }
   0x7   : > { %p30_p3 = por %p29_p2, %p28_p1  ;;  %132 = sbr.rel (%p414_p4) target bundleno = 22 (0x16), region = 16 }
   0xe   : > { %135 = sbr.rel (!%p30_p3) target bundleno = 22 (0x16), region = 20  ;;  %s137_s20 = sand.u32 (%p30_p3), 1, %s470_s13  }
   0xf   : > { %s427_s21 = sshll.u32 (%p30_p3), %s474_s14, 4  ;;  %s415_s22 = sshll.u32 (%p30_p3), %s137_s20, 6 }
  0x10   : > { %s142_s25 = scalar_lea.vmem (%p30_p3), %s563_s0, %s427_s21  ;;  %s139_s26 = scalar_lea.vmem (%p30_p3), [#allocation2], %s415_s22 }
  0x11   : > { %v155_v0 = vld [vmem:[%s142_s25] sm:$0xff] (%p30_p3)  ;;  %v157_v1 = vld [vmem:[%s142_s25 + $0x8] sm:$0xff] (%p30_p3) }
  0x12   : > { %v159_v2 = vld [vmem:[%s142_s25 + $0x20] sm:$0xff] (%p30_p3)  ;;  %156 = vst [vmem:[%s139_s26] sm:$0xff] (%p30_p3), %v155_v0  ;;  %158 = vst [vmem:[%s139_s26 + $0x8] sm:$0xff] (%p30_p3), %v157_v1  ;;  %v161_v3 = vld [vmem:[%s142_s25 + $0x28] sm:$0xff] (%p30_p3) }
  0x13   : > { %160 = vst [vmem:[%s139_s26 + $0x10] sm:$0xff] (%p30_p3), %v159_v2  ;;  %v163_v4 = vld [vmem:[%s142_s25 + $0x40] sm:$0xff] (%p30_p3)  ;;  %v165_v5 = vld [vmem:[%s142_s25 + $0x48] sm:$0xff] (%p30_p3)  ;;  %162 = vst [vmem:[%s139_s26 + $0x18] sm:$0xff] (%p30_p3), %v161_v3 }
  0x14   : > { %164 = vst [vmem:[%s139_s26 + $0x20] sm:$0xff] (%p30_p3), %v163_v4  ;;  %166 = vst [vmem:[%s139_s26 + $0x28] sm:$0xff] (%p30_p3), %v165_v5  ;;  %v167_v6 = vld [vmem:[%s142_s25 + $0x60] sm:$0xff] (%p30_p3)  ;;  %v169_v7 = vld [vmem:[%s142_s25 + $0x68] sm:$0xff] (%p30_p3) }
  0x15   : > { %168 = vst [vmem:[%s139_s26 + $0x30] sm:$0xff] %v167_v6  ;;  %170 = vst [vmem:[%s139_s26 + $0x38] sm:$0xff] %v169_v7 }
  0x16 PF: > { %p418_p5 = scmp.ge.s32.totalorder %s474_s14, 1  ;;  %p183_p6 = scmp.lt.s32.totalorder %s474_s14, 3 }
  0x18   : > { %p184_p7 = pnand %p418_p5, %p183_p6 }
  0x19   : > { %s190_s27 = sand.u32 (!%p184_p7), 1, %s466_s12   ;;  %s420_s28 = sshll.u32 (!%p184_p7), %s411_s15, 1  ;;  %v264_v8 = vlaneseq (!%p184_p7) }
  0x1a   : > { %187 = sbr.rel (%p184_p7) target bundleno = 46 (0x2e), region = 47  ;;  %s419_s29 = sshll.u32 (!%p184_p7), %s190_s27, 6 }
  0x1b   : > { %p224_p8 = scmp.lt.s32.totalorder (!%p184_p7), %s420_s28, 3  ;;  %v265_v9 = vshrl.u32 (!%p184_p7), %v264_v8, 7  ;;  %s192_s30 = scalar_lea.vmem (!%p184_p7), [#allocation2], %s419_s29 }
  0x1c   : > { %v240_v10 = vld [vmem:[%s192_s30] sm:$0xff] (!%p184_p7)  ;;  %v242_v11 = vld [vmem:[%s192_s30 + $0x10] sm:$0xff] (!%p184_p7)  ;;  %v241_v15 = vld [vmem:[%s192_s30 + $0x8] sm:$0xff] (!%p184_p7) }
  0x1d   : > { %v244_v12 = vld [vmem:[%s192_s30 + $0x20] sm:$0xff] (!%p184_p7)  ;;  %v246_v13 = vld [vmem:[%s192_s30 + $0x30] sm:$0xff] (!%p184_p7)  ;;  %v248_v14 = vmax.f32 (!%p184_p7), %v240_v10, %v242_v11  ;;  %v243_v16 = vld [vmem:[%s192_s30 + $0x18] sm:$0xff] (!%p184_p7)  ;;  %v266_v22 = vsub.s32 (!%p184_p7), 0, %v265_v9  ;;  %v270_v27 = vsub.s32 (!%p184_p7), 1, %v265_v9 }
  0x1e   : > { %v250_v17 = vmax.f32 (!%p184_p7), %v244_v12, %v246_v13  ;;  %v245_v18 = vld [vmem:[%s192_s30 + $0x28] sm:$0xff] (!%p184_p7)  ;;  %v247_v19 = vld [vmem:[%s192_s30 + $0x38] sm:$0xff] (!%p184_p7)  ;;  %v249_v20 = vmax.f32 (!%p184_p7), %v241_v15, %v243_v16 }
  0x1f   : > { %v251_v23 = vmax.f32 (!%p184_p7), %v245_v18, %v247_v19 }
  0x20   : > { %v252_v24 = vmax.f32 (!%p184_p7), %v248_v14, %v250_v17 }
  0x21   : > { %s571_s28 = smov (!%p224_p8, %s420_s28), 3  ;;  %v253_v28 = vmax.f32 %v249_v20, %v251_v23 }
  0x22   : > { %s226_s6 = scalar_lea.vmem %s564_s1, %s571_s28  ;;  %s422_s7 = sshll.u32 %s571_s28, 3  ;;  %vm257_vm0 = vcmp.eq.f32.partialorder %v242_v11, %v252_v24  ;;  %vm260_vm1 = vcmp.eq.f32.partialorder %v244_v12, %v252_v24  ;;  %vm255_vm4 = vcmp.eq.f32.partialorder %v240_v10, %v252_v24 }
  0x23   : > { %s232_s10 = scalar_lea.vmem %s565_s2, %s422_s7  ;;  %v254_v21 = vld [vmem:[%s226_s6] sm:$0x3]  ;;  %vm258_vm2 = vcmp.eq.f32.partialorder %v243_v16, %v253_v28  ;;  %vm261_vm3 = vcmp.eq.f32.partialorder %v245_v18, %v253_v28  ;;  %vm256_vm5 = vcmp.eq.f32.partialorder %v241_v15, %v253_v28  ;;  %s238_s14 = scalar_lea.vmem %s566_s3, %s422_s7 }
  0x24   : > { %v262_v25 = vadd.s32 32, %v254_v21  ;;  %v259_v26 = vadd.s32 1, %v254_v21  ;;  %302 = vst [vmem:[%s232_s10] sm:$0xff] %v252_v24  ;;  %v295_v30 = vrot.slane %v254_v21, %v266_v22  ;;  %v299_v31 = vrot.slane %v254_v21, %v270_v27  ;;  %303 = vst [vmem:[%s232_s10 + $0x8] sm:$0xff] %v253_v28 }
  0x26   : > { %v263_v29 = vadd.s32 1, %v262_v25  ;;  %v267_v32 = vrot.slane %v262_v25, %v266_v22  ;;  %v285_v33 = vrot.slane %v259_v26, %v266_v22  ;;  %v271_v35 = vrot.slane %v262_v25, %v270_v27 }
  0x27   : > { %v289_v37 = vrot.slane %v259_v26, %v270_v27 }
  0x28   : > { %v275_v34 = vrot.slane %v263_v29, %v266_v22  ;;  %v279_v36 = vrot.slane %v263_v29, %v270_v27 }
  0x2a   : > { %v280_v38 = vsel %vm260_vm1, %v267_v32, %v275_v34  ;;  %v281_v39 = vsel %vm261_vm3, %v271_v35, %v279_v36 }
  0x2b   : > { %v290_v40 = vsel %vm257_vm0, %v285_v33, %v280_v38  ;;  %v291_v41 = vsel %vm258_vm2, %v289_v37, %v281_v39 }
  0x2c   : > { %v300_v42 = vsel %vm255_vm4, %v295_v30, %v290_v40  ;;  %v301_v43 = vsel %vm256_vm5, %v299_v31, %v291_v41 }
  0x2d   : > { %304 = vst [vmem:[%s238_s14] sm:$0xff] %v300_v42  ;;  %305 = vst [vmem:[%s238_s14 + $0x8] sm:$0xff] %v301_v43 }
  0x2e PF: > { %p11_p9 = scmp.ge.s32.totalorder %s513_s16, 4   ;;  %s567_s12 = smov %s470_s13 }
  0x2f   : > { %s568_s13 = smov %s522_s19  ;;  %s569_s14 = smov %s513_s16 }
  0x30   :  { %13 = sbr.rel (!%p11_p9) target bundleno = 2 (0x2), region = 101 }

// kernel: segnet_forward.38
= control target key start
LH: loop header
LB: loop body
LE: loop exit
PB: predicated region body
PF: predicated region fallthrough
CT: control target
= control target key end

     0   :  { %v321_v1 = vmov 0   ;;  %vm146_vm0 = vcmask 1043456   ;;  %vm142_vm1 = vcmask 588800   ;;  %s429_s1 = inlined_call_operand.vmem [shape: bf16[72,512], index: 1, kind: input, shape index: {}]   ;;  %s430_s2 = inlined_call_operand.vmem [shape: f32[16,1], index: 2, kind: input, shape index: {}]   ;;  %s431_s0 = inlined_call_operand.vmem [shape: bf16[16,72], index: 0, kind: input, shape index: {}]   ;;  %s432_s3 = inlined_call_operand.vmem [shape: f32[16,512], index: 3, kind: output, shape index: {}]  }
   0x1   :  { %v292_v0 = vld [vmem:[%s429_s1 + $0x4] ss:$16 sps:$4 sm:$0xff]   ;;  %191 = vmatprep.mubr.bf16.mxu0 %v321_v1  ;;  %234 = vmatprep.mubr.bf16.mxu1 %v321_v1  ;;  %v294_v2 = vld [vmem:[%s429_s1 + $0xc] ss:$16 sps:$4 sm:$0xff]   ;;  %v296_v3 = vld [vmem:[%s429_s1] ss:$16 sps:$4 sm:$0xff]  }
   0x2   :  { %291 = vset.pattern.permute.xlu0 %v321_v1  ;;  %159 = vmatprep.subr.bf16.mxu0 %v292_v0  ;;  %v297_v4 = vld [vmem:[%s429_s1 + $0x8] ss:$16 sps:$4 sm:$0xff]   ;;  %v298_v5 = vld [vmem:[%s429_s1 + $0x24] ss:$16 sps:$4 sm:$0xff]   ;;  %v300_v6 = vld [vmem:[%s429_s1 + $0x2c] ss:$16 sps:$4 sm:$0xff]  }
   0x3   :  { %202 = vmatprep.subr.bf16.mxu1 %v294_v2  ;;  %160 = vmatpush1.bf16.msra.mxu0 %v296_v3  ;;  %v302_v7 = vld [vmem:[%s429_s1 + $0x20] ss:$16 sps:$4 sm:$0xff]   ;;  %v303_v8 = vld [vmem:[%s429_s1 + $0x28] ss:$16 sps:$4 sm:$0xff]   ;;  %v304_v9 = vld [vmem:[%s429_s1 + $0x44] ss:$16 sps:$4 sm:$0xff]  }
   0x4   :  { %203 = vmatpush1.bf16.msra.mxu1 %v297_v4  ;;  %161 = vmatprep.subr.bf16.mxu0 %v298_v5  ;;  %v306_v10 = vld [vmem:[%s429_s1 + $0x4c] ss:$16 sps:$4 sm:$0xff]   ;;  %v308_v11 = vld [vmem:[%s429_s1 + $0x40] ss:$16 sps:$4 sm:$0xff]   ;;  %v309_v12 = vld [vmem:[%s429_s1 + $0x48] ss:$16 sps:$4 sm:$0xff]  }
   0x5   :  { %204 = vmatprep.subr.bf16.mxu1 %v300_v6  ;;  %v310_v13 = vld [vmem:[%s429_s1 + $0x64] ss:$16 sps:$4 sm:$0xff]   ;;  %v312_v14 = vld [vmem:[%s429_s1 + $0x6c] ss:$16 sps:$4 sm:$0xff]   ;;  %v314_v17 = vld [vmem:[%s429_s1 + $0x60] ss:$16 sps:$4 sm:$0xff]  }
   0x6   :  { %v33_v15 = vld [vmem:[%s429_s1 + $0x80] sm:$0xff]  ;;  %v34_v16 = vld [vmem:[%s429_s1 + $0x88] sm:$0xff] }
   0x7   :  { %162 = vmatpush1.bf16.msra.mxu0 %v302_v7  ;;  %v315_v18 = vld [vmem:[%s429_s1 + $0x68] ss:$16 sps:$4 sm:$0xff]   ;;  %v283_v19 = vcombine.high %v33_v15, %v33_v15  ;;  %v35_v20 = vld [vmem:[%s430_s2] sm:$0xff]  ;;  %v285_v21 = vcombine.high %v34_v16, %v34_v16  ;;  %v282_v22 = vcombine.low %v33_v15, %v33_v15  ;;  %v284_v23 = vcombine.low %v34_v16, %v34_v16 }
   0x8   :  { %205 = vmatpush1.bf16.msra.mxu1 %v303_v8  ;;  %163 = vmatprep.subr.bf16.mxu0 %v304_v9  ;;  %v36_v24 = vld [vmem:[%s430_s2 + $0x8] sm:$0xff]  ;;  %v320_v27 = vld [vmem:[%s431_s0] sm:$0xff]  }
   0x9   :  { %206 = vmatprep.subr.bf16.mxu1 %v306_v10  ;;  %39 = vperm.xlu0 %291, %v35_v20   ;;  %v148_v25 = vsel %vm146_vm0, %v282_v22, 0  ;;  %v154_v26 = vsel %vm146_vm0, %v284_v23, 0 }
   0xb   :  { %164 = vmatpush1.bf16.msra.mxu0 %v308_v11 }
   0xc   :  { %207 = vmatpush1.bf16.msra.mxu1 %v309_v12  ;;  %165 = vmatprep.subr.bf16.mxu0 %v310_v13 }
   0xd   :  { %208 = vmatprep.subr.bf16.mxu1 %v312_v14  ;;  %44 = vperm.xlu0 %291, %v36_v24  }
   0xf   :  { %166 = vmatpush1.bf16.msra.mxu0 %v314_v17 }
  0x10   :  { %209 = vmatpush1.bf16.msra.mxu1 %v315_v18  ;;  %286 = vmatprep.subr.msk.bf16.mxu0 %vm146_vm0, %v283_v19 }
  0x11   :  { %288 = vmatprep.subr.msk.bf16.mxu1 %vm146_vm0, %v285_v21 }
  0x13   :  { %168 = vmatpush1.bf16.msra.mxu0 %v148_v25 }
  0x14   :  { %211 = vmatpush1.bf16.msra.mxu1 %v154_v26 }
  0x16   :  { %287 = vmatmul.mubr.msk.bf16.vlgmr.msra.gmra.mrb[0].mxu0 %vm142_vm1, %v320_v27 }
  0x17   :  { %289 = vmatmul.mubr.msk.bf16.vlgmr.msra.gmra.mrb[0].mxu1 %vm142_vm1, %v320_v27 }
  0x88   :  { %v40_v28 = vpop.permute.xlu0 %39 }
  0x8c   :  { %v45_v29 = vpop.permute.xlu0 %44 }
  0xe9   :  { %v193_v30 = vpop.f32.mrb[0].mxu0 }
  0xea   :  { %v236_v31 = vpop.f32.mrb[0].mxu1  ;;  %v194_v32 = vadd.f32 %v193_v30, %v40_v28  ;;  %v195_v34 = vpop.f32.mrb[1].mxu0 }
  0xeb   :  { %v237_v33 = vadd.f32 %v236_v31, %v40_v28  ;;  %v238_v35 = vpop.f32.mrb[1].mxu1  ;;  %v196_v36 = vadd.f32 %v195_v34, %v40_v28  ;;  %v197_v38 = vpop.f32.mrb[2].mxu0 }
  0xec   :  { %v239_v37 = vadd.f32 %v238_v35, %v40_v28  ;;  %v240_v39 = vpop.f32.mrb[2].mxu1  ;;  %v245_v40 = vmax.f32 %v194_v32, 0.0  ;;  %v198_v42 = vadd.f32 %v197_v38, %v45_v29  ;;  %v199_v44 = vpop.f32.mrb[3].mxu0 }
  0xed   :  { %v247_v41 = vmax.f32 %v237_v33, 0.0  ;;  %v241_v43 = vadd.f32 %v240_v39, %v45_v29  ;;  %v242_v45 = vpop.f32.mrb[3].mxu1  ;;  %v246_v46 = vmax.f32 %v196_v36, 0.0  ;;  %v200_v48 = vadd.f32 %v199_v44, %v45_v29 }
  0xee   :  { %v248_v47 = vmax.f32 %v239_v37, 0.0  ;;  %v243_v49 = vadd.f32 %v242_v45, %v45_v29  ;;  %253 = vst [vmem:[%s432_s3] sm:$0xff] %v245_v40  ;;  %v249_v50 = vmax.f32 %v198_v42, 0.0 }
  0xef   :  { %255 = vst [vmem:[%s432_s3 + $0x10] sm:$0xff] %v247_v41  ;;  %v251_v51 = vmax.f32 %v241_v43, 0.0  ;;  %254 = vst [vmem:[%s432_s3 + $0x8] sm:$0xff] %v246_v46  ;;  %v250_v52 = vmax.f32 %v200_v48, 0.0 }
  0xf0   :  { %256 = vst [vmem:[%s432_s3 + $0x18] sm:$0xff] %v248_v47  ;;  %v252_v53 = vmax.f32 %v243_v49, 0.0  ;;  %257 = vst [vmem:[%s432_s3 + $0x20] sm:$0xff] %v249_v50 }
  0xf1   :  { %259 = vst [vmem:[%s432_s3 + $0x30] sm:$0xff] %v251_v51  ;;  %258 = vst [vmem:[%s432_s3 + $0x28] sm:$0xff] %v250_v52 }
  0xf2   :  { %260 = vst [vmem:[%s432_s3 + $0x38] sm:$0xff] %v252_v53 }

// kernel: segnet_forward.39
= control target key start
LH: loop header
LB: loop body
LE: loop exit
PB: predicated region body
PF: predicated region fallthrough
CT: control target
= control target key end

     0   :  { %v463_v1 = vmov 0   ;;  %vm254_vm0 = vcmask 130048   ;;  %s628_s1 = inlined_call_operand.vmem [shape: bf16[144,512], index: 1, kind: input, shape index: {}]   ;;  %s629_s0 = inlined_call_operand.vmem [shape: bf16[16,144], index: 0, kind: input, shape index: {}]   ;;  %s630_s2 = inlined_call_operand.vmem [shape: f32[16,1], index: 2, kind: input, shape index: {}]   ;;  %s631_s3 = inlined_call_operand.vmem [shape: f32[16,512], index: 3, kind: output, shape index: {}]  }
   0x1   :  { %v406_v0 = vld [vmem:[%s628_s1 + $0x4] ss:$16 sps:$4 sm:$0xff]   ;;  %405 = vset.pattern.permute.xlu0 %v463_v1  ;;  %v408_v2 = vld [vmem:[%s628_s1 + $0xc] ss:$16 sps:$4 sm:$0xff]   ;;  %v410_v3 = vld [vmem:[%s628_s1] ss:$16 sps:$4 sm:$0xff]  }
   0x2   :  { %258 = vmatprep.subr.bf16.mxu0 %v406_v0  ;;  %v411_v4 = vld [vmem:[%s628_s1 + $0x8] ss:$16 sps:$4 sm:$0xff]   ;;  %301 = vmatprep.subr.bf16.mxu1 %v408_v2  ;;  %v412_v5 = vld [vmem:[%s628_s1 + $0x24] ss:$16 sps:$4 sm:$0xff]   ;;  %v414_v6 = vld [vmem:[%s628_s1 + $0x2c] ss:$16 sps:$4 sm:$0xff]  }
   0x3   :  { %259 = vmatpush1.bf16.msra.mxu0 %v410_v3  ;;  %302 = vmatpush1.bf16.msra.mxu1 %v411_v4  ;;  %v416_v7 = vld [vmem:[%s628_s1 + $0x20] ss:$16 sps:$4 sm:$0xff]   ;;  %v417_v8 = vld [vmem:[%s628_s1 + $0x28] ss:$16 sps:$4 sm:$0xff]   ;;  %v418_v9 = vld [vmem:[%s628_s1 + $0x44] ss:$16 sps:$4 sm:$0xff]  }
   0x4   :  { %260 = vmatprep.subr.bf16.mxu0 %v412_v5  ;;  %303 = vmatprep.subr.bf16.mxu1 %v414_v6  ;;  %v420_v10 = vld [vmem:[%s628_s1 + $0x4c] ss:$16 sps:$4 sm:$0xff]   ;;  %v422_v11 = vld [vmem:[%s628_s1 + $0x40] ss:$16 sps:$4 sm:$0xff]   ;;  %v423_v12 = vld [vmem:[%s628_s1 + $0x48] ss:$16 sps:$4 sm:$0xff]  }
   0x5   :  { %v424_v13 = vld [vmem:[%s628_s1 + $0x64] ss:$16 sps:$4 sm:$0xff]   ;;  %v426_v14 = vld [vmem:[%s628_s1 + $0x6c] ss:$16 sps:$4 sm:$0xff]   ;;  %v428_v15 = vld [vmem:[%s628_s1 + $0x60] ss:$16 sps:$4 sm:$0xff]  }
   0x6   :  { %v429_v16 = vld [vmem:[%s628_s1 + $0x68] ss:$16 sps:$4 sm:$0xff]   ;;  %v430_v17 = vld [vmem:[%s628_s1 + $0x84] ss:$16 sps:$4 sm:$0xff]   ;;  %v432_v18 = vld [vmem:[%s628_s1 + $0x8c] ss:$16 sps:$4 sm:$0xff]  }
   0x7   :  { %261 = vmatpush1.bf16.msra.mxu0 %v416_v7  ;;  %304 = vmatpush1.bf16.msra.mxu1 %v417_v8  ;;  %v434_v19 = vld [vmem:[%s628_s1 + $0x80] ss:$16 sps:$4 sm:$0xff]   ;;  %v435_v20 = vld [vmem:[%s628_s1 + $0x88] ss:$16 sps:$4 sm:$0xff]   ;;  %v436_v21 = vld [vmem:[%s628_s1 + $0xa4] ss:$16 sps:$4 sm:$0xff]  }
   0x8   :  { %262 = vmatprep.subr.bf16.mxu0 %v418_v9  ;;  %305 = vmatprep.subr.bf16.mxu1 %v420_v10  ;;  %v438_v22 = vld [vmem:[%s628_s1 + $0xac] ss:$16 sps:$4 sm:$0xff]   ;;  %v440_v23 = vld [vmem:[%s628_s1 + $0xa0] ss:$16 sps:$4 sm:$0xff]   ;;  %v441_v24 = vld [vmem:[%s628_s1 + $0xa8] ss:$16 sps:$4 sm:$0xff]  }
   0x9   :  { %v442_v25 = vld [vmem:[%s628_s1 + $0xc4] ss:$16 sps:$4 sm:$0xff]   ;;  %v444_v26 = vld [vmem:[%s628_s1 + $0xcc] ss:$16 sps:$4 sm:$0xff]   ;;  %v446_v27 = vld [vmem:[%s628_s1 + $0xc0] ss:$16 sps:$4 sm:$0xff]  }
   0xa   :  { %v447_v28 = vld [vmem:[%s628_s1 + $0xc8] ss:$16 sps:$4 sm:$0xff]   ;;  %v448_v29 = vld [vmem:[%s628_s1 + $0xe4] ss:$16 sps:$4 sm:$0xff]   ;;  %v450_v30 = vld [vmem:[%s628_s1 + $0xec] ss:$16 sps:$4 sm:$0xff]  }
   0xb   :  { %263 = vmatpush1.bf16.msra.mxu0 %v422_v11  ;;  %306 = vmatpush1.bf16.msra.mxu1 %v423_v12  ;;  %v462_v31 = vld [vmem:[%s629_s0 + $0x4] ss:$8 sps:$4 sm:$0xff]   ;;  %v452_v34 = vld [vmem:[%s628_s1 + $0xe0] ss:$16 sps:$4 sm:$0xff]   ;;  %v453_v35 = vld [vmem:[%s628_s1 + $0xe8] ss:$16 sps:$4 sm:$0xff]  }
   0xc   :  { %264 = vmatprep.subr.bf16.mxu0 %v424_v13  ;;  %307 = vmatprep.subr.bf16.mxu1 %v426_v14  ;;  %v53_v32 = vld [vmem:[%s630_s2] sm:$0xff]  ;;  %v54_v33 = vld [vmem:[%s630_s2 + $0x8] sm:$0xff] }
   0xd   :  { %57 = vperm.xlu0 %405, %v53_v32   ;;  %402 = vmatprep.mubr.msk.bf16.mxu0 %vm254_vm0, %v462_v31  ;;  %v454_v36 = vld [vmem:[%s628_s1 + $0x104] ss:$16 sps:$4 sm:$0xff]   ;;  %v456_v37 = vld [vmem:[%s628_s1 + $0x10c] ss:$16 sps:$4 sm:$0xff]   ;;  %v458_v38 = vld [vmem:[%s628_s1 + $0x100] ss:$16 sps:$4 sm:$0xff]  }
   0xe   :  { %403 = vmatprep.mubr.msk.bf16.mxu1 %vm254_vm0, %v462_v31  ;;  %v459_v39 = vld [vmem:[%s628_s1 + $0x108] ss:$16 sps:$4 sm:$0xff]  }
   0xf   :  { %265 = vmatpush1.bf16.msra.mxu0 %v428_v15  ;;  %308 = vmatpush1.bf16.msra.mxu1 %v429_v16  ;;  %v460_v40 = vld [vmem:[%s629_s0] ss:$8 sps:$4 sm:$0xff]  }
  0x10   :  { %266 = vmatprep.subr.bf16.mxu0 %v430_v17  ;;  %309 = vmatprep.subr.bf16.mxu1 %v432_v18 }
  0x11   :  { %62 = vperm.xlu0 %405, %v54_v33  }
  0x13   :  { %267 = vmatpush1.bf16.msra.mxu0 %v434_v19  ;;  %310 = vmatpush1.bf16.msra.mxu1 %v435_v20 }
  0x14   :  { %268 = vmatprep.subr.bf16.mxu0 %v436_v21  ;;  %311 = vmatprep.subr.bf16.mxu1 %v438_v22 }
  0x17   :  { %269 = vmatpush1.bf16.msra.mxu0 %v440_v23  ;;  %312 = vmatpush1.bf16.msra.mxu1 %v441_v24 }
  0x18   :  { %270 = vmatprep.subr.bf16.mxu0 %v442_v25  ;;  %313 = vmatprep.subr.bf16.mxu1 %v444_v26 }
  0x1b   :  { %271 = vmatpush1.bf16.msra.mxu0 %v446_v27  ;;  %314 = vmatpush1.bf16.msra.mxu1 %v447_v28 }
  0x1c   :  { %272 = vmatprep.subr.bf16.mxu0 %v448_v29  ;;  %315 = vmatprep.subr.bf16.mxu1 %v450_v30 }
  0x1f   :  { %273 = vmatpush1.bf16.msra.mxu0 %v452_v34  ;;  %316 = vmatpush1.bf16.msra.mxu1 %v453_v35 }
  0x20   :  { %274 = vmatprep.subr.bf16.mxu0 %v454_v36  ;;  %317 = vmatprep.subr.bf16.mxu1 %v456_v37 }
  0x23   :  { %275 = vmatpush1.bf16.msra.mxu0 %v458_v38  ;;  %318 = vmatpush1.bf16.msra.mxu1 %v459_v39 }
  0x26   :  { %291 = vmatmul.mubr.bf16.vlgmr.msra.gmra.mrb[0].mxu0 %v460_v40  ;;  %334 = vmatmul.mubr.bf16.vlgmr.msra.gmra.mrb[0].mxu1 %v460_v40 }
  0x8c   :  { %v58_v41 = vpop.permute.xlu0 %57 }
  0x90   :  { %v63_v42 = vpop.permute.xlu0 %62 }
  0xf9   :  { %v292_v43 = vpop.f32.mrb[0].mxu0  ;;  %v335_v44 = vpop.f32.mrb[0].mxu1 }
  0xfa   :  { %v293_v45 = vadd.f32 %v292_v43, %v58_v41  ;;  %v336_v46 = vadd.f32 %v335_v44, %v58_v41  ;;  %v294_v47 = vpop.f32.mrb[1].mxu0  ;;  %v337_v48 = vpop.f32.mrb[1].mxu1 }
  0xfb   :  { %v295_v49 = vadd.f32 %v294_v47, %v58_v41  ;;  %v338_v50 = vadd.f32 %v337_v48, %v58_v41  ;;  %v296_v51 = vpop.f32.mrb[2].mxu0  ;;  %v339_v52 = vpop.f32.mrb[2].mxu1 }
  0xfc   :  { %v344_v53 = vmax.f32 %v293_v45, 0.0  ;;  %v346_v54 = vmax.f32 %v336_v46, 0.0  ;;  %v297_v55 = vadd.f32 %v296_v51, %v63_v42  ;;  %v340_v56 = vadd.f32 %v339_v52, %v63_v42  ;;  %v298_v57 = vpop.f32.mrb[3].mxu0  ;;  %v341_v58 = vpop.f32.mrb[3].mxu1 }
  0xfd   :  { %v345_v59 = vmax.f32 %v295_v49, 0.0  ;;  %v347_v60 = vmax.f32 %v338_v50, 0.0  ;;  %v299_v61 = vadd.f32 %v298_v57, %v63_v42  ;;  %v342_v62 = vadd.f32 %v341_v58, %v63_v42 }
  0xfe   :  { %352 = vst [vmem:[%s631_s3] sm:$0xff] %v344_v53  ;;  %354 = vst [vmem:[%s631_s3 + $0x10] sm:$0xff] %v346_v54  ;;  %v348_v63 = vmax.f32 %v297_v55, 0.0  ;;  %v350_v0 = vmax.f32 %v340_v56, 0.0 }
  0xff   :  { %353 = vst [vmem:[%s631_s3 + $0x8] sm:$0xff] %v345_v59  ;;  %355 = vst [vmem:[%s631_s3 + $0x18] sm:$0xff] %v347_v60  ;;  %v349_v1 = vmax.f32 %v299_v61, 0.0  ;;  %v351_v2 = vmax.f32 %v342_v62, 0.0 }
 0x100   :  { %356 = vst [vmem:[%s631_s3 + $0x20] sm:$0xff] %v348_v63  ;;  %358 = vst [vmem:[%s631_s3 + $0x30] sm:$0xff] %v350_v0 }
 0x101   :  { %357 = vst [vmem:[%s631_s3 + $0x28] sm:$0xff] %v349_v1  ;;  %359 = vst [vmem:[%s631_s3 + $0x38] sm:$0xff] %v351_v2 }

// kernel: segnet_forward.40
= control target key start
LH: loop header
LB: loop body
LE: loop exit
PB: predicated region body
PF: predicated region fallthrough
CT: control target
= control target key end

     0   :  { %v37_v0 = vlaneseq  ;;  %s130_s0 = inlined_call_operand.vmem [shape: f32[64,128], index: 0, kind: input, shape index: {}]   ;;  %s131_s1 = inlined_call_operand.vmem [shape: s32[1,128], index: 1, kind: input, shape index: {}]   ;;  %s132_s2 = inlined_call_operand.vmem [shape: f32[16,128], index: 2, kind: output, shape index: {0}]   ;;  %s133_s3 = inlined_call_operand.vmem [shape: s32[16,128], index: 3, kind: output, shape index: {1}]  }
   0x1   :  { %v13_v1 = vld [vmem:[%s130_s0] sm:$0xff]  ;;  %v15_v2 = vld [vmem:[%s130_s0 + $0x10] sm:$0xff]  ;;  %v14_v6 = vld [vmem:[%s130_s0 + $0x8] sm:$0xff] }
   0x2   :  { %v17_v3 = vld [vmem:[%s130_s0 + $0x20] sm:$0xff]  ;;  %v19_v4 = vld [vmem:[%s130_s0 + $0x30] sm:$0xff]  ;;  %v21_v5 = vmax.f32 %v13_v1, %v15_v2  ;;  %v16_v7 = vld [vmem:[%s130_s0 + $0x18] sm:$0xff]  ;;  %v38_v8 = vshrl.u32 %v37_v0, 7 }
   0x3   :  { %v23_v9 = vmax.f32 %v17_v3, %v19_v4  ;;  %v18_v10 = vld [vmem:[%s130_s0 + $0x28] sm:$0xff]  ;;  %v20_v11 = vld [vmem:[%s130_s0 + $0x38] sm:$0xff]  ;;  %v22_v12 = vmax.f32 %v14_v6, %v16_v7  ;;  %v27_v13 = vld [vmem:[%s131_s1] sm:$0x1] }
   0x4   :  { %v24_v14 = vmax.f32 %v18_v10, %v20_v11  ;;  %v32_v15 = vadd.s32 1, %v27_v13  ;;  %v35_v16 = vadd.s32 16, %v27_v13  ;;  %v39_v17 = vsub.s32 0, %v38_v8 }
   0x5   :  { %v25_v18 = vmax.f32 %v21_v5, %v23_v9 }
   0x6   :  { %v26_v19 = vmax.f32 %v22_v12, %v24_v14  ;;  %v36_v20 = vadd.s32 1, %v35_v16  ;;  %v40_v21 = vrot.slane %v35_v16, %v39_v17  ;;  %v50_v22 = vrot.slane %v32_v15, %v39_v17 }
   0x7   :  { %59 = vst [vmem:[%s132_s2] sm:$0xff] %v25_v18  ;;  %vm30_vm0 = vcmp.eq.f32.partialorder %v15_v2, %v25_v18  ;;  %vm33_vm1 = vcmp.eq.f32.partialorder %v17_v3, %v25_v18  ;;  %v56_v24 = vrot.slane %v27_v13, %v39_v17  ;;  %vm28_vm4 = vcmp.eq.f32.partialorder %v13_v1, %v25_v18 }
   0x8   :  { %60 = vst [vmem:[%s132_s2 + $0x8] sm:$0xff] %v26_v19  ;;  %v44_v23 = vrot.slane %v36_v20, %v39_v17  ;;  %vm31_vm2 = vcmp.eq.f32.partialorder %v16_v7, %v26_v19  ;;  %vm34_vm3 = vcmp.eq.f32.partialorder %v18_v10, %v26_v19  ;;  %vm29_vm5 = vcmp.eq.f32.partialorder %v14_v6, %v26_v19 }
   0xa   :  { %v45_v25 = vsel %vm33_vm1, %v40_v21, %v44_v23  ;;  %v46_v26 = vsel %vm34_vm3, %v40_v21, %v44_v23 }
   0xb   :  { %v51_v27 = vsel %vm30_vm0, %v50_v22, %v45_v25  ;;  %v52_v28 = vsel %vm31_vm2, %v50_v22, %v46_v26 }
   0xc   :  { %v57_v29 = vsel %vm28_vm4, %v56_v24, %v51_v27  ;;  %v58_v30 = vsel %vm29_vm5, %v56_v24, %v52_v28 }
   0xd   :  { %61 = vst [vmem:[%s133_s3] sm:$0xff] %v57_v29  ;;  %62 = vst [vmem:[%s133_s3 + $0x8] sm:$0xff] %v58_v30 }

// kernel: segnet_forward.41
= control target key start
LH: loop header
LB: loop body
LE: loop exit
PB: predicated region body
PF: predicated region fallthrough
CT: control target
= control target key end

     0   :  { %v252_v0 = vmov 0   ;;  %vm133_vm0 = vcmask 130048   ;;  %s336_s1 = inlined_call_operand.vmem [shape: bf16[144,128], index: 1, kind: input, shape index: {}]   ;;  %s337_s0 = inlined_call_operand.vmem [shape: bf16[32,144], index: 0, kind: input, shape index: {}]   ;;  %s338_s2 = inlined_call_operand.vmem [shape: f32[32,1], index: 2, kind: input, shape index: {}]   ;;  %s339_s3 = inlined_call_operand.vmem [shape: f32[32,128], index: 3, kind: output, shape index: {}]  }
   0x1   :  { %140 = vmatprep.subr.bf16.mxu0 %v252_v0  ;;  %216 = vmatprep.subr.bf16.mxu1 %v252_v0  ;;  %v237_v1 = vld [vmem:[%s336_s1] sm:$0xff]   ;;  %v238_v2 = vld [vmem:[%s336_s1 + $0x8] sm:$0xff]   ;;  %v239_v3 = vld [vmem:[%s336_s1 + $0x10] sm:$0xff]  }
   0x2   :  { %236 = vset.pattern.permute.xlu1 %v252_v0  ;;  %235 = vset.pattern.permute.xlu0 %v252_v0  ;;  %v240_v4 = vld [vmem:[%s336_s1 + $0x18] sm:$0xff]   ;;  %v248_v5 = vld [vmem:[%s337_s0 + $0x4] ss:$8 sps:$4 sm:$0xff]   ;;  %v39_v7 = vld [vmem:[%s338_s2 + $0x10] sm:$0xff] }
   0x3   :  { %141 = vmatpush1.bf16.msra.mxu0 %v237_v1  ;;  %225 = vmatpush1.bf16.msra.mxu1 %v237_v1  ;;  %v251_v6 = vld [vmem:[%s337_s0 + $0x14] ss:$8 sps:$4 sm:$0xff]   ;;  %v37_v8 = vld [vmem:[%s338_s2] sm:$0xff]  ;;  %v38_v11 = vld [vmem:[%s338_s2 + $0x8] sm:$0xff] }
   0x4   :  { %142 = vmatprep.subr.bf16.mxu0 %v252_v0  ;;  %217 = vmatprep.subr.bf16.mxu1 %v252_v0  ;;  %v40_v9 = vld [vmem:[%s338_s2 + $0x18] sm:$0xff]  ;;  %v241_v10 = vld [vmem:[%s336_s1 + $0x20] sm:$0xff]   ;;  %v242_v12 = vld [vmem:[%s336_s1 + $0x28] sm:$0xff]  }
   0x5   :  { %214 = vmatprep.mubr.msk.bf16.mxu0 %vm133_vm0, %v248_v5  ;;  %53 = vperm.xlu1 %236, %v39_v7   ;;  %v243_v13 = vld [vmem:[%s336_s1 + $0x30] sm:$0xff]   ;;  %v244_v14 = vld [vmem:[%s336_s1 + $0x38] sm:$0xff]   ;;  %v245_v15 = vld [vmem:[%s336_s1 + $0x40] sm:$0xff]  }
   0x6   :  { %215 = vmatprep.mubr.msk.bf16.mxu1 %vm133_vm0, %v251_v6  ;;  %43 = vperm.xlu0 %235, %v37_v8   ;;  %v246_v16 = vld [vmem:[%s337_s0] ss:$8 sps:$4 sm:$0xff]   ;;  %v249_v17 = vld [vmem:[%s337_s0 + $0x10] ss:$8 sps:$4 sm:$0xff]  }
   0x7   :  { %143 = vmatpush1.bf16.msra.mxu0 %v238_v2  ;;  %226 = vmatpush1.bf16.msra.mxu1 %v238_v2 }
   0x8   :  { %144 = vmatprep.subr.bf16.mxu0 %v252_v0  ;;  %218 = vmatprep.subr.bf16.mxu1 %v252_v0 }
   0x9   :  { %58 = vperm.xlu1 %236, %v40_v9  }
   0xa   :  { %48 = vperm.xlu0 %235, %v38_v11  }
   0xb   :  { %145 = vmatpush1.bf16.msra.mxu0 %v239_v3  ;;  %227 = vmatpush1.bf16.msra.mxu1 %v239_v3 }
   0xc   :  { %146 = vmatprep.subr.bf16.mxu0 %v252_v0  ;;  %219 = vmatprep.subr.bf16.mxu1 %v252_v0 }
   0xf   :  { %147 = vmatpush1.bf16.msra.mxu0 %v240_v4  ;;  %228 = vmatpush1.bf16.msra.mxu1 %v240_v4 }
  0x10   :  { %148 = vmatprep.subr.bf16.mxu0 %v252_v0  ;;  %220 = vmatprep.subr.bf16.mxu1 %v252_v0 }
  0x13   :  { %149 = vmatpush1.bf16.msra.mxu0 %v241_v10  ;;  %229 = vmatpush1.bf16.msra.mxu1 %v241_v10 }
  0x14   :  { %150 = vmatprep.subr.bf16.mxu0 %v252_v0  ;;  %221 = vmatprep.subr.bf16.mxu1 %v252_v0 }
  0x17   :  { %151 = vmatpush1.bf16.msra.mxu0 %v242_v12  ;;  %230 = vmatpush1.bf16.msra.mxu1 %v242_v12 }
  0x18   :  { %152 = vmatprep.subr.bf16.mxu0 %v252_v0  ;;  %222 = vmatprep.subr.bf16.mxu1 %v252_v0 }
  0x1b   :  { %153 = vmatpush1.bf16.msra.mxu0 %v243_v13  ;;  %231 = vmatpush1.bf16.msra.mxu1 %v243_v13 }
  0x1c   :  { %154 = vmatprep.subr.bf16.mxu0 %v252_v0  ;;  %223 = vmatprep.subr.bf16.mxu1 %v252_v0 }
  0x1f   :  { %155 = vmatpush1.bf16.msra.mxu0 %v244_v14  ;;  %232 = vmatpush1.bf16.msra.mxu1 %v244_v14 }
  0x20   :  { %156 = vmatprep.subr.bf16.mxu0 %v252_v0  ;;  %224 = vmatprep.subr.bf16.mxu1 %v252_v0 }
  0x23   :  { %157 = vmatpush1.bf16.msra.mxu0 %v245_v15  ;;  %233 = vmatpush1.bf16.msra.mxu1 %v245_v15 }
  0x26   :  { %173 = vmatmul.mubr.bf16.vlgmr.msra.gmra.mrb[0].mxu0 %v246_v16  ;;  %181 = vmatmul.mubr.bf16.vlgmr.msra.gmra.mrb[0].mxu1 %v249_v17 }
  0x84   :  { %v54_v18 = vpop.permute.xlu1 %53 }
  0x85   :  { %v44_v19 = vpop.permute.xlu0 %43 }
  0x88   :  { %v59_v20 = vpop.permute.xlu1 %58 }
  0x89   :  { %v49_v21 = vpop.permute.xlu0 %48 }
  0xf9   :  { %v174_v22 = vpop.f32.mrb[0].mxu0  ;;  %v182_v23 = vpop.f32.mrb[0].mxu1 }
  0xfa   :  { %v175_v24 = vadd.f32 %v174_v22, %v44_v19  ;;  %v183_v25 = vadd.f32 %v182_v23, %v54_v18  ;;  %v176_v26 = vpop.f32.mrb[1].mxu0  ;;  %v184_v27 = vpop.f32.mrb[1].mxu1 }
  0xfb   :  { %v177_v28 = vpop.f32.mrb[2].mxu0  ;;  %v185_v29 = vpop.f32.mrb[2].mxu1 }
  0xfc   :  { %v189_v30 = vmax.f32 %v175_v24, 0.0  ;;  %v191_v31 = vmax.f32 %v183_v25, 0.0  ;;  %v178_v32 = vadd.f32 %v177_v28, %v49_v21  ;;  %v186_v33 = vadd.f32 %v185_v29, %v59_v20  ;;  %v179_v34 = vpop.f32.mrb[3].mxu0  ;;  %v187_v35 = vpop.f32.mrb[3].mxu1 }
  0xfe   :  { %193 = vst [vmem:[%s339_s3] sm:$0xff] %v189_v30  ;;  %195 = vst [vmem:[%s339_s3 + $0x10] sm:$0xff] %v191_v31  ;;  %v190_v36 = vmax.f32 %v178_v32, 0.0  ;;  %v192_v37 = vmax.f32 %v186_v33, 0.0 }
 0x100   :  { %194 = vst [vmem:[%s339_s3 + $0x8] sm:$0xff] %v190_v36  ;;  %196 = vst [vmem:[%s339_s3 + $0x18] sm:$0xff] %v192_v37 }

// kernel: segnet_forward.42
= control target key start
LH: loop header
LB: loop body
LE: loop exit
PB: predicated region body
PF: predicated region fallthrough
CT: control target
= control target key end

     0   :  { %v433_v1 = vmov 0   ;;  %vm221_vm0 = vcmask 261120   ;;  %s552_s1 = inlined_call_operand.vmem [shape: bf16[288,128], index: 1, kind: input, shape index: {}]   ;;  %s553_s0 = inlined_call_operand.vmem [shape: bf16[32,288], index: 0, kind: input, shape index: {}]   ;;  %s554_s2 = inlined_call_operand.vmem [shape: f32[32,1], index: 2, kind: input, shape index: {}]   ;;  %s555_s3 = inlined_call_operand.vmem [shape: f32[32,128], index: 3, kind: output, shape index: {}]  }
   0x1   :  { %v407_v0 = vld [vmem:[%s552_s1 + $0x40] sm:$0xff]   ;;  %405 = vset.pattern.permute.xlu0 %v433_v1  ;;  %406 = vset.pattern.permute.xlu1 %v433_v1  ;;  %v409_v3 = vld [vmem:[%s552_s1 + $0x48] sm:$0xff]   ;;  %v411_v5 = vld [vmem:[%s552_s1 + $0x50] sm:$0xff]  }
   0x2   :  { %v408_v2 = vld [vmem:[%s552_s1] sm:$0xff]   ;;  %364 = vmatprep.subr.bf16.mxu0 %v407_v0  ;;  %v410_v4 = vld [vmem:[%s552_s1 + $0x8] sm:$0xff]   ;;  %v412_v6 = vld [vmem:[%s552_s1 + $0x10] sm:$0xff]  }
   0x3   :  { %365 = vmatpush3.bf16.msra.mxu0 %v408_v2  ;;  %v413_v7 = vld [vmem:[%s552_s1 + $0x58] sm:$0xff]   ;;  %v415_v9 = vld [vmem:[%s552_s1 + $0x60] sm:$0xff]   ;;  %v417_v12 = vld [vmem:[%s552_s1 + $0x68] sm:$0xff]  }
   0x4   :  { %366 = vmatprep.subr.bf16.mxu0 %v409_v3  ;;  %v414_v8 = vld [vmem:[%s552_s1 + $0x18] sm:$0xff]   ;;  %v416_v10 = vld [vmem:[%s552_s1 + $0x20] sm:$0xff]   ;;  %v418_v13 = vld [vmem:[%s552_s1 + $0x28] sm:$0xff]  }
   0x5   :  { %v422_v11 = vld [vmem:[%s552_s1 + $0x80] sm:$0xff]   ;;  %v419_v14 = vld [vmem:[%s552_s1 + $0x70] sm:$0xff]   ;;  %v427_v16 = vld [vmem:[%s552_s1 + $0x88] sm:$0xff]  }
   0x6   :  { %396 = vmatprep.subr.bf16.mxu1 %v422_v11  ;;  %v426_v15 = vld [vmem:[%s553_s0 + $0x4] ss:$12 sps:$4 sm:$0xff]   ;;  %v428_v17 = vld [vmem:[%s553_s0 + $0x8] ss:$12 sps:$4 sm:$0xff]   ;;  %v429_v18 = vld [vmem:[%s553_s0 + $0x20] ss:$12 sps:$4 sm:$0xff]  }
   0x7   :  { %367 = vmatpush3.bf16.msra.mxu0 %v410_v4  ;;  %397 = vmatpush3.bf16.msra.mxu1 %v422_v11  ;;  %v59_v19 = vld [vmem:[%s554_s2] sm:$0xff]  ;;  %v420_v20 = vld [vmem:[%s552_s1 + $0x30] sm:$0xff]   ;;  %v421_v22 = vld [vmem:[%s552_s1 + $0x78] sm:$0xff]  }
   0x8   :  { %368 = vmatprep.subr.bf16.mxu0 %v411_v5  ;;  %260 = vmatprep.mubr.bf16.mxu0 %v426_v15  ;;  %v61_v21 = vld [vmem:[%s554_s2 + $0x10] sm:$0xff]  ;;  %v60_v23 = vld [vmem:[%s554_s2 + $0x8] sm:$0xff]  ;;  %v62_v24 = vld [vmem:[%s554_s2 + $0x18] sm:$0xff] }
   0x9   :  { %398 = vmatprep.subr.bf16.mxu1 %v427_v16  ;;  %400 = vmatprep.mubr.msk.bf16.mxu1 %vm221_vm0, %v428_v17  ;;  %v423_v25 = vld [vmem:[%s552_s1 + $0x38] sm:$0xff]   ;;  %v424_v26 = vld [vmem:[%s553_s0] ss:$12 sps:$4 sm:$0xff]  }
   0xa   :  { %65 = vperm.xlu0 %405, %v59_v19   ;;  %75 = vperm.xlu1 %406, %v61_v21   ;;  %v430_v27 = vld [vmem:[%s553_s0 + $0x1c] ss:$12 sps:$4 sm:$0xff]   ;;  %v432_v28 = vld [vmem:[%s553_s0 + $0x18] ss:$12 sps:$4 sm:$0xff]  }
   0xb   :  { %369 = vmatpush3.bf16.msra.mxu0 %v412_v6  ;;  %399 = vmatpush3.bf16.msra.mxu1 %v427_v16 }
   0xc   :  { %370 = vmatprep.subr.bf16.mxu0 %v413_v7 }
   0xe   :  { %401 = vmatmul.mubr.msk.bf16.vlgmr.msra.gmra.mrb[0].mxu1 %vm221_vm0, %v429_v18  ;;  %70 = vperm.xlu0 %405, %v60_v23  }
   0xf   :  { %371 = vmatpush3.bf16.msra.mxu0 %v414_v8  ;;  %80 = vperm.xlu1 %406, %v62_v24  }
  0x10   :  { %372 = vmatprep.subr.bf16.mxu0 %v415_v9 }
  0x13   :  { %373 = vmatpush3.bf16.msra.mxu0 %v416_v10 }
  0x14   :  { %374 = vmatprep.subr.bf16.mxu0 %v417_v12 }
  0x17   :  { %375 = vmatpush3.bf16.msra.mxu0 %v418_v13 }
  0x18   :  { %376 = vmatprep.subr.bf16.mxu0 %v419_v14 }
  0x1b   :  { %377 = vmatpush3.bf16.msra.mxu0 %v420_v20 }
  0x1c   :  { %378 = vmatprep.subr.bf16.mxu0 %v421_v22 }
  0x1f   :  { %379 = vmatpush3.bf16.msra.mxu0 %v423_v25 }
  0x22   :  { %261 = vmatmul.mubr.bf16.vlgmr.msra.gmra.mrb[0].mxu0 %v424_v26 }
  0x23   :  { %268 = vmatprep.mubr.bf16.mxu0 %v430_v27 }
  0x2a   :  { %269 = vmatmul.mubr.bf16.gmra.mrb[4].mxu0 %v432_v28 }
  0x89   :  { %v66_v33 = vpop.permute.xlu0 %65  ;;  %v76_v44 = vpop.permute.xlu1 %75 }
  0x8d   :  { %v71_v39 = vpop.permute.xlu0 %70 }
  0x8e   :  { %v81_v55 = vpop.permute.xlu1 %80 }
  0xe1   :  { %v402_v29 = vpop.f32.mrb[0].mxu1 }
  0xe2   :  { %v311_v30 = vpop.f32.mrb[1].mxu1 }
  0xe3   :  { %v403_v31 = vpop.f32.mrb[2].mxu1 }
  0xe4   :  { %v314_v32 = vpop.f32.mrb[3].mxu1 }
  0xf5   :  { %v380_v34 = vpop.f32.mrb[0].mxu0 }
  0xf6   :  { %v381_v35 = vpop.f32.mrb[1].mxu0 }
  0xf7   :  { %v382_v36 = vadd.f32 %v381_v35, %v380_v34  ;;  %v383_v37 = vpop.f32.mrb[2].mxu0 }
  0xf8   :  { %v384_v38 = vpop.f32.mrb[3].mxu0 }
  0xf9   :  { %v385_v40 = vadd.f32 %v384_v38, %v383_v37  ;;  %v263_v41 = vadd.f32 %v382_v36, %v66_v33 }
  0xfb   :  { %v266_v42 = vadd.f32 %v385_v40, %v71_v39  ;;  %v312_v43 = vadd.f32 %v311_v30, %v263_v41 }
  0xfd   :  { %v326_v45 = vmax.f32 %v312_v43, 0.0  ;;  %v315_v46 = vadd.f32 %v314_v32, %v266_v42  ;;  %v386_v47 = vpop.f32.mrb[4].mxu0 }
  0xfe   :  { %v387_v48 = vpop.f32.mrb[5].mxu0 }
  0xff   :  { %330 = vst [vmem:[%s555_s3] sm:$0xff] %v326_v45  ;;  %v327_v49 = vmax.f32 %v315_v46, 0.0  ;;  %v388_v50 = vadd.f32 %v387_v48, %v386_v47  ;;  %v389_v51 = vpop.f32.mrb[6].mxu0 }
 0x100   :  { %v390_v52 = vpop.f32.mrb[7].mxu0 }
 0x101   :  { %331 = vst [vmem:[%s555_s3 + $0x8] sm:$0xff] %v327_v49  ;;  %v271_v53 = vadd.f32 %v388_v50, %v76_v44  ;;  %v391_v54 = vadd.f32 %v390_v52, %v389_v51 }
 0x103   :  { %v320_v56 = vadd.f32 %v402_v29, %v271_v53  ;;  %v274_v57 = vadd.f32 %v391_v54, %v81_v55 }
 0x105   :  { %v328_v58 = vmax.f32 %v320_v56, 0.0  ;;  %v323_v59 = vadd.f32 %v403_v31, %v274_v57 }
 0x107   :  { %332 = vst [vmem:[%s555_s3 + $0x10] sm:$0xff] %v328_v58  ;;  %v329_v60 = vmax.f32 %v323_v59, 0.0 }
 0x109   :  { %333 = vst [vmem:[%s555_s3 + $0x18] sm:$0xff] %v329_v60 }

// kernel: segnet_forward.44
= control target key start
LH: loop header
LB: loop body
LE: loop exit
PB: predicated region body
PF: predicated region fallthrough
CT: control target
= control target key end

     0   :  { %v57_v0 = vlaneseq  ;;  %vm85_vm0 = vcmask 261120   ;;  %s221_s0 = inlined_call_operand.vmem [shape: f32[128,32], index: 0, kind: input, shape index: {}]   ;;  %s222_s1 = inlined_call_operand.vmem [shape: s32[1,32], index: 1, kind: input, shape index: {}]   ;;  %s223_s2 = inlined_call_operand.vmem [shape: f32[32,32], index: 2, kind: output, shape index: {0}]   ;;  %s224_s3 = inlined_call_operand.vmem [shape: s32[32,32], index: 3, kind: output, shape index: {1}]  }
   0x1   :  { %v125_v1 = vld [vmem:[%s221_s0] sm:$0xff]  ;;  %v143_v6 = vld [vmem:[%s221_s0 + $0x8] sm:$0xff]  ;;  %v15_v13 = vld [vmem:[%s221_s0 + $0x10] sm:$0xff] }
   0x2   :  { %v130_v2 = vld [vmem:[%s221_s0 + $0x20] sm:$0xff]  ;;  %v18_v7 = vld [vmem:[%s221_s0 + $0x28] sm:$0xff]  ;;  %v58_v8 = vshrl.u32 %v57_v0, 7  ;;  %v19_v15 = vld [vmem:[%s221_s0 + $0x30] sm:$0xff] }
   0x3   :  { %v21_v3 = vld [vmem:[%s221_s0 + $0x40] sm:$0xff]  ;;  %v29_v5 = vmax.f32 %v125_v1, %v130_v2  ;;  %v22_v10 = vld [vmem:[%s221_s0 + $0x48] sm:$0xff]  ;;  %v30_v12 = vmax.f32 %v143_v6, %v18_v7  ;;  %v23_v16 = vld [vmem:[%s221_s0 + $0x50] sm:$0xff]  ;;  %v31_v19 = vmax.f32 %v15_v13, %v19_v15 }
   0x4   :  { %v25_v4 = vld [vmem:[%s221_s0 + $0x60] sm:$0xff]  ;;  %v26_v11 = vld [vmem:[%s221_s0 + $0x68] sm:$0xff]  ;;  %v27_v17 = vld [vmem:[%s221_s0 + $0x70] sm:$0xff]  ;;  %v59_v28 = vsub.s32 0, %v58_v8 }
   0x5   :  { %v33_v9 = vmax.f32 %v21_v3, %v25_v4  ;;  %v34_v14 = vmax.f32 %v22_v10, %v26_v11  ;;  %v35_v20 = vmax.f32 %v23_v16, %v27_v17  ;;  %v16_v21 = vld [vmem:[%s221_s0 + $0x18] sm:$0xff]  ;;  %v41_v27 = vld [vmem:[%s222_s1] sm:$0x1] }
   0x6   :  { %v20_v22 = vld [vmem:[%s221_s0 + $0x38] sm:$0xff]  ;;  %v50_v31 = vadd.s32 1, %v41_v27  ;;  %v55_v32 = vadd.s32 8, %v41_v27  ;;  %v80_v36 = vrot.slane %v41_v27, %v59_v28 }
   0x7   :  { %v37_v18 = vmax.f32 %v29_v5, %v33_v9  ;;  %v24_v23 = vld [vmem:[%s221_s0 + $0x58] sm:$0xff]  ;;  %v38_v24 = vmax.f32 %v30_v12, %v34_v14  ;;  %v32_v26 = vmax.f32 %v16_v21, %v20_v22  ;;  %v39_v29 = vmax.f32 %v31_v19, %v35_v20 }
   0x8   :  { %v28_v25 = vld [vmem:[%s221_s0 + $0x78] sm:$0xff]  ;;  %v56_v34 = vadd.s32 1, %v55_v32  ;;  %v60_v35 = vrot.slane %v55_v32, %v59_v28  ;;  %v72_v37 = vrot.slane %v50_v31, %v59_v28 }
   0x9   :  { %86 = vst.msk [vmem:[%s223_s2] sm:$0xff] %vm85_vm0, %v37_v18  ;;  %v36_v30 = vmax.f32 %v24_v23, %v28_v25  ;;  %87 = vst.msk [vmem:[%s223_s2 + $0x8] sm:$0xff] %vm85_vm0, %v38_v24  ;;  %vm46_vm1 = vcmp.eq.f32.partialorder %v130_v2, %v37_v18  ;;  %vm51_vm2 = vcmp.eq.f32.partialorder %v21_v3, %v37_v18 }
   0xa   :  { %88 = vst.msk [vmem:[%s223_s2 + $0x10] sm:$0xff] %vm85_vm0, %v39_v29  ;;  %vm47_vm3 = vcmp.eq.f32.partialorder %v18_v7, %v38_v24  ;;  %vm52_vm4 = vcmp.eq.f32.partialorder %v22_v10, %v38_v24  ;;  %vm53_vm5 = vcmp.eq.f32.partialorder %v23_v16, %v39_v29  ;;  %v64_v38 = vrot.slane %v56_v34, %v59_v28 }
   0xb   :  { %v40_v33 = vmax.f32 %v32_v26, %v36_v30  ;;  %vm48_vm6 = vcmp.eq.f32.partialorder %v19_v15, %v39_v29  ;;  %vm42_vm9 = vcmp.eq.f32.partialorder %v125_v1, %v37_v18  ;;  %vm43_vm10 = vcmp.eq.f32.partialorder %v143_v6, %v38_v24 }
   0xc   :  { %vm44_vm11 = vcmp.eq.f32.partialorder %v15_v13, %v39_v29  ;;  %v65_v39 = vsel %vm51_vm2, %v60_v35, %v64_v38  ;;  %v66_v40 = vsel %vm52_vm4, %v60_v35, %v64_v38  ;;  %v67_v41 = vsel %vm53_vm5, %v60_v35, %v64_v38 }
   0xd   :  { %89 = vst.msk [vmem:[%s223_s2 + $0x18] sm:$0xff] %vm85_vm0, %v40_v33  ;;  %vm49_vm7 = vcmp.eq.f32.partialorder %v20_v22, %v40_v33  ;;  %vm54_vm8 = vcmp.eq.f32.partialorder %v24_v23, %v40_v33  ;;  %vm45_vm12 = vcmp.eq.f32.partialorder %v16_v21, %v40_v33  ;;  %v73_v43 = vsel %vm46_vm1, %v72_v37, %v65_v39 }
   0xe   :  { %v68_v42 = vsel %vm54_vm8, %v60_v35, %v64_v38  ;;  %v74_v44 = vsel %vm47_vm3, %v72_v37, %v66_v40  ;;  %v75_v45 = vsel %vm48_vm6, %v72_v37, %v67_v41  ;;  %v81_v47 = vsel %vm42_vm9, %v80_v36, %v73_v43 }
   0xf   :  { %v76_v46 = vsel %vm49_vm7, %v72_v37, %v68_v42  ;;  %v82_v48 = vsel %vm43_vm10, %v80_v36, %v74_v44  ;;  %v83_v49 = vsel %vm44_vm11, %v80_v36, %v75_v45  ;;  %90 = vst.msk [vmem:[%s224_s3] sm:$0xff] %vm85_vm0, %v81_v47 }
  0x10   :  { %v84_v50 = vsel %vm45_vm12, %v80_v36, %v76_v46  ;;  %91 = vst.msk [vmem:[%s224_s3 + $0x8] sm:$0xff] %vm85_vm0, %v82_v48  ;;  %92 = vst.msk [vmem:[%s224_s3 + $0x10] sm:$0xff] %vm85_vm0, %v83_v49 }
  0x11   :  { %93 = vst.msk [vmem:[%s224_s3 + $0x18] sm:$0xff] %vm85_vm0, %v84_v50 }

// kernel: segnet_forward.45
= control target key start
LH: loop header
LB: loop body
LE: loop exit
PB: predicated region body
PF: predicated region fallthrough
CT: control target
= control target key end

     0   :  { %v591_v1 = vmov 0   ;;  %vm283_vm0 = vcmask 261120   ;;  %s762_s1 = inlined_call_operand.vmem [shape: bf16[288,32], index: 1, kind: input, shape index: {}]   ;;  %s763_s0 = inlined_call_operand.vmem [shape: bf16[64,288], index: 0, kind: input, shape index: {}]   ;;  %s764_s2 = inlined_call_operand.vmem [shape: f32[64,1], index: 2, kind: input, shape index: {}]   ;;  %s765_s3 = inlined_call_operand.vmem [shape: f32[64,32], index: 3, kind: output, shape index: {}]  }
   0x1   :  { %v557_v0 = vld [vmem:[%s762_s1 + $0x40] sm:$0xff]   ;;  %556 = vset.pattern.permute.xlu1 %v591_v1  ;;  %555 = vset.pattern.permute.xlu0 %v591_v1  ;;  %v559_v3 = vld [vmem:[%s762_s1 + $0x48] sm:$0xff]   ;;  %v561_v5 = vld [vmem:[%s762_s1 + $0x50] sm:$0xff]  }
   0x2   :  { %v558_v2 = vld [vmem:[%s762_s1] sm:$0xff]   ;;  %480 = vmatprep.subr.bf16.mxu0 %v557_v0  ;;  %538 = vmatprep.subr.bf16.mxu1 %v557_v0  ;;  %v560_v4 = vld [vmem:[%s762_s1 + $0x8] sm:$0xff]   ;;  %v562_v6 = vld [vmem:[%s762_s1 + $0x10] sm:$0xff]  }
   0x3   :  { %481 = vmatpush3.bf16.msra.mxu0 %v558_v2  ;;  %546 = vmatpush3.bf16.msra.mxu1 %v558_v2  ;;  %v563_v7 = vld [vmem:[%s762_s1 + $0x58] sm:$0xff]   ;;  %v565_v9 = vld [vmem:[%s762_s1 + $0x60] sm:$0xff]   ;;  %v567_v11 = vld [vmem:[%s762_s1 + $0x68] sm:$0xff]  }
   0x4   :  { %482 = vmatprep.subr.bf16.mxu0 %v559_v3  ;;  %539 = vmatprep.subr.bf16.mxu1 %v559_v3  ;;  %v564_v8 = vld [vmem:[%s762_s1 + $0x18] sm:$0xff]   ;;  %v566_v10 = vld [vmem:[%s762_s1 + $0x20] sm:$0xff]   ;;  %v568_v14 = vld [vmem:[%s762_s1 + $0x28] sm:$0xff]  }
   0x5   :  { %v575_v12 = vld [vmem:[%s763_s0 + $0x4] ss:$12 sps:$4 sm:$0xff]   ;;  %v578_v13 = vld [vmem:[%s763_s0 + $0x4c] ss:$12 sps:$4 sm:$0xff]   ;;  %v576_v23 = vld [vmem:[%s763_s0 + $0x48] ss:$12 sps:$4 sm:$0xff]  }
   0x6   :  { %v569_v15 = vld [vmem:[%s762_s1 + $0x70] sm:$0xff]   ;;  %328 = vmatprep.mubr.bf16.mxu0 %v575_v12  ;;  %352 = vmatprep.mubr.bf16.mxu1 %v578_v13  ;;  %v571_v17 = vld [vmem:[%s762_s1 + $0x78] sm:$0xff]   ;;  %v67_v20 = vld [vmem:[%s764_s2] sm:$0xff] }
   0x7   :  { %483 = vmatpush3.bf16.msra.mxu0 %v560_v4  ;;  %547 = vmatpush3.bf16.msra.mxu1 %v560_v4  ;;  %v570_v16 = vld [vmem:[%s762_s1 + $0x30] sm:$0xff]   ;;  %v572_v18 = vld [vmem:[%s762_s1 + $0x38] sm:$0xff]   ;;  %v579_v21 = vld [vmem:[%s762_s1 + $0x80] sm:$0xff]  }
   0x8   :  { %484 = vmatprep.subr.bf16.mxu0 %v561_v5  ;;  %540 = vmatprep.subr.bf16.mxu1 %v561_v5  ;;  %v69_v19 = vld [vmem:[%s764_s2 + $0x10] sm:$0xff]  ;;  %v573_v22 = vld [vmem:[%s763_s0] ss:$12 sps:$4 sm:$0xff]   ;;  %v70_v24 = vld [vmem:[%s764_s2 + $0x18] sm:$0xff] }
   0x9   :  { %87 = vperm.xlu1 %556, %v69_v19   ;;  %77 = vperm.xlu0 %555, %v67_v20   ;;  %v68_v25 = vld [vmem:[%s764_s2 + $0x8] sm:$0xff]  ;;  %v71_v30 = vld [vmem:[%s764_s2 + $0x20] sm:$0xff]  ;;  %v74_v33 = vld [vmem:[%s764_s2 + $0x38] sm:$0xff] }
   0xa   :  { %v581_v26 = vld [vmem:[%s763_s0 + $0x1c] ss:$12 sps:$4 sm:$0xff]   ;;  %v584_v31 = vld [vmem:[%s763_s0 + $0x18] ss:$12 sps:$4 sm:$0xff]   ;;  %v585_v32 = vld [vmem:[%s763_s0 + $0x20] ss:$12 sps:$4 sm:$0xff]  }
   0xb   :  { %485 = vmatpush3.bf16.msra.mxu0 %v562_v6  ;;  %548 = vmatpush3.bf16.msra.mxu1 %v562_v6  ;;  %v580_v27 = vld [vmem:[%s762_s1 + $0x88] sm:$0xff]   ;;  %v73_v34 = vld [vmem:[%s764_s2 + $0x30] sm:$0xff]  ;;  %v588_v36 = vld [vmem:[%s763_s0 + $0x38] ss:$12 sps:$4 sm:$0xff]  }
   0xc   :  { %486 = vmatprep.subr.bf16.mxu0 %v563_v7  ;;  %541 = vmatprep.subr.bf16.mxu1 %v563_v7  ;;  %v583_v28 = vld [vmem:[%s763_s0 + $0x8] ss:$12 sps:$4 sm:$0xff]   ;;  %v589_v37 = vld [vmem:[%s763_s0 + $0x30] ss:$12 sps:$4 sm:$0xff]  }
   0xd   :  { %92 = vperm.xlu1 %556, %v70_v24   ;;  %82 = vperm.xlu0 %555, %v68_v25   ;;  %v72_v29 = vld [vmem:[%s764_s2 + $0x28] sm:$0xff]  ;;  %v586_v35 = vld [vmem:[%s763_s0 + $0x34] ss:$12 sps:$4 sm:$0xff]   ;;  %v590_v38 = vld [vmem:[%s763_s0 + $0x50] ss:$12 sps:$4 sm:$0xff]  }
   0xf   :  { %487 = vmatpush3.bf16.msra.mxu0 %v564_v8  ;;  %549 = vmatpush3.bf16.msra.mxu1 %v564_v8 }
  0x10   :  { %488 = vmatprep.subr.bf16.mxu0 %v565_v9  ;;  %542 = vmatprep.subr.bf16.mxu1 %v565_v9 }
  0x11   :  { %102 = vperm.xlu1 %556, %v72_v29   ;;  %97 = vperm.xlu0 %555, %v71_v30  }
  0x13   :  { %489 = vmatpush3.bf16.msra.mxu0 %v566_v10  ;;  %550 = vmatpush3.bf16.msra.mxu1 %v566_v10 }
  0x14   :  { %490 = vmatprep.subr.bf16.mxu0 %v567_v11  ;;  %543 = vmatprep.subr.bf16.mxu1 %v567_v11 }
  0x15   :  { %112 = vperm.xlu1 %556, %v74_v33   ;;  %107 = vperm.xlu0 %555, %v73_v34  }
  0x17   :  { %491 = vmatpush3.bf16.msra.mxu0 %v568_v14  ;;  %551 = vmatpush3.bf16.msra.mxu1 %v568_v14 }
  0x18   :  { %492 = vmatprep.subr.bf16.mxu0 %v569_v15  ;;  %544 = vmatprep.subr.bf16.mxu1 %v569_v15 }
  0x1b   :  { %493 = vmatpush3.bf16.msra.mxu0 %v570_v16  ;;  %552 = vmatpush3.bf16.msra.mxu1 %v570_v16 }
  0x1c   :  { %494 = vmatprep.subr.bf16.mxu0 %v571_v17  ;;  %545 = vmatprep.subr.bf16.mxu1 %v571_v17 }
  0x1f   :  { %495 = vmatpush3.bf16.msra.mxu0 %v572_v18  ;;  %553 = vmatpush3.bf16.msra.mxu1 %v572_v18 }
  0x20   :  { %526 = vmatprep.subr.bf16.mxu1 %v579_v21 }
  0x22   :  { %329 = vmatmul.mubr.bf16.vlgmr.msra.gmra.mrb[0].mxu0 %v573_v22  ;;  %353 = vmatmul.mubr.bf16.vlgmr.msra.gmra.mrb[0].mxu1 %v576_v23 }
  0x23   :  { %527 = vmatpush3.bf16.msra.mxu1 %v579_v21  ;;  %336 = vmatprep.mubr.bf16.mxu0 %v581_v26 }
  0x24   :  { %528 = vmatprep.subr.bf16.mxu1 %v580_v27  ;;  %530 = vmatprep.mubr.msk.bf16.mxu1 %vm283_vm0, %v583_v28 }
  0x27   :  { %529 = vmatpush3.bf16.msra.mxu1 %v580_v27 }
  0x2a   :  { %337 = vmatmul.mubr.bf16.gmra.mrb[4].mxu0 %v584_v31  ;;  %531 = vmatmul.mubr.msk.bf16.vlgmr.msra.gmra.mrb[4].mxu1 %vm283_vm0, %v585_v32 }
  0x2b   :  { %344 = vmatprep.mubr.bf16.mxu0 %v586_v35  ;;  %534 = vmatprep.mubr.msk.bf16.mxu1 %vm283_vm0, %v588_v36 }
  0x32   :  { %345 = vmatmul.mubr.bf16.gmra.mrb[8].mxu0 %v589_v37  ;;  %535 = vmatmul.mubr.msk.bf16.gmra.mrb[8].mxu1 %vm283_vm0, %v590_v38 }
  0x88   :  { %v88_v39 = vpop.permute.xlu1 %87  ;;  %v78_v40 = vpop.permute.xlu0 %77 }
  0x8c   :  { %v93_v41 = vpop.permute.xlu1 %92  ;;  %v83_v42 = vpop.permute.xlu0 %82 }
  0x90   :  { %v98_v55 = vpop.permute.xlu0 %97  ;;  %v103_v56 = vpop.permute.xlu1 %102 }
  0x94   :  { %v108_v5 = vpop.permute.xlu0 %107  ;;  %v113_v10 = vpop.permute.xlu1 %112 }
  0xf5   :  { %v496_v43 = vpop.f32.mrb[0].mxu0  ;;  %v514_v44 = vpop.f32.mrb[0].mxu1 }
  0xf6   :  { %v497_v45 = vpop.f32.mrb[1].mxu0  ;;  %v515_v46 = vpop.f32.mrb[1].mxu1 }
  0xf7   :  { %v498_v47 = vadd.f32 %v497_v45, %v496_v43  ;;  %v499_v48 = vpop.f32.mrb[2].mxu0  ;;  %v516_v49 = vadd.f32 %v515_v46, %v514_v44  ;;  %v517_v50 = vpop.f32.mrb[2].mxu1 }
  0xf8   :  { %v500_v51 = vpop.f32.mrb[3].mxu0  ;;  %v518_v52 = vpop.f32.mrb[3].mxu1 }
  0xf9   :  { %v501_v53 = vadd.f32 %v500_v51, %v499_v48  ;;  %v519_v54 = vadd.f32 %v518_v52, %v517_v50  ;;  %v331_v59 = vadd.f32 %v498_v47, %v78_v40  ;;  %v355_v14 = vadd.f32 %v516_v49, %v108_v5 }
  0xfb   :  { %v334_v2 = vadd.f32 %v501_v53, %v83_v42  ;;  %v358_v19 = vadd.f32 %v519_v54, %v113_v10 }
  0xfd   :  { %v502_v57 = vpop.f32.mrb[4].mxu0  ;;  %v532_v58 = vpop.f32.mrb[4].mxu1 }
  0xfe   :  { %v503_v60 = vpop.f32.mrb[5].mxu0  ;;  %v395_v61 = vpop.f32.mrb[5].mxu1 }
  0xff   :  { %v504_v62 = vadd.f32 %v503_v60, %v502_v57  ;;  %v396_v63 = vadd.f32 %v395_v61, %v331_v59  ;;  %v505_v0 = vpop.f32.mrb[6].mxu0  ;;  %v533_v1 = vpop.f32.mrb[6].mxu1 }
 0x100   :  { %v506_v3 = vpop.f32.mrb[7].mxu0  ;;  %v398_v4 = vpop.f32.mrb[7].mxu1 }
 0x101   :  { %v339_v6 = vadd.f32 %v504_v62, %v88_v39  ;;  %v426_v7 = vmax.f32 %v396_v63, 0.0  ;;  %v507_v8 = vadd.f32 %v506_v3, %v505_v0  ;;  %v399_v9 = vadd.f32 %v398_v4, %v334_v2 }
 0x103   :  { %v404_v11 = vadd.f32 %v532_v58, %v339_v6  ;;  %434 = vst.msk [vmem:[%s765_s3] sm:$0xff] %vm283_vm0, %v426_v7  ;;  %v342_v12 = vadd.f32 %v507_v8, %v93_v41  ;;  %v427_v13 = vmax.f32 %v399_v9, 0.0 }
 0x105   :  { %v428_v15 = vmax.f32 %v404_v11, 0.0  ;;  %v407_v16 = vadd.f32 %v533_v1, %v342_v12  ;;  %435 = vst.msk [vmem:[%s765_s3 + $0x8] sm:$0xff] %vm283_vm0, %v427_v13  ;;  %v508_v17 = vpop.f32.mrb[8].mxu0  ;;  %v536_v18 = vpop.f32.mrb[8].mxu1 }
 0x106   :  { %v420_v20 = vadd.f32 %v536_v18, %v355_v14  ;;  %v509_v21 = vpop.f32.mrb[9].mxu0  ;;  %v411_v22 = vpop.f32.mrb[9].mxu1 }
 0x107   :  { %436 = vst.msk [vmem:[%s765_s3 + $0x10] sm:$0xff] %vm283_vm0, %v428_v15  ;;  %v429_v23 = vmax.f32 %v407_v16, 0.0  ;;  %v510_v24 = vadd.f32 %v509_v21, %v508_v17  ;;  %v511_v25 = vpop.f32.mrb[10].mxu0  ;;  %v537_v26 = vpop.f32.mrb[10].mxu1 }
 0x108   :  { %v432_v27 = vmax.f32 %v420_v20, 0.0  ;;  %v423_v28 = vadd.f32 %v537_v26, %v358_v19  ;;  %v512_v29 = vpop.f32.mrb[11].mxu0  ;;  %v414_v30 = vpop.f32.mrb[11].mxu1 }
 0x109   :  { %437 = vst.msk [vmem:[%s765_s3 + $0x18] sm:$0xff] %vm283_vm0, %v429_v23  ;;  %v347_v31 = vadd.f32 %v510_v24, %v98_v55  ;;  %v513_v32 = vadd.f32 %v512_v29, %v511_v25 }
 0x10a   :  { %440 = vst.msk [vmem:[%s765_s3 + $0x30] sm:$0xff] %vm283_vm0, %v432_v27  ;;  %v433_v33 = vmax.f32 %v423_v28, 0.0 }
 0x10b   :  { %v412_v34 = vadd.f32 %v411_v22, %v347_v31  ;;  %v350_v35 = vadd.f32 %v513_v32, %v103_v56 }
 0x10c   :  { %441 = vst.msk [vmem:[%s765_s3 + $0x38] sm:$0xff] %vm283_vm0, %v433_v33 }
 0x10d   :  { %v430_v36 = vmax.f32 %v412_v34, 0.0  ;;  %v415_v37 = vadd.f32 %v414_v30, %v350_v35 }
 0x10f   :  { %438 = vst.msk [vmem:[%s765_s3 + $0x20] sm:$0xff] %vm283_vm0, %v430_v36  ;;  %v431_v38 = vmax.f32 %v415_v37, 0.0 }
 0x111   :  { %439 = vst.msk [vmem:[%s765_s3 + $0x28] sm:$0xff] %vm283_vm0, %v431_v38 }

// kernel: segnet_forward.46
= control target key start
LH: loop header
LB: loop body
LE: loop exit
PB: predicated region body
PF: predicated region fallthrough
CT: control target
= control target key end

     0   :  { %v943_v1 = vmov 0   ;;  %vm475_vm0 = vcmask 523264   ;;  %vm691_vm1 = vcmask 261120   ;;  %s1198_s1 = inlined_call_operand.vmem [shape: bf16[576,32], index: 1, kind: input, shape index: {}]   ;;  %s1199_s0 = inlined_call_operand.vmem [shape: bf16[64,576], index: 0, kind: input, shape index: {}]   ;;  %s1200_s2 = inlined_call_operand.vmem [shape: f32[64,1], index: 2, kind: input, shape index: {}]   ;;  %s1201_s3 = inlined_call_operand.vmem [shape: f32[64,32], index: 3, kind: output, shape index: {}]  }
   0x1   :  { %v879_v0 = vld [vmem:[%s1198_s1 + $0x40] sm:$0xff]   ;;  %877 = vset.pattern.permute.xlu0 %v943_v1  ;;  %878 = vset.pattern.permute.xlu1 %v943_v1  ;;  %v883_v5 = vld [vmem:[%s1198_s1 + $0x48] sm:$0xff]   ;;  %v887_v9 = vld [vmem:[%s1198_s1 + $0x50] sm:$0xff]  }
   0x2   :  { %v880_v2 = vld [vmem:[%s1198_s1 + $0xc0] sm:$0xff]   ;;  %764 = vmatprep.subr.bf16.mxu0 %v879_v0  ;;  %v884_v6 = vld [vmem:[%s1198_s1 + $0xc8] sm:$0xff]   ;;  %v888_v10 = vld [vmem:[%s1198_s1 + $0xd0] sm:$0xff]  }
   0x3   :  { %v881_v3 = vld [vmem:[%s1198_s1] sm:$0xff]   ;;  %804 = vmatprep.subr.bf16.mxu1 %v880_v2  ;;  %v885_v7 = vld [vmem:[%s1198_s1 + $0x8] sm:$0xff]   ;;  %v889_v11 = vld [vmem:[%s1198_s1 + $0x10] sm:$0xff]  }
   0x4   :  { %v882_v4 = vld [vmem:[%s1198_s1 + $0x80] sm:$0xff]   ;;  %765 = vmatpush3.bf16.msra.mxu0 %v881_v3  ;;  %v886_v8 = vld [vmem:[%s1198_s1 + $0x88] sm:$0xff]   ;;  %v890_v12 = vld [vmem:[%s1198_s1 + $0x90] sm:$0xff]  }
   0x5   :  { %805 = vmatpush3.bf16.msra.mxu1 %v882_v4  ;;  %766 = vmatprep.subr.bf16.mxu0 %v883_v5  ;;  %v891_v13 = vld [vmem:[%s1198_s1 + $0x58] sm:$0xff]   ;;  %v895_v17 = vld [vmem:[%s1198_s1 + $0x60] sm:$0xff]   ;;  %v899_v21 = vld [vmem:[%s1198_s1 + $0x68] sm:$0xff]  }
   0x6   :  { %806 = vmatprep.subr.bf16.mxu1 %v884_v6  ;;  %v892_v14 = vld [vmem:[%s1198_s1 + $0xd8] sm:$0xff]   ;;  %v896_v18 = vld [vmem:[%s1198_s1 + $0xe0] sm:$0xff]   ;;  %v900_v22 = vld [vmem:[%s1198_s1 + $0xe8] sm:$0xff]  }
   0x7   :  { %v893_v15 = vld [vmem:[%s1198_s1 + $0x18] sm:$0xff]   ;;  %v897_v19 = vld [vmem:[%s1198_s1 + $0x20] sm:$0xff]   ;;  %v901_v23 = vld [vmem:[%s1198_s1 + $0x28] sm:$0xff]  }
   0x8   :  { %767 = vmatpush3.bf16.msra.mxu0 %v885_v7  ;;  %v894_v16 = vld [vmem:[%s1198_s1 + $0x98] sm:$0xff]   ;;  %v898_v20 = vld [vmem:[%s1198_s1 + $0xa0] sm:$0xff]   ;;  %v902_v24 = vld [vmem:[%s1198_s1 + $0xa8] sm:$0xff]  }
   0x9   :  { %807 = vmatpush3.bf16.msra.mxu1 %v886_v8  ;;  %768 = vmatprep.subr.bf16.mxu0 %v887_v9  ;;  %v903_v25 = vld [vmem:[%s1198_s1 + $0x70] sm:$0xff]   ;;  %v907_v29 = vld [vmem:[%s1198_s1 + $0x78] sm:$0xff]   ;;  %v916_v36 = vld [vmem:[%s1199_s0 + $0xc] ss:$20 sps:$4 sm:$0xff]  }
   0xa   :  { %808 = vmatprep.subr.bf16.mxu1 %v888_v10  ;;  %v904_v26 = vld [vmem:[%s1198_s1 + $0xf0] sm:$0xff]   ;;  %v908_v30 = vld [vmem:[%s1198_s1 + $0xf8] sm:$0xff]   ;;  %v917_v37 = vld [vmem:[%s1198_s1 + $0x100] sm:$0xff]   ;;  %585 = vmatprep.mubr.bf16.mxu1 %v916_v36 }
   0xb   :  { %v905_v27 = vld [vmem:[%s1198_s1 + $0x30] sm:$0xff]   ;;  %v909_v31 = vld [vmem:[%s1198_s1 + $0x38] sm:$0xff]   ;;  %v918_v38 = vld [vmem:[%s1199_s0 + $0x2c] ss:$20 sps:$4 sm:$0xff]  }
   0xc   :  { %769 = vmatpush3.bf16.msra.mxu0 %v889_v11  ;;  %v906_v28 = vld [vmem:[%s1198_s1 + $0xb0] sm:$0xff]   ;;  %v910_v32 = vld [vmem:[%s1198_s1 + $0xb8] sm:$0xff]   ;;  %v924_v40 = vld [vmem:[%s1198_s1 + $0x108] sm:$0xff]  }
   0xd   :  { %809 = vmatpush3.bf16.msra.mxu1 %v890_v12  ;;  %770 = vmatprep.subr.bf16.mxu0 %v891_v13  ;;  %v911_v33 = vld [vmem:[%s1199_s0] ss:$20 sps:$4 sm:$0xff]   ;;  %v913_v34 = vld [vmem:[%s1199_s0 + $0x4] ss:$20 sps:$4 sm:$0xff]   ;;  %v914_v35 = vld [vmem:[%s1199_s0 + $0x8] ss:$20 sps:$4 sm:$0xff]  }
   0xe   :  { %810 = vmatprep.subr.bf16.mxu1 %v892_v14  ;;  %520 = vmatprep.mubr.bf16.mxu0 %v913_v34  ;;  %v920_v39 = vld [vmem:[%s1199_s0 + $0x34] ss:$20 sps:$4 sm:$0xff]   ;;  %v923_v42 = vld [vmem:[%s1199_s0 + $0x30] ss:$20 sps:$4 sm:$0xff]   ;;  %v938_v46 = vld [vmem:[%s1198_s1 + $0x118] sm:$0xff]  }
   0xf   :  { %v922_v41 = vld [vmem:[%s1199_s0 + $0x28] ss:$20 sps:$4 sm:$0xff]   ;;  %v931_v45 = vld [vmem:[%s1198_s1 + $0x110] sm:$0xff]   ;;  %v930_v48 = vld [vmem:[%s1199_s0 + $0x58] ss:$20 sps:$4 sm:$0xff]  }
  0x10   :  { %771 = vmatpush3.bf16.msra.mxu0 %v893_v15  ;;  %v925_v43 = vld [vmem:[%s1199_s0 + $0x54] ss:$20 sps:$4 sm:$0xff]   ;;  %v927_v44 = vld [vmem:[%s1199_s0 + $0x5c] ss:$20 sps:$4 sm:$0xff]   ;;  %v934_v50 = vld [vmem:[%s1199_s0 + $0x84] ss:$20 sps:$4 sm:$0xff]  }
  0x11   :  { %811 = vmatpush3.bf16.msra.mxu1 %v894_v16  ;;  %772 = vmatprep.subr.bf16.mxu0 %v895_v17  ;;  %v929_v47 = vld [vmem:[%s1199_s0 + $0x50] ss:$20 sps:$4 sm:$0xff]   ;;  %v112_v53 = vld [vmem:[%s1200_s2 + $0x8] sm:$0xff]  ;;  %v114_v54 = vld [vmem:[%s1200_s2 + $0x18] sm:$0xff] }
  0x12   :  { %812 = vmatprep.subr.bf16.mxu1 %v896_v18  ;;  %v932_v49 = vld [vmem:[%s1199_s0 + $0x7c] ss:$20 sps:$4 sm:$0xff]   ;;  %v111_v51 = vld [vmem:[%s1200_s2] sm:$0xff]  ;;  %v936_v55 = vld [vmem:[%s1199_s0 + $0x78] ss:$20 sps:$4 sm:$0xff]  }
  0x13   :  { %v113_v52 = vld [vmem:[%s1200_s2 + $0x10] sm:$0xff]  ;;  %121 = vperm.xlu0 %877, %v111_v51   ;;  %v115_v58 = vld [vmem:[%s1200_s2 + $0x20] sm:$0xff]  ;;  %v116_v60 = vld [vmem:[%s1200_s2 + $0x28] sm:$0xff] }
  0x14   :  { %773 = vmatpush3.bf16.msra.mxu0 %v897_v19  ;;  %131 = vperm.xlu1 %878, %v113_v52   ;;  %v937_v56 = vld [vmem:[%s1199_s0 + $0x80] ss:$20 sps:$4 sm:$0xff]   ;;  %v939_v57 = vld [vmem:[%s1199_s0 + $0x10] ss:$20 sps:$4 sm:$0xff]   ;;  %v118_v62 = vld [vmem:[%s1200_s2 + $0x38] sm:$0xff] }
  0x15   :  { %813 = vmatpush3.bf16.msra.mxu1 %v898_v20  ;;  %774 = vmatprep.subr.bf16.mxu0 %v899_v21  ;;  %v940_v59 = vld [vmem:[%s1199_s0 + $0x60] ss:$20 sps:$4 sm:$0xff]   ;;  %v941_v63 = vld [vmem:[%s1199_s0 + $0x38] ss:$20 sps:$4 sm:$0xff]   ;;  %v942_v0 = vld [vmem:[%s1199_s0 + $0x88] ss:$20 sps:$4 sm:$0xff]  }
  0x16   :  { %814 = vmatprep.subr.bf16.mxu1 %v900_v22  ;;  %v117_v61 = vld [vmem:[%s1200_s2 + $0x30] sm:$0xff] }
  0x17   :  { %126 = vperm.xlu0 %877, %v112_v53  }
  0x18   :  { %775 = vmatpush3.bf16.msra.mxu0 %v901_v23  ;;  %136 = vperm.xlu1 %878, %v114_v54  }
  0x19   :  { %815 = vmatpush3.bf16.msra.mxu1 %v902_v24  ;;  %776 = vmatprep.subr.bf16.mxu0 %v903_v25 }
  0x1a   :  { %816 = vmatprep.subr.bf16.mxu1 %v904_v26 }
  0x1b   :  { %141 = vperm.xlu0 %877, %v115_v58  }
  0x1c   :  { %777 = vmatpush3.bf16.msra.mxu0 %v905_v27  ;;  %146 = vperm.xlu1 %878, %v116_v60  }
  0x1d   :  { %817 = vmatpush3.bf16.msra.mxu1 %v906_v28  ;;  %778 = vmatprep.subr.bf16.mxu0 %v907_v29 }
  0x1e   :  { %818 = vmatprep.subr.bf16.mxu1 %v908_v30 }
  0x1f   :  { %151 = vperm.xlu0 %877, %v117_v61  }
  0x20   :  { %779 = vmatpush3.bf16.msra.mxu0 %v909_v31  ;;  %156 = vperm.xlu1 %878, %v118_v62  }
  0x21   :  { %819 = vmatpush3.bf16.msra.mxu1 %v910_v32  ;;  %852 = vmatprep.subr.bf16.mxu0 %v917_v37 }
  0x22   :  { %868 = vmatprep.subr.bf16.mxu1 %v917_v37 }
  0x23   :  { %521 = vmatmul.mubr.bf16.vlgmr.msra.gmra.mrb[0].mxu0 %v911_v33 }
  0x24   :  { %586 = vmatmul.mubr.bf16.vlgmr.msra.gmra.mrb[0].mxu1 %v914_v35  ;;  %853 = vmatpush3.bf16.msra.mxu0 %v917_v37 }
  0x25   :  { %872 = vmatpush3.bf16.msra.mxu1 %v917_v37  ;;  %528 = vmatprep.mubr.bf16.mxu0 %v918_v38 }
  0x26   :  { %593 = vmatprep.mubr.bf16.mxu1 %v920_v39  ;;  %854 = vmatprep.subr.bf16.mxu0 %v924_v40 }
  0x27   :  { %869 = vmatprep.subr.bf16.mxu1 %v924_v40 }
  0x28   :  { %855 = vmatpush3.bf16.msra.mxu0 %v924_v40 }
  0x29   :  { %873 = vmatpush3.bf16.msra.mxu1 %v924_v40  ;;  %856 = vmatprep.subr.bf16.mxu0 %v931_v45 }
  0x2a   :  { %870 = vmatprep.subr.bf16.mxu1 %v931_v45 }
  0x2b   :  { %529 = vmatmul.mubr.bf16.gmra.mrb[4].mxu0 %v922_v41 }
  0x2c   :  { %594 = vmatmul.mubr.bf16.gmra.mrb[4].mxu1 %v923_v42  ;;  %536 = vmatprep.mubr.bf16.mxu0 %v925_v43 }
  0x2d   :  { %601 = vmatprep.mubr.bf16.mxu1 %v927_v44  ;;  %857 = vmatpush3.bf16.msra.mxu0 %v931_v45 }
  0x2e   :  { %874 = vmatpush3.bf16.msra.mxu1 %v931_v45  ;;  %858 = vmatprep.subr.bf16.mxu0 %v938_v46 }
  0x2f   :  { %871 = vmatprep.subr.bf16.mxu1 %v938_v46 }
  0x31   :  { %859 = vmatpush3.bf16.msra.mxu0 %v938_v46 }
  0x32   :  { %875 = vmatpush3.bf16.msra.mxu1 %v938_v46 }
  0x33   :  { %537 = vmatmul.mubr.bf16.gmra.mrb[8].mxu0 %v929_v47 }
  0x34   :  { %602 = vmatmul.mubr.bf16.gmra.mrb[8].mxu1 %v930_v48  ;;  %544 = vmatprep.mubr.bf16.mxu0 %v932_v49 }
  0x35   :  { %609 = vmatprep.mubr.bf16.mxu1 %v934_v50 }
  0x3b   :  { %545 = vmatmul.mubr.bf16.gmra.mrb[12].mxu0 %v936_v55 }
  0x3c   :  { %610 = vmatmul.mubr.bf16.gmra.mrb[12].mxu1 %v937_v56  ;;  %860 = vmatprep.mubr.msk.bf16.mxu0 %vm475_vm0, %v939_v57 }
  0x3d   :  { %864 = vmatprep.mubr.msk.bf16.mxu1 %vm475_vm0, %v940_v59 }
  0x43   :  { %861 = vmatmul.mubr.msk.bf16.vlgmr.msra.gmra.mrb[16].mxu0 %vm475_vm0, %v941_v63 }
  0x44   :  { %865 = vmatmul.mubr.msk.bf16.vlgmr.msra.gmra.mrb[16].mxu1 %vm475_vm0, %v942_v0 }
  0x92   :  { %v122_v1 = vpop.permute.xlu0 %121 }
  0x93   :  { %v132_v18 = vpop.permute.xlu1 %131 }
  0x96   :  { %v127_v3 = vpop.permute.xlu0 %126 }
  0x97   :  { %v137_v33 = vpop.permute.xlu1 %136 }
  0x9a   :  { %v142_v36 = vpop.permute.xlu0 %141 }
  0x9b   :  { %v147_v50 = vpop.permute.xlu1 %146 }
  0x9e   :  { %v152_v54 = vpop.permute.xlu0 %151 }
  0xf6   :  { %v780_v2 = vpop.f32.mrb[0].mxu0 }
  0xf7   :  { %v820_v4 = vpop.f32.mrb[0].mxu1  ;;  %v781_v5 = vpop.f32.mrb[1].mxu0 }
  0xf8   :  { %v782_v6 = vadd.f32 %v781_v5, %v780_v2  ;;  %v821_v7 = vpop.f32.mrb[1].mxu1  ;;  %v783_v8 = vpop.f32.mrb[2].mxu0 }
  0xf9   :  { %v822_v9 = vadd.f32 %v821_v7, %v820_v4  ;;  %v823_v10 = vpop.f32.mrb[2].mxu1  ;;  %v784_v11 = vpop.f32.mrb[3].mxu0 }
  0xfa   :  { %v523_v12 = vadd.f32 %v782_v6, %v122_v1  ;;  %v785_v13 = vadd.f32 %v784_v11, %v783_v8  ;;  %v824_v14 = vpop.f32.mrb[3].mxu1  ;;  %v157_v4 = vpop.permute.xlu1 %156 }
  0xfb   :  { %v825_v15 = vadd.f32 %v824_v14, %v823_v10 }
  0xfc   :  { %v526_v16 = vadd.f32 %v785_v13, %v127_v3  ;;  %v1160_v17 = vadd.f32 %v822_v9, %v523_v12 }
  0xfe   :  { %v786_v19 = vpop.f32.mrb[4].mxu0  ;;  %v1162_v20 = vadd.f32 %v825_v15, %v526_v16 }
  0xff   :  { %v826_v21 = vpop.f32.mrb[4].mxu1  ;;  %v787_v22 = vpop.f32.mrb[5].mxu0 }
 0x100   :  { %v788_v23 = vadd.f32 %v787_v22, %v786_v19  ;;  %v827_v24 = vpop.f32.mrb[5].mxu1  ;;  %v789_v25 = vpop.f32.mrb[6].mxu0 }
 0x101   :  { %v828_v26 = vadd.f32 %v827_v24, %v826_v21  ;;  %v829_v27 = vpop.f32.mrb[6].mxu1  ;;  %v790_v28 = vpop.f32.mrb[7].mxu0 }
 0x102   :  { %v531_v29 = vadd.f32 %v788_v23, %v132_v18  ;;  %v791_v30 = vadd.f32 %v790_v28, %v789_v25  ;;  %v830_v31 = vpop.f32.mrb[7].mxu1 }
 0x103   :  { %v831_v32 = vadd.f32 %v830_v31, %v829_v27 }
 0x104   :  { %v534_v34 = vadd.f32 %v791_v30, %v137_v33  ;;  %v596_v35 = vadd.f32 %v828_v26, %v531_v29 }
 0x106   :  { %v792_v37 = vpop.f32.mrb[8].mxu0  ;;  %v599_v38 = vadd.f32 %v831_v32, %v534_v34 }
 0x107   :  { %v832_v39 = vpop.f32.mrb[8].mxu1  ;;  %v793_v40 = vpop.f32.mrb[9].mxu0 }
 0x108   :  { %v794_v41 = vadd.f32 %v793_v40, %v792_v37  ;;  %v833_v42 = vpop.f32.mrb[9].mxu1  ;;  %v795_v43 = vpop.f32.mrb[10].mxu0 }
 0x109   :  { %v834_v44 = vadd.f32 %v833_v42, %v832_v39  ;;  %v835_v45 = vpop.f32.mrb[10].mxu1  ;;  %v796_v46 = vpop.f32.mrb[11].mxu0 }
 0x10a   :  { %v539_v47 = vadd.f32 %v794_v41, %v142_v36  ;;  %v797_v48 = vadd.f32 %v796_v46, %v795_v43  ;;  %v836_v49 = vpop.f32.mrb[11].mxu1 }
 0x10b   :  { %v837_v51 = vadd.f32 %v836_v49, %v835_v45 }
 0x10c   :  { %v542_v52 = vadd.f32 %v797_v48, %v147_v50  ;;  %v604_v53 = vadd.f32 %v834_v44, %v539_v47 }
 0x10e   :  { %v798_v55 = vpop.f32.mrb[12].mxu0  ;;  %v607_v56 = vadd.f32 %v837_v51, %v542_v52 }
 0x10f   :  { %v838_v57 = vpop.f32.mrb[12].mxu1  ;;  %v799_v58 = vpop.f32.mrb[13].mxu0 }
 0x110   :  { %v800_v59 = vadd.f32 %v799_v58, %v798_v55  ;;  %v839_v60 = vpop.f32.mrb[13].mxu1  ;;  %v801_v61 = vpop.f32.mrb[14].mxu0 }
 0x111   :  { %v840_v62 = vadd.f32 %v839_v60, %v838_v57  ;;  %v841_v63 = vpop.f32.mrb[14].mxu1  ;;  %v802_v0 = vpop.f32.mrb[15].mxu0 }
 0x112   :  { %v547_v1 = vadd.f32 %v800_v59, %v152_v54  ;;  %v803_v2 = vadd.f32 %v802_v0, %v801_v61  ;;  %v842_v3 = vpop.f32.mrb[15].mxu1 }
 0x113   :  { %v843_v5 = vadd.f32 %v842_v3, %v841_v63 }
 0x114   :  { %v550_v6 = vadd.f32 %v803_v2, %v157_v4  ;;  %v612_v7 = vadd.f32 %v840_v62, %v547_v1 }
 0x116   :  { %v862_v8 = vpop.f32.mrb[16].mxu0  ;;  %v615_v9 = vadd.f32 %v843_v5, %v550_v6 }
 0x117   :  { %v661_v10 = vadd.f32 %v862_v8, %v596_v35  ;;  %v866_v11 = vpop.f32.mrb[16].mxu1  ;;  %v652_v12 = vpop.f32.mrb[17].mxu0 }
 0x118   :  { %v677_v13 = vadd.f32 %v866_v11, %v612_v7  ;;  %v653_v14 = vadd.f32 %v652_v12, %v1160_v17  ;;  %v668_v15 = vpop.f32.mrb[17].mxu1  ;;  %v863_v16 = vpop.f32.mrb[18].mxu0 }
 0x119   :  { %v685_v18 = vmax.f32 %v661_v10, 0.0  ;;  %v669_v19 = vadd.f32 %v668_v15, %v604_v53  ;;  %v664_v21 = vadd.f32 %v863_v16, %v599_v38  ;;  %v867_v22 = vpop.f32.mrb[18].mxu1  ;;  %v655_v23 = vpop.f32.mrb[19].mxu0 }
 0x11a   :  { %v689_v24 = vmax.f32 %v677_v13, 0.0  ;;  %v683_v25 = vmax.f32 %v653_v14, 0.0  ;;  %v680_v26 = vadd.f32 %v867_v22, %v615_v9  ;;  %v656_v27 = vadd.f32 %v655_v23, %v1162_v20  ;;  %v671_v28 = vpop.f32.mrb[19].mxu1 }
 0x11b   :  { %694 = vst.msk [vmem:[%s1201_s3 + $0x10] sm:$0xff] %vm691_vm1, %v685_v18  ;;  %v687_v29 = vmax.f32 %v669_v19, 0.0  ;;  %v686_v17 = vmax.f32 %v664_v21, 0.0  ;;  %v672_v30 = vadd.f32 %v671_v28, %v607_v56 }
 0x11c   :  { %698 = vst.msk [vmem:[%s1201_s3 + $0x30] sm:$0xff] %vm691_vm1, %v689_v24  ;;  %692 = vst.msk [vmem:[%s1201_s3] sm:$0xff] %vm691_vm1, %v683_v25  ;;  %v690_v20 = vmax.f32 %v680_v26, 0.0  ;;  %v684_v31 = vmax.f32 %v656_v27, 0.0 }
 0x11d   :  { %696 = vst.msk [vmem:[%s1201_s3 + $0x20] sm:$0xff] %vm691_vm1, %v687_v29  ;;  %695 = vst.msk [vmem:[%s1201_s3 + $0x18] sm:$0xff] %vm691_vm1, %v686_v17  ;;  %v688_v32 = vmax.f32 %v672_v30, 0.0 }
 0x11e   :  { %699 = vst.msk [vmem:[%s1201_s3 + $0x38] sm:$0xff] %vm691_vm1, %v690_v20  ;;  %693 = vst.msk [vmem:[%s1201_s3 + $0x8] sm:$0xff] %vm691_vm1, %v684_v31 }
 0x11f   :  { %697 = vst.msk [vmem:[%s1201_s3 + $0x28] sm:$0xff] %vm691_vm1, %v688_v32 }

// kernel: segnet_forward.48
= control target key start
LH: loop header
LB: loop body
LE: loop exit
PB: predicated region body
PF: predicated region fallthrough
CT: control target
= control target key end

     0   :  { %v97_v0 = vlaneseq  ;;  %vm137_vm0 = vcmask 64512   ;;  %s539_s0 = inlined_call_operand.vmem [shape: f32[256,8], index: 0, kind: input, shape index: {}]   ;;  %s540_s2 = inlined_call_operand.vmem [shape: f32[64,8], index: 2, kind: output, shape index: {0}]   ;;  %s541_s1 = inlined_call_operand.vmem [shape: s32[1,8], index: 1, kind: input, shape index: {}]   ;;  %s542_s3 = inlined_call_operand.vmem [shape: s32[64,8], index: 3, kind: output, shape index: {1}]  }
   0x1   :  { %v185_v1 = vld [vmem:[%s539_s0] sm:$0xff]  ;;  %v205_v6 = vld [vmem:[%s539_s0 + $0x8] sm:$0xff]  ;;  %v226_v12 = vld [vmem:[%s539_s0 + $0x10] sm:$0xff] }
   0x2   :  { %v190_v2 = vld [vmem:[%s539_s0 + $0x40] sm:$0xff]  ;;  %v210_v7 = vld [vmem:[%s539_s0 + $0x48] sm:$0xff]  ;;  %v232_v14 = vld [vmem:[%s539_s0 + $0x50] sm:$0xff]  ;;  %v98_v17 = vshrl.u32 %v97_v0, 7 }
   0x3   :  { %v195_v3 = vld [vmem:[%s539_s0 + $0x80] sm:$0xff]  ;;  %v45_v5 = vmax.f32 %v185_v1, %v190_v2  ;;  %v216_v9 = vld [vmem:[%s539_s0 + $0x88] sm:$0xff]  ;;  %v46_v11 = vmax.f32 %v205_v6, %v210_v7  ;;  %v237_v15 = vld [vmem:[%s539_s0 + $0x90] sm:$0xff]  ;;  %v47_v19 = vmax.f32 %v226_v12, %v232_v14 }
   0x4   :  { %v37_v4 = vld [vmem:[%s539_s0 + $0xc0] sm:$0xff]  ;;  %v38_v10 = vld [vmem:[%s539_s0 + $0xc8] sm:$0xff]  ;;  %v39_v16 = vld [vmem:[%s539_s0 + $0xd0] sm:$0xff]  ;;  %v99_v39 = vsub.s32 0, %v98_v17 }
   0x5   :  { %v53_v8 = vmax.f32 %v195_v3, %v37_v4  ;;  %v54_v13 = vmax.f32 %v216_v9, %v38_v10  ;;  %v55_v20 = vmax.f32 %v237_v15, %v39_v16  ;;  %v250_v21 = vld [vmem:[%s539_s0 + $0x18] sm:$0xff]  ;;  %v272_v27 = vld [vmem:[%s539_s0 + $0x20] sm:$0xff]  ;;  %v300_v34 = vld [vmem:[%s539_s0 + $0x28] sm:$0xff] }
   0x6   :  { %v255_v22 = vld [vmem:[%s539_s0 + $0x58] sm:$0xff]  ;;  %v277_v28 = vld [vmem:[%s539_s0 + $0x60] sm:$0xff]  ;;  %v311_v36 = vld [vmem:[%s539_s0 + $0x68] sm:$0xff] }
   0x7   :  { %v242_v18 = vmax.f32 %v45_v5, %v53_v8  ;;  %v260_v23 = vld [vmem:[%s539_s0 + $0x98] sm:$0xff]  ;;  %v262_v24 = vmax.f32 %v46_v11, %v54_v13  ;;  %v48_v26 = vmax.f32 %v250_v21, %v255_v22  ;;  %v284_v29 = vmax.f32 %v47_v19, %v55_v20  ;;  %v290_v31 = vld [vmem:[%s539_s0 + $0xa0] sm:$0xff]  ;;  %v316_v37 = vld [vmem:[%s539_s0 + $0xa8] sm:$0xff] }
   0x8   :  { %v40_v25 = vld [vmem:[%s539_s0 + $0xd8] sm:$0xff]  ;;  %v41_v32 = vld [vmem:[%s539_s0 + $0xe0] sm:$0xff]  ;;  %v49_v33 = vmax.f32 %v272_v27, %v277_v28  ;;  %v42_v38 = vld [vmem:[%s539_s0 + $0xe8] sm:$0xff]  ;;  %v50_v41 = vmax.f32 %v300_v34, %v311_v36 }
   0x9   :  { %138 = vst.msk [vmem:[%s540_s2] sm:$0xff] %vm137_vm0, %v242_v18  ;;  %v56_v30 = vmax.f32 %v260_v23, %v40_v25  ;;  %139 = vst.msk [vmem:[%s540_s2 + $0x8] sm:$0xff] %vm137_vm0, %v262_v24  ;;  %v57_v35 = vmax.f32 %v290_v31, %v41_v32  ;;  %vm78_vm1 = vcmp.eq.f32.partialorder %v190_v2, %v242_v18  ;;  %v338_v43 = vld [vmem:[%s539_s0 + $0x30] sm:$0xff]  ;;  %v366_v49 = vld [vmem:[%s539_s0 + $0x38] sm:$0xff] }
   0xa   :  { %vm87_vm2 = vcmp.eq.f32.partialorder %v195_v3, %v242_v18  ;;  %140 = vst.msk [vmem:[%s540_s2 + $0x10] sm:$0xff] %vm137_vm0, %v284_v29  ;;  %v58_v42 = vmax.f32 %v316_v37, %v42_v38  ;;  %v343_v44 = vld [vmem:[%s539_s0 + $0x70] sm:$0xff]  ;;  %vm79_vm5 = vcmp.eq.f32.partialorder %v210_v7, %v262_v24  ;;  %v371_v50 = vld [vmem:[%s539_s0 + $0x78] sm:$0xff]  ;;  %vm88_vm6 = vcmp.eq.f32.partialorder %v216_v9, %v262_v24  ;;  %v69_v56 = vld [vmem:[%s541_s1] sm:$0x1] }
   0xb   :  { %v330_v40 = vmax.f32 %v48_v26, %v56_v30  ;;  %v348_v45 = vld [vmem:[%s539_s0 + $0xb0] sm:$0xff]  ;;  %v356_v46 = vmax.f32 %v49_v33, %v57_v35  ;;  %v51_v48 = vmax.f32 %v338_v43, %v343_v44  ;;  %v388_v53 = vld [vmem:[%s539_s0 + $0xb8] sm:$0xff]  ;;  %v52_v55 = vmax.f32 %v366_v49, %v371_v50 }
   0xc   :  { %v43_v47 = vld [vmem:[%s539_s0 + $0xf0] sm:$0xff]  ;;  %v382_v51 = vmax.f32 %v50_v41, %v58_v42  ;;  %v44_v54 = vld [vmem:[%s539_s0 + $0xf8] sm:$0xff]  ;;  %vm80_vm8 = vcmp.eq.f32.partialorder %v232_v14, %v284_v29  ;;  %v86_v58 = vadd.s32 1, %v69_v56  ;;  %v95_v59 = vadd.s32 4, %v69_v56 }
   0xd   :  { %141 = vst.msk [vmem:[%s540_s2 + $0x18] sm:$0xff] %vm137_vm0, %v330_v40  ;;  %v59_v52 = vmax.f32 %v348_v45, %v43_v47  ;;  %142 = vst.msk [vmem:[%s540_s2 + $0x20] sm:$0xff] %vm137_vm0, %v356_v46  ;;  %v60_v57 = vmax.f32 %v388_v53, %v44_v54  ;;  %v128_v60 = vrot.slane %v69_v56, %v99_v39 }
   0xe   :  { %143 = vst.msk [vmem:[%s540_s2 + $0x28] sm:$0xff] %vm137_vm0, %v382_v51  ;;  %vm89_vm9 = vcmp.eq.f32.partialorder %v237_v15, %v284_v29  ;;  %vm81_vm11 = vcmp.eq.f32.partialorder %v255_v22, %v330_v40  ;;  %v96_v63 = vadd.s32 1, %v95_v59  ;;  %v100_v0 = vrot.slane %v95_v59, %v99_v39 }
   0xf   :  { %v67_v61 = vmax.f32 %v51_v48, %v59_v52  ;;  %v68_v62 = vmax.f32 %v52_v55, %v60_v57  ;;  %v116_v4 = vrot.slane %v86_v58, %v99_v39  ;;  %vm90_vm12 = vcmp.eq.f32.partialorder %v260_v23, %v330_v40 }
  0x10   :  { %v104_v5 = vrot.slane %v96_v63, %v99_v39  ;;  %vm75_vm10 = vcmp.eq.f32.partialorder %v300_v34, %v382_v51  ;;  %vm83_vm7 = vcmp.eq.f32.partialorder %v311_v36, %v382_v51  ;;  %vm92_vm13 = vcmp.eq.f32.partialorder %v316_v37, %v382_v51 }
  0x11   :  { %144 = vst.msk [vmem:[%s540_s2 + $0x30] sm:$0xff] %vm137_vm0, %v67_v61  ;;  %145 = vst.msk [vmem:[%s540_s2 + $0x38] sm:$0xff] %vm137_vm0, %v68_v62  ;;  %vm76_vm14 = vcmp.eq.f32.partialorder %v338_v43, %v67_v61  ;;  %vm84_vm4 = vcmp.eq.f32.partialorder %v343_v44, %v67_v61  ;;  %vm93_vm15 = vcmp.eq.f32.partialorder %v348_v45, %v67_v61 }
  0x12   :  { %vm77_vm3 = vcmp.eq.f32.partialorder %v366_v49, %v68_v62  ;;  %v105_v8 = vsel %vm87_vm2, %v100_v0, %v104_v5  ;;  %v106_v10 = vsel %vm88_vm6, %v100_v0, %v104_v5  ;;  %v107_v11 = vsel %vm89_vm9, %v100_v0, %v104_v5 }
  0x13   :  { %v108_v13 = vsel %vm90_vm12, %v100_v0, %v104_v5  ;;  %v117_v16 = vsel %vm78_vm1, %v116_v4, %v105_v8  ;;  %v118_v3 = vsel %vm79_vm5, %v116_v4, %v106_v10  ;;  %v119_v9 = vsel %vm80_vm8, %v116_v4, %v107_v11 }
  0x14   :  { %v120_v15 = vsel %vm81_vm11, %v116_v4, %v108_v13  ;;  %vm543_vm2 = vcmp.eq.f32.partialorder %v185_v1, %v242_v18  ;;  %vm544_vm6 = vcmp.eq.f32.partialorder %v205_v6, %v262_v24  ;;  %vm545_vm1 = vcmp.eq.f32.partialorder %v226_v12, %v284_v29 }
  0x15   :  { %v129_v17 = vsel %vm543_vm2, %v128_v60, %v117_v16  ;;  %v130_v2 = vsel %vm544_vm6, %v128_v60, %v118_v3  ;;  %v131_v7 = vsel %vm545_vm1, %v128_v60, %v119_v9  ;;  %vm546_vm5 = vcmp.eq.f32.partialorder %v250_v21, %v330_v40 }
  0x16   :  { %v132_v14 = vsel %vm546_vm5, %v128_v60, %v120_v15  ;;  %146 = vst.msk [vmem:[%s542_s3] sm:$0xff] %vm137_vm0, %v129_v17  ;;  %147 = vst.msk [vmem:[%s542_s3 + $0x8] sm:$0xff] %vm137_vm0, %v130_v2  ;;  %vm547_vm8 = vcmp.eq.f32.partialorder %v290_v31, %v356_v46  ;;  %v110_v6 = vsel %vm92_vm13, %v100_v0, %v104_v5 }
  0x17   :  { %148 = vst.msk [vmem:[%s542_s3 + $0x10] sm:$0xff] %vm137_vm0, %v131_v7  ;;  %149 = vst.msk [vmem:[%s542_s3 + $0x18] sm:$0xff] %vm137_vm0, %v132_v14  ;;  %v109_v1 = vsel %vm547_vm8, %v100_v0, %v104_v5  ;;  %v111_v12 = vsel %vm93_vm15, %v100_v0, %v104_v5  ;;  %vm85_vm9 = vcmp.eq.f32.partialorder %v371_v50, %v68_v62 }
  0x18   :  { %vm548_vm11 = vcmp.eq.f32.partialorder %v277_v28, %v356_v46  ;;  %v122_v19 = vsel %vm83_vm7, %v116_v4, %v110_v6  ;;  %v123_v20 = vsel %vm84_vm4, %v116_v4, %v111_v12  ;;  %vm94_vm12 = vcmp.eq.f32.partialorder %v388_v53, %v68_v62 }
  0x19   :  { %v121_v18 = vsel %vm548_vm11, %v116_v4, %v109_v1  ;;  %vm549_vm13 = vcmp.eq.f32.partialorder %v272_v27, %v356_v46  ;;  %v134_v22 = vsel %vm75_vm10, %v128_v60, %v122_v19  ;;  %v135_v23 = vsel %vm76_vm14, %v128_v60, %v123_v20 }
  0x1a   :  { %v133_v21 = vsel %vm549_vm13, %v128_v60, %v121_v18  ;;  %v112_v24 = vsel %vm94_vm12, %v100_v0, %v104_v5  ;;  %151 = vst.msk [vmem:[%s542_s3 + $0x28] sm:$0xff] %vm137_vm0, %v134_v22  ;;  %152 = vst.msk [vmem:[%s542_s3 + $0x30] sm:$0xff] %vm137_vm0, %v135_v23 }
  0x1b   :  { %150 = vst.msk [vmem:[%s542_s3 + $0x20] sm:$0xff] %vm137_vm0, %v133_v21  ;;  %v124_v25 = vsel %vm85_vm9, %v116_v4, %v112_v24 }
  0x1c   :  { %v136_v26 = vsel %vm77_vm3, %v128_v60, %v124_v25 }
  0x1d   :  { %153 = vst.msk [vmem:[%s542_s3 + $0x38] sm:$0xff] %vm137_vm0, %v136_v26 }

// kernel: segnet_forward.53
= control target key start
LH: loop header
LB: loop body
LE: loop exit
PB: predicated region body
PF: predicated region fallthrough
CT: control target
= control target key end

     0   :  { %v31_v0 = vlaneseq  ;;  %vm114_vm0 = vcmask 15360   ;;  %s466_s2 = inlined_call_operand.vmem [shape: s32[1,2], index: 2, kind: input, shape index: {}]   ;;  %s467_s0 = inlined_call_operand.vmem [shape: f32[64,2], index: 0, kind: input, shape index: {}]   ;;  %s468_s1 = inlined_call_operand.vmem [shape: s32[64,2], index: 1, kind: input, shape index: {}]   ;;  %s469_s3 = inlined_call_operand.vmem [shape: f32[256,2], index: 3, kind: output, shape index: {}]  }
   0x1   :  { %v30_v1 = vld [vmem:[%s466_s2] sm:$0x1]  ;;  %v187_v9 = vld [vmem:[%s467_s0 + $0x8] sm:$0xff]  ;;  %v197_v11 = vld [vmem:[%s467_s0 + $0x10] sm:$0xff] }
   0x2   :  { %v32_v2 = vshrl.u32 %v31_v0, 7  ;;  %v51_v3 = vadd.s32 1, %v30_v1  ;;  %v72_v4 = vadd.s32 2, %v30_v1  ;;  %v93_v5 = vadd.s32 3, %v30_v1  ;;  %v177_v6 = vld [vmem:[%s467_s0] sm:$0xff]  ;;  %v192_v10 = vld [vmem:[%s468_s1 + $0x8] sm:$0xff] }
   0x3   :  { %v182_v7 = vld [vmem:[%s468_s1] sm:$0xff]  ;;  %v202_v12 = vld [vmem:[%s468_s1 + $0x10] sm:$0xff]  ;;  %v207_v13 = vld [vmem:[%s468_s1 + $0x18] sm:$0xff] }
   0x4   :  { %v33_v8 = vsub.s32 0, %v32_v2  ;;  %v212_v15 = vld [vmem:[%s467_s0 + $0x18] sm:$0xff]  ;;  %v217_v16 = vld [vmem:[%s467_s0 + $0x20] sm:$0xff]  ;;  %v227_v18 = vld [vmem:[%s468_s1 + $0x28] sm:$0xff] }
   0x5   :  { %v222_v17 = vld [vmem:[%s468_s1 + $0x20] sm:$0xff]  ;;  %v232_v19 = vld [vmem:[%s468_s1 + $0x30] sm:$0xff]  ;;  %v237_v20 = vld [vmem:[%s468_s1 + $0x38] sm:$0xff] }
   0x6   :  { %v34_v14 = vrot.slane %v30_v1, %v33_v8  ;;  %v55_v21 = vrot.slane %v51_v3, %v33_v8  ;;  %v239_v22 = vrot.slane %v72_v4, %v33_v8  ;;  %v241_v23 = vrot.slane %v93_v5, %v33_v8  ;;  %v250_v24 = vld [vmem:[%s467_s0 + $0x28] sm:$0xff]  ;;  %v255_v25 = vld [vmem:[%s467_s0 + $0x30] sm:$0xff]  ;;  %v260_v26 = vld [vmem:[%s467_s0 + $0x38] sm:$0xff] }
   0x8   :  { %vm35_vm1 = vcmp.eq.s32.totalorder %v182_v7, %v34_v14  ;;  %vm36_vm2 = vcmp.eq.s32.totalorder %v192_v10, %v34_v14  ;;  %vm37_vm3 = vcmp.eq.s32.totalorder %v202_v12, %v34_v14  ;;  %vm38_vm4 = vcmp.eq.s32.totalorder %v207_v13, %v34_v14 }
   0x9   :  { %v43_v27 = vsel %vm35_vm1, %v177_v6, 0.0  ;;  %v44_v28 = vsel %vm36_vm2, %v187_v9, 0.0  ;;  %v45_v29 = vsel %vm37_vm3, %v197_v11, 0.0  ;;  %v46_v30 = vsel %vm38_vm4, %v212_v15, 0.0 }
   0xa   :  { %115 = vst.msk [vmem:[%s469_s3] sm:$0xff] %vm114_vm0, %v43_v27  ;;  %116 = vst.msk [vmem:[%s469_s3 + $0x8] sm:$0xff] %vm114_vm0, %v44_v28  ;;  %vm39_vm5 = vcmp.eq.s32.totalorder %v222_v17, %v34_v14  ;;  %vm40_vm6 = vcmp.eq.s32.totalorder %v227_v18, %v34_v14  ;;  %vm41_vm7 = vcmp.eq.s32.totalorder %v232_v19, %v34_v14 }
   0xb   :  { %117 = vst.msk [vmem:[%s469_s3 + $0x10] sm:$0xff] %vm114_vm0, %v45_v29  ;;  %118 = vst.msk [vmem:[%s469_s3 + $0x18] sm:$0xff] %vm114_vm0, %v46_v30  ;;  %vm42_vm8 = vcmp.eq.s32.totalorder %v237_v20, %v34_v14  ;;  %v47_v31 = vsel %vm39_vm5, %v217_v16, 0.0  ;;  %v48_v32 = vsel %vm40_vm6, %v250_v24, 0.0  ;;  %v49_v33 = vsel %vm41_vm7, %v255_v25, 0.0 }
   0xc   :  { %v50_v34 = vsel %vm42_vm8, %v260_v26, 0.0  ;;  %119 = vst.msk [vmem:[%s469_s3 + $0x20] sm:$0xff] %vm114_vm0, %v47_v31  ;;  %120 = vst.msk [vmem:[%s469_s3 + $0x28] sm:$0xff] %vm114_vm0, %v48_v32  ;;  %vm56_vm9 = vcmp.eq.s32.totalorder %v182_v7, %v55_v21  ;;  %vm57_vm10 = vcmp.eq.s32.totalorder %v192_v10, %v55_v21  ;;  %vm58_vm11 = vcmp.eq.s32.totalorder %v202_v12, %v55_v21 }
   0xd   :  { %121 = vst.msk [vmem:[%s469_s3 + $0x30] sm:$0xff] %vm114_vm0, %v49_v33  ;;  %122 = vst.msk [vmem:[%s469_s3 + $0x38] sm:$0xff] %vm114_vm0, %v50_v34  ;;  %vm59_vm12 = vcmp.eq.s32.totalorder %v207_v13, %v55_v21  ;;  %v64_v35 = vsel %vm56_vm9, %v177_v6, 0.0  ;;  %v65_v36 = vsel %vm57_vm10, %v187_v9, 0.0  ;;  %v66_v37 = vsel %vm58_vm11, %v197_v11, 0.0 }
   0xe   :  { %v67_v38 = vsel %vm59_vm12, %v212_v15, 0.0  ;;  %123 = vst.msk [vmem:[%s469_s3 + $0x40] sm:$0xff] %vm114_vm0, %v64_v35  ;;  %124 = vst.msk [vmem:[%s469_s3 + $0x48] sm:$0xff] %vm114_vm0, %v65_v36  ;;  %vm60_vm13 = vcmp.eq.s32.totalorder %v222_v17, %v55_v21  ;;  %vm61_vm14 = vcmp.eq.s32.totalorder %v227_v18, %v55_v21  ;;  %vm62_vm15 = vcmp.eq.s32.totalorder %v232_v19, %v55_v21 }
   0xf   :  { %125 = vst.msk [vmem:[%s469_s3 + $0x50] sm:$0xff] %vm114_vm0, %v66_v37  ;;  %126 = vst.msk [vmem:[%s469_s3 + $0x58] sm:$0xff] %vm114_vm0, %v67_v38  ;;  %vm63_vm1 = vcmp.eq.s32.totalorder %v237_v20, %v55_v21  ;;  %v68_v39 = vsel %vm60_vm13, %v217_v16, 0.0  ;;  %v69_v40 = vsel %vm61_vm14, %v250_v24, 0.0  ;;  %v70_v41 = vsel %vm62_vm15, %v255_v25, 0.0 }
  0x10   :  { %v71_v42 = vsel %vm63_vm1, %v260_v26, 0.0  ;;  %127 = vst.msk [vmem:[%s469_s3 + $0x60] sm:$0xff] %vm114_vm0, %v68_v39  ;;  %128 = vst.msk [vmem:[%s469_s3 + $0x68] sm:$0xff] %vm114_vm0, %v69_v40  ;;  %vm77_vm2 = vcmp.eq.s32.totalorder %v182_v7, %v239_v22  ;;  %vm78_vm3 = vcmp.eq.s32.totalorder %v192_v10, %v239_v22  ;;  %vm79_vm4 = vcmp.eq.s32.totalorder %v202_v12, %v239_v22 }
  0x11   :  { %129 = vst.msk [vmem:[%s469_s3 + $0x70] sm:$0xff] %vm114_vm0, %v70_v41  ;;  %130 = vst.msk [vmem:[%s469_s3 + $0x78] sm:$0xff] %vm114_vm0, %v71_v42  ;;  %vm80_vm5 = vcmp.eq.s32.totalorder %v207_v13, %v239_v22  ;;  %v85_v43 = vsel %vm77_vm2, %v177_v6, 0.0  ;;  %v86_v44 = vsel %vm78_vm3, %v187_v9, 0.0  ;;  %v87_v45 = vsel %vm79_vm4, %v197_v11, 0.0 }
  0x12   :  { %v88_v46 = vsel %vm80_vm5, %v212_v15, 0.0  ;;  %131 = vst.msk [vmem:[%s469_s3 + $0x80] sm:$0xff] %vm114_vm0, %v85_v43  ;;  %132 = vst.msk [vmem:[%s469_s3 + $0x88] sm:$0xff] %vm114_vm0, %v86_v44  ;;  %vm81_vm6 = vcmp.eq.s32.totalorder %v222_v17, %v239_v22  ;;  %vm82_vm7 = vcmp.eq.s32.totalorder %v227_v18, %v239_v22  ;;  %vm83_vm8 = vcmp.eq.s32.totalorder %v232_v19, %v239_v22 }
  0x13   :  { %133 = vst.msk [vmem:[%s469_s3 + $0x90] sm:$0xff] %vm114_vm0, %v87_v45  ;;  %134 = vst.msk [vmem:[%s469_s3 + $0x98] sm:$0xff] %vm114_vm0, %v88_v46  ;;  %vm84_vm9 = vcmp.eq.s32.totalorder %v237_v20, %v239_v22  ;;  %v89_v47 = vsel %vm81_vm6, %v217_v16, 0.0  ;;  %v90_v48 = vsel %vm82_vm7, %v250_v24, 0.0  ;;  %v91_v49 = vsel %vm83_vm8, %v255_v25, 0.0 }
  0x14   :  { %v92_v50 = vsel %vm84_vm9, %v260_v26, 0.0  ;;  %135 = vst.msk [vmem:[%s469_s3 + $0xa0] sm:$0xff] %vm114_vm0, %v89_v47  ;;  %136 = vst.msk [vmem:[%s469_s3 + $0xa8] sm:$0xff] %vm114_vm0, %v90_v48  ;;  %vm98_vm10 = vcmp.eq.s32.totalorder %v182_v7, %v241_v23  ;;  %vm99_vm11 = vcmp.eq.s32.totalorder %v192_v10, %v241_v23  ;;  %vm100_vm12 = vcmp.eq.s32.totalorder %v202_v12, %v241_v23 }
  0x15   :  { %137 = vst.msk [vmem:[%s469_s3 + $0xb0] sm:$0xff] %vm114_vm0, %v91_v49  ;;  %138 = vst.msk [vmem:[%s469_s3 + $0xb8] sm:$0xff] %vm114_vm0, %v92_v50  ;;  %vm101_vm13 = vcmp.eq.s32.totalorder %v207_v13, %v241_v23  ;;  %v106_v51 = vsel %vm98_vm10, %v177_v6, 0.0  ;;  %v107_v52 = vsel %vm99_vm11, %v187_v9, 0.0  ;;  %v108_v53 = vsel %vm100_vm12, %v197_v11, 0.0 }
  0x16   :  { %v109_v54 = vsel %vm101_vm13, %v212_v15, 0.0  ;;  %139 = vst.msk [vmem:[%s469_s3 + $0xc0] sm:$0xff] %vm114_vm0, %v106_v51  ;;  %140 = vst.msk [vmem:[%s469_s3 + $0xc8] sm:$0xff] %vm114_vm0, %v107_v52  ;;  %vm102_vm14 = vcmp.eq.s32.totalorder %v222_v17, %v241_v23  ;;  %vm103_vm15 = vcmp.eq.s32.totalorder %v227_v18, %v241_v23  ;;  %vm104_vm1 = vcmp.eq.s32.totalorder %v232_v19, %v241_v23 }
  0x17   :  { %141 = vst.msk [vmem:[%s469_s3 + $0xd0] sm:$0xff] %vm114_vm0, %v108_v53  ;;  %142 = vst.msk [vmem:[%s469_s3 + $0xd8] sm:$0xff] %vm114_vm0, %v109_v54  ;;  %vm105_vm2 = vcmp.eq.s32.totalorder %v237_v20, %v241_v23  ;;  %v110_v55 = vsel %vm102_vm14, %v217_v16, 0.0  ;;  %v111_v56 = vsel %vm103_vm15, %v250_v24, 0.0  ;;  %v112_v57 = vsel %vm104_vm1, %v255_v25, 0.0 }
  0x18   :  { %v113_v58 = vsel %vm105_vm2, %v260_v26, 0.0  ;;  %143 = vst.msk [vmem:[%s469_s3 + $0xe0] sm:$0xff] %vm114_vm0, %v110_v55  ;;  %144 = vst.msk [vmem:[%s469_s3 + $0xe8] sm:$0xff] %vm114_vm0, %v111_v56 }
  0x19   :  { %145 = vst.msk [vmem:[%s469_s3 + $0xf0] sm:$0xff] %vm114_vm0, %v112_v57  ;;  %146 = vst.msk [vmem:[%s469_s3 + $0xf8] sm:$0xff] %vm114_vm0, %v113_v58 }

// kernel: segnet_forward.52
= control target key start
LH: loop header
LB: loop body
LE: loop exit
PB: predicated region body
PF: predicated region fallthrough
CT: control target
= control target key end

     0   :  { %v97_v0 = vlaneseq  ;;  %vm137_vm0 = vcmask 15360   ;;  %s539_s0 = inlined_call_operand.vmem [shape: f32[256,2], index: 0, kind: input, shape index: {}]   ;;  %s540_s2 = inlined_call_operand.vmem [shape: f32[64,2], index: 2, kind: output, shape index: {0}]   ;;  %s541_s1 = inlined_call_operand.vmem [shape: s32[1,2], index: 1, kind: input, shape index: {}]   ;;  %s542_s3 = inlined_call_operand.vmem [shape: s32[64,2], index: 3, kind: output, shape index: {1}]  }
   0x1   :  { %v185_v1 = vld [vmem:[%s539_s0] sm:$0xff]  ;;  %v205_v6 = vld [vmem:[%s539_s0 + $0x8] sm:$0xff]  ;;  %v226_v12 = vld [vmem:[%s539_s0 + $0x10] sm:$0xff] }
   0x2   :  { %v190_v2 = vld [vmem:[%s539_s0 + $0x40] sm:$0xff]  ;;  %v210_v7 = vld [vmem:[%s539_s0 + $0x48] sm:$0xff]  ;;  %v232_v14 = vld [vmem:[%s539_s0 + $0x50] sm:$0xff]  ;;  %v98_v17 = vshrl.u32 %v97_v0, 7 }
   0x3   :  { %v195_v3 = vld [vmem:[%s539_s0 + $0x80] sm:$0xff]  ;;  %v45_v5 = vmax.f32 %v185_v1, %v190_v2  ;;  %v216_v9 = vld [vmem:[%s539_s0 + $0x88] sm:$0xff]  ;;  %v46_v11 = vmax.f32 %v205_v6, %v210_v7  ;;  %v237_v15 = vld [vmem:[%s539_s0 + $0x90] sm:$0xff]  ;;  %v47_v19 = vmax.f32 %v226_v12, %v232_v14 }
   0x4   :  { %v37_v4 = vld [vmem:[%s539_s0 + $0xc0] sm:$0xff]  ;;  %v38_v10 = vld [vmem:[%s539_s0 + $0xc8] sm:$0xff]  ;;  %v39_v16 = vld [vmem:[%s539_s0 + $0xd0] sm:$0xff]  ;;  %v99_v39 = vsub.s32 0, %v98_v17 }
   0x5   :  { %v53_v8 = vmax.f32 %v195_v3, %v37_v4  ;;  %v54_v13 = vmax.f32 %v216_v9, %v38_v10  ;;  %v55_v20 = vmax.f32 %v237_v15, %v39_v16  ;;  %v250_v21 = vld [vmem:[%s539_s0 + $0x18] sm:$0xff]  ;;  %v272_v27 = vld [vmem:[%s539_s0 + $0x20] sm:$0xff]  ;;  %v300_v34 = vld [vmem:[%s539_s0 + $0x28] sm:$0xff] }
   0x6   :  { %v255_v22 = vld [vmem:[%s539_s0 + $0x58] sm:$0xff]  ;;  %v277_v28 = vld [vmem:[%s539_s0 + $0x60] sm:$0xff]  ;;  %v311_v36 = vld [vmem:[%s539_s0 + $0x68] sm:$0xff] }
   0x7   :  { %v242_v18 = vmax.f32 %v45_v5, %v53_v8  ;;  %v260_v23 = vld [vmem:[%s539_s0 + $0x98] sm:$0xff]  ;;  %v262_v24 = vmax.f32 %v46_v11, %v54_v13  ;;  %v48_v26 = vmax.f32 %v250_v21, %v255_v22  ;;  %v284_v29 = vmax.f32 %v47_v19, %v55_v20  ;;  %v290_v31 = vld [vmem:[%s539_s0 + $0xa0] sm:$0xff]  ;;  %v316_v37 = vld [vmem:[%s539_s0 + $0xa8] sm:$0xff] }
   0x8   :  { %v40_v25 = vld [vmem:[%s539_s0 + $0xd8] sm:$0xff]  ;;  %v41_v32 = vld [vmem:[%s539_s0 + $0xe0] sm:$0xff]  ;;  %v49_v33 = vmax.f32 %v272_v27, %v277_v28  ;;  %v42_v38 = vld [vmem:[%s539_s0 + $0xe8] sm:$0xff]  ;;  %v50_v41 = vmax.f32 %v300_v34, %v311_v36 }
   0x9   :  { %138 = vst.msk [vmem:[%s540_s2] sm:$0xff] %vm137_vm0, %v242_v18  ;;  %v56_v30 = vmax.f32 %v260_v23, %v40_v25  ;;  %139 = vst.msk [vmem:[%s540_s2 + $0x8] sm:$0xff] %vm137_vm0, %v262_v24  ;;  %v57_v35 = vmax.f32 %v290_v31, %v41_v32  ;;  %vm78_vm1 = vcmp.eq.f32.partialorder %v190_v2, %v242_v18  ;;  %v338_v43 = vld [vmem:[%s539_s0 + $0x30] sm:$0xff]  ;;  %v366_v49 = vld [vmem:[%s539_s0 + $0x38] sm:$0xff] }
   0xa   :  { %vm87_vm2 = vcmp.eq.f32.partialorder %v195_v3, %v242_v18  ;;  %140 = vst.msk [vmem:[%s540_s2 + $0x10] sm:$0xff] %vm137_vm0, %v284_v29  ;;  %v58_v42 = vmax.f32 %v316_v37, %v42_v38  ;;  %v343_v44 = vld [vmem:[%s539_s0 + $0x70] sm:$0xff]  ;;  %vm79_vm5 = vcmp.eq.f32.partialorder %v210_v7, %v262_v24  ;;  %v371_v50 = vld [vmem:[%s539_s0 + $0x78] sm:$0xff]  ;;  %vm88_vm6 = vcmp.eq.f32.partialorder %v216_v9, %v262_v24  ;;  %v69_v56 = vld [vmem:[%s541_s1] sm:$0x1] }
   0xb   :  { %v330_v40 = vmax.f32 %v48_v26, %v56_v30  ;;  %v348_v45 = vld [vmem:[%s539_s0 + $0xb0] sm:$0xff]  ;;  %v356_v46 = vmax.f32 %v49_v33, %v57_v35  ;;  %v51_v48 = vmax.f32 %v338_v43, %v343_v44  ;;  %v388_v53 = vld [vmem:[%s539_s0 + $0xb8] sm:$0xff]  ;;  %v52_v55 = vmax.f32 %v366_v49, %v371_v50 }
   0xc   :  { %v43_v47 = vld [vmem:[%s539_s0 + $0xf0] sm:$0xff]  ;;  %v382_v51 = vmax.f32 %v50_v41, %v58_v42  ;;  %v44_v54 = vld [vmem:[%s539_s0 + $0xf8] sm:$0xff]  ;;  %vm80_vm8 = vcmp.eq.f32.partialorder %v232_v14, %v284_v29  ;;  %v86_v58 = vadd.s32 1, %v69_v56  ;;  %v95_v59 = vadd.s32 2, %v69_v56 }
   0xd   :  { %141 = vst.msk [vmem:[%s540_s2 + $0x18] sm:$0xff] %vm137_vm0, %v330_v40  ;;  %v59_v52 = vmax.f32 %v348_v45, %v43_v47  ;;  %142 = vst.msk [vmem:[%s540_s2 + $0x20] sm:$0xff] %vm137_vm0, %v356_v46  ;;  %v60_v57 = vmax.f32 %v388_v53, %v44_v54  ;;  %v128_v60 = vrot.slane %v69_v56, %v99_v39 }
   0xe   :  { %143 = vst.msk [vmem:[%s540_s2 + $0x28] sm:$0xff] %vm137_vm0, %v382_v51  ;;  %vm89_vm9 = vcmp.eq.f32.partialorder %v237_v15, %v284_v29  ;;  %vm81_vm11 = vcmp.eq.f32.partialorder %v255_v22, %v330_v40  ;;  %v96_v63 = vadd.s32 1, %v95_v59  ;;  %v100_v0 = vrot.slane %v95_v59, %v99_v39 }
   0xf   :  { %v67_v61 = vmax.f32 %v51_v48, %v59_v52  ;;  %v68_v62 = vmax.f32 %v52_v55, %v60_v57  ;;  %v116_v4 = vrot.slane %v86_v58, %v99_v39  ;;  %vm90_vm12 = vcmp.eq.f32.partialorder %v260_v23, %v330_v40 }
  0x10   :  { %v104_v5 = vrot.slane %v96_v63, %v99_v39  ;;  %vm75_vm10 = vcmp.eq.f32.partialorder %v300_v34, %v382_v51  ;;  %vm83_vm7 = vcmp.eq.f32.partialorder %v311_v36, %v382_v51  ;;  %vm92_vm13 = vcmp.eq.f32.partialorder %v316_v37, %v382_v51 }
  0x11   :  { %144 = vst.msk [vmem:[%s540_s2 + $0x30] sm:$0xff] %vm137_vm0, %v67_v61  ;;  %145 = vst.msk [vmem:[%s540_s2 + $0x38] sm:$0xff] %vm137_vm0, %v68_v62  ;;  %vm76_vm14 = vcmp.eq.f32.partialorder %v338_v43, %v67_v61  ;;  %vm84_vm4 = vcmp.eq.f32.partialorder %v343_v44, %v67_v61  ;;  %vm93_vm15 = vcmp.eq.f32.partialorder %v348_v45, %v67_v61 }
  0x12   :  { %vm77_vm3 = vcmp.eq.f32.partialorder %v366_v49, %v68_v62  ;;  %v105_v8 = vsel %vm87_vm2, %v100_v0, %v104_v5  ;;  %v106_v10 = vsel %vm88_vm6, %v100_v0, %v104_v5  ;;  %v107_v11 = vsel %vm89_vm9, %v100_v0, %v104_v5 }
  0x13   :  { %v108_v13 = vsel %vm90_vm12, %v100_v0, %v104_v5  ;;  %v117_v16 = vsel %vm78_vm1, %v116_v4, %v105_v8  ;;  %v118_v3 = vsel %vm79_vm5, %v116_v4, %v106_v10  ;;  %v119_v9 = vsel %vm80_vm8, %v116_v4, %v107_v11 }
  0x14   :  { %v120_v15 = vsel %vm81_vm11, %v116_v4, %v108_v13  ;;  %vm543_vm2 = vcmp.eq.f32.partialorder %v185_v1, %v242_v18  ;;  %vm544_vm6 = vcmp.eq.f32.partialorder %v205_v6, %v262_v24  ;;  %vm545_vm1 = vcmp.eq.f32.partialorder %v226_v12, %v284_v29 }
  0x15   :  { %v129_v17 = vsel %vm543_vm2, %v128_v60, %v117_v16  ;;  %v130_v2 = vsel %vm544_vm6, %v128_v60, %v118_v3  ;;  %v131_v7 = vsel %vm545_vm1, %v128_v60, %v119_v9  ;;  %vm546_vm5 = vcmp.eq.f32.partialorder %v250_v21, %v330_v40 }
  0x16   :  { %v132_v14 = vsel %vm546_vm5, %v128_v60, %v120_v15  ;;  %146 = vst.msk [vmem:[%s542_s3] sm:$0xff] %vm137_vm0, %v129_v17  ;;  %147 = vst.msk [vmem:[%s542_s3 + $0x8] sm:$0xff] %vm137_vm0, %v130_v2  ;;  %vm547_vm8 = vcmp.eq.f32.partialorder %v290_v31, %v356_v46  ;;  %v110_v6 = vsel %vm92_vm13, %v100_v0, %v104_v5 }
  0x17   :  { %148 = vst.msk [vmem:[%s542_s3 + $0x10] sm:$0xff] %vm137_vm0, %v131_v7  ;;  %149 = vst.msk [vmem:[%s542_s3 + $0x18] sm:$0xff] %vm137_vm0, %v132_v14  ;;  %v109_v1 = vsel %vm547_vm8, %v100_v0, %v104_v5  ;;  %v111_v12 = vsel %vm93_vm15, %v100_v0, %v104_v5  ;;  %vm85_vm9 = vcmp.eq.f32.partialorder %v371_v50, %v68_v62 }
  0x18   :  { %vm548_vm11 = vcmp.eq.f32.partialorder %v277_v28, %v356_v46  ;;  %v122_v19 = vsel %vm83_vm7, %v116_v4, %v110_v6  ;;  %v123_v20 = vsel %vm84_vm4, %v116_v4, %v111_v12  ;;  %vm94_vm12 = vcmp.eq.f32.partialorder %v388_v53, %v68_v62 }
  0x19   :  { %v121_v18 = vsel %vm548_vm11, %v116_v4, %v109_v1  ;;  %vm549_vm13 = vcmp.eq.f32.partialorder %v272_v27, %v356_v46  ;;  %v134_v22 = vsel %vm75_vm10, %v128_v60, %v122_v19  ;;  %v135_v23 = vsel %vm76_vm14, %v128_v60, %v123_v20 }
  0x1a   :  { %v133_v21 = vsel %vm549_vm13, %v128_v60, %v121_v18  ;;  %v112_v24 = vsel %vm94_vm12, %v100_v0, %v104_v5  ;;  %151 = vst.msk [vmem:[%s542_s3 + $0x28] sm:$0xff] %vm137_vm0, %v134_v22  ;;  %152 = vst.msk [vmem:[%s542_s3 + $0x30] sm:$0xff] %vm137_vm0, %v135_v23 }
  0x1b   :  { %150 = vst.msk [vmem:[%s542_s3 + $0x20] sm:$0xff] %vm137_vm0, %v133_v21  ;;  %v124_v25 = vsel %vm85_vm9, %v116_v4, %v112_v24 }
  0x1c   :  { %v136_v26 = vsel %vm77_vm3, %v128_v60, %v124_v25 }
  0x1d   :  { %153 = vst.msk [vmem:[%s542_s3 + $0x38] sm:$0xff] %vm137_vm0, %v136_v26 }

// kernel: segnet_forward.49
= control target key start
LH: loop header
LB: loop body
LE: loop exit
PB: predicated region body
PF: predicated region fallthrough
CT: control target
= control target key end

     0   :  { %v943_v1 = vmov 0   ;;  %vm475_vm0 = vcmask 523264   ;;  %vm691_vm1 = vcmask 64512   ;;  %s1198_s1 = inlined_call_operand.vmem [shape: bf16[576,8], index: 1, kind: input, shape index: {}]   ;;  %s1199_s0 = inlined_call_operand.vmem [shape: bf16[64,576], index: 0, kind: input, shape index: {}]   ;;  %s1200_s2 = inlined_call_operand.vmem [shape: f32[64,1], index: 2, kind: input, shape index: {}]   ;;  %s1201_s3 = inlined_call_operand.vmem [shape: f32[64,8], index: 3, kind: output, shape index: {}]  }
   0x1   :  { %v879_v0 = vld [vmem:[%s1198_s1 + $0x40] sm:$0xff]   ;;  %877 = vset.pattern.permute.xlu0 %v943_v1  ;;  %878 = vset.pattern.permute.xlu1 %v943_v1  ;;  %v883_v5 = vld [vmem:[%s1198_s1 + $0x48] sm:$0xff]   ;;  %v887_v9 = vld [vmem:[%s1198_s1 + $0x50] sm:$0xff]  }
   0x2   :  { %v880_v2 = vld [vmem:[%s1198_s1 + $0xc0] sm:$0xff]   ;;  %764 = vmatprep.subr.bf16.mxu0 %v879_v0  ;;  %v884_v6 = vld [vmem:[%s1198_s1 + $0xc8] sm:$0xff]   ;;  %v888_v10 = vld [vmem:[%s1198_s1 + $0xd0] sm:$0xff]  }
   0x3   :  { %v881_v3 = vld [vmem:[%s1198_s1] sm:$0xff]   ;;  %804 = vmatprep.subr.bf16.mxu1 %v880_v2  ;;  %v885_v7 = vld [vmem:[%s1198_s1 + $0x8] sm:$0xff]   ;;  %v889_v11 = vld [vmem:[%s1198_s1 + $0x10] sm:$0xff]  }
   0x4   :  { %v882_v4 = vld [vmem:[%s1198_s1 + $0x80] sm:$0xff]   ;;  %765 = vmatpush3.bf16.msra.mxu0 %v881_v3  ;;  %v886_v8 = vld [vmem:[%s1198_s1 + $0x88] sm:$0xff]   ;;  %v890_v12 = vld [vmem:[%s1198_s1 + $0x90] sm:$0xff]  }
   0x5   :  { %805 = vmatpush3.bf16.msra.mxu1 %v882_v4  ;;  %766 = vmatprep.subr.bf16.mxu0 %v883_v5  ;;  %v891_v13 = vld [vmem:[%s1198_s1 + $0x58] sm:$0xff]   ;;  %v895_v17 = vld [vmem:[%s1198_s1 + $0x60] sm:$0xff]   ;;  %v899_v21 = vld [vmem:[%s1198_s1 + $0x68] sm:$0xff]  }
   0x6   :  { %806 = vmatprep.subr.bf16.mxu1 %v884_v6  ;;  %v892_v14 = vld [vmem:[%s1198_s1 + $0xd8] sm:$0xff]   ;;  %v896_v18 = vld [vmem:[%s1198_s1 + $0xe0] sm:$0xff]   ;;  %v900_v22 = vld [vmem:[%s1198_s1 + $0xe8] sm:$0xff]  }
   0x7   :  { %v893_v15 = vld [vmem:[%s1198_s1 + $0x18] sm:$0xff]   ;;  %v897_v19 = vld [vmem:[%s1198_s1 + $0x20] sm:$0xff]   ;;  %v901_v23 = vld [vmem:[%s1198_s1 + $0x28] sm:$0xff]  }
   0x8   :  { %767 = vmatpush3.bf16.msra.mxu0 %v885_v7  ;;  %v894_v16 = vld [vmem:[%s1198_s1 + $0x98] sm:$0xff]   ;;  %v898_v20 = vld [vmem:[%s1198_s1 + $0xa0] sm:$0xff]   ;;  %v902_v24 = vld [vmem:[%s1198_s1 + $0xa8] sm:$0xff]  }
   0x9   :  { %807 = vmatpush3.bf16.msra.mxu1 %v886_v8  ;;  %768 = vmatprep.subr.bf16.mxu0 %v887_v9  ;;  %v903_v25 = vld [vmem:[%s1198_s1 + $0x70] sm:$0xff]   ;;  %v907_v29 = vld [vmem:[%s1198_s1 + $0x78] sm:$0xff]   ;;  %v916_v36 = vld [vmem:[%s1199_s0 + $0xc] ss:$20 sps:$4 sm:$0xff]  }
   0xa   :  { %808 = vmatprep.subr.bf16.mxu1 %v888_v10  ;;  %v904_v26 = vld [vmem:[%s1198_s1 + $0xf0] sm:$0xff]   ;;  %v908_v30 = vld [vmem:[%s1198_s1 + $0xf8] sm:$0xff]   ;;  %v917_v37 = vld [vmem:[%s1198_s1 + $0x100] sm:$0xff]   ;;  %585 = vmatprep.mubr.bf16.mxu1 %v916_v36 }
   0xb   :  { %v905_v27 = vld [vmem:[%s1198_s1 + $0x30] sm:$0xff]   ;;  %v909_v31 = vld [vmem:[%s1198_s1 + $0x38] sm:$0xff]   ;;  %v918_v38 = vld [vmem:[%s1199_s0 + $0x2c] ss:$20 sps:$4 sm:$0xff]  }
   0xc   :  { %769 = vmatpush3.bf16.msra.mxu0 %v889_v11  ;;  %v906_v28 = vld [vmem:[%s1198_s1 + $0xb0] sm:$0xff]   ;;  %v910_v32 = vld [vmem:[%s1198_s1 + $0xb8] sm:$0xff]   ;;  %v924_v40 = vld [vmem:[%s1198_s1 + $0x108] sm:$0xff]  }
   0xd   :  { %809 = vmatpush3.bf16.msra.mxu1 %v890_v12  ;;  %770 = vmatprep.subr.bf16.mxu0 %v891_v13  ;;  %v911_v33 = vld [vmem:[%s1199_s0] ss:$20 sps:$4 sm:$0xff]   ;;  %v913_v34 = vld [vmem:[%s1199_s0 + $0x4] ss:$20 sps:$4 sm:$0xff]   ;;  %v914_v35 = vld [vmem:[%s1199_s0 + $0x8] ss:$20 sps:$4 sm:$0xff]  }
   0xe   :  { %810 = vmatprep.subr.bf16.mxu1 %v892_v14  ;;  %520 = vmatprep.mubr.bf16.mxu0 %v913_v34  ;;  %v920_v39 = vld [vmem:[%s1199_s0 + $0x34] ss:$20 sps:$4 sm:$0xff]   ;;  %v923_v42 = vld [vmem:[%s1199_s0 + $0x30] ss:$20 sps:$4 sm:$0xff]   ;;  %v938_v46 = vld [vmem:[%s1198_s1 + $0x118] sm:$0xff]  }
   0xf   :  { %v922_v41 = vld [vmem:[%s1199_s0 + $0x28] ss:$20 sps:$4 sm:$0xff]   ;;  %v931_v45 = vld [vmem:[%s1198_s1 + $0x110] sm:$0xff]   ;;  %v930_v48 = vld [vmem:[%s1199_s0 + $0x58] ss:$20 sps:$4 sm:$0xff]  }
  0x10   :  { %771 = vmatpush3.bf16.msra.mxu0 %v893_v15  ;;  %v925_v43 = vld [vmem:[%s1199_s0 + $0x54] ss:$20 sps:$4 sm:$0xff]   ;;  %v927_v44 = vld [vmem:[%s1199_s0 + $0x5c] ss:$20 sps:$4 sm:$0xff]   ;;  %v934_v50 = vld [vmem:[%s1199_s0 + $0x84] ss:$20 sps:$4 sm:$0xff]  }
  0x11   :  { %811 = vmatpush3.bf16.msra.mxu1 %v894_v16  ;;  %772 = vmatprep.subr.bf16.mxu0 %v895_v17  ;;  %v929_v47 = vld [vmem:[%s1199_s0 + $0x50] ss:$20 sps:$4 sm:$0xff]   ;;  %v112_v53 = vld [vmem:[%s1200_s2 + $0x8] sm:$0xff]  ;;  %v114_v54 = vld [vmem:[%s1200_s2 + $0x18] sm:$0xff] }
  0x12   :  { %812 = vmatprep.subr.bf16.mxu1 %v896_v18  ;;  %v932_v49 = vld [vmem:[%s1199_s0 + $0x7c] ss:$20 sps:$4 sm:$0xff]   ;;  %v111_v51 = vld [vmem:[%s1200_s2] sm:$0xff]  ;;  %v936_v55 = vld [vmem:[%s1199_s0 + $0x78] ss:$20 sps:$4 sm:$0xff]  }
  0x13   :  { %v113_v52 = vld [vmem:[%s1200_s2 + $0x10] sm:$0xff]  ;;  %121 = vperm.xlu0 %877, %v111_v51   ;;  %v115_v58 = vld [vmem:[%s1200_s2 + $0x20] sm:$0xff]  ;;  %v116_v60 = vld [vmem:[%s1200_s2 + $0x28] sm:$0xff] }
  0x14   :  { %773 = vmatpush3.bf16.msra.mxu0 %v897_v19  ;;  %131 = vperm.xlu1 %878, %v113_v52   ;;  %v937_v56 = vld [vmem:[%s1199_s0 + $0x80] ss:$20 sps:$4 sm:$0xff]   ;;  %v939_v57 = vld [vmem:[%s1199_s0 + $0x10] ss:$20 sps:$4 sm:$0xff]   ;;  %v118_v62 = vld [vmem:[%s1200_s2 + $0x38] sm:$0xff] }
  0x15   :  { %813 = vmatpush3.bf16.msra.mxu1 %v898_v20  ;;  %774 = vmatprep.subr.bf16.mxu0 %v899_v21  ;;  %v940_v59 = vld [vmem:[%s1199_s0 + $0x60] ss:$20 sps:$4 sm:$0xff]   ;;  %v941_v63 = vld [vmem:[%s1199_s0 + $0x38] ss:$20 sps:$4 sm:$0xff]   ;;  %v942_v0 = vld [vmem:[%s1199_s0 + $0x88] ss:$20 sps:$4 sm:$0xff]  }
  0x16   :  { %814 = vmatprep.subr.bf16.mxu1 %v900_v22  ;;  %v117_v61 = vld [vmem:[%s1200_s2 + $0x30] sm:$0xff] }
  0x17   :  { %126 = vperm.xlu0 %877, %v112_v53  }
  0x18   :  { %775 = vmatpush3.bf16.msra.mxu0 %v901_v23  ;;  %136 = vperm.xlu1 %878, %v114_v54  }
  0x19   :  { %815 = vmatpush3.bf16.msra.mxu1 %v902_v24  ;;  %776 = vmatprep.subr.bf16.mxu0 %v903_v25 }
  0x1a   :  { %816 = vmatprep.subr.bf16.mxu1 %v904_v26 }
  0x1b   :  { %141 = vperm.xlu0 %877, %v115_v58  }
  0x1c   :  { %777 = vmatpush3.bf16.msra.mxu0 %v905_v27  ;;  %146 = vperm.xlu1 %878, %v116_v60  }
  0x1d   :  { %817 = vmatpush3.bf16.msra.mxu1 %v906_v28  ;;  %778 = vmatprep.subr.bf16.mxu0 %v907_v29 }
  0x1e   :  { %818 = vmatprep.subr.bf16.mxu1 %v908_v30 }
  0x1f   :  { %151 = vperm.xlu0 %877, %v117_v61  }
  0x20   :  { %779 = vmatpush3.bf16.msra.mxu0 %v909_v31  ;;  %156 = vperm.xlu1 %878, %v118_v62  }
  0x21   :  { %819 = vmatpush3.bf16.msra.mxu1 %v910_v32  ;;  %852 = vmatprep.subr.bf16.mxu0 %v917_v37 }
  0x22   :  { %868 = vmatprep.subr.bf16.mxu1 %v917_v37 }
  0x23   :  { %521 = vmatmul.mubr.bf16.vlgmr.msra.gmra.mrb[0].mxu0 %v911_v33 }
  0x24   :  { %586 = vmatmul.mubr.bf16.vlgmr.msra.gmra.mrb[0].mxu1 %v914_v35  ;;  %853 = vmatpush3.bf16.msra.mxu0 %v917_v37 }
  0x25   :  { %872 = vmatpush3.bf16.msra.mxu1 %v917_v37  ;;  %528 = vmatprep.mubr.bf16.mxu0 %v918_v38 }
  0x26   :  { %593 = vmatprep.mubr.bf16.mxu1 %v920_v39  ;;  %854 = vmatprep.subr.bf16.mxu0 %v924_v40 }
  0x27   :  { %869 = vmatprep.subr.bf16.mxu1 %v924_v40 }
  0x28   :  { %855 = vmatpush3.bf16.msra.mxu0 %v924_v40 }
  0x29   :  { %873 = vmatpush3.bf16.msra.mxu1 %v924_v40  ;;  %856 = vmatprep.subr.bf16.mxu0 %v931_v45 }
  0x2a   :  { %870 = vmatprep.subr.bf16.mxu1 %v931_v45 }
  0x2b   :  { %529 = vmatmul.mubr.bf16.gmra.mrb[4].mxu0 %v922_v41 }
  0x2c   :  { %594 = vmatmul.mubr.bf16.gmra.mrb[4].mxu1 %v923_v42  ;;  %536 = vmatprep.mubr.bf16.mxu0 %v925_v43 }
  0x2d   :  { %601 = vmatprep.mubr.bf16.mxu1 %v927_v44  ;;  %857 = vmatpush3.bf16.msra.mxu0 %v931_v45 }
  0x2e   :  { %874 = vmatpush3.bf16.msra.mxu1 %v931_v45  ;;  %858 = vmatprep.subr.bf16.mxu0 %v938_v46 }
  0x2f   :  { %871 = vmatprep.subr.bf16.mxu1 %v938_v46 }
  0x31   :  { %859 = vmatpush3.bf16.msra.mxu0 %v938_v46 }
  0x32   :  { %875 = vmatpush3.bf16.msra.mxu1 %v938_v46 }
  0x33   :  { %537 = vmatmul.mubr.bf16.gmra.mrb[8].mxu0 %v929_v47 }
  0x34   :  { %602 = vmatmul.mubr.bf16.gmra.mrb[8].mxu1 %v930_v48  ;;  %544 = vmatprep.mubr.bf16.mxu0 %v932_v49 }
  0x35   :  { %609 = vmatprep.mubr.bf16.mxu1 %v934_v50 }
  0x3b   :  { %545 = vmatmul.mubr.bf16.gmra.mrb[12].mxu0 %v936_v55 }
  0x3c   :  { %610 = vmatmul.mubr.bf16.gmra.mrb[12].mxu1 %v937_v56  ;;  %860 = vmatprep.mubr.msk.bf16.mxu0 %vm475_vm0, %v939_v57 }
  0x3d   :  { %864 = vmatprep.mubr.msk.bf16.mxu1 %vm475_vm0, %v940_v59 }
  0x43   :  { %861 = vmatmul.mubr.msk.bf16.vlgmr.msra.gmra.mrb[16].mxu0 %vm475_vm0, %v941_v63 }
  0x44   :  { %865 = vmatmul.mubr.msk.bf16.vlgmr.msra.gmra.mrb[16].mxu1 %vm475_vm0, %v942_v0 }
  0x92   :  { %v122_v1 = vpop.permute.xlu0 %121 }
  0x93   :  { %v132_v18 = vpop.permute.xlu1 %131 }
  0x96   :  { %v127_v3 = vpop.permute.xlu0 %126 }
  0x97   :  { %v137_v33 = vpop.permute.xlu1 %136 }
  0x9a   :  { %v142_v36 = vpop.permute.xlu0 %141 }
  0x9b   :  { %v147_v50 = vpop.permute.xlu1 %146 }
  0x9e   :  { %v152_v54 = vpop.permute.xlu0 %151 }
  0xf6   :  { %v780_v2 = vpop.f32.mrb[0].mxu0 }
  0xf7   :  { %v820_v4 = vpop.f32.mrb[0].mxu1  ;;  %v781_v5 = vpop.f32.mrb[1].mxu0 }
  0xf8   :  { %v782_v6 = vadd.f32 %v781_v5, %v780_v2  ;;  %v821_v7 = vpop.f32.mrb[1].mxu1  ;;  %v783_v8 = vpop.f32.mrb[2].mxu0 }
  0xf9   :  { %v822_v9 = vadd.f32 %v821_v7, %v820_v4  ;;  %v823_v10 = vpop.f32.mrb[2].mxu1  ;;  %v784_v11 = vpop.f32.mrb[3].mxu0 }
  0xfa   :  { %v523_v12 = vadd.f32 %v782_v6, %v122_v1  ;;  %v785_v13 = vadd.f32 %v784_v11, %v783_v8  ;;  %v824_v14 = vpop.f32.mrb[3].mxu1  ;;  %v157_v4 = vpop.permute.xlu1 %156 }
  0xfb   :  { %v825_v15 = vadd.f32 %v824_v14, %v823_v10 }
  0xfc   :  { %v526_v16 = vadd.f32 %v785_v13, %v127_v3  ;;  %v1160_v17 = vadd.f32 %v822_v9, %v523_v12 }
  0xfe   :  { %v786_v19 = vpop.f32.mrb[4].mxu0  ;;  %v1162_v20 = vadd.f32 %v825_v15, %v526_v16 }
  0xff   :  { %v826_v21 = vpop.f32.mrb[4].mxu1  ;;  %v787_v22 = vpop.f32.mrb[5].mxu0 }
 0x100   :  { %v788_v23 = vadd.f32 %v787_v22, %v786_v19  ;;  %v827_v24 = vpop.f32.mrb[5].mxu1  ;;  %v789_v25 = vpop.f32.mrb[6].mxu0 }
 0x101   :  { %v828_v26 = vadd.f32 %v827_v24, %v826_v21  ;;  %v829_v27 = vpop.f32.mrb[6].mxu1  ;;  %v790_v28 = vpop.f32.mrb[7].mxu0 }
 0x102   :  { %v531_v29 = vadd.f32 %v788_v23, %v132_v18  ;;  %v791_v30 = vadd.f32 %v790_v28, %v789_v25  ;;  %v830_v31 = vpop.f32.mrb[7].mxu1 }
 0x103   :  { %v831_v32 = vadd.f32 %v830_v31, %v829_v27 }
 0x104   :  { %v534_v34 = vadd.f32 %v791_v30, %v137_v33  ;;  %v596_v35 = vadd.f32 %v828_v26, %v531_v29 }
 0x106   :  { %v792_v37 = vpop.f32.mrb[8].mxu0  ;;  %v599_v38 = vadd.f32 %v831_v32, %v534_v34 }
 0x107   :  { %v832_v39 = vpop.f32.mrb[8].mxu1  ;;  %v793_v40 = vpop.f32.mrb[9].mxu0 }
 0x108   :  { %v794_v41 = vadd.f32 %v793_v40, %v792_v37  ;;  %v833_v42 = vpop.f32.mrb[9].mxu1  ;;  %v795_v43 = vpop.f32.mrb[10].mxu0 }
 0x109   :  { %v834_v44 = vadd.f32 %v833_v42, %v832_v39  ;;  %v835_v45 = vpop.f32.mrb[10].mxu1  ;;  %v796_v46 = vpop.f32.mrb[11].mxu0 }
 0x10a   :  { %v539_v47 = vadd.f32 %v794_v41, %v142_v36  ;;  %v797_v48 = vadd.f32 %v796_v46, %v795_v43  ;;  %v836_v49 = vpop.f32.mrb[11].mxu1 }
 0x10b   :  { %v837_v51 = vadd.f32 %v836_v49, %v835_v45 }
 0x10c   :  { %v542_v52 = vadd.f32 %v797_v48, %v147_v50  ;;  %v604_v53 = vadd.f32 %v834_v44, %v539_v47 }
 0x10e   :  { %v798_v55 = vpop.f32.mrb[12].mxu0  ;;  %v607_v56 = vadd.f32 %v837_v51, %v542_v52 }
 0x10f   :  { %v838_v57 = vpop.f32.mrb[12].mxu1  ;;  %v799_v58 = vpop.f32.mrb[13].mxu0 }
 0x110   :  { %v800_v59 = vadd.f32 %v799_v58, %v798_v55  ;;  %v839_v60 = vpop.f32.mrb[13].mxu1  ;;  %v801_v61 = vpop.f32.mrb[14].mxu0 }
 0x111   :  { %v840_v62 = vadd.f32 %v839_v60, %v838_v57  ;;  %v841_v63 = vpop.f32.mrb[14].mxu1  ;;  %v802_v0 = vpop.f32.mrb[15].mxu0 }
 0x112   :  { %v547_v1 = vadd.f32 %v800_v59, %v152_v54  ;;  %v803_v2 = vadd.f32 %v802_v0, %v801_v61  ;;  %v842_v3 = vpop.f32.mrb[15].mxu1 }
 0x113   :  { %v843_v5 = vadd.f32 %v842_v3, %v841_v63 }
 0x114   :  { %v550_v6 = vadd.f32 %v803_v2, %v157_v4  ;;  %v612_v7 = vadd.f32 %v840_v62, %v547_v1 }
 0x116   :  { %v862_v8 = vpop.f32.mrb[16].mxu0  ;;  %v615_v9 = vadd.f32 %v843_v5, %v550_v6 }
 0x117   :  { %v661_v10 = vadd.f32 %v862_v8, %v596_v35  ;;  %v866_v11 = vpop.f32.mrb[16].mxu1  ;;  %v652_v12 = vpop.f32.mrb[17].mxu0 }
 0x118   :  { %v677_v13 = vadd.f32 %v866_v11, %v612_v7  ;;  %v653_v14 = vadd.f32 %v652_v12, %v1160_v17  ;;  %v668_v15 = vpop.f32.mrb[17].mxu1  ;;  %v863_v16 = vpop.f32.mrb[18].mxu0 }
 0x119   :  { %v685_v18 = vmax.f32 %v661_v10, 0.0  ;;  %v669_v19 = vadd.f32 %v668_v15, %v604_v53  ;;  %v664_v21 = vadd.f32 %v863_v16, %v599_v38  ;;  %v867_v22 = vpop.f32.mrb[18].mxu1  ;;  %v655_v23 = vpop.f32.mrb[19].mxu0 }
 0x11a   :  { %v689_v24 = vmax.f32 %v677_v13, 0.0  ;;  %v683_v25 = vmax.f32 %v653_v14, 0.0  ;;  %v680_v26 = vadd.f32 %v867_v22, %v615_v9  ;;  %v656_v27 = vadd.f32 %v655_v23, %v1162_v20  ;;  %v671_v28 = vpop.f32.mrb[19].mxu1 }
 0x11b   :  { %694 = vst.msk [vmem:[%s1201_s3 + $0x10] sm:$0xff] %vm691_vm1, %v685_v18  ;;  %v687_v29 = vmax.f32 %v669_v19, 0.0  ;;  %v686_v17 = vmax.f32 %v664_v21, 0.0  ;;  %v672_v30 = vadd.f32 %v671_v28, %v607_v56 }
 0x11c   :  { %698 = vst.msk [vmem:[%s1201_s3 + $0x30] sm:$0xff] %vm691_vm1, %v689_v24  ;;  %692 = vst.msk [vmem:[%s1201_s3] sm:$0xff] %vm691_vm1, %v683_v25  ;;  %v690_v20 = vmax.f32 %v680_v26, 0.0  ;;  %v684_v31 = vmax.f32 %v656_v27, 0.0 }
 0x11d   :  { %696 = vst.msk [vmem:[%s1201_s3 + $0x20] sm:$0xff] %vm691_vm1, %v687_v29  ;;  %695 = vst.msk [vmem:[%s1201_s3 + $0x18] sm:$0xff] %vm691_vm1, %v686_v17  ;;  %v688_v32 = vmax.f32 %v672_v30, 0.0 }
 0x11e   :  { %699 = vst.msk [vmem:[%s1201_s3 + $0x38] sm:$0xff] %vm691_vm1, %v690_v20  ;;  %693 = vst.msk [vmem:[%s1201_s3 + $0x8] sm:$0xff] %vm691_vm1, %v684_v31 }
 0x11f   :  { %697 = vst.msk [vmem:[%s1201_s3 + $0x28] sm:$0xff] %vm691_vm1, %v688_v32 }

// kernel: segnet_forward.57
= control target key start
LH: loop header
LB: loop body
LE: loop exit
PB: predicated region body
PF: predicated region fallthrough
CT: control target
= control target key end

     0   :  { %v31_v0 = vlaneseq  ;;  %vm114_vm0 = vcmask 64512   ;;  %s466_s2 = inlined_call_operand.vmem [shape: s32[1,8], index: 2, kind: input, shape index: {}]   ;;  %s467_s0 = inlined_call_operand.vmem [shape: f32[64,8], index: 0, kind: input, shape index: {}]   ;;  %s468_s1 = inlined_call_operand.vmem [shape: s32[64,8], index: 1, kind: input, shape index: {}]   ;;  %s469_s3 = inlined_call_operand.vmem [shape: f32[256,8], index: 3, kind: output, shape index: {}]  }
   0x1   :  { %v30_v1 = vld [vmem:[%s466_s2] sm:$0x1]  ;;  %v187_v9 = vld [vmem:[%s467_s0 + $0x8] sm:$0xff]  ;;  %v197_v11 = vld [vmem:[%s467_s0 + $0x10] sm:$0xff] }
   0x2   :  { %v32_v2 = vshrl.u32 %v31_v0, 7  ;;  %v51_v3 = vadd.s32 1, %v30_v1  ;;  %v72_v4 = vadd.s32 4, %v30_v1  ;;  %v93_v5 = vadd.s32 5, %v30_v1  ;;  %v177_v6 = vld [vmem:[%s467_s0] sm:$0xff]  ;;  %v192_v10 = vld [vmem:[%s468_s1 + $0x8] sm:$0xff] }
   0x3   :  { %v182_v7 = vld [vmem:[%s468_s1] sm:$0xff]  ;;  %v202_v12 = vld [vmem:[%s468_s1 + $0x10] sm:$0xff]  ;;  %v207_v13 = vld [vmem:[%s468_s1 + $0x18] sm:$0xff] }
   0x4   :  { %v33_v8 = vsub.s32 0, %v32_v2  ;;  %v212_v15 = vld [vmem:[%s467_s0 + $0x18] sm:$0xff]  ;;  %v217_v16 = vld [vmem:[%s467_s0 + $0x20] sm:$0xff]  ;;  %v227_v18 = vld [vmem:[%s468_s1 + $0x28] sm:$0xff] }
   0x5   :  { %v222_v17 = vld [vmem:[%s468_s1 + $0x20] sm:$0xff]  ;;  %v232_v19 = vld [vmem:[%s468_s1 + $0x30] sm:$0xff]  ;;  %v237_v20 = vld [vmem:[%s468_s1 + $0x38] sm:$0xff] }
   0x6   :  { %v34_v14 = vrot.slane %v30_v1, %v33_v8  ;;  %v55_v21 = vrot.slane %v51_v3, %v33_v8  ;;  %v239_v22 = vrot.slane %v72_v4, %v33_v8  ;;  %v241_v23 = vrot.slane %v93_v5, %v33_v8  ;;  %v250_v24 = vld [vmem:[%s467_s0 + $0x28] sm:$0xff]  ;;  %v255_v25 = vld [vmem:[%s467_s0 + $0x30] sm:$0xff]  ;;  %v260_v26 = vld [vmem:[%s467_s0 + $0x38] sm:$0xff] }
   0x8   :  { %vm35_vm1 = vcmp.eq.s32.totalorder %v182_v7, %v34_v14  ;;  %vm36_vm2 = vcmp.eq.s32.totalorder %v192_v10, %v34_v14  ;;  %vm37_vm3 = vcmp.eq.s32.totalorder %v202_v12, %v34_v14  ;;  %vm38_vm4 = vcmp.eq.s32.totalorder %v207_v13, %v34_v14 }
   0x9   :  { %v43_v27 = vsel %vm35_vm1, %v177_v6, 0.0  ;;  %v44_v28 = vsel %vm36_vm2, %v187_v9, 0.0  ;;  %v45_v29 = vsel %vm37_vm3, %v197_v11, 0.0  ;;  %v46_v30 = vsel %vm38_vm4, %v212_v15, 0.0 }
   0xa   :  { %115 = vst.msk [vmem:[%s469_s3] sm:$0xff] %vm114_vm0, %v43_v27  ;;  %116 = vst.msk [vmem:[%s469_s3 + $0x8] sm:$0xff] %vm114_vm0, %v44_v28  ;;  %vm39_vm5 = vcmp.eq.s32.totalorder %v222_v17, %v34_v14  ;;  %vm40_vm6 = vcmp.eq.s32.totalorder %v227_v18, %v34_v14  ;;  %vm41_vm7 = vcmp.eq.s32.totalorder %v232_v19, %v34_v14 }
   0xb   :  { %117 = vst.msk [vmem:[%s469_s3 + $0x10] sm:$0xff] %vm114_vm0, %v45_v29  ;;  %118 = vst.msk [vmem:[%s469_s3 + $0x18] sm:$0xff] %vm114_vm0, %v46_v30  ;;  %vm42_vm8 = vcmp.eq.s32.totalorder %v237_v20, %v34_v14  ;;  %v47_v31 = vsel %vm39_vm5, %v217_v16, 0.0  ;;  %v48_v32 = vsel %vm40_vm6, %v250_v24, 0.0  ;;  %v49_v33 = vsel %vm41_vm7, %v255_v25, 0.0 }
   0xc   :  { %v50_v34 = vsel %vm42_vm8, %v260_v26, 0.0  ;;  %119 = vst.msk [vmem:[%s469_s3 + $0x20] sm:$0xff] %vm114_vm0, %v47_v31  ;;  %120 = vst.msk [vmem:[%s469_s3 + $0x28] sm:$0xff] %vm114_vm0, %v48_v32  ;;  %vm56_vm9 = vcmp.eq.s32.totalorder %v182_v7, %v55_v21  ;;  %vm57_vm10 = vcmp.eq.s32.totalorder %v192_v10, %v55_v21  ;;  %vm58_vm11 = vcmp.eq.s32.totalorder %v202_v12, %v55_v21 }
   0xd   :  { %121 = vst.msk [vmem:[%s469_s3 + $0x30] sm:$0xff] %vm114_vm0, %v49_v33  ;;  %122 = vst.msk [vmem:[%s469_s3 + $0x38] sm:$0xff] %vm114_vm0, %v50_v34  ;;  %vm59_vm12 = vcmp.eq.s32.totalorder %v207_v13, %v55_v21  ;;  %v64_v35 = vsel %vm56_vm9, %v177_v6, 0.0  ;;  %v65_v36 = vsel %vm57_vm10, %v187_v9, 0.0  ;;  %v66_v37 = vsel %vm58_vm11, %v197_v11, 0.0 }
   0xe   :  { %v67_v38 = vsel %vm59_vm12, %v212_v15, 0.0  ;;  %123 = vst.msk [vmem:[%s469_s3 + $0x40] sm:$0xff] %vm114_vm0, %v64_v35  ;;  %124 = vst.msk [vmem:[%s469_s3 + $0x48] sm:$0xff] %vm114_vm0, %v65_v36  ;;  %vm60_vm13 = vcmp.eq.s32.totalorder %v222_v17, %v55_v21  ;;  %vm61_vm14 = vcmp.eq.s32.totalorder %v227_v18, %v55_v21  ;;  %vm62_vm15 = vcmp.eq.s32.totalorder %v232_v19, %v55_v21 }
   0xf   :  { %125 = vst.msk [vmem:[%s469_s3 + $0x50] sm:$0xff] %vm114_vm0, %v66_v37  ;;  %126 = vst.msk [vmem:[%s469_s3 + $0x58] sm:$0xff] %vm114_vm0, %v67_v38  ;;  %vm63_vm1 = vcmp.eq.s32.totalorder %v237_v20, %v55_v21  ;;  %v68_v39 = vsel %vm60_vm13, %v217_v16, 0.0  ;;  %v69_v40 = vsel %vm61_vm14, %v250_v24, 0.0  ;;  %v70_v41 = vsel %vm62_vm15, %v255_v25, 0.0 }
  0x10   :  { %v71_v42 = vsel %vm63_vm1, %v260_v26, 0.0  ;;  %127 = vst.msk [vmem:[%s469_s3 + $0x60] sm:$0xff] %vm114_vm0, %v68_v39  ;;  %128 = vst.msk [vmem:[%s469_s3 + $0x68] sm:$0xff] %vm114_vm0, %v69_v40  ;;  %vm77_vm2 = vcmp.eq.s32.totalorder %v182_v7, %v239_v22  ;;  %vm78_vm3 = vcmp.eq.s32.totalorder %v192_v10, %v239_v22  ;;  %vm79_vm4 = vcmp.eq.s32.totalorder %v202_v12, %v239_v22 }
  0x11   :  { %129 = vst.msk [vmem:[%s469_s3 + $0x70] sm:$0xff] %vm114_vm0, %v70_v41  ;;  %130 = vst.msk [vmem:[%s469_s3 + $0x78] sm:$0xff] %vm114_vm0, %v71_v42  ;;  %vm80_vm5 = vcmp.eq.s32.totalorder %v207_v13, %v239_v22  ;;  %v85_v43 = vsel %vm77_vm2, %v177_v6, 0.0  ;;  %v86_v44 = vsel %vm78_vm3, %v187_v9, 0.0  ;;  %v87_v45 = vsel %vm79_vm4, %v197_v11, 0.0 }
  0x12   :  { %v88_v46 = vsel %vm80_vm5, %v212_v15, 0.0  ;;  %131 = vst.msk [vmem:[%s469_s3 + $0x80] sm:$0xff] %vm114_vm0, %v85_v43  ;;  %132 = vst.msk [vmem:[%s469_s3 + $0x88] sm:$0xff] %vm114_vm0, %v86_v44  ;;  %vm81_vm6 = vcmp.eq.s32.totalorder %v222_v17, %v239_v22  ;;  %vm82_vm7 = vcmp.eq.s32.totalorder %v227_v18, %v239_v22  ;;  %vm83_vm8 = vcmp.eq.s32.totalorder %v232_v19, %v239_v22 }
  0x13   :  { %133 = vst.msk [vmem:[%s469_s3 + $0x90] sm:$0xff] %vm114_vm0, %v87_v45  ;;  %134 = vst.msk [vmem:[%s469_s3 + $0x98] sm:$0xff] %vm114_vm0, %v88_v46  ;;  %vm84_vm9 = vcmp.eq.s32.totalorder %v237_v20, %v239_v22  ;;  %v89_v47 = vsel %vm81_vm6, %v217_v16, 0.0  ;;  %v90_v48 = vsel %vm82_vm7, %v250_v24, 0.0  ;;  %v91_v49 = vsel %vm83_vm8, %v255_v25, 0.0 }
  0x14   :  { %v92_v50 = vsel %vm84_vm9, %v260_v26, 0.0  ;;  %135 = vst.msk [vmem:[%s469_s3 + $0xa0] sm:$0xff] %vm114_vm0, %v89_v47  ;;  %136 = vst.msk [vmem:[%s469_s3 + $0xa8] sm:$0xff] %vm114_vm0, %v90_v48  ;;  %vm98_vm10 = vcmp.eq.s32.totalorder %v182_v7, %v241_v23  ;;  %vm99_vm11 = vcmp.eq.s32.totalorder %v192_v10, %v241_v23  ;;  %vm100_vm12 = vcmp.eq.s32.totalorder %v202_v12, %v241_v23 }
  0x15   :  { %137 = vst.msk [vmem:[%s469_s3 + $0xb0] sm:$0xff] %vm114_vm0, %v91_v49  ;;  %138 = vst.msk [vmem:[%s469_s3 + $0xb8] sm:$0xff] %vm114_vm0, %v92_v50  ;;  %vm101_vm13 = vcmp.eq.s32.totalorder %v207_v13, %v241_v23  ;;  %v106_v51 = vsel %vm98_vm10, %v177_v6, 0.0  ;;  %v107_v52 = vsel %vm99_vm11, %v187_v9, 0.0  ;;  %v108_v53 = vsel %vm100_vm12, %v197_v11, 0.0 }
  0x16   :  { %v109_v54 = vsel %vm101_vm13, %v212_v15, 0.0  ;;  %139 = vst.msk [vmem:[%s469_s3 + $0xc0] sm:$0xff] %vm114_vm0, %v106_v51  ;;  %140 = vst.msk [vmem:[%s469_s3 + $0xc8] sm:$0xff] %vm114_vm0, %v107_v52  ;;  %vm102_vm14 = vcmp.eq.s32.totalorder %v222_v17, %v241_v23  ;;  %vm103_vm15 = vcmp.eq.s32.totalorder %v227_v18, %v241_v23  ;;  %vm104_vm1 = vcmp.eq.s32.totalorder %v232_v19, %v241_v23 }
  0x17   :  { %141 = vst.msk [vmem:[%s469_s3 + $0xd0] sm:$0xff] %vm114_vm0, %v108_v53  ;;  %142 = vst.msk [vmem:[%s469_s3 + $0xd8] sm:$0xff] %vm114_vm0, %v109_v54  ;;  %vm105_vm2 = vcmp.eq.s32.totalorder %v237_v20, %v241_v23  ;;  %v110_v55 = vsel %vm102_vm14, %v217_v16, 0.0  ;;  %v111_v56 = vsel %vm103_vm15, %v250_v24, 0.0  ;;  %v112_v57 = vsel %vm104_vm1, %v255_v25, 0.0 }
  0x18   :  { %v113_v58 = vsel %vm105_vm2, %v260_v26, 0.0  ;;  %143 = vst.msk [vmem:[%s469_s3 + $0xe0] sm:$0xff] %vm114_vm0, %v110_v55  ;;  %144 = vst.msk [vmem:[%s469_s3 + $0xe8] sm:$0xff] %vm114_vm0, %v111_v56 }
  0x19   :  { %145 = vst.msk [vmem:[%s469_s3 + $0xf0] sm:$0xff] %vm114_vm0, %v112_v57  ;;  %146 = vst.msk [vmem:[%s469_s3 + $0xf8] sm:$0xff] %vm114_vm0, %v113_v58 }

// kernel: segnet_forward.61
= control target key start
LH: loop header
LB: loop body
LE: loop exit
PB: predicated region body
PF: predicated region fallthrough
CT: control target
= control target key end

     0   :  { %v23_v0 = vlaneseq  ;;  %vm74_vm0 = vcmask 261120   ;;  %s206_s2 = inlined_call_operand.vmem [shape: s32[1,32], index: 2, kind: input, shape index: {}]   ;;  %s207_s0 = inlined_call_operand.vmem [shape: f32[32,32], index: 0, kind: input, shape index: {}]   ;;  %s208_s1 = inlined_call_operand.vmem [shape: s32[32,32], index: 1, kind: input, shape index: {}]   ;;  %s209_s3 = inlined_call_operand.vmem [shape: f32[128,32], index: 3, kind: output, shape index: {}]  }
   0x1   :  { %v22_v1 = vld [vmem:[%s206_s2] sm:$0x1]  ;;  %v19_v9 = vld [vmem:[%s208_s1 + $0x8] sm:$0xff]  ;;  %v20_v10 = vld [vmem:[%s208_s1 + $0x10] sm:$0xff] }
   0x2   :  { %v24_v2 = vshrl.u32 %v23_v0, 7  ;;  %v35_v3 = vadd.s32 1, %v22_v1  ;;  %v48_v4 = vadd.s32 8, %v22_v1  ;;  %v61_v5 = vadd.s32 9, %v22_v1  ;;  %v14_v6 = vld [vmem:[%s207_s0] sm:$0xff]  ;;  %v21_v11 = vld [vmem:[%s208_s1 + $0x18] sm:$0xff] }
   0x3   :  { %v18_v7 = vld [vmem:[%s208_s1] sm:$0xff]  ;;  %v15_v13 = vld [vmem:[%s207_s0 + $0x8] sm:$0xff]  ;;  %v16_v14 = vld [vmem:[%s207_s0 + $0x10] sm:$0xff] }
   0x4   :  { %v25_v8 = vsub.s32 0, %v24_v2  ;;  %v17_v15 = vld [vmem:[%s207_s0 + $0x18] sm:$0xff] }
   0x6   :  { %v26_v12 = vrot.slane %v22_v1, %v25_v8  ;;  %v39_v16 = vrot.slane %v35_v3, %v25_v8  ;;  %v52_v17 = vrot.slane %v48_v4, %v25_v8  ;;  %v65_v18 = vrot.slane %v61_v5, %v25_v8 }
   0x8   :  { %vm27_vm1 = vcmp.eq.s32.totalorder %v18_v7, %v26_v12  ;;  %vm28_vm2 = vcmp.eq.s32.totalorder %v19_v9, %v26_v12  ;;  %vm29_vm3 = vcmp.eq.s32.totalorder %v20_v10, %v26_v12  ;;  %vm30_vm4 = vcmp.eq.s32.totalorder %v21_v11, %v26_v12 }
   0x9   :  { %v31_v19 = vsel %vm27_vm1, %v14_v6, 0.0  ;;  %v32_v20 = vsel %vm28_vm2, %v15_v13, 0.0  ;;  %v33_v21 = vsel %vm29_vm3, %v16_v14, 0.0  ;;  %v34_v22 = vsel %vm30_vm4, %v17_v15, 0.0 }
   0xa   :  { %75 = vst.msk [vmem:[%s209_s3] sm:$0xff] %vm74_vm0, %v31_v19  ;;  %76 = vst.msk [vmem:[%s209_s3 + $0x8] sm:$0xff] %vm74_vm0, %v32_v20  ;;  %vm40_vm5 = vcmp.eq.s32.totalorder %v18_v7, %v39_v16  ;;  %vm41_vm6 = vcmp.eq.s32.totalorder %v19_v9, %v39_v16  ;;  %vm42_vm7 = vcmp.eq.s32.totalorder %v20_v10, %v39_v16 }
   0xb   :  { %77 = vst.msk [vmem:[%s209_s3 + $0x10] sm:$0xff] %vm74_vm0, %v33_v21  ;;  %78 = vst.msk [vmem:[%s209_s3 + $0x18] sm:$0xff] %vm74_vm0, %v34_v22  ;;  %vm43_vm8 = vcmp.eq.s32.totalorder %v21_v11, %v39_v16  ;;  %v44_v23 = vsel %vm40_vm5, %v14_v6, 0.0  ;;  %v45_v24 = vsel %vm41_vm6, %v15_v13, 0.0  ;;  %v46_v25 = vsel %vm42_vm7, %v16_v14, 0.0 }
   0xc   :  { %v47_v26 = vsel %vm43_vm8, %v17_v15, 0.0  ;;  %79 = vst.msk [vmem:[%s209_s3 + $0x20] sm:$0xff] %vm74_vm0, %v44_v23  ;;  %80 = vst.msk [vmem:[%s209_s3 + $0x28] sm:$0xff] %vm74_vm0, %v45_v24  ;;  %vm53_vm9 = vcmp.eq.s32.totalorder %v18_v7, %v52_v17  ;;  %vm54_vm10 = vcmp.eq.s32.totalorder %v19_v9, %v52_v17  ;;  %vm55_vm11 = vcmp.eq.s32.totalorder %v20_v10, %v52_v17 }
   0xd   :  { %81 = vst.msk [vmem:[%s209_s3 + $0x30] sm:$0xff] %vm74_vm0, %v46_v25  ;;  %82 = vst.msk [vmem:[%s209_s3 + $0x38] sm:$0xff] %vm74_vm0, %v47_v26  ;;  %vm56_vm12 = vcmp.eq.s32.totalorder %v21_v11, %v52_v17  ;;  %v57_v27 = vsel %vm53_vm9, %v14_v6, 0.0  ;;  %v58_v28 = vsel %vm54_vm10, %v15_v13, 0.0  ;;  %v59_v29 = vsel %vm55_vm11, %v16_v14, 0.0 }
   0xe   :  { %v60_v30 = vsel %vm56_vm12, %v17_v15, 0.0  ;;  %83 = vst.msk [vmem:[%s209_s3 + $0x40] sm:$0xff] %vm74_vm0, %v57_v27  ;;  %84 = vst.msk [vmem:[%s209_s3 + $0x48] sm:$0xff] %vm74_vm0, %v58_v28  ;;  %vm66_vm13 = vcmp.eq.s32.totalorder %v18_v7, %v65_v18  ;;  %vm67_vm14 = vcmp.eq.s32.totalorder %v19_v9, %v65_v18  ;;  %vm68_vm15 = vcmp.eq.s32.totalorder %v20_v10, %v65_v18 }
   0xf   :  { %85 = vst.msk [vmem:[%s209_s3 + $0x50] sm:$0xff] %vm74_vm0, %v59_v29  ;;  %86 = vst.msk [vmem:[%s209_s3 + $0x58] sm:$0xff] %vm74_vm0, %v60_v30  ;;  %vm69_vm1 = vcmp.eq.s32.totalorder %v21_v11, %v65_v18  ;;  %v70_v31 = vsel %vm66_vm13, %v14_v6, 0.0  ;;  %v71_v32 = vsel %vm67_vm14, %v15_v13, 0.0  ;;  %v72_v33 = vsel %vm68_vm15, %v16_v14, 0.0 }
  0x10   :  { %v73_v34 = vsel %vm69_vm1, %v17_v15, 0.0  ;;  %87 = vst.msk [vmem:[%s209_s3 + $0x60] sm:$0xff] %vm74_vm0, %v70_v31  ;;  %88 = vst.msk [vmem:[%s209_s3 + $0x68] sm:$0xff] %vm74_vm0, %v71_v32 }
  0x11   :  { %89 = vst.msk [vmem:[%s209_s3 + $0x70] sm:$0xff] %vm74_vm0, %v72_v33  ;;  %90 = vst.msk [vmem:[%s209_s3 + $0x78] sm:$0xff] %vm74_vm0, %v73_v34 }

// kernel: segnet_forward.60
= control target key start
LH: loop header
LB: loop body
LE: loop exit
PB: predicated region body
PF: predicated region fallthrough
CT: control target
= control target key end

     0   :  { %v731_v1 = vmov 0   ;;  %vm389_vm0 = vcmask 523264   ;;  %vm547_vm1 = vcmask 261120   ;;  %s916_s1 = inlined_call_operand.vmem [shape: bf16[576,32], index: 1, kind: input, shape index: {}]   ;;  %s917_s0 = inlined_call_operand.vmem [shape: bf16[32,576], index: 0, kind: input, shape index: {}]   ;;  %s918_s2 = inlined_call_operand.vmem [shape: f32[32,1], index: 2, kind: input, shape index: {}]   ;;  %s919_s3 = inlined_call_operand.vmem [shape: f32[32,32], index: 3, kind: output, shape index: {}]  }
   0x1   :  { %v681_v0 = vld [vmem:[%s916_s1 + $0x40] sm:$0xff]   ;;  %679 = vset.pattern.permute.xlu0 %v731_v1  ;;  %680 = vset.pattern.permute.xlu1 %v731_v1  ;;  %v685_v5 = vld [vmem:[%s916_s1 + $0x48] sm:$0xff]   ;;  %v689_v9 = vld [vmem:[%s916_s1 + $0x50] sm:$0xff]  }
   0x2   :  { %v682_v2 = vld [vmem:[%s916_s1] sm:$0xff]   ;;  %604 = vmatprep.subr.bf16.mxu0 %v681_v0  ;;  %v686_v6 = vld [vmem:[%s916_s1 + $0x8] sm:$0xff]   ;;  %v690_v10 = vld [vmem:[%s916_s1 + $0x10] sm:$0xff]  }
   0x3   :  { %v683_v3 = vld [vmem:[%s916_s1 + $0xc0] sm:$0xff]   ;;  %605 = vmatpush3.bf16.msra.mxu0 %v682_v2  ;;  %v687_v7 = vld [vmem:[%s916_s1 + $0xc8] sm:$0xff]   ;;  %v691_v11 = vld [vmem:[%s916_s1 + $0xd0] sm:$0xff]  }
   0x4   :  { %v684_v4 = vld [vmem:[%s916_s1 + $0x80] sm:$0xff]   ;;  %632 = vmatprep.subr.bf16.mxu1 %v683_v3  ;;  %606 = vmatprep.subr.bf16.mxu0 %v685_v5  ;;  %v688_v8 = vld [vmem:[%s916_s1 + $0x88] sm:$0xff]   ;;  %v692_v12 = vld [vmem:[%s916_s1 + $0x90] sm:$0xff]  }
   0x5   :  { %633 = vmatpush3.bf16.msra.mxu1 %v684_v4  ;;  %v693_v13 = vld [vmem:[%s916_s1 + $0x58] sm:$0xff]   ;;  %v697_v17 = vld [vmem:[%s916_s1 + $0x60] sm:$0xff]   ;;  %v701_v21 = vld [vmem:[%s916_s1 + $0x68] sm:$0xff]  }
   0x6   :  { %634 = vmatprep.subr.bf16.mxu1 %v687_v7  ;;  %v694_v14 = vld [vmem:[%s916_s1 + $0x18] sm:$0xff]   ;;  %v698_v18 = vld [vmem:[%s916_s1 + $0x20] sm:$0xff]   ;;  %v702_v22 = vld [vmem:[%s916_s1 + $0x28] sm:$0xff]  }
   0x7   :  { %607 = vmatpush3.bf16.msra.mxu0 %v686_v6  ;;  %v695_v15 = vld [vmem:[%s916_s1 + $0xd8] sm:$0xff]   ;;  %v699_v19 = vld [vmem:[%s916_s1 + $0xe0] sm:$0xff]   ;;  %v703_v23 = vld [vmem:[%s916_s1 + $0xe8] sm:$0xff]  }
   0x8   :  { %608 = vmatprep.subr.bf16.mxu0 %v689_v9  ;;  %v696_v16 = vld [vmem:[%s916_s1 + $0x98] sm:$0xff]   ;;  %v700_v20 = vld [vmem:[%s916_s1 + $0xa0] sm:$0xff]   ;;  %v704_v24 = vld [vmem:[%s916_s1 + $0xa8] sm:$0xff]  }
   0x9   :  { %635 = vmatpush3.bf16.msra.mxu1 %v688_v8  ;;  %v705_v25 = vld [vmem:[%s916_s1 + $0x70] sm:$0xff]   ;;  %v709_v29 = vld [vmem:[%s916_s1 + $0x78] sm:$0xff]   ;;  %v716_v35 = vld [vmem:[%s916_s1 + $0x100] sm:$0xff]  }
   0xa   :  { %636 = vmatprep.subr.bf16.mxu1 %v691_v11  ;;  %v706_v26 = vld [vmem:[%s916_s1 + $0x30] sm:$0xff]   ;;  %v710_v30 = vld [vmem:[%s916_s1 + $0x38] sm:$0xff]   ;;  %v719_v37 = vld [vmem:[%s917_s0 + $0xc] ss:$20 sps:$4 sm:$0xff]  }
   0xb   :  { %609 = vmatpush3.bf16.msra.mxu0 %v690_v10  ;;  %v707_v27 = vld [vmem:[%s916_s1 + $0xf0] sm:$0xff]   ;;  %v711_v31 = vld [vmem:[%s916_s1 + $0xf8] sm:$0xff]   ;;  %v720_v38 = vld [vmem:[%s916_s1 + $0x108] sm:$0xff]   ;;  %477 = vmatprep.mubr.bf16.mxu1 %v719_v37 }
   0xc   :  { %610 = vmatprep.subr.bf16.mxu0 %v693_v13  ;;  %v708_v28 = vld [vmem:[%s916_s1 + $0xb0] sm:$0xff]   ;;  %v714_v33 = vld [vmem:[%s917_s0 + $0x4] ss:$20 sps:$4 sm:$0xff]   ;;  %v717_v36 = vld [vmem:[%s917_s0 + $0x8] ss:$20 sps:$4 sm:$0xff]  }
   0xd   :  { %637 = vmatpush3.bf16.msra.mxu1 %v692_v12  ;;  %v712_v32 = vld [vmem:[%s917_s0] ss:$20 sps:$4 sm:$0xff]   ;;  %v715_v34 = vld [vmem:[%s916_s1 + $0xb8] sm:$0xff]   ;;  %428 = vmatprep.mubr.bf16.mxu0 %v714_v33  ;;  %v727_v43 = vld [vmem:[%s917_s0 + $0x30] ss:$20 sps:$4 sm:$0xff]  }
   0xe   :  { %638 = vmatprep.subr.bf16.mxu1 %v695_v15  ;;  %v721_v39 = vld [vmem:[%s917_s0 + $0x2c] ss:$20 sps:$4 sm:$0xff]   ;;  %v723_v40 = vld [vmem:[%s917_s0 + $0x28] ss:$20 sps:$4 sm:$0xff]   ;;  %v724_v41 = vld [vmem:[%s916_s1 + $0x110] sm:$0xff]  }
   0xf   :  { %611 = vmatpush3.bf16.msra.mxu0 %v694_v14  ;;  %v725_v42 = vld [vmem:[%s917_s0 + $0x34] ss:$20 sps:$4 sm:$0xff]   ;;  %v728_v44 = vld [vmem:[%s916_s1 + $0x118] sm:$0xff]   ;;  %v729_v45 = vld [vmem:[%s917_s0 + $0x10] ss:$20 sps:$4 sm:$0xff]  }
  0x10   :  { %612 = vmatprep.subr.bf16.mxu0 %v697_v17  ;;  %v99_v46 = vld [vmem:[%s918_s2] sm:$0xff]  ;;  %v101_v47 = vld [vmem:[%s918_s2 + $0x10] sm:$0xff]  ;;  %v100_v48 = vld [vmem:[%s918_s2 + $0x8] sm:$0xff] }
  0x11   :  { %639 = vmatpush3.bf16.msra.mxu1 %v696_v16  ;;  %105 = vperm.xlu0 %679, %v99_v46   ;;  %v102_v49 = vld [vmem:[%s918_s2 + $0x18] sm:$0xff] }
  0x12   :  { %640 = vmatprep.subr.bf16.mxu1 %v699_v19  ;;  %115 = vperm.xlu1 %680, %v101_v47   ;;  %v730_v50 = vld [vmem:[%s917_s0 + $0x38] ss:$20 sps:$4 sm:$0xff]  }
  0x13   :  { %613 = vmatpush3.bf16.msra.mxu0 %v698_v18 }
  0x14   :  { %614 = vmatprep.subr.bf16.mxu0 %v701_v21 }
  0x15   :  { %641 = vmatpush3.bf16.msra.mxu1 %v700_v20  ;;  %110 = vperm.xlu0 %679, %v100_v48  }
  0x16   :  { %642 = vmatprep.subr.bf16.mxu1 %v703_v23  ;;  %120 = vperm.xlu1 %680, %v102_v49  }
  0x17   :  { %615 = vmatpush3.bf16.msra.mxu0 %v702_v22 }
  0x18   :  { %616 = vmatprep.subr.bf16.mxu0 %v705_v25 }
  0x19   :  { %643 = vmatpush3.bf16.msra.mxu1 %v704_v24 }
  0x1a   :  { %644 = vmatprep.subr.bf16.mxu1 %v707_v27 }
  0x1b   :  { %617 = vmatpush3.bf16.msra.mxu0 %v706_v26 }
  0x1c   :  { %618 = vmatprep.subr.bf16.mxu0 %v709_v29 }
  0x1d   :  { %645 = vmatpush3.bf16.msra.mxu1 %v708_v28 }
  0x1e   :  { %646 = vmatprep.subr.bf16.mxu1 %v711_v31 }
  0x1f   :  { %619 = vmatpush3.bf16.msra.mxu0 %v710_v30 }
  0x20   :  { %666 = vmatprep.subr.bf16.mxu0 %v716_v35 }
  0x21   :  { %647 = vmatpush3.bf16.msra.mxu1 %v715_v34 }
  0x22   :  { %429 = vmatmul.mubr.bf16.vlgmr.msra.gmra.mrb[0].mxu0 %v712_v32 }
  0x23   :  { %667 = vmatpush3.bf16.msra.mxu0 %v716_v35  ;;  %436 = vmatprep.mubr.bf16.mxu0 %v721_v39 }
  0x24   :  { %478 = vmatmul.mubr.bf16.vlgmr.msra.gmra.mrb[0].mxu1 %v717_v36  ;;  %668 = vmatprep.subr.bf16.mxu0 %v720_v38 }
  0x25   :  { %485 = vmatprep.mubr.bf16.mxu1 %v725_v42 }
  0x27   :  { %669 = vmatpush3.bf16.msra.mxu0 %v720_v38 }
  0x28   :  { %670 = vmatprep.subr.bf16.mxu0 %v724_v41 }
  0x2a   :  { %437 = vmatmul.mubr.bf16.gmra.mrb[4].mxu0 %v723_v40 }
  0x2b   :  { %674 = vmatprep.mubr.msk.bf16.mxu0 %vm389_vm0, %v729_v45  ;;  %671 = vmatpush3.bf16.msra.mxu0 %v724_v41 }
  0x2c   :  { %486 = vmatmul.mubr.bf16.gmra.mrb[4].mxu1 %v727_v43  ;;  %672 = vmatprep.subr.bf16.mxu0 %v728_v44 }
  0x2f   :  { %673 = vmatpush3.bf16.msra.mxu0 %v728_v44 }
  0x32   :  { %675 = vmatmul.mubr.msk.bf16.vlgmr.msra.gmra.mrb[8].mxu0 %vm389_vm0, %v730_v50 }
  0x90   :  { %v106_v51 = vpop.permute.xlu0 %105 }
  0x91   :  { %v116_v3 = vpop.permute.xlu1 %115 }
  0x94   :  { %v111_v56 = vpop.permute.xlu0 %110 }
  0x95   :  { %v121_v16 = vpop.permute.xlu1 %120 }
  0xf5   :  { %v620_v52 = vpop.f32.mrb[0].mxu0 }
  0xf6   :  { %v621_v53 = vpop.f32.mrb[1].mxu0 }
  0xf7   :  { %v622_v54 = vadd.f32 %v621_v53, %v620_v52  ;;  %v623_v55 = vpop.f32.mrb[2].mxu0  ;;  %v648_v57 = vpop.f32.mrb[0].mxu1 }
  0xf8   :  { %v624_v58 = vpop.f32.mrb[3].mxu0  ;;  %v649_v61 = vpop.f32.mrb[1].mxu1 }
  0xf9   :  { %v431_v59 = vadd.f32 %v622_v54, %v106_v51  ;;  %v625_v60 = vadd.f32 %v624_v58, %v623_v55  ;;  %v650_v62 = vadd.f32 %v649_v61, %v648_v57  ;;  %v651_v63 = vpop.f32.mrb[2].mxu1 }
  0xfa   :  { %v652_v1 = vpop.f32.mrb[3].mxu1 }
  0xfb   :  { %v434_v0 = vadd.f32 %v625_v60, %v111_v56  ;;  %v653_v2 = vadd.f32 %v652_v1, %v651_v63  ;;  %v480_v4 = vadd.f32 %v650_v62, %v431_v59 }
  0xfd   :  { %v626_v5 = vpop.f32.mrb[4].mxu0  ;;  %v483_v7 = vadd.f32 %v653_v2, %v434_v0 }
  0xfe   :  { %v627_v6 = vpop.f32.mrb[5].mxu0 }
  0xff   :  { %v628_v8 = vadd.f32 %v627_v6, %v626_v5  ;;  %v629_v9 = vpop.f32.mrb[6].mxu0  ;;  %v654_v10 = vpop.f32.mrb[4].mxu1 }
 0x100   :  { %v630_v11 = vpop.f32.mrb[7].mxu0  ;;  %v655_v14 = vpop.f32.mrb[5].mxu1 }
 0x101   :  { %v439_v12 = vadd.f32 %v628_v8, %v116_v3  ;;  %v631_v13 = vadd.f32 %v630_v11, %v629_v9  ;;  %v656_v15 = vadd.f32 %v655_v14, %v654_v10  ;;  %v657_v17 = vpop.f32.mrb[6].mxu1 }
 0x102   :  { %v658_v19 = vpop.f32.mrb[7].mxu1 }
 0x103   :  { %v442_v18 = vadd.f32 %v631_v13, %v121_v16  ;;  %v659_v20 = vadd.f32 %v658_v19, %v657_v17  ;;  %v488_v21 = vadd.f32 %v656_v15, %v439_v12 }
 0x105   :  { %v676_v22 = vpop.f32.mrb[8].mxu0  ;;  %v491_v23 = vadd.f32 %v659_v20, %v442_v18 }
 0x106   :  { %v537_v24 = vadd.f32 %v676_v22, %v488_v21  ;;  %v528_v25 = vpop.f32.mrb[9].mxu0 }
 0x107   :  { %v529_v26 = vadd.f32 %v528_v25, %v480_v4  ;;  %v677_v27 = vpop.f32.mrb[10].mxu0 }
 0x108   :  { %v545_v28 = vmax.f32 %v537_v24, 0.0  ;;  %v540_v29 = vadd.f32 %v677_v27, %v491_v23  ;;  %v531_v30 = vpop.f32.mrb[11].mxu0 }
 0x109   :  { %v543_v31 = vmax.f32 %v529_v26, 0.0  ;;  %v532_v32 = vadd.f32 %v531_v30, %v483_v7 }
 0x10a   :  { %550 = vst.msk [vmem:[%s919_s3 + $0x10] sm:$0xff] %vm547_vm1, %v545_v28  ;;  %v546_v33 = vmax.f32 %v540_v29, 0.0 }
 0x10b   :  { %548 = vst.msk [vmem:[%s919_s3] sm:$0xff] %vm547_vm1, %v543_v31  ;;  %v544_v34 = vmax.f32 %v532_v32, 0.0 }
 0x10c   :  { %551 = vst.msk [vmem:[%s919_s3 + $0x18] sm:$0xff] %vm547_vm1, %v546_v33 }
 0x10d   :  { %549 = vst.msk [vmem:[%s919_s3 + $0x8] sm:$0xff] %vm547_vm1, %v544_v34 }

// kernel: segnet_forward.65
= control target key start
LH: loop header
LB: loop body
LE: loop exit
PB: predicated region body
PF: predicated region fallthrough
CT: control target
= control target key end

     0   :  { %v19_v0 = vlaneseq  ;;  %s125_s2 = inlined_call_operand.vmem [shape: s32[1,128], index: 2, kind: input, shape index: {}]   ;;  %s126_s1 = inlined_call_operand.vmem [shape: s32[16,128], index: 1, kind: input, shape index: {}]   ;;  %s127_s0 = inlined_call_operand.vmem [shape: f32[16,128], index: 0, kind: input, shape index: {}]   ;;  %s128_s3 = inlined_call_operand.vmem [shape: f32[64,128], index: 3, kind: output, shape index: {}]  }
   0x1   :  { %v18_v1 = vld [vmem:[%s125_s2] sm:$0x1]  ;;  %v17_v8 = vld [vmem:[%s126_s1 + $0x8] sm:$0xff] }
   0x2   :  { %v20_v2 = vshrl.u32 %v19_v0, 7  ;;  %v27_v3 = vadd.s32 1, %v18_v1  ;;  %v36_v4 = vadd.s32 16, %v18_v1  ;;  %v45_v5 = vadd.s32 17, %v18_v1  ;;  %v16_v7 = vld [vmem:[%s126_s1] sm:$0xff]  ;;  %v15_v11 = vld [vmem:[%s127_s0 + $0x8] sm:$0xff] }
   0x3   :  { %v14_v9 = vld [vmem:[%s127_s0] sm:$0xff] }
   0x4   :  { %v21_v6 = vsub.s32 0, %v20_v2 }
   0x6   :  { %v22_v10 = vrot.slane %v18_v1, %v21_v6  ;;  %v31_v12 = vrot.slane %v27_v3, %v21_v6  ;;  %v40_v13 = vrot.slane %v36_v4, %v21_v6  ;;  %v49_v14 = vrot.slane %v45_v5, %v21_v6 }
   0x8   :  { %vm23_vm0 = vcmp.eq.s32.totalorder %v16_v7, %v22_v10  ;;  %vm24_vm1 = vcmp.eq.s32.totalorder %v17_v8, %v22_v10  ;;  %vm32_vm2 = vcmp.eq.s32.totalorder %v16_v7, %v31_v12  ;;  %vm33_vm3 = vcmp.eq.s32.totalorder %v17_v8, %v31_v12 }
   0x9   :  { %v25_v15 = vsel %vm23_vm0, %v14_v9, 0.0  ;;  %v26_v16 = vsel %vm24_vm1, %v15_v11, 0.0  ;;  %v34_v17 = vsel %vm32_vm2, %v14_v9, 0.0  ;;  %v35_v18 = vsel %vm33_vm3, %v15_v11, 0.0 }
   0xa   :  { %54 = vst [vmem:[%s128_s3] sm:$0xff] %v25_v15  ;;  %55 = vst [vmem:[%s128_s3 + $0x8] sm:$0xff] %v26_v16  ;;  %vm41_vm4 = vcmp.eq.s32.totalorder %v16_v7, %v40_v13  ;;  %vm42_vm5 = vcmp.eq.s32.totalorder %v17_v8, %v40_v13  ;;  %vm50_vm6 = vcmp.eq.s32.totalorder %v16_v7, %v49_v14 }
   0xb   :  { %56 = vst [vmem:[%s128_s3 + $0x10] sm:$0xff] %v34_v17  ;;  %57 = vst [vmem:[%s128_s3 + $0x18] sm:$0xff] %v35_v18  ;;  %vm51_vm7 = vcmp.eq.s32.totalorder %v17_v8, %v49_v14  ;;  %v43_v19 = vsel %vm41_vm4, %v14_v9, 0.0  ;;  %v44_v20 = vsel %vm42_vm5, %v15_v11, 0.0  ;;  %v52_v21 = vsel %vm50_vm6, %v14_v9, 0.0 }
   0xc   :  { %v53_v22 = vsel %vm51_vm7, %v15_v11, 0.0  ;;  %58 = vst [vmem:[%s128_s3 + $0x20] sm:$0xff] %v43_v19  ;;  %59 = vst [vmem:[%s128_s3 + $0x28] sm:$0xff] %v44_v20 }
   0xd   :  { %60 = vst [vmem:[%s128_s3 + $0x30] sm:$0xff] %v52_v21  ;;  %61 = vst [vmem:[%s128_s3 + $0x38] sm:$0xff] %v53_v22 }

// kernel: segnet_forward.64
= control target key start
LH: loop header
LB: loop body
LE: loop exit
PB: predicated region body
PF: predicated region fallthrough
CT: control target
= control target key end

     0   :  { %v365_v1 = vmov 0.0   ;;  %vm366_vm0 = vmmov 0   ;;  %v367_v3 = vmov 0   ;;  %vm190_vm1 = vcmask 261120   ;;  %s463_s1 = inlined_call_operand.vmem [shape: bf16[288,128], index: 1, kind: input, shape index: {}]   ;;  %s464_s0 = inlined_call_operand.vmem [shape: bf16[16,288], index: 0, kind: input, shape index: {}]   ;;  %s465_s2 = inlined_call_operand.vmem [shape: f32[16,1], index: 2, kind: input, shape index: {}]   ;;  %s466_s3 = inlined_call_operand.vmem [shape: f32[16,128], index: 3, kind: output, shape index: {}]  }
   0x1   :  { %v343_v0 = vld [vmem:[%s463_s1 + $0x40] sm:$0xff]   ;;  %331 = vmatprep.subr.bf16.mxu1 %v365_v1  ;;  %335 = vmatprep.mubr.msk.bf16.mxu1 %vm366_vm0, %v365_v1  ;;  %v345_v4 = vld [vmem:[%s463_s1 + $0x48] sm:$0xff]   ;;  %v347_v6 = vld [vmem:[%s463_s1 + $0x50] sm:$0xff]  }
   0x2   :  { %v344_v2 = vld [vmem:[%s463_s1] sm:$0xff]   ;;  %342 = vset.pattern.permute.xlu0 %v367_v3  ;;  %306 = vmatprep.subr.bf16.mxu0 %v343_v0  ;;  %v346_v5 = vld [vmem:[%s463_s1 + $0x8] sm:$0xff]   ;;  %v348_v7 = vld [vmem:[%s463_s1 + $0x10] sm:$0xff]  }
   0x3   :  { %307 = vmatpush3.bf16.msra.mxu0 %v344_v2  ;;  %v349_v8 = vld [vmem:[%s463_s1 + $0x58] sm:$0xff]   ;;  %v351_v10 = vld [vmem:[%s463_s1 + $0x60] sm:$0xff]   ;;  %v353_v13 = vld [vmem:[%s463_s1 + $0x68] sm:$0xff]  }
   0x4   :  { %308 = vmatprep.subr.bf16.mxu0 %v345_v4  ;;  %v350_v9 = vld [vmem:[%s463_s1 + $0x18] sm:$0xff]   ;;  %v357_v11 = vld [vmem:[%s463_s1 + $0x80] sm:$0xff]   ;;  %v354_v14 = vld [vmem:[%s463_s1 + $0x28] sm:$0xff]  }
   0x5   :  { %v352_v12 = vld [vmem:[%s463_s1 + $0x20] sm:$0xff]   ;;  %332 = vmatpush3.bf16.msra.mxu1 %v357_v11  ;;  %v363_v16 = vld [vmem:[%s463_s1 + $0x88] sm:$0xff]   ;;  %v355_v17 = vld [vmem:[%s463_s1 + $0x70] sm:$0xff]  }
   0x6   :  { %333 = vmatprep.subr.bf16.mxu1 %v365_v1  ;;  %v362_v15 = vld [vmem:[%s464_s0 + $0x4] ss:$12 sps:$4 sm:$0xff]   ;;  %v364_v18 = vld [vmem:[%s464_s0 + $0x8] ss:$12 sps:$4 sm:$0xff]   ;;  %v358_v22 = vld [vmem:[%s463_s1 + $0x78] sm:$0xff]  }
   0x7   :  { %309 = vmatpush3.bf16.msra.mxu0 %v346_v5  ;;  %226 = vmatprep.mubr.bf16.mxu0 %v362_v15  ;;  %v55_v19 = vld [vmem:[%s465_s2] sm:$0xff]  ;;  %v56_v20 = vld [vmem:[%s465_s2 + $0x8] sm:$0xff]  ;;  %v356_v21 = vld [vmem:[%s463_s1 + $0x30] sm:$0xff]  }
   0x8   :  { %310 = vmatprep.subr.bf16.mxu0 %v347_v6  ;;  %59 = vperm.xlu0 %342, %v55_v19   ;;  %v359_v23 = vld [vmem:[%s463_s1 + $0x38] sm:$0xff]   ;;  %v360_v24 = vld [vmem:[%s464_s0] ss:$12 sps:$4 sm:$0xff]  }
   0x9   :  { %334 = vmatpush3.bf16.msra.mxu1 %v363_v16 }
   0xb   :  { %311 = vmatpush3.bf16.msra.mxu0 %v348_v7 }
   0xc   :  { %312 = vmatprep.subr.bf16.mxu0 %v349_v8  ;;  %336 = vmatmul.mubr.msk.bf16.vlgmr.msra.gmra.mrb[0].mxu1 %vm190_vm1, %v364_v18 }
   0xd   :  { %64 = vperm.xlu0 %342, %v56_v20  }
   0xf   :  { %313 = vmatpush3.bf16.msra.mxu0 %v350_v9 }
  0x10   :  { %314 = vmatprep.subr.bf16.mxu0 %v351_v10 }
  0x13   :  { %315 = vmatpush3.bf16.msra.mxu0 %v352_v12 }
  0x14   :  { %316 = vmatprep.subr.bf16.mxu0 %v353_v13 }
  0x17   :  { %317 = vmatpush3.bf16.msra.mxu0 %v354_v14 }
  0x18   :  { %318 = vmatprep.subr.bf16.mxu0 %v355_v17 }
  0x1b   :  { %319 = vmatpush3.bf16.msra.mxu0 %v356_v21 }
  0x1c   :  { %320 = vmatprep.subr.bf16.mxu0 %v358_v22 }
  0x1f   :  { %321 = vmatpush3.bf16.msra.mxu0 %v359_v23 }
  0x22   :  { %227 = vmatmul.mubr.bf16.vlgmr.msra.gmra.mrb[0].mxu0 %v360_v24 }
  0x87   :  { %v60_v29 = vpop.permute.xlu0 %59 }
  0x8c   :  { %v65_v37 = vpop.permute.xlu0 %64 }
  0xdf   :  { %v269_v25 = vpop.f32.mrb[0].mxu1 }
  0xe0   :  { %v337_v26 = vpop.f32.mrb[1].mxu1 }
  0xe1   :  { %v272_v27 = vpop.f32.mrb[2].mxu1 }
  0xe2   :  { %v338_v28 = vpop.f32.mrb[3].mxu1 }
  0xf5   :  { %v322_v30 = vpop.f32.mrb[0].mxu0 }
  0xf6   :  { %v323_v31 = vpop.f32.mrb[1].mxu0 }
  0xf7   :  { %v324_v32 = vadd.f32 %v323_v31, %v322_v30  ;;  %v325_v33 = vpop.f32.mrb[2].mxu0 }
  0xf8   :  { %v326_v34 = vpop.f32.mrb[3].mxu0 }
  0xf9   :  { %v229_v35 = vadd.f32 %v324_v32, %v60_v29  ;;  %v327_v36 = vadd.f32 %v326_v34, %v325_v33 }
  0xfb   :  { %v270_v38 = vadd.f32 %v269_v25, %v229_v35  ;;  %v232_v39 = vadd.f32 %v327_v36, %v65_v37 }
  0xfd   :  { %v276_v40 = vmax.f32 %v270_v38, 0.0  ;;  %v273_v41 = vadd.f32 %v272_v27, %v232_v39 }
  0xff   :  { %278 = vst [vmem:[%s466_s3] sm:$0xff] %v276_v40  ;;  %v277_v42 = vmax.f32 %v273_v41, 0.0 }
 0x101   :  { %279 = vst [vmem:[%s466_s3 + $0x8] sm:$0xff] %v277_v42 }

// kernel: segnet_forward.68
= control target key start
LH: loop header
LB: loop body
LE: loop exit
PB: predicated region body
PF: predicated region fallthrough
CT: control target
= control target key end

     0   :  { %s470_s12 = smov 0   ;;  %s472_s13 = smov 0   ;;  %s540_s0 = inlined_call_operand.vmem [shape: f32[8,512], index: 0, kind: input, shape index: {}]   ;;  %s541_s1 = inlined_call_operand.vmem [shape: s32[8,512], index: 1, kind: input, shape index: {}]   ;;  %s542_s2 = inlined_call_operand.vmem [shape: s32[1,512], index: 2, kind: input, shape index: {}]   ;;  %s543_s3 = inlined_call_operand.vmem [shape: f32[32,512], index: 3, kind: output, shape index: {}]  }
   0x1   :  { %s474_s14 = smov 0  }
   0x2 LB: > { %s481_s15 = sadd.s32 4294967295, %s448_s14   ;;  %s483_s16 = sadd.s32 1, %s448_s14   ;;  %s448_s14 = sphi %s474_s14, %s547_s14   ;;  %s444_s13 = sphi %s472_s13, %s546_s13   ;;  %s440_s12 = sphi %s470_s12, %s545_s12  }
   0x3   : > { %s95_s17 = ssub.s32 %s448_s14, %s483_s16  ;;  %s98_s18 = sadd.s32 1, %s444_s13 }
   0x4   : > { %p96_p0 = scmp.eq.s32.totalorder %s95_s17, 0  ;;  %p108_p1 = scmp.ne.s32.totalorder %s444_s13, %s440_s12 }
   0x5   : > { %p109_p2 = scmp.eq.s32.totalorder %s481_s15, 1  ;;  %p389_p3 = scmp.ge.s32.totalorder %s448_s14, 1 }
   0x6   : > { %s490_s19 = scalar_select %p96_p0, %s444_s13, %s98_s18  }
   0x7   : > { %p492_p4 = por %p109_p2, %p108_p1  ;;  %p159_p5 = scmp.lt.s32.totalorder %s448_s14, 3 }
   0x9   : > { %p160_p6 = pnand %p389_p3, %p159_p5 }
   0xa   : > { %s391_s21 = sshll.u32 (!%p160_p6), %s481_s15, 1  ;;  %v214_v0 = vlaneseq (!%p160_p6)  ;;  %s188_s22 = sand.u32 (!%p160_p6), 1, %s440_s12  }
   0xb   : > { %163 = sbr.rel (%p160_p6) target bundleno = 39 (0x27), region = 32  ;;  %p192_p7 = scmp.lt.s32.totalorder (!%p160_p6), %s391_s21, 3 }
   0xc   : > { %v215_v1 = vshrl.u32 (!%p160_p6), %v214_v0, 7  ;;  %s390_s23 = sshll.u32 (!%p160_p6), %s188_s22, 6 }
   0xd   : > { %s506_s7 = scalar_lea.vmem (!%p160_p6), [#allocation2], %s390_s23 }
   0xe   : > { %v216_v2 = vsub.s32 (!%p160_p6), 0, %v215_v1  ;;  %v220_v3 = vsub.s32 (!%p160_p6), 1, %v215_v1 }
  0x12   : > { %s549_s21 = smov (!%p192_p7, %s391_s21), 3  ;;  %s401_s8 = sshll.u32 (%p492_p4), %s481_s15, 4 }
  0x13   : > { %s392_s24 = sshll.u32 %s549_s21, 3  ;;  %s206_s27 = scalar_lea.vmem %s542_s2, %s549_s21 }
  0x14   : > { %s195_s30 = scalar_lea.vmem %s540_s0, %s392_s24  ;;  %s201_s6 = scalar_lea.vmem %s541_s1, %s392_s24  ;;  %v213_v4 = vld [vmem:[%s206_s27] sm:$0x3] }
  0x15   : > { %v209_v5 = vld [vmem:[%s195_s30] sm:$0xff]  ;;  %v217_v7 = vrot.slane %v213_v4, %v216_v2  ;;  %v210_v8 = vld [vmem:[%s195_s30 + $0x8] sm:$0xff]  ;;  %v221_v9 = vrot.slane %v213_v4, %v220_v3  ;;  %v226_v10 = vadd.s32 1, %v213_v4  ;;  %v239_v11 = vadd.s32 32, %v213_v4  ;;  %s282_s11 = scalar_lea.vmem (%p492_p4), %s543_s3, %s401_s8 }
  0x16   : > { %v211_v6 = vld [vmem:[%s201_s6] sm:$0xff]  ;;  %v212_v12 = vld [vmem:[%s201_s6 + $0x8] sm:$0xff]  ;;  %v252_v13 = vadd.s32 33, %v213_v4 }
  0x17   : > { %vm222_vm0 = vcmp.eq.s32.totalorder %v211_v6, %v217_v7  ;;  %vm223_vm1 = vcmp.eq.s32.totalorder %v212_v12, %v221_v9  ;;  %v230_v14 = vrot.slane %v226_v10, %v216_v2  ;;  %v234_v15 = vrot.slane %v226_v10, %v220_v3 }
  0x18   : > { %v224_v16 = vsel %vm222_vm0, %v209_v5, 0.0  ;;  %v225_v17 = vsel %vm223_vm1, %v210_v8, 0.0  ;;  %v243_v18 = vrot.slane %v239_v11, %v216_v2  ;;  %v247_v19 = vrot.slane %v239_v11, %v220_v3  ;;  %279 = sbr.rel (!%p492_p4) target bundleno = 39 (0x27), region = 36 }
  0x19   : > { %265 = vst [vmem:[%s506_s7] sm:$0xff] %v224_v16  ;;  %266 = vst [vmem:[%s506_s7 + $0x8] sm:$0xff] %v225_v17  ;;  %vm235_vm2 = vcmp.eq.s32.totalorder %v211_v6, %v230_v14  ;;  %vm236_vm3 = vcmp.eq.s32.totalorder %v212_v12, %v234_v15  ;;  %v256_v20 = vrot.slane %v252_v13, %v216_v2 }
  0x1a   : > { %v260_v21 = vrot.slane %v252_v13, %v220_v3  ;;  %v237_v22 = vsel %vm235_vm2, %v209_v5, 0.0  ;;  %v238_v23 = vsel %vm236_vm3, %v210_v8, 0.0  ;;  %vm248_vm4 = vcmp.eq.s32.totalorder %v211_v6, %v243_v18 }
  0x1b   : > { %vm249_vm5 = vcmp.eq.s32.totalorder %v212_v12, %v247_v19  ;;  %267 = vst [vmem:[%s506_s7 + $0x10] sm:$0xff] %v237_v22  ;;  %268 = vst [vmem:[%s506_s7 + $0x18] sm:$0xff] %v238_v23  ;;  %v250_v24 = vsel %vm248_vm4, %v209_v5, 0.0  ;;  %vm261_vm6 = vcmp.eq.s32.totalorder %v211_v6, %v256_v20 }
  0x1c   : > { %v251_v25 = vsel %vm249_vm5, %v210_v8, 0.0  ;;  %vm262_vm7 = vcmp.eq.s32.totalorder %v212_v12, %v260_v21  ;;  %269 = vst [vmem:[%s506_s7 + $0x20] sm:$0xff] %v250_v24  ;;  %v263_v26 = vsel %vm261_vm6, %v209_v5, 0.0 }
  0x1d   : > { %270 = vst [vmem:[%s506_s7 + $0x28] sm:$0xff] %v251_v25  ;;  %v264_v27 = vsel %vm262_vm7, %v210_v8, 0.0  ;;  %271 = vst [vmem:[%s506_s7 + $0x30] sm:$0xff] %v263_v26 }
  0x1e   : > { %272 = vst [vmem:[%s506_s7 + $0x38] sm:$0xff] %v264_v27 }
  0x20   : > { %v295_v28 = vld [vmem:[%s506_s7] sm:$0xff]  ;;  %v297_v29 = vld [vmem:[%s506_s7 + $0x8] sm:$0xff] }
  0x21   : > { %296 = vst [vmem:[%s282_s11] sm:$0xff] %v295_v28  ;;  %298 = vst [vmem:[%s282_s11 + $0x8] sm:$0xff] %v297_v29 }
  0x22   : > { %v299_v30 = vld [vmem:[%s506_s7 + $0x10] sm:$0xff]  ;;  %v301_v31 = vld [vmem:[%s506_s7 + $0x18] sm:$0xff] }
  0x23   : > { %v303_v32 = vld [vmem:[%s506_s7 + $0x20] sm:$0xff]  ;;  %300 = vst [vmem:[%s282_s11 + $0x20] sm:$0xff] %v299_v30  ;;  %302 = vst [vmem:[%s282_s11 + $0x28] sm:$0xff] %v301_v31 }
  0x24   : > { %v305_v33 = vld [vmem:[%s506_s7 + $0x28] sm:$0xff]  ;;  %304 = vst [vmem:[%s282_s11 + $0x40] sm:$0xff] %v303_v32  ;;  %v307_v34 = vld [vmem:[%s506_s7 + $0x30] sm:$0xff] }
  0x25   : > { %306 = vst [vmem:[%s282_s11 + $0x48] sm:$0xff] %v305_v33  ;;  %v309_v35 = vld [vmem:[%s506_s7 + $0x38] sm:$0xff]  ;;  %308 = vst [vmem:[%s282_s11 + $0x60] sm:$0xff] %v307_v34 }
  0x26   : > { %310 = vst [vmem:[%s282_s11 + $0x68] sm:$0xff] %v309_v35 }
  0x27 PF: > { %p10_p8 = scmp.ge.s32.totalorder %s483_s16, 4   ;;  %s545_s12 = smov %s444_s13 }
  0x28   : > { %s546_s13 = smov %s490_s19  ;;  %s547_s14 = smov %s483_s16 }
  0x29   :  { %12 = sbr.rel (!%p10_p8) target bundleno = 2 (0x2), region = 91 }

// kernel: segnet_forward.67
= control target key start
LH: loop header
LB: loop body
LE: loop exit
PB: predicated region body
PF: predicated region fallthrough
CT: control target
= control target key end

     0   :  { %v440_v1 = vmov 0   ;;  %vm244_vm0 = vcmask 130048   ;;  %s587_s1 = inlined_call_operand.vmem [shape: bf16[144,512], index: 1, kind: input, shape index: {}]   ;;  %s588_s0 = inlined_call_operand.vmem [shape: bf16[8,144], index: 0, kind: input, shape index: {}]   ;;  %s589_s2 = inlined_call_operand.vmem [shape: f32[8,1], index: 2, kind: input, shape index: {}]   ;;  %s590_s3 = inlined_call_operand.vmem [shape: f32[8,512], index: 3, kind: output, shape index: {}]  }
   0x1   :  { %v384_v0 = vld [vmem:[%s587_s1 + $0x4] ss:$16 sps:$4 sm:$0xff]   ;;  %383 = vset.pattern.permute.xlu0 %v440_v1  ;;  %v386_v2 = vld [vmem:[%s587_s1 + $0xc] ss:$16 sps:$4 sm:$0xff]   ;;  %v388_v3 = vld [vmem:[%s587_s1] ss:$16 sps:$4 sm:$0xff]  }
   0x2   :  { %248 = vmatprep.subr.bf16.mxu0 %v384_v0  ;;  %v389_v4 = vld [vmem:[%s587_s1 + $0x8] ss:$16 sps:$4 sm:$0xff]   ;;  %289 = vmatprep.subr.bf16.mxu1 %v386_v2  ;;  %v390_v5 = vld [vmem:[%s587_s1 + $0x24] ss:$16 sps:$4 sm:$0xff]   ;;  %v392_v6 = vld [vmem:[%s587_s1 + $0x2c] ss:$16 sps:$4 sm:$0xff]  }
   0x3   :  { %249 = vmatpush1.bf16.msra.mxu0 %v388_v3  ;;  %290 = vmatpush1.bf16.msra.mxu1 %v389_v4  ;;  %v394_v7 = vld [vmem:[%s587_s1 + $0x20] ss:$16 sps:$4 sm:$0xff]   ;;  %v395_v8 = vld [vmem:[%s587_s1 + $0x28] ss:$16 sps:$4 sm:$0xff]   ;;  %v396_v9 = vld [vmem:[%s587_s1 + $0x44] ss:$16 sps:$4 sm:$0xff]  }
   0x4   :  { %250 = vmatprep.subr.bf16.mxu0 %v390_v5  ;;  %291 = vmatprep.subr.bf16.mxu1 %v392_v6  ;;  %v398_v10 = vld [vmem:[%s587_s1 + $0x4c] ss:$16 sps:$4 sm:$0xff]   ;;  %v400_v11 = vld [vmem:[%s587_s1 + $0x40] ss:$16 sps:$4 sm:$0xff]   ;;  %v401_v12 = vld [vmem:[%s587_s1 + $0x48] ss:$16 sps:$4 sm:$0xff]  }
   0x5   :  { %v402_v13 = vld [vmem:[%s587_s1 + $0x64] ss:$16 sps:$4 sm:$0xff]   ;;  %v404_v14 = vld [vmem:[%s587_s1 + $0x6c] ss:$16 sps:$4 sm:$0xff]   ;;  %v406_v15 = vld [vmem:[%s587_s1 + $0x60] ss:$16 sps:$4 sm:$0xff]  }
   0x6   :  { %v407_v16 = vld [vmem:[%s587_s1 + $0x68] ss:$16 sps:$4 sm:$0xff]   ;;  %v408_v17 = vld [vmem:[%s587_s1 + $0x84] ss:$16 sps:$4 sm:$0xff]   ;;  %v410_v18 = vld [vmem:[%s587_s1 + $0x8c] ss:$16 sps:$4 sm:$0xff]  }
   0x7   :  { %251 = vmatpush1.bf16.msra.mxu0 %v394_v7  ;;  %292 = vmatpush1.bf16.msra.mxu1 %v395_v8  ;;  %v412_v19 = vld [vmem:[%s587_s1 + $0x80] ss:$16 sps:$4 sm:$0xff]   ;;  %v413_v20 = vld [vmem:[%s587_s1 + $0x88] ss:$16 sps:$4 sm:$0xff]   ;;  %v414_v21 = vld [vmem:[%s587_s1 + $0xa4] ss:$16 sps:$4 sm:$0xff]  }
   0x8   :  { %252 = vmatprep.subr.bf16.mxu0 %v396_v9  ;;  %293 = vmatprep.subr.bf16.mxu1 %v398_v10  ;;  %v416_v22 = vld [vmem:[%s587_s1 + $0xac] ss:$16 sps:$4 sm:$0xff]   ;;  %v418_v23 = vld [vmem:[%s587_s1 + $0xa0] ss:$16 sps:$4 sm:$0xff]   ;;  %v419_v24 = vld [vmem:[%s587_s1 + $0xa8] ss:$16 sps:$4 sm:$0xff]  }
   0x9   :  { %v420_v25 = vld [vmem:[%s587_s1 + $0xc4] ss:$16 sps:$4 sm:$0xff]   ;;  %v422_v26 = vld [vmem:[%s587_s1 + $0xcc] ss:$16 sps:$4 sm:$0xff]   ;;  %v424_v27 = vld [vmem:[%s587_s1 + $0xc0] ss:$16 sps:$4 sm:$0xff]  }
   0xa   :  { %v425_v28 = vld [vmem:[%s587_s1 + $0xc8] ss:$16 sps:$4 sm:$0xff]   ;;  %v15_v29 = vld [vmem:[%s588_s0] sm:$0xff]  ;;  %v428_v32 = vld [vmem:[%s587_s1 + $0xec] ss:$16 sps:$4 sm:$0xff]  }
   0xb   :  { %253 = vmatpush1.bf16.msra.mxu0 %v400_v11  ;;  %294 = vmatpush1.bf16.msra.mxu1 %v401_v12  ;;  %v52_v30 = vld [vmem:[%s589_s2] sm:$0xff]  ;;  %v343_v33 = vcombine.high %v15_v29, %v15_v29  ;;  %v431_v35 = vld [vmem:[%s587_s1 + $0xe8] ss:$16 sps:$4 sm:$0xff]   ;;  %v434_v37 = vld [vmem:[%s587_s1 + $0x10c] ss:$16 sps:$4 sm:$0xff]   ;;  %v342_v40 = vcombine.low %v15_v29, %v15_v29 }
   0xc   :  { %254 = vmatprep.subr.bf16.mxu0 %v402_v13  ;;  %295 = vmatprep.subr.bf16.mxu1 %v404_v14  ;;  %v426_v31 = vld [vmem:[%s587_s1 + $0xe4] ss:$16 sps:$4 sm:$0xff]   ;;  %v430_v34 = vld [vmem:[%s587_s1 + $0xe0] ss:$16 sps:$4 sm:$0xff]   ;;  %v437_v39 = vld [vmem:[%s587_s1 + $0x108] ss:$16 sps:$4 sm:$0xff]  }
   0xd   :  { %55 = vperm.xlu0 %383, %v52_v30   ;;  %380 = vmatprep.mubr.msk.bf16.mxu0 %vm244_vm0, %v343_v33  ;;  %v432_v36 = vld [vmem:[%s587_s1 + $0x104] ss:$16 sps:$4 sm:$0xff]   ;;  %v436_v38 = vld [vmem:[%s587_s1 + $0x100] ss:$16 sps:$4 sm:$0xff]  }
   0xe   :  { %381 = vmatprep.mubr.msk.bf16.mxu1 %vm244_vm0, %v343_v33 }
   0xf   :  { %255 = vmatpush1.bf16.msra.mxu0 %v406_v15  ;;  %296 = vmatpush1.bf16.msra.mxu1 %v407_v16 }
  0x10   :  { %256 = vmatprep.subr.bf16.mxu0 %v408_v17  ;;  %297 = vmatprep.subr.bf16.mxu1 %v410_v18 }
  0x13   :  { %257 = vmatpush1.bf16.msra.mxu0 %v412_v19  ;;  %298 = vmatpush1.bf16.msra.mxu1 %v413_v20 }
  0x14   :  { %258 = vmatprep.subr.bf16.mxu0 %v414_v21  ;;  %299 = vmatprep.subr.bf16.mxu1 %v416_v22 }
  0x17   :  { %259 = vmatpush1.bf16.msra.mxu0 %v418_v23  ;;  %300 = vmatpush1.bf16.msra.mxu1 %v419_v24 }
  0x18   :  { %260 = vmatprep.subr.bf16.mxu0 %v420_v25  ;;  %301 = vmatprep.subr.bf16.mxu1 %v422_v26 }
  0x1b   :  { %261 = vmatpush1.bf16.msra.mxu0 %v424_v27  ;;  %302 = vmatpush1.bf16.msra.mxu1 %v425_v28 }
  0x1c   :  { %262 = vmatprep.subr.bf16.mxu0 %v426_v31  ;;  %303 = vmatprep.subr.bf16.mxu1 %v428_v32 }
  0x1f   :  { %263 = vmatpush1.bf16.msra.mxu0 %v430_v34  ;;  %304 = vmatpush1.bf16.msra.mxu1 %v431_v35 }
  0x20   :  { %264 = vmatprep.subr.bf16.mxu0 %v432_v36  ;;  %305 = vmatprep.subr.bf16.mxu1 %v434_v37 }
  0x23   :  { %265 = vmatpush1.bf16.msra.mxu0 %v436_v38  ;;  %306 = vmatpush1.bf16.msra.mxu1 %v437_v39 }
  0x26   :  { %281 = vmatmul.mubr.bf16.vlgmr.msra.gmra.mrb[0].mxu0 %v342_v40  ;;  %322 = vmatmul.mubr.bf16.vlgmr.msra.gmra.mrb[0].mxu1 %v342_v40 }
  0x8c   :  { %v56_v41 = vpop.permute.xlu0 %55 }
  0xf9   :  { %v282_v42 = vpop.f32.mrb[0].mxu0  ;;  %v323_v43 = vpop.f32.mrb[0].mxu1 }
  0xfa   :  { %v283_v44 = vadd.f32 %v282_v42, %v56_v41  ;;  %v324_v45 = vadd.f32 %v323_v43, %v56_v41  ;;  %v284_v46 = vpop.f32.mrb[1].mxu0  ;;  %v325_v47 = vpop.f32.mrb[1].mxu1 }
  0xfb   :  { %v285_v48 = vadd.f32 %v284_v46, %v56_v41  ;;  %v326_v49 = vadd.f32 %v325_v47, %v56_v41  ;;  %v286_v50 = vpop.f32.mrb[2].mxu0  ;;  %v327_v51 = vpop.f32.mrb[2].mxu1 }
  0xfc   :  { %v330_v52 = vmax.f32 %v283_v44, 0.0  ;;  %v332_v53 = vmax.f32 %v324_v45, 0.0  ;;  %v287_v54 = vpop.f32.mrb[3].mxu0  ;;  %v328_v55 = vpop.f32.mrb[3].mxu1 }
  0xfd   :  { %v331_v56 = vmax.f32 %v285_v48, 0.0  ;;  %v333_v57 = vmax.f32 %v326_v49, 0.0 }
  0xfe   :  { %334 = vst [vmem:[%s590_s3] sm:$0xff] %v330_v52  ;;  %336 = vst [vmem:[%s590_s3 + $0x10] sm:$0xff] %v332_v53 }
  0xff   :  { %335 = vst [vmem:[%s590_s3 + $0x8] sm:$0xff] %v331_v56  ;;  %337 = vst [vmem:[%s590_s3 + $0x18] sm:$0xff] %v333_v57 }

// kernel: segnet_forward.69
= control target key start
LH: loop header
LB: loop body
LE: loop exit
PB: predicated region body
PF: predicated region fallthrough
CT: control target
= control target key end

     0   :  { %s537_s12 = smov 0   ;;  %s582_s0 = inlined_call_operand.vmem [shape: bf16[5,8], index: 0, kind: input, shape index: {}]   ;;  %s583_s1 = inlined_call_operand.vmem [shape: bf16[8,2048], index: 1, kind: input, shape index: {}]   ;;  %s584_s2 = inlined_call_operand.vmem [shape: f32[5,1], index: 2, kind: input, shape index: {}]   ;;  %s585_s3 = inlined_call_operand.vmem [shape: f32[5,2048], index: 3, kind: output, shape index: {}]  }
   0x1 LB: > { %s463_s13 = sadd.s32 4294967295, %s514_s12   ;;  %p467_p0 = scmp.ge.s32.totalorder %s514_s12, 1  ;;  %s514_s12 = sphi %s537_s12, %s13_s12  }
   0x2   : > { %p138_p1 = scmp.lt.s32.totalorder %s514_s12, 3 }
   0x4   : > { %p139_p2 = pnand %p467_p0, %p138_p1 }
   0x5   : > { %s468_s14 = sshll.u32 (!%p139_p2), %s463_s13, 3  ;;  %v516_v0 = vmov (!%p139_p2), 0   ;;  %v180_v1 = vld [vmem:[%s584_s2] sm:$0x1f] (!%p139_p2)  ;;  %vm210_vm0 = vcmask (!%p139_p2), 1043456   ;;  %vm206_vm1 = vcmask (!%p139_p2), 64512  }
   0x6   : > { %142 = sbr.rel (%p139_p2) target bundleno = 247 (0xf7), region = 32  ;;  %p163_p3 = scmp.lt.s32.totalorder (!%p139_p2), %s468_s14, 15  ;;  %267 = vmatprep.mubr.bf16.mxu0 (!%p139_p2), %v516_v0  ;;  %308 = vmatprep.mubr.bf16.mxu1 (!%p139_p2), %v516_v0  ;;  %v175_v16 = vld [vmem:[%s582_s0] sm:$0x7] (!%p139_p2) }
   0x7   : > { %499 = vset.pattern.permute.xlu0 (!%p139_p2), %v516_v0 }
   0x8   : > { %183 = vperm.xlu0 (!%p139_p2), %499, %v180_v1  }
   0xd   : > { %s587_s14 = smov (!%p163_p3, %s468_s14), 15 }
   0xe   : > { %s469_s17 = sshll.u32 %s587_s14, 2  ;;  %s471_s23 = sshll.u32 %s587_s14, 3 }
   0xf   : > { %s166_s20 = scalar_lea.vmem %s583_s1, %s469_s17  ;;  %s569_s26 = scalar_lea.vmem %s585_s3, %s471_s23 }
  0x10   : > { %v176_v2 = vld [vmem:[%s166_s20] sm:$0xff]  ;;  %v177_v3 = vld [vmem:[%s166_s20 + $0x8] sm:$0xff]  ;;  %v178_v4 = vld [vmem:[%s166_s20 + $0x10] sm:$0xff] }
  0x11   : > { %v473_v5 = vcombine.high %v176_v2, %v176_v2  ;;  %v475_v6 = vcombine.high %v177_v3, %v177_v3  ;;  %v472_v7 = vcombine.low %v176_v2, %v176_v2  ;;  %v474_v8 = vcombine.low %v177_v3, %v177_v3  ;;  %v179_v9 = vld [vmem:[%s166_s20 + $0x18] sm:$0xff] }
  0x12   : > { %v477_v10 = vcombine.high %v178_v4, %v178_v4  ;;  %v479_v11 = vcombine.high %v179_v9, %v179_v9  ;;  %v476_v12 = vcombine.low %v178_v4, %v178_v4  ;;  %v478_v13 = vcombine.low %v179_v9, %v179_v9 }
  0x13   : > { %480 = vmatprep.subr.msk.bf16.mxu0 %vm210_vm0, %v473_v5  ;;  %482 = vmatprep.subr.msk.bf16.mxu1 %vm210_vm0, %v475_v6  ;;  %v212_v14 = vsel %vm210_vm0, %v472_v7, 0  ;;  %v218_v15 = vsel %vm210_vm0, %v474_v8, 0 }
  0x14   : > { %236 = vmatpush1.bf16.msra.mxu0 %v212_v14  ;;  %277 = vmatpush1.bf16.msra.mxu1 %v218_v15  ;;  %v224_v17 = vsel %vm210_vm0, %v476_v12, 0  ;;  %v230_v18 = vsel %vm210_vm0, %v478_v13, 0 }
  0x15   : > { %484 = vmatprep.subr.msk.bf16.mxu0 %vm210_vm0, %v477_v10  ;;  %486 = vmatprep.subr.msk.bf16.mxu1 %vm210_vm0, %v479_v11 }
  0x17   : > { %481 = vmatmul.mubr.msk.bf16.vlgmr.msra.gmra.mrb[0].mxu0 %vm206_vm1, %v175_v16  ;;  %483 = vmatmul.mubr.msk.bf16.vlgmr.msra.gmra.mrb[0].mxu1 %vm206_vm1, %v175_v16 }
  0x18   : > { %318 = vmatpush1.bf16.msra.mxu0 %v224_v17  ;;  %359 = vmatpush1.bf16.msra.mxu1 %v230_v18 }
  0x19   : > { %349 = vmatprep.mubr.bf16.mxu0 %v516_v0  ;;  %390 = vmatprep.mubr.bf16.mxu1 %v516_v0 }
  0x1f   : > { %485 = vmatmul.mubr.msk.bf16.vlgmr.msra.gmra.mrb[4].mxu0 %vm206_vm1, %v175_v16  ;;  %487 = vmatmul.mubr.msk.bf16.vlgmr.msra.gmra.mrb[4].mxu1 %vm206_vm1, %v175_v16 }
  0x87   : > { %v184_v19 = vpop.permute.xlu0 %183 }
  0xea   : > { %v269_v20 = vpop.f32.mrb[0].mxu0  ;;  %v310_v21 = vpop.f32.mrb[0].mxu1 }
  0xeb   : > { %v270_v22 = vadd.f32 %v269_v20, %v184_v19  ;;  %v311_v23 = vadd.f32 %v310_v21, %v184_v19  ;;  %v271_v24 = vpop.f32.mrb[1].mxu0  ;;  %v312_v25 = vpop.f32.mrb[1].mxu1 }
  0xec   : > { %v272_v26 = vadd.f32 %v271_v24, %v184_v19  ;;  %v313_v27 = vadd.f32 %v312_v25, %v184_v19  ;;  %v273_v28 = vpop.f32.mrb[2].mxu0  ;;  %v314_v29 = vpop.f32.mrb[2].mxu1 }
  0xed   : > { %399 = vst [vmem:[%s569_s26] sm:$0x1f] %v270_v22  ;;  %401 = vst [vmem:[%s569_s26 + $0x10] sm:$0x1f] %v311_v23  ;;  %v274_v30 = vpop.f32.mrb[3].mxu0  ;;  %v315_v31 = vpop.f32.mrb[3].mxu1 }
  0xee   : > { %400 = vst [vmem:[%s569_s26 + $0x8] sm:$0x1f] %v272_v26  ;;  %402 = vst [vmem:[%s569_s26 + $0x18] sm:$0x1f] %v313_v27 }
  0xf2   : > { %v351_v32 = vpop.f32.mrb[4].mxu0  ;;  %v392_v33 = vpop.f32.mrb[4].mxu1 }
  0xf3   : > { %v352_v34 = vadd.f32 %v351_v32, %v184_v19  ;;  %v393_v35 = vadd.f32 %v392_v33, %v184_v19  ;;  %v353_v36 = vpop.f32.mrb[5].mxu0  ;;  %v394_v37 = vpop.f32.mrb[5].mxu1 }
  0xf4   : > { %v354_v38 = vadd.f32 %v353_v36, %v184_v19  ;;  %v395_v39 = vadd.f32 %v394_v37, %v184_v19  ;;  %v355_v40 = vpop.f32.mrb[6].mxu0  ;;  %v396_v41 = vpop.f32.mrb[6].mxu1 }
  0xf5   : > { %403 = vst [vmem:[%s569_s26 + $0x20] sm:$0x1f] %v352_v34  ;;  %405 = vst [vmem:[%s569_s26 + $0x30] sm:$0x1f] %v393_v35  ;;  %v356_v42 = vpop.f32.mrb[7].mxu0  ;;  %v397_v43 = vpop.f32.mrb[7].mxu1 }
  0xf6   : > { %404 = vst [vmem:[%s569_s26 + $0x28] sm:$0x1f] %v354_v38  ;;  %406 = vst [vmem:[%s569_s26 + $0x38] sm:$0x1f] %v395_v39 }
  0xf7 PF: > { %s13_s12 = sadd.s32 1, %s514_s12  }
  0xf8   : > { %p10_p4 = scmp.ge.s32.totalorder %s13_s12, 4  }
  0xfa   :  { %12 = sbr.rel (!%p10_p4) target bundleno = 1 (0x1), region = 62 }

</bundles_post_ra>
